<compile_context>
chip_gen: v5e
topology: v5e:2x2
jax: 0.10.0
libtpu: 0.0.40
codegen_flags: <defaults>
</compile_context>

<pallas_src>
import math
import functools

import jax
import jax.numpy as jnp
from jax.experimental import pallas as pl
from jax.experimental.pallas import tpu as pltpu

# ---- model hyper-parameters (small, consistent with the module's structure) ----
D_MODEL = 32
D_FF = 64
N_HEAD = 4
N_LAYER = 2
SRC_VOCAB = 16
TGT_VOCAB = 16
D_K = D_MODEL // N_HEAD
EPS = 1e-6
MASK_PENALTY = 1e9           # additive bias magnitude for masked positions
SLAB_W = 3 * D_MODEL         # widest packed vector (fused QKV bias)

# encoder slab: 8 rows per layer + 2 rows of final LayerNorm
E_ROWS = 8
E_LN1_G, E_LN1_B, E_BQKV, E_BO, E_LN2_G, E_LN2_B, E_B1, E_B2 = range(E_ROWS)
E_NORM = N_LAYER * E_ROWS

# decoder slab: 13 rows per layer + 2 rows of final LayerNorm
D_ROWS = 13
(D_LN1_G, D_LN1_B, D_BQKV_S, D_BO_S, D_LN2_G, D_LN2_B,
 D_BQ_C, D_BKV_C, D_BO_C, D_LN3_G, D_LN3_B, D_B1, D_B2) = range(D_ROWS)
D_NORM = N_LAYER * D_ROWS


# =============== in-kernel building blocks (operate on VMEM values) ===============

def _layer_norm(x, g, b):
    # Annotated-Transformer LayerNorm: gamma*(x-mean)/(std+eps)+beta,
    # std unbiased (ddof=1), eps outside the sqrt.  Exact divide (f32).
    mean = jnp.mean(x, axis=-1, keepdims=True)
    xc = x - mean
    var = jnp.sum(xc * xc, axis=-1, keepdims=True) * (1.0 / (x.shape[-1] - 1))
    return g * xc / (jnp.sqrt(var) + EPS) + b


def _softmax_last(s):
    s = s - jnp.max(s, axis=-1, keepdims=True)
    p = jnp.exp(s)
    return p * pl.reciprocal(jnp.sum(p, axis=-1, keepdims=True), approx=True)


def _attend_proj(q, k, v, wo_ref, wo_base, bo, bias, batch, s_q, s_kv):
    # Multi-head attention with the output projection fused in.
    # q/k/v: (B*S, D) f32 (1/sqrt(d_k) already folded into the Q weights).
    # bias : (B, Sq, Skv) additive mask bias (0 keep / -1e9 masked).
    # wo_ref: (N_LAYER*N_HEAD, D_K, D) bf16 head-blocked output weights.
    # Heads are merged by accumulating ctx_h @ wo_h, mathematically identical to
    # concat(heads) @ Wo but with lane-dense stores and no lane concatenation.
    # TODO(synk): collapse the static head loop into one (B*H)-batched
    # contraction once Mosaic reliably lowers multi-batch-dim dot_general /
    # lane-splitting reshape+transpose at dk=8; the 8-lane slices below are the
    # residual XLU cost.
    q3 = q.reshape(batch, s_q, D_MODEL).astype(jnp.bfloat16)
    k3 = k.reshape(batch, s_kv, D_MODEL).astype(jnp.bfloat16)
    v3 = v.reshape(batch, s_kv, D_MODEL).astype(jnp.bfloat16)
    acc = jnp.zeros((batch * s_q, D_MODEL), jnp.float32)
    for h in range(N_HEAD):                      # static unrolled loop over heads
        lo = h * D_K
        s = jnp.einsum("bqd,bkd->bqk",
                       q3[:, :, lo:lo + D_K], k3[:, :, lo:lo + D_K],
                       preferred_element_type=jnp.float32)
        p = _softmax_last(s + bias)
        ctx = jnp.einsum("bqk,bkd->bqd",
                         p.astype(jnp.bfloat16), v3[:, :, lo:lo + D_K],
                         preferred_element_type=jnp.float32)     # (B, Sq, dk)
        acc = acc + jnp.dot(ctx.reshape(batch * s_q, D_K).astype(jnp.bfloat16),
                            wo_ref[wo_base + h],
                            preferred_element_type=jnp.float32)
    return acc + bo


def _mha_self(y, wqkv, bqkv, wo_ref, wo_base, bo, bias, batch, seq):
    # fused QKV projection: one (B*S, D) x (D, 3D) bf16 matmul, f32 accumulate
    qkv = jnp.dot(y.astype(jnp.bfloat16), wqkv,
                  preferred_element_type=jnp.float32) + bqkv
    q = qkv[:, :D_MODEL]
    k = qkv[:, D_MODEL:2 * D_MODEL]
    v = qkv[:, 2 * D_MODEL:]
    return _attend_proj(q, k, v, wo_ref, wo_base, bo, bias, batch, seq, seq)


def _mha_cross(y, mem16, wq, bq, wkv, bkv, wo_ref, wo_base, bo, bias,
               batch, s_q, s_kv):
    # query from decoder stream, key/value from encoder memory (fused KV matmul)
    q = jnp.dot(y.astype(jnp.bfloat16), wq,
                preferred_element_type=jnp.float32) + bq
    kv = jnp.dot(mem16, wkv, preferred_element_type=jnp.float32) + bkv
    k = kv[:, :D_MODEL]
    v = kv[:, D_MODEL:]
    return _attend_proj(q, k, v, wo_ref, wo_base, bo, bias, batch, s_q, s_kv)


def _ffn(y, w1, b1, w2, b2):
    h = jnp.maximum(jnp.dot(y.astype(jnp.bfloat16), w1,
                            preferred_element_type=jnp.float32) + b1, 0.0)
    return jnp.dot(h.astype(jnp.bfloat16), w2,
                   preferred_element_type=jnp.float32) + b2


# =============== single fused whole-model kernel (one pallas_call) ===============

def _transformer_kernel(x_src_ref, x_tgt_ref, sbias_ref, tbias_ref,
                        e_slab, e_wqkv, e_wo, e_w1, e_w2,
                        d_slab, d_wqkv_s, d_wo_s, d_wq_c, d_wkv_c, d_wo_c,
                        d_w1, d_w2,
                        o_ref, *, batch, s_src, s_tgt):
    # additive mask biases, broadcast over queries once, in-register
    sbias = sbias_ref[...]                                        # (B, 1, S_src)
    enc_bias = jnp.broadcast_to(sbias, (batch, s_src, s_src))
    crs_bias = jnp.broadcast_to(sbias, (batch, s_tgt, s_src))
    tgt_bias = tbias_ref[...]                                     # (B, T, T)

    def ev(r, w):                    # encoder packed vector (1, w), static row r
        return e_slab[r:r + 1, :w]

    def dv(r, w):                    # decoder packed vector
        return d_slab[r:r + 1, :w]

    # ----------------------------- encoder stack -----------------------------
    x = x_src_ref[...]                                            # (B*S_src, D) f32
    for l in range(N_LAYER):                                      # static unroll
        b0 = l * E_ROWS
        y = _layer_norm(x, ev(b0 + E_LN1_G, D_MODEL), ev(b0 + E_LN1_B, D_MODEL))
        x = x + _mha_self(y, e_wqkv[l], ev(b0 + E_BQKV, 3 * D_MODEL),
                          e_wo, l * N_HEAD, ev(b0 + E_BO, D_MODEL),
                          enc_bias, batch, s_src)
        y = _layer_norm(x, ev(b0 + E_LN2_G, D_MODEL), ev(b0 + E_LN2_B, D_MODEL))
        x = x + _ffn(y, e_w1[l], ev(b0 + E_B1, D_FF),
                     e_w2[l], ev(b0 + E_B2, D_MODEL))
    # encoder memory stays resident in VMEM/vregs; cast once for all KV matmuls
    mem16 = _layer_norm(x, ev(E_NORM, D_MODEL),
                        ev(E_NORM + 1, D_MODEL)).astype(jnp.bfloat16)

    # ----------------------------- decoder stack -----------------------------
    x = x_tgt_ref[...]                                            # (B*S_tgt, D) f32
    for l in range(N_LAYER):
        b0 = l * D_ROWS
        y = _layer_norm(x, dv(b0 + D_LN1_G, D_MODEL), dv(b0 + D_LN1_B, D_MODEL))
        x = x + _mha_self(y, d_wqkv_s[l], dv(b0 + D_BQKV_S, 3 * D_MODEL),
                          d_wo_s, l * N_HEAD, dv(b0 + D_BO_S, D_MODEL),
                          tgt_bias, batch, s_tgt)
        y = _layer_norm(x, dv(b0 + D_LN2_G, D_MODEL), dv(b0 + D_LN2_B, D_MODEL))
        x = x + _mha_cross(y, mem16,
                           d_wq_c[l], dv(b0 + D_BQ_C, D_MODEL),
                           d_wkv_c[l], dv(b0 + D_BKV_C, 2 * D_MODEL),
                           d_wo_c, l * N_HEAD, dv(b0 + D_BO_C, D_MODEL),
                           crs_bias, batch, s_tgt, s_src)
        y = _layer_norm(x, dv(b0 + D_LN3_G, D_MODEL), dv(b0 + D_LN3_B, D_MODEL))
        x = x + _ffn(y, d_w1[l], dv(b0 + D_B1, D_FF),
                     d_w2[l], dv(b0 + D_B2, D_MODEL))
    o_ref[...] = _layer_norm(x, dv(D_NORM, D_MODEL), dv(D_NORM + 1, D_MODEL))


def _vmem_spec():
    # whole array, VMEM-resident (total footprint ~100 KiB: fine on v5e/v6e/v7x).
    # TODO(synk): if the model is scaled up (D>=512, long sequences), switch to a
    # batch-tiled grid with dimension_semantics=("parallel",) -- needed first on
    # v7x (64 MiB VMEM, 2 TCs/chip).
    return pl.BlockSpec(memory_space=pltpu.MemorySpace.VMEM)


def transformer_forward(params, src, tgt, src_mask, tgt_mask, pe):
    x_src = embed(params["src_emb"], src, pe)                     # (B, S_src, D)
    x_tgt = embed(params["tgt_emb"], tgt, pe)                     # (B, S_tgt, D)
    B, s_src, D = x_src.shape
    s_tgt = x_tgt.shape[1]

    # un-broadcast additive mask biases: 0 where mask==1, -1e9 where mask==0
    sbias = (src_mask.astype(jnp.float32) - 1.0) * MASK_PENALTY   # (B, 1, S_src)
    tbias = (tgt_mask.astype(jnp.float32) - 1.0) * MASK_PENALTY   # (B, T, T)

    e, d = params["enc"], params["dec"]
    inputs = [x_src.reshape(B * s_src, D), x_tgt.reshape(B * s_tgt, D),
              sbias, tbias,
              e["slab"], e["wqkv"], e["wo"], e["w1"], e["w2"],
              d["slab"], d["wqkv_s"], d["wo_s"], d["wq_c"], d["wkv_c"], d["wo_c"],
              d["w1"], d["w2"]]

    out = pl.pallas_call(
        functools.partial(_transformer_kernel, batch=B, s_src=s_src, s_tgt=s_tgt),
        out_shape=jax.ShapeDtypeStruct((B * s_tgt, D), jnp.float32),
        in_specs=[_vmem_spec() for _ in inputs],
        out_specs=_vmem_spec(),
    )(*inputs)
    return out.reshape(B, s_tgt, D)


# =========================== glue (plain JAX, under jit) ===========================

def positional_encoding(max_len, d_model):
    pos = jnp.arange(max_len, dtype=jnp.float32)[:, None]
    div = jnp.exp(jnp.arange(0, d_model, 2, dtype=jnp.float32)
                  * (-math.log(10000.0) / d_model))
    pe = jnp.zeros((max_len, d_model), jnp.float32)
    pe = pe.at[:, 0::2].set(jnp.sin(pos * div))
    pe = pe.at[:, 1::2].set(jnp.cos(pos * div))
    return pe


def embed(table, tokens, pe):
    x = jnp.take(table, tokens, axis=0) * math.sqrt(D_MODEL)
    return x + pe[: tokens.shape[1]][None, :, :]


# =========================== deterministic init ===========================

def _make_slab(rows):
    # pack per-layer LN gammas/betas and all biases into one (R, SLAB_W) f32 slab
    return jnp.stack([jnp.pad(r, (0, SLAB_W - r.shape[0])) for r in rows])


def init_params(key):
    keys = iter(jax.random.split(key, 256))

    def xavier(shape):
        fan_in, fan_out = shape
        limit = math.sqrt(6.0 / (fan_in + fan_out))
        return jax.random.uniform(next(keys), shape, jnp.float32, -limit, limit)

    scale = 1.0 / math.sqrt(D_K)        # folded into the Q projection weights
    ones = lambda n: jnp.ones((n,), jnp.float32)
    zeros = lambda n: jnp.zeros((n,), jnp.float32)

    def split_head_rows(w):             # (D, D) -> per-head (D_K, D) row blocks
        return [w[h * D_K:(h + 1) * D_K, :] for h in range(N_HEAD)]

    bf16_stack = lambda mats: jnp.stack(mats).astype(jnp.bfloat16)

    # ----------------------------- encoder -----------------------------
    e_rows, e_wqkv, e_wo, e_w1, e_w2 = [], [], [], [], []
    for _ in range(N_LAYER):
        wq, wk, wv = (xavier((D_MODEL, D_MODEL)) for _ in range(3))
        e_wqkv.append(jnp.concatenate([wq * scale, wk, wv], axis=1))   # (D, 3D)
        e_wo.extend(split_head_rows(xavier((D_MODEL, D_MODEL))))
        e_w1.append(xavier((D_MODEL, D_FF)))
        e_w2.append(xavier((D_FF, D_MODEL)))
        e_rows += [ones(D_MODEL), zeros(D_MODEL),            # ln1 gamma/beta
                   zeros(3 * D_MODEL), zeros(D_MODEL),       # qkv bias, out bias
                   ones(D_MODEL), zeros(D_MODEL),            # ln2 gamma/beta
                   zeros(D_FF), zeros(D_MODEL)]              # ffn biases
    e_rows += [ones(D_MODEL), zeros(D_MODEL)]                # final encoder LN
    enc = dict(slab=_make_slab(e_rows),
               wqkv=bf16_stack(e_wqkv),          # (L, D, 3D)
               wo=bf16_stack(e_wo),              # (L*H, D_K, D)
               w1=bf16_stack(e_w1),              # (L, D, D_FF)
               w2=bf16_stack(e_w2))              # (L, D_FF, D)

    # ----------------------------- decoder -----------------------------
    d_rows = []
    wqkv_s, wo_s, wq_c, wkv_c, wo_c, w1s, w2s = ([] for _ in range(7))
    for _ in range(N_LAYER):
        wq, wk, wv = (xavier((D_MODEL, D_MODEL)) for _ in range(3))
        wqkv_s.append(jnp.concatenate([wq * scale, wk, wv], axis=1))
        wo_s.extend(split_head_rows(xavier((D_MODEL, D_MODEL))))
        cq, ck, cv = (xavier((D_MODEL, D_MODEL)) for _ in range(3))
        wq_c.append(cq * scale)
        wkv_c.append(jnp.concatenate([ck, cv], axis=1))                # (D, 2D)
        wo_c.extend(split_head_rows(xavier((D_MODEL, D_MODEL))))
        w1s.append(xavier((D_MODEL, D_FF)))
        w2s.append(xavier((D_FF, D_MODEL)))
        d_rows += [ones(D_MODEL), zeros(D_MODEL),            # ln1
                   zeros(3 * D_MODEL), zeros(D_MODEL),       # self-attn biases
                   ones(D_MODEL), zeros(D_MODEL),            # ln2
                   zeros(D_MODEL), zeros(2 * D_MODEL), zeros(D_MODEL),  # cross biases
                   ones(D_MODEL), zeros(D_MODEL),            # ln3
                   zeros(D_FF), zeros(D_MODEL)]              # ffn biases
    d_rows += [ones(D_MODEL), zeros(D_MODEL)]                # final decoder LN
    dec = dict(slab=_make_slab(d_rows),
               wqkv_s=bf16_stack(wqkv_s), wo_s=bf16_stack(wo_s),
               wq_c=bf16_stack(wq_c), wkv_c=bf16_stack(wkv_c), wo_c=bf16_stack(wo_c),
               w1=bf16_stack(w1s), w2=bf16_stack(w2s))

    return dict(src_emb=xavier((SRC_VOCAB, D_MODEL)),
                tgt_emb=xavier((TGT_VOCAB, D_MODEL)),
                enc=enc, dec=dec)


# =========================== main ===========================

if __name__ == "__main__":
    key = jax.random.PRNGKey(0)
    pkey, skey, tkey = jax.random.split(key, 3)

    B, S_SRC, S_TGT = 2, 8, 8
    params = init_params(pkey)
    pe = positional_encoding(64, D_MODEL)

    src = jax.random.randint(skey, (B, S_SRC), 0, SRC_VOCAB, dtype=jnp.int32)
    tgt = jax.random.randint(tkey, (B, S_TGT), 0, TGT_VOCAB, dtype=jnp.int32)
    src_mask = jnp.ones((B, 1, S_SRC), jnp.float32)                 # all positions valid
    tgt_mask = jnp.broadcast_to(
        jnp.tril(jnp.ones((S_TGT, S_TGT), jnp.float32))[None], (B, S_TGT, S_TGT)
    )  # causal / subsequent mask

    fwd = jax.jit(transformer_forward)
    out = jax.block_until_ready(fwd(params, src, tgt, src_mask, tgt_mask, pe))

    assert out.shape == (B, S_TGT, D_MODEL)
    assert bool(jnp.all(jnp.isfinite(out)))
    print("KERNEL_OK")
</pallas_src>

<mosaic_0001>
module attributes {stable_mosaic.version = 11 : i64} {
  func.func @_transformer_kernel(%arg0: memref<16x32xf32, #tpu.memory_space<vmem>>, %arg1: memref<16x32xf32, #tpu.memory_space<vmem>>, %arg2: memref<2x1x8xf32, #tpu.memory_space<vmem>>, %arg3: memref<2x8x8xf32, #tpu.memory_space<vmem>>, %arg4: memref<18x96xf32, #tpu.memory_space<vmem>>, %arg5: memref<2x32x96xbf16, #tpu.memory_space<vmem>>, %arg6: memref<8x8x32xbf16, #tpu.memory_space<vmem>>, %arg7: memref<2x32x64xbf16, #tpu.memory_space<vmem>>, %arg8: memref<2x64x32xbf16, #tpu.memory_space<vmem>>, %arg9: memref<28x96xf32, #tpu.memory_space<vmem>>, %arg10: memref<2x32x96xbf16, #tpu.memory_space<vmem>>, %arg11: memref<8x8x32xbf16, #tpu.memory_space<vmem>>, %arg12: memref<2x32x32xbf16, #tpu.memory_space<vmem>>, %arg13: memref<2x32x64xbf16, #tpu.memory_space<vmem>>, %arg14: memref<8x8x32xbf16, #tpu.memory_space<vmem>>, %arg15: memref<2x32x64xbf16, #tpu.memory_space<vmem>>, %arg16: memref<2x64x32xbf16, #tpu.memory_space<vmem>>, %arg17: memref<16x32xf32, #tpu.memory_space<vmem>>) attributes {dimension_semantics = [], scalar_prefetch = 0 : i64, scratch_operands = 0 : i64, tpu.core_type = #tpu.core_type<tc>} {
    %c0 = arith.constant 0 : index
    %c0_0 = arith.constant 0 : index
    %c0_1 = arith.constant 0 : index
    %0 = vector.load %arg2[%c0, %c0_0, %c0_1] : memref<2x1x8xf32, #tpu.memory_space<vmem>>, vector<2x1x8xf32>
    %1 = vector.shape_cast %0 : vector<2x1x8xf32> to vector<2x1x8xf32>
    %2 = vector.broadcast %1 : vector<2x1x8xf32> to vector<2x8x8xf32>
    %3 = vector.shape_cast %0 : vector<2x1x8xf32> to vector<2x1x8xf32>
    %4 = vector.broadcast %3 : vector<2x1x8xf32> to vector<2x8x8xf32>
    %c0_2 = arith.constant 0 : index
    %c0_3 = arith.constant 0 : index
    %c0_4 = arith.constant 0 : index
    %5 = vector.load %arg3[%c0_2, %c0_3, %c0_4] : memref<2x8x8xf32, #tpu.memory_space<vmem>>, vector<2x8x8xf32>
    %c0_5 = arith.constant 0 : index
    %c0_6 = arith.constant 0 : index
    %6 = vector.load %arg0[%c0_5, %c0_6] : memref<16x32xf32, #tpu.memory_space<vmem>>, vector<16x32xf32>
    %c0_7 = arith.constant 0 : index
    %c0_8 = arith.constant 0 : index
    %7 = vector.load %arg4[%c0_7, %c0_8] : memref<18x96xf32, #tpu.memory_space<vmem>>, vector<1x32xf32>
    %c1 = arith.constant 1 : index
    %c0_9 = arith.constant 0 : index
    %8 = vector.load %arg4[%c1, %c0_9] : memref<18x96xf32, #tpu.memory_space<vmem>>, vector<1x32xf32>
    %cst = arith.constant dense<0.000000e+00> : vector<16xf32>
    %9 = vector.multi_reduction <add>, %6, %cst [1] : vector<16x32xf32> to vector<16xf32>
    %10 = vector.shape_cast %9 : vector<16xf32> to vector<16x1xf32>
    %cst_10 = arith.constant 3.200000e+01 : f32
    %11 = vector.broadcast %cst_10 : f32 to vector<16x1xf32>
    %12 = arith.divf %10, %11 : vector<16x1xf32>
    %13 = vector.broadcast %12 : vector<16x1xf32> to vector<16x32xf32>
    %14 = arith.subf %6, %13 : vector<16x32xf32>
    %15 = arith.mulf %14, %14 : vector<16x32xf32>
    %cst_11 = arith.constant dense<0.000000e+00> : vector<16xf32>
    %16 = vector.multi_reduction <add>, %15, %cst_11 [1] : vector<16x32xf32> to vector<16xf32>
    %17 = vector.shape_cast %16 : vector<16xf32> to vector<16x1xf32>
    %cst_12 = arith.constant 0.0322580636 : f32
    %18 = vector.broadcast %cst_12 : f32 to vector<16x1xf32>
    %19 = arith.mulf %17, %18 : vector<16x1xf32>
    %20 = vector.broadcast %7 : vector<1x32xf32> to vector<16x32xf32>
    %21 = arith.mulf %20, %14 : vector<16x32xf32>
    %22 = math.sqrt %19 : vector<16x1xf32>
    %cst_13 = arith.constant 9.99999997E-7 : f32
    %23 = vector.broadcast %cst_13 : f32 to vector<16x1xf32>
    %24 = arith.addf %22, %23 : vector<16x1xf32>
    %25 = vector.broadcast %24 : vector<16x1xf32> to vector<16x32xf32>
    %26 = arith.divf %21, %25 : vector<16x32xf32>
    %27 = vector.broadcast %8 : vector<1x32xf32> to vector<16x32xf32>
    %28 = arith.addf %26, %27 : vector<16x32xf32>
    %c0_14 = arith.constant 0 : index
    %c0_15 = arith.constant 0 : index
    %c0_16 = arith.constant 0 : index
    %29 = vector.load %arg5[%c0_14, %c0_15, %c0_16] : memref<2x32x96xbf16, #tpu.memory_space<vmem>>, vector<1x32x96xbf16>
    %30 = vector.shape_cast %29 : vector<1x32x96xbf16> to vector<32x96xbf16>
    %c2 = arith.constant 2 : index
    %c0_17 = arith.constant 0 : index
    %31 = vector.load %arg4[%c2, %c0_17] : memref<18x96xf32, #tpu.memory_space<vmem>>, vector<1x96xf32>
    %c3 = arith.constant 3 : index
    %c0_18 = arith.constant 0 : index
    %32 = vector.load %arg4[%c3, %c0_18] : memref<18x96xf32, #tpu.memory_space<vmem>>, vector<1x32xf32>
    %33 = arith.truncf %28 : vector<16x32xf32> to vector<16x32xbf16>
    %cst_19 = arith.constant dense<0.000000e+00> : vector<16x96xf32>
    %34 = tpu.matmul %33, %30, %cst_19 {dimension_numbers = #tpu.dot_dimension_numbers<[1], [0], [0], [1], [0, 0, 1, 1], [], []>} : vector<16x32xbf16>, vector<32x96xbf16>, vector<16x96xf32> -> vector<16x96xf32>
    %35 = vector.broadcast %31 : vector<1x96xf32> to vector<16x96xf32>
    %36 = arith.addf %34, %35 : vector<16x96xf32>
    %37 = vector.extract_strided_slice %36 {offsets = [0, 0], sizes = [16, 32], strides = [1, 1]} : vector<16x96xf32> to vector<16x32xf32>
    %38 = vector.extract_strided_slice %36 {offsets = [0, 32], sizes = [16, 32], strides = [1, 1]} : vector<16x96xf32> to vector<16x32xf32>
    %39 = vector.extract_strided_slice %36 {offsets = [0, 64], sizes = [16, 32], strides = [1, 1]} : vector<16x96xf32> to vector<16x32xf32>
    %40 = vector.shape_cast %37 : vector<16x32xf32> to vector<2x8x32xf32>
    %41 = arith.truncf %40 : vector<2x8x32xf32> to vector<2x8x32xbf16>
    %42 = vector.shape_cast %38 : vector<16x32xf32> to vector<2x8x32xf32>
    %43 = arith.truncf %42 : vector<2x8x32xf32> to vector<2x8x32xbf16>
    %44 = vector.shape_cast %39 : vector<16x32xf32> to vector<2x8x32xf32>
    %45 = arith.truncf %44 : vector<2x8x32xf32> to vector<2x8x32xbf16>
    %cst_20 = arith.constant 0.000000e+00 : f32
    %46 = vector.broadcast %cst_20 : f32 to vector<16x32xf32>
    %47 = vector.extract_strided_slice %41 {offsets = [0, 0, 0], sizes = [2, 8, 8], strides = [1, 1, 1]} : vector<2x8x32xbf16> to vector<2x8x8xbf16>
    %48 = vector.extract_strided_slice %43 {offsets = [0, 0, 0], sizes = [2, 8, 8], strides = [1, 1, 1]} : vector<2x8x32xbf16> to vector<2x8x8xbf16>
    "tpu.trace_start"() <{level = 10 : i32, message = "bqd,bkd->bqk"}> : () -> ()
    %cst_21 = arith.constant dense<0.000000e+00> : vector<2x8x8xf32>
    %49 = tpu.matmul %47, %48, %cst_21 {dimension_numbers = #tpu.dot_dimension_numbers<[2], [2], [1], [1], [0, 0, 0, 1, 1, 1], [0], [0]>} : vector<2x8x8xbf16>, vector<2x8x8xbf16>, vector<2x8x8xf32> -> vector<2x8x8xf32>
    "tpu.trace_stop"() : () -> ()
    %50 = arith.addf %49, %2 : vector<2x8x8xf32>
    %cst_22 = arith.constant dense<0xFF800000> : vector<2x8xf32>
    %51 = vector.multi_reduction <maximumf>, %50, %cst_22 [2] : vector<2x8x8xf32> to vector<2x8xf32>
    %52 = vector.shape_cast %51 : vector<2x8xf32> to vector<2x8x1xf32>
    %53 = vector.broadcast %52 : vector<2x8x1xf32> to vector<2x8x8xf32>
    %54 = arith.subf %50, %53 : vector<2x8x8xf32>
    %55 = math.exp %54 : vector<2x8x8xf32>
    %cst_23 = arith.constant dense<0.000000e+00> : vector<2x8xf32>
    %56 = vector.multi_reduction <add>, %55, %cst_23 [2] : vector<2x8x8xf32> to vector<2x8xf32>
    %57 = vector.shape_cast %56 : vector<2x8xf32> to vector<2x8x1xf32>
    %58 = tpu.reciprocal %57 {approx = true} : vector<2x8x1xf32> -> vector<2x8x1xf32>
    %59 = vector.broadcast %58 : vector<2x8x1xf32> to vector<2x8x8xf32>
    %60 = arith.mulf %55, %59 : vector<2x8x8xf32>
    %61 = arith.truncf %60 : vector<2x8x8xf32> to vector<2x8x8xbf16>
    %62 = vector.extract_strided_slice %45 {offsets = [0, 0, 0], sizes = [2, 8, 8], strides = [1, 1, 1]} : vector<2x8x32xbf16> to vector<2x8x8xbf16>
    "tpu.trace_start"() <{level = 10 : i32, message = "bqk,bkd->bqd"}> : () -> ()
    %cst_24 = arith.constant dense<0.000000e+00> : vector<2x8x8xf32>
    %63 = tpu.matmul %61, %62, %cst_24 {dimension_numbers = #tpu.dot_dimension_numbers<[2], [1], [1], [2], [0, 0, 0, 1, 1, 2], [0], [0]>} : vector<2x8x8xbf16>, vector<2x8x8xbf16>, vector<2x8x8xf32> -> vector<2x8x8xf32>
    "tpu.trace_stop"() : () -> ()
    %64 = vector.shape_cast %63 : vector<2x8x8xf32> to vector<16x8xf32>
    %65 = arith.truncf %64 : vector<16x8xf32> to vector<16x8xbf16>
    %c0_25 = arith.constant 0 : index
    %c0_26 = arith.constant 0 : index
    %c0_27 = arith.constant 0 : index
    %66 = vector.load %arg6[%c0_25, %c0_26, %c0_27] : memref<8x8x32xbf16, #tpu.memory_space<vmem>>, vector<1x8x32xbf16>
    %67 = vector.shape_cast %66 : vector<1x8x32xbf16> to vector<8x32xbf16>
    %cst_28 = arith.constant dense<0.000000e+00> : vector<16x32xf32>
    %68 = tpu.matmul %65, %67, %cst_28 {dimension_numbers = #tpu.dot_dimension_numbers<[1], [0], [0], [1], [0, 0, 1, 1], [], []>} : vector<16x8xbf16>, vector<8x32xbf16>, vector<16x32xf32> -> vector<16x32xf32>
    %69 = arith.addf %46, %68 : vector<16x32xf32>
    %70 = vector.extract_strided_slice %41 {offsets = [0, 0, 8], sizes = [2, 8, 8], strides = [1, 1, 1]} : vector<2x8x32xbf16> to vector<2x8x8xbf16>
    %71 = vector.extract_strided_slice %43 {offsets = [0, 0, 8], sizes = [2, 8, 8], strides = [1, 1, 1]} : vector<2x8x32xbf16> to vector<2x8x8xbf16>
    "tpu.trace_start"() <{level = 10 : i32, message = "bqd,bkd->bqk"}> : () -> ()
    %cst_29 = arith.constant dense<0.000000e+00> : vector<2x8x8xf32>
    %72 = tpu.matmul %70, %71, %cst_29 {dimension_numbers = #tpu.dot_dimension_numbers<[2], [2], [1], [1], [0, 0, 0, 1, 1, 1], [0], [0]>} : vector<2x8x8xbf16>, vector<2x8x8xbf16>, vector<2x8x8xf32> -> vector<2x8x8xf32>
    "tpu.trace_stop"() : () -> ()
    %73 = arith.addf %72, %2 : vector<2x8x8xf32>
    %cst_30 = arith.constant dense<0xFF800000> : vector<2x8xf32>
    %74 = vector.multi_reduction <maximumf>, %73, %cst_30 [2] : vector<2x8x8xf32> to vector<2x8xf32>
    %75 = vector.shape_cast %74 : vector<2x8xf32> to vector<2x8x1xf32>
    %76 = vector.broadcast %75 : vector<2x8x1xf32> to vector<2x8x8xf32>
    %77 = arith.subf %73, %76 : vector<2x8x8xf32>
    %78 = math.exp %77 : vector<2x8x8xf32>
    %cst_31 = arith.constant dense<0.000000e+00> : vector<2x8xf32>
    %79 = vector.multi_reduction <add>, %78, %cst_31 [2] : vector<2x8x8xf32> to vector<2x8xf32>
    %80 = vector.shape_cast %79 : vector<2x8xf32> to vector<2x8x1xf32>
    %81 = tpu.reciprocal %80 {approx = true} : vector<2x8x1xf32> -> vector<2x8x1xf32>
    %82 = vector.broadcast %81 : vector<2x8x1xf32> to vector<2x8x8xf32>
    %83 = arith.mulf %78, %82 : vector<2x8x8xf32>
    %84 = arith.truncf %83 : vector<2x8x8xf32> to vector<2x8x8xbf16>
    %85 = vector.extract_strided_slice %45 {offsets = [0, 0, 8], sizes = [2, 8, 8], strides = [1, 1, 1]} : vector<2x8x32xbf16> to vector<2x8x8xbf16>
    "tpu.trace_start"() <{level = 10 : i32, message = "bqk,bkd->bqd"}> : () -> ()
    %cst_32 = arith.constant dense<0.000000e+00> : vector<2x8x8xf32>
    %86 = tpu.matmul %84, %85, %cst_32 {dimension_numbers = #tpu.dot_dimension_numbers<[2], [1], [1], [2], [0, 0, 0, 1, 1, 2], [0], [0]>} : vector<2x8x8xbf16>, vector<2x8x8xbf16>, vector<2x8x8xf32> -> vector<2x8x8xf32>
    "tpu.trace_stop"() : () -> ()
    %87 = vector.shape_cast %86 : vector<2x8x8xf32> to vector<16x8xf32>
    %88 = arith.truncf %87 : vector<16x8xf32> to vector<16x8xbf16>
    %c1_33 = arith.constant 1 : index
    %c0_34 = arith.constant 0 : index
    %c0_35 = arith.constant 0 : index
    %89 = vector.load %arg6[%c1_33, %c0_34, %c0_35] : memref<8x8x32xbf16, #tpu.memory_space<vmem>>, vector<1x8x32xbf16>
    %90 = vector.shape_cast %89 : vector<1x8x32xbf16> to vector<8x32xbf16>
    %cst_36 = arith.constant dense<0.000000e+00> : vector<16x32xf32>
    %91 = tpu.matmul %88, %90, %cst_36 {dimension_numbers = #tpu.dot_dimension_numbers<[1], [0], [0], [1], [0, 0, 1, 1], [], []>} : vector<16x8xbf16>, vector<8x32xbf16>, vector<16x32xf32> -> vector<16x32xf32>
    %92 = arith.addf %69, %91 : vector<16x32xf32>
    %93 = vector.extract_strided_slice %41 {offsets = [0, 0, 16], sizes = [2, 8, 8], strides = [1, 1, 1]} : vector<2x8x32xbf16> to vector<2x8x8xbf16>
    %94 = vector.extract_strided_slice %43 {offsets = [0, 0, 16], sizes = [2, 8, 8], strides = [1, 1, 1]} : vector<2x8x32xbf16> to vector<2x8x8xbf16>
    "tpu.trace_start"() <{level = 10 : i32, message = "bqd,bkd->bqk"}> : () -> ()
    %cst_37 = arith.constant dense<0.000000e+00> : vector<2x8x8xf32>
    %95 = tpu.matmul %93, %94, %cst_37 {dimension_numbers = #tpu.dot_dimension_numbers<[2], [2], [1], [1], [0, 0, 0, 1, 1, 1], [0], [0]>} : vector<2x8x8xbf16>, vector<2x8x8xbf16>, vector<2x8x8xf32> -> vector<2x8x8xf32>
    "tpu.trace_stop"() : () -> ()
    %96 = arith.addf %95, %2 : vector<2x8x8xf32>
    %cst_38 = arith.constant dense<0xFF800000> : vector<2x8xf32>
    %97 = vector.multi_reduction <maximumf>, %96, %cst_38 [2] : vector<2x8x8xf32> to vector<2x8xf32>
    %98 = vector.shape_cast %97 : vector<2x8xf32> to vector<2x8x1xf32>
    %99 = vector.broadcast %98 : vector<2x8x1xf32> to vector<2x8x8xf32>
    %100 = arith.subf %96, %99 : vector<2x8x8xf32>
    %101 = math.exp %100 : vector<2x8x8xf32>
    %cst_39 = arith.constant dense<0.000000e+00> : vector<2x8xf32>
    %102 = vector.multi_reduction <add>, %101, %cst_39 [2] : vector<2x8x8xf32> to vector<2x8xf32>
    %103 = vector.shape_cast %102 : vector<2x8xf32> to vector<2x8x1xf32>
    %104 = tpu.reciprocal %103 {approx = true} : vector<2x8x1xf32> -> vector<2x8x1xf32>
    %105 = vector.broadcast %104 : vector<2x8x1xf32> to vector<2x8x8xf32>
    %106 = arith.mulf %101, %105 : vector<2x8x8xf32>
    %107 = arith.truncf %106 : vector<2x8x8xf32> to vector<2x8x8xbf16>
    %108 = vector.extract_strided_slice %45 {offsets = [0, 0, 16], sizes = [2, 8, 8], strides = [1, 1, 1]} : vector<2x8x32xbf16> to vector<2x8x8xbf16>
    "tpu.trace_start"() <{level = 10 : i32, message = "bqk,bkd->bqd"}> : () -> ()
    %cst_40 = arith.constant dense<0.000000e+00> : vector<2x8x8xf32>
    %109 = tpu.matmul %107, %108, %cst_40 {dimension_numbers = #tpu.dot_dimension_numbers<[2], [1], [1], [2], [0, 0, 0, 1, 1, 2], [0], [0]>} : vector<2x8x8xbf16>, vector<2x8x8xbf16>, vector<2x8x8xf32> -> vector<2x8x8xf32>
    "tpu.trace_stop"() : () -> ()
    %110 = vector.shape_cast %109 : vector<2x8x8xf32> to vector<16x8xf32>
    %111 = arith.truncf %110 : vector<16x8xf32> to vector<16x8xbf16>
    %c2_41 = arith.constant 2 : index
    %c0_42 = arith.constant 0 : index
    %c0_43 = arith.constant 0 : index
    %112 = vector.load %arg6[%c2_41, %c0_42, %c0_43] : memref<8x8x32xbf16, #tpu.memory_space<vmem>>, vector<1x8x32xbf16>
    %113 = vector.shape_cast %112 : vector<1x8x32xbf16> to vector<8x32xbf16>
    %cst_44 = arith.constant dense<0.000000e+00> : vector<16x32xf32>
    %114 = tpu.matmul %111, %113, %cst_44 {dimension_numbers = #tpu.dot_dimension_numbers<[1], [0], [0], [1], [0, 0, 1, 1], [], []>} : vector<16x8xbf16>, vector<8x32xbf16>, vector<16x32xf32> -> vector<16x32xf32>
    %115 = arith.addf %92, %114 : vector<16x32xf32>
    %116 = vector.extract_strided_slice %41 {offsets = [0, 0, 24], sizes = [2, 8, 8], strides = [1, 1, 1]} : vector<2x8x32xbf16> to vector<2x8x8xbf16>
    %117 = vector.extract_strided_slice %43 {offsets = [0, 0, 24], sizes = [2, 8, 8], strides = [1, 1, 1]} : vector<2x8x32xbf16> to vector<2x8x8xbf16>
    "tpu.trace_start"() <{level = 10 : i32, message = "bqd,bkd->bqk"}> : () -> ()
    %cst_45 = arith.constant dense<0.000000e+00> : vector<2x8x8xf32>
    %118 = tpu.matmul %116, %117, %cst_45 {dimension_numbers = #tpu.dot_dimension_numbers<[2], [2], [1], [1], [0, 0, 0, 1, 1, 1], [0], [0]>} : vector<2x8x8xbf16>, vector<2x8x8xbf16>, vector<2x8x8xf32> -> vector<2x8x8xf32>
    "tpu.trace_stop"() : () -> ()
    %119 = arith.addf %118, %2 : vector<2x8x8xf32>
    %cst_46 = arith.constant dense<0xFF800000> : vector<2x8xf32>
    %120 = vector.multi_reduction <maximumf>, %119, %cst_46 [2] : vector<2x8x8xf32> to vector<2x8xf32>
    %121 = vector.shape_cast %120 : vector<2x8xf32> to vector<2x8x1xf32>
    %122 = vector.broadcast %121 : vector<2x8x1xf32> to vector<2x8x8xf32>
    %123 = arith.subf %119, %122 : vector<2x8x8xf32>
    %124 = math.exp %123 : vector<2x8x8xf32>
    %cst_47 = arith.constant dense<0.000000e+00> : vector<2x8xf32>
    %125 = vector.multi_reduction <add>, %124, %cst_47 [2] : vector<2x8x8xf32> to vector<2x8xf32>
    %126 = vector.shape_cast %125 : vector<2x8xf32> to vector<2x8x1xf32>
    %127 = tpu.reciprocal %126 {approx = true} : vector<2x8x1xf32> -> vector<2x8x1xf32>
    %128 = vector.broadcast %127 : vector<2x8x1xf32> to vector<2x8x8xf32>
    %129 = arith.mulf %124, %128 : vector<2x8x8xf32>
    %130 = arith.truncf %129 : vector<2x8x8xf32> to vector<2x8x8xbf16>
    %131 = vector.extract_strided_slice %45 {offsets = [0, 0, 24], sizes = [2, 8, 8], strides = [1, 1, 1]} : vector<2x8x32xbf16> to vector<2x8x8xbf16>
    "tpu.trace_start"() <{level = 10 : i32, message = "bqk,bkd->bqd"}> : () -> ()
    %cst_48 = arith.constant dense<0.000000e+00> : vector<2x8x8xf32>
    %132 = tpu.matmul %130, %131, %cst_48 {dimension_numbers = #tpu.dot_dimension_numbers<[2], [1], [1], [2], [0, 0, 0, 1, 1, 2], [0], [0]>} : vector<2x8x8xbf16>, vector<2x8x8xbf16>, vector<2x8x8xf32> -> vector<2x8x8xf32>
    "tpu.trace_stop"() : () -> ()
    %133 = vector.shape_cast %132 : vector<2x8x8xf32> to vector<16x8xf32>
    %134 = arith.truncf %133 : vector<16x8xf32> to vector<16x8xbf16>
    %c3_49 = arith.constant 3 : index
    %c0_50 = arith.constant 0 : index
    %c0_51 = arith.constant 0 : index
    %135 = vector.load %arg6[%c3_49, %c0_50, %c0_51] : memref<8x8x32xbf16, #tpu.memory_space<vmem>>, vector<1x8x32xbf16>
    %136 = vector.shape_cast %135 : vector<1x8x32xbf16> to vector<8x32xbf16>
    %cst_52 = arith.constant dense<0.000000e+00> : vector<16x32xf32>
    %137 = tpu.matmul %134, %136, %cst_52 {dimension_numbers = #tpu.dot_dimension_numbers<[1], [0], [0], [1], [0, 0, 1, 1], [], []>} : vector<16x8xbf16>, vector<8x32xbf16>, vector<16x32xf32> -> vector<16x32xf32>
    %138 = arith.addf %115, %137 : vector<16x32xf32>
    %139 = vector.broadcast %32 : vector<1x32xf32> to vector<16x32xf32>
    %140 = arith.addf %138, %139 : vector<16x32xf32>
    %141 = arith.addf %6, %140 : vector<16x32xf32>
    %c4 = arith.constant 4 : index
    %c0_53 = arith.constant 0 : index
    %142 = vector.load %arg4[%c4, %c0_53] : memref<18x96xf32, #tpu.memory_space<vmem>>, vector<1x32xf32>
    %c5 = arith.constant 5 : index
    %c0_54 = arith.constant 0 : index
    %143 = vector.load %arg4[%c5, %c0_54] : memref<18x96xf32, #tpu.memory_space<vmem>>, vector<1x32xf32>
    %cst_55 = arith.constant dense<0.000000e+00> : vector<16xf32>
    %144 = vector.multi_reduction <add>, %141, %cst_55 [1] : vector<16x32xf32> to vector<16xf32>
    %145 = vector.shape_cast %144 : vector<16xf32> to vector<16x1xf32>
    %cst_56 = arith.constant 3.200000e+01 : f32
    %146 = vector.broadcast %cst_56 : f32 to vector<16x1xf32>
    %147 = arith.divf %145, %146 : vector<16x1xf32>
    %148 = vector.broadcast %147 : vector<16x1xf32> to vector<16x32xf32>
    %149 = arith.subf %141, %148 : vector<16x32xf32>
    %150 = arith.mulf %149, %149 : vector<16x32xf32>
    %cst_57 = arith.constant dense<0.000000e+00> : vector<16xf32>
    %151 = vector.multi_reduction <add>, %150, %cst_57 [1] : vector<16x32xf32> to vector<16xf32>
    %152 = vector.shape_cast %151 : vector<16xf32> to vector<16x1xf32>
    %cst_58 = arith.constant 0.0322580636 : f32
    %153 = vector.broadcast %cst_58 : f32 to vector<16x1xf32>
    %154 = arith.mulf %152, %153 : vector<16x1xf32>
    %155 = vector.broadcast %142 : vector<1x32xf32> to vector<16x32xf32>
    %156 = arith.mulf %155, %149 : vector<16x32xf32>
    %157 = math.sqrt %154 : vector<16x1xf32>
    %cst_59 = arith.constant 9.99999997E-7 : f32
    %158 = vector.broadcast %cst_59 : f32 to vector<16x1xf32>
    %159 = arith.addf %157, %158 : vector<16x1xf32>
    %160 = vector.broadcast %159 : vector<16x1xf32> to vector<16x32xf32>
    %161 = arith.divf %156, %160 : vector<16x32xf32>
    %162 = vector.broadcast %143 : vector<1x32xf32> to vector<16x32xf32>
    %163 = arith.addf %161, %162 : vector<16x32xf32>
    %c0_60 = arith.constant 0 : index
    %c0_61 = arith.constant 0 : index
    %c0_62 = arith.constant 0 : index
    %164 = vector.load %arg7[%c0_60, %c0_61, %c0_62] : memref<2x32x64xbf16, #tpu.memory_space<vmem>>, vector<1x32x64xbf16>
    %165 = vector.shape_cast %164 : vector<1x32x64xbf16> to vector<32x64xbf16>
    %c6 = arith.constant 6 : index
    %c0_63 = arith.constant 0 : index
    %166 = vector.load %arg4[%c6, %c0_63] : memref<18x96xf32, #tpu.memory_space<vmem>>, vector<1x64xf32>
    %c0_64 = arith.constant 0 : index
    %c0_65 = arith.constant 0 : index
    %c0_66 = arith.constant 0 : index
    %167 = vector.load %arg8[%c0_64, %c0_65, %c0_66] : memref<2x64x32xbf16, #tpu.memory_space<vmem>>, vector<1x64x32xbf16>
    %168 = vector.shape_cast %167 : vector<1x64x32xbf16> to vector<64x32xbf16>
    %c7 = arith.constant 7 : index
    %c0_67 = arith.constant 0 : index
    %169 = vector.load %arg4[%c7, %c0_67] : memref<18x96xf32, #tpu.memory_space<vmem>>, vector<1x32xf32>
    %170 = arith.truncf %163 : vector<16x32xf32> to vector<16x32xbf16>
    %cst_68 = arith.constant dense<0.000000e+00> : vector<16x64xf32>
    %171 = tpu.matmul %170, %165, %cst_68 {dimension_numbers = #tpu.dot_dimension_numbers<[1], [0], [0], [1], [0, 0, 1, 1], [], []>} : vector<16x32xbf16>, vector<32x64xbf16>, vector<16x64xf32> -> vector<16x64xf32>
    %172 = vector.broadcast %166 : vector<1x64xf32> to vector<16x64xf32>
    %173 = arith.addf %171, %172 : vector<16x64xf32>
    %cst_69 = arith.constant 0.000000e+00 : f32
    %174 = vector.broadcast %cst_69 : f32 to vector<16x64xf32>
    %175 = arith.maximumf %173, %174 : vector<16x64xf32>
    %176 = arith.truncf %175 : vector<16x64xf32> to vector<16x64xbf16>
    %cst_70 = arith.constant dense<0.000000e+00> : vector<16x32xf32>
    %177 = tpu.matmul %176, %168, %cst_70 {dimension_numbers = #tpu.dot_dimension_numbers<[1], [0], [0], [1], [0, 0, 1, 1], [], []>} : vector<16x64xbf16>, vector<64x32xbf16>, vector<16x32xf32> -> vector<16x32xf32>
    %178 = vector.broadcast %169 : vector<1x32xf32> to vector<16x32xf32>
    %179 = arith.addf %177, %178 : vector<16x32xf32>
    %180 = arith.addf %141, %179 : vector<16x32xf32>
    %c8 = arith.constant 8 : index
    %c0_71 = arith.constant 0 : index
    %181 = vector.load %arg4[%c8, %c0_71] : memref<18x96xf32, #tpu.memory_space<vmem>>, vector<1x32xf32>
    %c9 = arith.constant 9 : index
    %c0_72 = arith.constant 0 : index
    %182 = vector.load %arg4[%c9, %c0_72] : memref<18x96xf32, #tpu.memory_space<vmem>>, vector<1x32xf32>
    %cst_73 = arith.constant dense<0.000000e+00> : vector<16xf32>
    %183 = vector.multi_reduction <add>, %180, %cst_73 [1] : vector<16x32xf32> to vector<16xf32>
    %184 = vector.shape_cast %183 : vector<16xf32> to vector<16x1xf32>
    %cst_74 = arith.constant 3.200000e+01 : f32
    %185 = vector.broadcast %cst_74 : f32 to vector<16x1xf32>
    %186 = arith.divf %184, %185 : vector<16x1xf32>
    %187 = vector.broadcast %186 : vector<16x1xf32> to vector<16x32xf32>
    %188 = arith.subf %180, %187 : vector<16x32xf32>
    %189 = arith.mulf %188, %188 : vector<16x32xf32>
    %cst_75 = arith.constant dense<0.000000e+00> : vector<16xf32>
    %190 = vector.multi_reduction <add>, %189, %cst_75 [1] : vector<16x32xf32> to vector<16xf32>
    %191 = vector.shape_cast %190 : vector<16xf32> to vector<16x1xf32>
    %cst_76 = arith.constant 0.0322580636 : f32
    %192 = vector.broadcast %cst_76 : f32 to vector<16x1xf32>
    %193 = arith.mulf %191, %192 : vector<16x1xf32>
    %194 = vector.broadcast %181 : vector<1x32xf32> to vector<16x32xf32>
    %195 = arith.mulf %194, %188 : vector<16x32xf32>
    %196 = math.sqrt %193 : vector<16x1xf32>
    %cst_77 = arith.constant 9.99999997E-7 : f32
    %197 = vector.broadcast %cst_77 : f32 to vector<16x1xf32>
    %198 = arith.addf %196, %197 : vector<16x1xf32>
    %199 = vector.broadcast %198 : vector<16x1xf32> to vector<16x32xf32>
    %200 = arith.divf %195, %199 : vector<16x32xf32>
    %201 = vector.broadcast %182 : vector<1x32xf32> to vector<16x32xf32>
    %202 = arith.addf %200, %201 : vector<16x32xf32>
    %c1_78 = arith.constant 1 : index
    %c0_79 = arith.constant 0 : index
    %c0_80 = arith.constant 0 : index
    %203 = vector.load %arg5[%c1_78, %c0_79, %c0_80] : memref<2x32x96xbf16, #tpu.memory_space<vmem>>, vector<1x32x96xbf16>
    %204 = vector.shape_cast %203 : vector<1x32x96xbf16> to vector<32x96xbf16>
    %c10 = arith.constant 10 : index
    %c0_81 = arith.constant 0 : index
    %205 = vector.load %arg4[%c10, %c0_81] : memref<18x96xf32, #tpu.memory_space<vmem>>, vector<1x96xf32>
    %c11 = arith.constant 11 : index
    %c0_82 = arith.constant 0 : index
    %206 = vector.load %arg4[%c11, %c0_82] : memref<18x96xf32, #tpu.memory_space<vmem>>, vector<1x32xf32>
    %207 = arith.truncf %202 : vector<16x32xf32> to vector<16x32xbf16>
    %cst_83 = arith.constant dense<0.000000e+00> : vector<16x96xf32>
    %208 = tpu.matmul %207, %204, %cst_83 {dimension_numbers = #tpu.dot_dimension_numbers<[1], [0], [0], [1], [0, 0, 1, 1], [], []>} : vector<16x32xbf16>, vector<32x96xbf16>, vector<16x96xf32> -> vector<16x96xf32>
    %209 = vector.broadcast %205 : vector<1x96xf32> to vector<16x96xf32>
    %210 = arith.addf %208, %209 : vector<16x96xf32>
    %211 = vector.extract_strided_slice %210 {offsets = [0, 0], sizes = [16, 32], strides = [1, 1]} : vector<16x96xf32> to vector<16x32xf32>
    %212 = vector.extract_strided_slice %210 {offsets = [0, 32], sizes = [16, 32], strides = [1, 1]} : vector<16x96xf32> to vector<16x32xf32>
    %213 = vector.extract_strided_slice %210 {offsets = [0, 64], sizes = [16, 32], strides = [1, 1]} : vector<16x96xf32> to vector<16x32xf32>
    %214 = vector.shape_cast %211 : vector<16x32xf32> to vector<2x8x32xf32>
    %215 = arith.truncf %214 : vector<2x8x32xf32> to vector<2x8x32xbf16>
    %216 = vector.shape_cast %212 : vector<16x32xf32> to vector<2x8x32xf32>
    %217 = arith.truncf %216 : vector<2x8x32xf32> to vector<2x8x32xbf16>
    %218 = vector.shape_cast %213 : vector<16x32xf32> to vector<2x8x32xf32>
    %219 = arith.truncf %218 : vector<2x8x32xf32> to vector<2x8x32xbf16>
    %cst_84 = arith.constant 0.000000e+00 : f32
    %220 = vector.broadcast %cst_84 : f32 to vector<16x32xf32>
    %221 = vector.extract_strided_slice %215 {offsets = [0, 0, 0], sizes = [2, 8, 8], strides = [1, 1, 1]} : vector<2x8x32xbf16> to vector<2x8x8xbf16>
    %222 = vector.extract_strided_slice %217 {offsets = [0, 0, 0], sizes = [2, 8, 8], strides = [1, 1, 1]} : vector<2x8x32xbf16> to vector<2x8x8xbf16>
    "tpu.trace_start"() <{level = 10 : i32, message = "bqd,bkd->bqk"}> : () -> ()
    %cst_85 = arith.constant dense<0.000000e+00> : vector<2x8x8xf32>
    %223 = tpu.matmul %221, %222, %cst_85 {dimension_numbers = #tpu.dot_dimension_numbers<[2], [2], [1], [1], [0, 0, 0, 1, 1, 1], [0], [0]>} : vector<2x8x8xbf16>, vector<2x8x8xbf16>, vector<2x8x8xf32> -> vector<2x8x8xf32>
    "tpu.trace_stop"() : () -> ()
    %224 = arith.addf %223, %2 : vector<2x8x8xf32>
    %cst_86 = arith.constant dense<0xFF800000> : vector<2x8xf32>
    %225 = vector.multi_reduction <maximumf>, %224, %cst_86 [2] : vector<2x8x8xf32> to vector<2x8xf32>
    %226 = vector.shape_cast %225 : vector<2x8xf32> to vector<2x8x1xf32>
    %227 = vector.broadcast %226 : vector<2x8x1xf32> to vector<2x8x8xf32>
    %228 = arith.subf %224, %227 : vector<2x8x8xf32>
    %229 = math.exp %228 : vector<2x8x8xf32>
    %cst_87 = arith.constant dense<0.000000e+00> : vector<2x8xf32>
    %230 = vector.multi_reduction <add>, %229, %cst_87 [2] : vector<2x8x8xf32> to vector<2x8xf32>
    %231 = vector.shape_cast %230 : vector<2x8xf32> to vector<2x8x1xf32>
    %232 = tpu.reciprocal %231 {approx = true} : vector<2x8x1xf32> -> vector<2x8x1xf32>
    %233 = vector.broadcast %232 : vector<2x8x1xf32> to vector<2x8x8xf32>
    %234 = arith.mulf %229, %233 : vector<2x8x8xf32>
    %235 = arith.truncf %234 : vector<2x8x8xf32> to vector<2x8x8xbf16>
    %236 = vector.extract_strided_slice %219 {offsets = [0, 0, 0], sizes = [2, 8, 8], strides = [1, 1, 1]} : vector<2x8x32xbf16> to vector<2x8x8xbf16>
    "tpu.trace_start"() <{level = 10 : i32, message = "bqk,bkd->bqd"}> : () -> ()
    %cst_88 = arith.constant dense<0.000000e+00> : vector<2x8x8xf32>
    %237 = tpu.matmul %235, %236, %cst_88 {dimension_numbers = #tpu.dot_dimension_numbers<[2], [1], [1], [2], [0, 0, 0, 1, 1, 2], [0], [0]>} : vector<2x8x8xbf16>, vector<2x8x8xbf16>, vector<2x8x8xf32> -> vector<2x8x8xf32>
    "tpu.trace_stop"() : () -> ()
    %238 = vector.shape_cast %237 : vector<2x8x8xf32> to vector<16x8xf32>
    %239 = arith.truncf %238 : vector<16x8xf32> to vector<16x8xbf16>
    %c4_89 = arith.constant 4 : index
    %c0_90 = arith.constant 0 : index
    %c0_91 = arith.constant 0 : index
    %240 = vector.load %arg6[%c4_89, %c0_90, %c0_91] : memref<8x8x32xbf16, #tpu.memory_space<vmem>>, vector<1x8x32xbf16>
    %241 = vector.shape_cast %240 : vector<1x8x32xbf16> to vector<8x32xbf16>
    %cst_92 = arith.constant dense<0.000000e+00> : vector<16x32xf32>
    %242 = tpu.matmul %239, %241, %cst_92 {dimension_numbers = #tpu.dot_dimension_numbers<[1], [0], [0], [1], [0, 0, 1, 1], [], []>} : vector<16x8xbf16>, vector<8x32xbf16>, vector<16x32xf32> -> vector<16x32xf32>
    %243 = arith.addf %220, %242 : vector<16x32xf32>
    %244 = vector.extract_strided_slice %215 {offsets = [0, 0, 8], sizes = [2, 8, 8], strides = [1, 1, 1]} : vector<2x8x32xbf16> to vector<2x8x8xbf16>
    %245 = vector.extract_strided_slice %217 {offsets = [0, 0, 8], sizes = [2, 8, 8], strides = [1, 1, 1]} : vector<2x8x32xbf16> to vector<2x8x8xbf16>
    "tpu.trace_start"() <{level = 10 : i32, message = "bqd,bkd->bqk"}> : () -> ()
    %cst_93 = arith.constant dense<0.000000e+00> : vector<2x8x8xf32>
    %246 = tpu.matmul %244, %245, %cst_93 {dimension_numbers = #tpu.dot_dimension_numbers<[2], [2], [1], [1], [0, 0, 0, 1, 1, 1], [0], [0]>} : vector<2x8x8xbf16>, vector<2x8x8xbf16>, vector<2x8x8xf32> -> vector<2x8x8xf32>
    "tpu.trace_stop"() : () -> ()
    %247 = arith.addf %246, %2 : vector<2x8x8xf32>
    %cst_94 = arith.constant dense<0xFF800000> : vector<2x8xf32>
    %248 = vector.multi_reduction <maximumf>, %247, %cst_94 [2] : vector<2x8x8xf32> to vector<2x8xf32>
    %249 = vector.shape_cast %248 : vector<2x8xf32> to vector<2x8x1xf32>
    %250 = vector.broadcast %249 : vector<2x8x1xf32> to vector<2x8x8xf32>
    %251 = arith.subf %247, %250 : vector<2x8x8xf32>
    %252 = math.exp %251 : vector<2x8x8xf32>
    %cst_95 = arith.constant dense<0.000000e+00> : vector<2x8xf32>
    %253 = vector.multi_reduction <add>, %252, %cst_95 [2] : vector<2x8x8xf32> to vector<2x8xf32>
    %254 = vector.shape_cast %253 : vector<2x8xf32> to vector<2x8x1xf32>
    %255 = tpu.reciprocal %254 {approx = true} : vector<2x8x1xf32> -> vector<2x8x1xf32>
    %256 = vector.broadcast %255 : vector<2x8x1xf32> to vector<2x8x8xf32>
    %257 = arith.mulf %252, %256 : vector<2x8x8xf32>
    %258 = arith.truncf %257 : vector<2x8x8xf32> to vector<2x8x8xbf16>
    %259 = vector.extract_strided_slice %219 {offsets = [0, 0, 8], sizes = [2, 8, 8], strides = [1, 1, 1]} : vector<2x8x32xbf16> to vector<2x8x8xbf16>
    "tpu.trace_start"() <{level = 10 : i32, message = "bqk,bkd->bqd"}> : () -> ()
    %cst_96 = arith.constant dense<0.000000e+00> : vector<2x8x8xf32>
    %260 = tpu.matmul %258, %259, %cst_96 {dimension_numbers = #tpu.dot_dimension_numbers<[2], [1], [1], [2], [0, 0, 0, 1, 1, 2], [0], [0]>} : vector<2x8x8xbf16>, vector<2x8x8xbf16>, vector<2x8x8xf32> -> vector<2x8x8xf32>
    "tpu.trace_stop"() : () -> ()
    %261 = vector.shape_cast %260 : vector<2x8x8xf32> to vector<16x8xf32>
    %262 = arith.truncf %261 : vector<16x8xf32> to vector<16x8xbf16>
    %c5_97 = arith.constant 5 : index
    %c0_98 = arith.constant 0 : index
    %c0_99 = arith.constant 0 : index
    %263 = vector.load %arg6[%c5_97, %c0_98, %c0_99] : memref<8x8x32xbf16, #tpu.memory_space<vmem>>, vector<1x8x32xbf16>
    %264 = vector.shape_cast %263 : vector<1x8x32xbf16> to vector<8x32xbf16>
    %cst_100 = arith.constant dense<0.000000e+00> : vector<16x32xf32>
    %265 = tpu.matmul %262, %264, %cst_100 {dimension_numbers = #tpu.dot_dimension_numbers<[1], [0], [0], [1], [0, 0, 1, 1], [], []>} : vector<16x8xbf16>, vector<8x32xbf16>, vector<16x32xf32> -> vector<16x32xf32>
    %266 = arith.addf %243, %265 : vector<16x32xf32>
    %267 = vector.extract_strided_slice %215 {offsets = [0, 0, 16], sizes = [2, 8, 8], strides = [1, 1, 1]} : vector<2x8x32xbf16> to vector<2x8x8xbf16>
    %268 = vector.extract_strided_slice %217 {offsets = [0, 0, 16], sizes = [2, 8, 8], strides = [1, 1, 1]} : vector<2x8x32xbf16> to vector<2x8x8xbf16>
    "tpu.trace_start"() <{level = 10 : i32, message = "bqd,bkd->bqk"}> : () -> ()
    %cst_101 = arith.constant dense<0.000000e+00> : vector<2x8x8xf32>
    %269 = tpu.matmul %267, %268, %cst_101 {dimension_numbers = #tpu.dot_dimension_numbers<[2], [2], [1], [1], [0, 0, 0, 1, 1, 1], [0], [0]>} : vector<2x8x8xbf16>, vector<2x8x8xbf16>, vector<2x8x8xf32> -> vector<2x8x8xf32>
    "tpu.trace_stop"() : () -> ()
    %270 = arith.addf %269, %2 : vector<2x8x8xf32>
    %cst_102 = arith.constant dense<0xFF800000> : vector<2x8xf32>
    %271 = vector.multi_reduction <maximumf>, %270, %cst_102 [2] : vector<2x8x8xf32> to vector<2x8xf32>
    %272 = vector.shape_cast %271 : vector<2x8xf32> to vector<2x8x1xf32>
    %273 = vector.broadcast %272 : vector<2x8x1xf32> to vector<2x8x8xf32>
    %274 = arith.subf %270, %273 : vector<2x8x8xf32>
    %275 = math.exp %274 : vector<2x8x8xf32>
    %cst_103 = arith.constant dense<0.000000e+00> : vector<2x8xf32>
    %276 = vector.multi_reduction <add>, %275, %cst_103 [2] : vector<2x8x8xf32> to vector<2x8xf32>
    %277 = vector.shape_cast %276 : vector<2x8xf32> to vector<2x8x1xf32>
    %278 = tpu.reciprocal %277 {approx = true} : vector<2x8x1xf32> -> vector<2x8x1xf32>
    %279 = vector.broadcast %278 : vector<2x8x1xf32> to vector<2x8x8xf32>
    %280 = arith.mulf %275, %279 : vector<2x8x8xf32>
    %281 = arith.truncf %280 : vector<2x8x8xf32> to vector<2x8x8xbf16>
    %282 = vector.extract_strided_slice %219 {offsets = [0, 0, 16], sizes = [2, 8, 8], strides = [1, 1, 1]} : vector<2x8x32xbf16> to vector<2x8x8xbf16>
    "tpu.trace_start"() <{level = 10 : i32, message = "bqk,bkd->bqd"}> : () -> ()
    %cst_104 = arith.constant dense<0.000000e+00> : vector<2x8x8xf32>
    %283 = tpu.matmul %281, %282, %cst_104 {dimension_numbers = #tpu.dot_dimension_numbers<[2], [1], [1], [2], [0, 0, 0, 1, 1, 2], [0], [0]>} : vector<2x8x8xbf16>, vector<2x8x8xbf16>, vector<2x8x8xf32> -> vector<2x8x8xf32>
    "tpu.trace_stop"() : () -> ()
    %284 = vector.shape_cast %283 : vector<2x8x8xf32> to vector<16x8xf32>
    %285 = arith.truncf %284 : vector<16x8xf32> to vector<16x8xbf16>
    %c6_105 = arith.constant 6 : index
    %c0_106 = arith.constant 0 : index
    %c0_107 = arith.constant 0 : index
    %286 = vector.load %arg6[%c6_105, %c0_106, %c0_107] : memref<8x8x32xbf16, #tpu.memory_space<vmem>>, vector<1x8x32xbf16>
    %287 = vector.shape_cast %286 : vector<1x8x32xbf16> to vector<8x32xbf16>
    %cst_108 = arith.constant dense<0.000000e+00> : vector<16x32xf32>
    %288 = tpu.matmul %285, %287, %cst_108 {dimension_numbers = #tpu.dot_dimension_numbers<[1], [0], [0], [1], [0, 0, 1, 1], [], []>} : vector<16x8xbf16>, vector<8x32xbf16>, vector<16x32xf32> -> vector<16x32xf32>
    %289 = arith.addf %266, %288 : vector<16x32xf32>
    %290 = vector.extract_strided_slice %215 {offsets = [0, 0, 24], sizes = [2, 8, 8], strides = [1, 1, 1]} : vector<2x8x32xbf16> to vector<2x8x8xbf16>
    %291 = vector.extract_strided_slice %217 {offsets = [0, 0, 24], sizes = [2, 8, 8], strides = [1, 1, 1]} : vector<2x8x32xbf16> to vector<2x8x8xbf16>
    "tpu.trace_start"() <{level = 10 : i32, message = "bqd,bkd->bqk"}> : () -> ()
    %cst_109 = arith.constant dense<0.000000e+00> : vector<2x8x8xf32>
    %292 = tpu.matmul %290, %291, %cst_109 {dimension_numbers = #tpu.dot_dimension_numbers<[2], [2], [1], [1], [0, 0, 0, 1, 1, 1], [0], [0]>} : vector<2x8x8xbf16>, vector<2x8x8xbf16>, vector<2x8x8xf32> -> vector<2x8x8xf32>
    "tpu.trace_stop"() : () -> ()
    %293 = arith.addf %292, %2 : vector<2x8x8xf32>
    %cst_110 = arith.constant dense<0xFF800000> : vector<2x8xf32>
    %294 = vector.multi_reduction <maximumf>, %293, %cst_110 [2] : vector<2x8x8xf32> to vector<2x8xf32>
    %295 = vector.shape_cast %294 : vector<2x8xf32> to vector<2x8x1xf32>
    %296 = vector.broadcast %295 : vector<2x8x1xf32> to vector<2x8x8xf32>
    %297 = arith.subf %293, %296 : vector<2x8x8xf32>
    %298 = math.exp %297 : vector<2x8x8xf32>
    %cst_111 = arith.constant dense<0.000000e+00> : vector<2x8xf32>
    %299 = vector.multi_reduction <add>, %298, %cst_111 [2] : vector<2x8x8xf32> to vector<2x8xf32>
    %300 = vector.shape_cast %299 : vector<2x8xf32> to vector<2x8x1xf32>
    %301 = tpu.reciprocal %300 {approx = true} : vector<2x8x1xf32> -> vector<2x8x1xf32>
    %302 = vector.broadcast %301 : vector<2x8x1xf32> to vector<2x8x8xf32>
    %303 = arith.mulf %298, %302 : vector<2x8x8xf32>
    %304 = arith.truncf %303 : vector<2x8x8xf32> to vector<2x8x8xbf16>
    %305 = vector.extract_strided_slice %219 {offsets = [0, 0, 24], sizes = [2, 8, 8], strides = [1, 1, 1]} : vector<2x8x32xbf16> to vector<2x8x8xbf16>
    "tpu.trace_start"() <{level = 10 : i32, message = "bqk,bkd->bqd"}> : () -> ()
    %cst_112 = arith.constant dense<0.000000e+00> : vector<2x8x8xf32>
    %306 = tpu.matmul %304, %305, %cst_112 {dimension_numbers = #tpu.dot_dimension_numbers<[2], [1], [1], [2], [0, 0, 0, 1, 1, 2], [0], [0]>} : vector<2x8x8xbf16>, vector<2x8x8xbf16>, vector<2x8x8xf32> -> vector<2x8x8xf32>
    "tpu.trace_stop"() : () -> ()
    %307 = vector.shape_cast %306 : vector<2x8x8xf32> to vector<16x8xf32>
    %308 = arith.truncf %307 : vector<16x8xf32> to vector<16x8xbf16>
    %c7_113 = arith.constant 7 : index
    %c0_114 = arith.constant 0 : index
    %c0_115 = arith.constant 0 : index
    %309 = vector.load %arg6[%c7_113, %c0_114, %c0_115] : memref<8x8x32xbf16, #tpu.memory_space<vmem>>, vector<1x8x32xbf16>
    %310 = vector.shape_cast %309 : vector<1x8x32xbf16> to vector<8x32xbf16>
    %cst_116 = arith.constant dense<0.000000e+00> : vector<16x32xf32>
    %311 = tpu.matmul %308, %310, %cst_116 {dimension_numbers = #tpu.dot_dimension_numbers<[1], [0], [0], [1], [0, 0, 1, 1], [], []>} : vector<16x8xbf16>, vector<8x32xbf16>, vector<16x32xf32> -> vector<16x32xf32>
    %312 = arith.addf %289, %311 : vector<16x32xf32>
    %313 = vector.broadcast %206 : vector<1x32xf32> to vector<16x32xf32>
    %314 = arith.addf %312, %313 : vector<16x32xf32>
    %315 = arith.addf %180, %314 : vector<16x32xf32>
    %c12 = arith.constant 12 : index
    %c0_117 = arith.constant 0 : index
    %316 = vector.load %arg4[%c12, %c0_117] : memref<18x96xf32, #tpu.memory_space<vmem>>, vector<1x32xf32>
    %c13 = arith.constant 13 : index
    %c0_118 = arith.constant 0 : index
    %317 = vector.load %arg4[%c13, %c0_118] : memref<18x96xf32, #tpu.memory_space<vmem>>, vector<1x32xf32>
    %cst_119 = arith.constant dense<0.000000e+00> : vector<16xf32>
    %318 = vector.multi_reduction <add>, %315, %cst_119 [1] : vector<16x32xf32> to vector<16xf32>
    %319 = vector.shape_cast %318 : vector<16xf32> to vector<16x1xf32>
    %cst_120 = arith.constant 3.200000e+01 : f32
    %320 = vector.broadcast %cst_120 : f32 to vector<16x1xf32>
    %321 = arith.divf %319, %320 : vector<16x1xf32>
    %322 = vector.broadcast %321 : vector<16x1xf32> to vector<16x32xf32>
    %323 = arith.subf %315, %322 : vector<16x32xf32>
    %324 = arith.mulf %323, %323 : vector<16x32xf32>
    %cst_121 = arith.constant dense<0.000000e+00> : vector<16xf32>
    %325 = vector.multi_reduction <add>, %324, %cst_121 [1] : vector<16x32xf32> to vector<16xf32>
    %326 = vector.shape_cast %325 : vector<16xf32> to vector<16x1xf32>
    %cst_122 = arith.constant 0.0322580636 : f32
    %327 = vector.broadcast %cst_122 : f32 to vector<16x1xf32>
    %328 = arith.mulf %326, %327 : vector<16x1xf32>
    %329 = vector.broadcast %316 : vector<1x32xf32> to vector<16x32xf32>
    %330 = arith.mulf %329, %323 : vector<16x32xf32>
    %331 = math.sqrt %328 : vector<16x1xf32>
    %cst_123 = arith.constant 9.99999997E-7 : f32
    %332 = vector.broadcast %cst_123 : f32 to vector<16x1xf32>
    %333 = arith.addf %331, %332 : vector<16x1xf32>
    %334 = vector.broadcast %333 : vector<16x1xf32> to vector<16x32xf32>
    %335 = arith.divf %330, %334 : vector<16x32xf32>
    %336 = vector.broadcast %317 : vector<1x32xf32> to vector<16x32xf32>
    %337 = arith.addf %335, %336 : vector<16x32xf32>
    %c1_124 = arith.constant 1 : index
    %c0_125 = arith.constant 0 : index
    %c0_126 = arith.constant 0 : index
    %338 = vector.load %arg7[%c1_124, %c0_125, %c0_126] : memref<2x32x64xbf16, #tpu.memory_space<vmem>>, vector<1x32x64xbf16>
    %339 = vector.shape_cast %338 : vector<1x32x64xbf16> to vector<32x64xbf16>
    %c14 = arith.constant 14 : index
    %c0_127 = arith.constant 0 : index
    %340 = vector.load %arg4[%c14, %c0_127] : memref<18x96xf32, #tpu.memory_space<vmem>>, vector<1x64xf32>
    %c1_128 = arith.constant 1 : index
    %c0_129 = arith.constant 0 : index
    %c0_130 = arith.constant 0 : index
    %341 = vector.load %arg8[%c1_128, %c0_129, %c0_130] : memref<2x64x32xbf16, #tpu.memory_space<vmem>>, vector<1x64x32xbf16>
    %342 = vector.shape_cast %341 : vector<1x64x32xbf16> to vector<64x32xbf16>
    %c15 = arith.constant 15 : index
    %c0_131 = arith.constant 0 : index
    %343 = vector.load %arg4[%c15, %c0_131] : memref<18x96xf32, #tpu.memory_space<vmem>>, vector<1x32xf32>
    %344 = arith.truncf %337 : vector<16x32xf32> to vector<16x32xbf16>
    %cst_132 = arith.constant dense<0.000000e+00> : vector<16x64xf32>
    %345 = tpu.matmul %344, %339, %cst_132 {dimension_numbers = #tpu.dot_dimension_numbers<[1], [0], [0], [1], [0, 0, 1, 1], [], []>} : vector<16x32xbf16>, vector<32x64xbf16>, vector<16x64xf32> -> vector<16x64xf32>
    %346 = vector.broadcast %340 : vector<1x64xf32> to vector<16x64xf32>
    %347 = arith.addf %345, %346 : vector<16x64xf32>
    %cst_133 = arith.constant 0.000000e+00 : f32
    %348 = vector.broadcast %cst_133 : f32 to vector<16x64xf32>
    %349 = arith.maximumf %347, %348 : vector<16x64xf32>
    %350 = arith.truncf %349 : vector<16x64xf32> to vector<16x64xbf16>
    %cst_134 = arith.constant dense<0.000000e+00> : vector<16x32xf32>
    %351 = tpu.matmul %350, %342, %cst_134 {dimension_numbers = #tpu.dot_dimension_numbers<[1], [0], [0], [1], [0, 0, 1, 1], [], []>} : vector<16x64xbf16>, vector<64x32xbf16>, vector<16x32xf32> -> vector<16x32xf32>
    %352 = vector.broadcast %343 : vector<1x32xf32> to vector<16x32xf32>
    %353 = arith.addf %351, %352 : vector<16x32xf32>
    %354 = arith.addf %315, %353 : vector<16x32xf32>
    %c16 = arith.constant 16 : index
    %c0_135 = arith.constant 0 : index
    %355 = vector.load %arg4[%c16, %c0_135] : memref<18x96xf32, #tpu.memory_space<vmem>>, vector<1x32xf32>
    %c17 = arith.constant 17 : index
    %c0_136 = arith.constant 0 : index
    %356 = vector.load %arg4[%c17, %c0_136] : memref<18x96xf32, #tpu.memory_space<vmem>>, vector<1x32xf32>
    %cst_137 = arith.constant dense<0.000000e+00> : vector<16xf32>
    %357 = vector.multi_reduction <add>, %354, %cst_137 [1] : vector<16x32xf32> to vector<16xf32>
    %358 = vector.shape_cast %357 : vector<16xf32> to vector<16x1xf32>
    %cst_138 = arith.constant 3.200000e+01 : f32
    %359 = vector.broadcast %cst_138 : f32 to vector<16x1xf32>
    %360 = arith.divf %358, %359 : vector<16x1xf32>
    %361 = vector.broadcast %360 : vector<16x1xf32> to vector<16x32xf32>
    %362 = arith.subf %354, %361 : vector<16x32xf32>
    %363 = arith.mulf %362, %362 : vector<16x32xf32>
    %cst_139 = arith.constant dense<0.000000e+00> : vector<16xf32>
    %364 = vector.multi_reduction <add>, %363, %cst_139 [1] : vector<16x32xf32> to vector<16xf32>
    %365 = vector.shape_cast %364 : vector<16xf32> to vector<16x1xf32>
    %cst_140 = arith.constant 0.0322580636 : f32
    %366 = vector.broadcast %cst_140 : f32 to vector<16x1xf32>
    %367 = arith.mulf %365, %366 : vector<16x1xf32>
    %368 = vector.broadcast %355 : vector<1x32xf32> to vector<16x32xf32>
    %369 = arith.mulf %368, %362 : vector<16x32xf32>
    %370 = math.sqrt %367 : vector<16x1xf32>
    %cst_141 = arith.constant 9.99999997E-7 : f32
    %371 = vector.broadcast %cst_141 : f32 to vector<16x1xf32>
    %372 = arith.addf %370, %371 : vector<16x1xf32>
    %373 = vector.broadcast %372 : vector<16x1xf32> to vector<16x32xf32>
    %374 = arith.divf %369, %373 : vector<16x32xf32>
    %375 = vector.broadcast %356 : vector<1x32xf32> to vector<16x32xf32>
    %376 = arith.addf %374, %375 : vector<16x32xf32>
    %377 = arith.truncf %376 : vector<16x32xf32> to vector<16x32xbf16>
    %c0_142 = arith.constant 0 : index
    %c0_143 = arith.constant 0 : index
    %378 = vector.load %arg1[%c0_142, %c0_143] : memref<16x32xf32, #tpu.memory_space<vmem>>, vector<16x32xf32>
    %c0_144 = arith.constant 0 : index
    %c0_145 = arith.constant 0 : index
    %379 = vector.load %arg9[%c0_144, %c0_145] : memref<28x96xf32, #tpu.memory_space<vmem>>, vector<1x32xf32>
    %c1_146 = arith.constant 1 : index
    %c0_147 = arith.constant 0 : index
    %380 = vector.load %arg9[%c1_146, %c0_147] : memref<28x96xf32, #tpu.memory_space<vmem>>, vector<1x32xf32>
    %cst_148 = arith.constant dense<0.000000e+00> : vector<16xf32>
    %381 = vector.multi_reduction <add>, %378, %cst_148 [1] : vector<16x32xf32> to vector<16xf32>
    %382 = vector.shape_cast %381 : vector<16xf32> to vector<16x1xf32>
    %cst_149 = arith.constant 3.200000e+01 : f32
    %383 = vector.broadcast %cst_149 : f32 to vector<16x1xf32>
    %384 = arith.divf %382, %383 : vector<16x1xf32>
    %385 = vector.broadcast %384 : vector<16x1xf32> to vector<16x32xf32>
    %386 = arith.subf %378, %385 : vector<16x32xf32>
    %387 = arith.mulf %386, %386 : vector<16x32xf32>
    %cst_150 = arith.constant dense<0.000000e+00> : vector<16xf32>
    %388 = vector.multi_reduction <add>, %387, %cst_150 [1] : vector<16x32xf32> to vector<16xf32>
    %389 = vector.shape_cast %388 : vector<16xf32> to vector<16x1xf32>
    %cst_151 = arith.constant 0.0322580636 : f32
    %390 = vector.broadcast %cst_151 : f32 to vector<16x1xf32>
    %391 = arith.mulf %389, %390 : vector<16x1xf32>
    %392 = vector.broadcast %379 : vector<1x32xf32> to vector<16x32xf32>
    %393 = arith.mulf %392, %386 : vector<16x32xf32>
    %394 = math.sqrt %391 : vector<16x1xf32>
    %cst_152 = arith.constant 9.99999997E-7 : f32
    %395 = vector.broadcast %cst_152 : f32 to vector<16x1xf32>
    %396 = arith.addf %394, %395 : vector<16x1xf32>
    %397 = vector.broadcast %396 : vector<16x1xf32> to vector<16x32xf32>
    %398 = arith.divf %393, %397 : vector<16x32xf32>
    %399 = vector.broadcast %380 : vector<1x32xf32> to vector<16x32xf32>
    %400 = arith.addf %398, %399 : vector<16x32xf32>
    %c0_153 = arith.constant 0 : index
    %c0_154 = arith.constant 0 : index
    %c0_155 = arith.constant 0 : index
    %401 = vector.load %arg10[%c0_153, %c0_154, %c0_155] : memref<2x32x96xbf16, #tpu.memory_space<vmem>>, vector<1x32x96xbf16>
    %402 = vector.shape_cast %401 : vector<1x32x96xbf16> to vector<32x96xbf16>
    %c2_156 = arith.constant 2 : index
    %c0_157 = arith.constant 0 : index
    %403 = vector.load %arg9[%c2_156, %c0_157] : memref<28x96xf32, #tpu.memory_space<vmem>>, vector<1x96xf32>
    %c3_158 = arith.constant 3 : index
    %c0_159 = arith.constant 0 : index
    %404 = vector.load %arg9[%c3_158, %c0_159] : memref<28x96xf32, #tpu.memory_space<vmem>>, vector<1x32xf32>
    %405 = arith.truncf %400 : vector<16x32xf32> to vector<16x32xbf16>
    %cst_160 = arith.constant dense<0.000000e+00> : vector<16x96xf32>
    %406 = tpu.matmul %405, %402, %cst_160 {dimension_numbers = #tpu.dot_dimension_numbers<[1], [0], [0], [1], [0, 0, 1, 1], [], []>} : vector<16x32xbf16>, vector<32x96xbf16>, vector<16x96xf32> -> vector<16x96xf32>
    %407 = vector.broadcast %403 : vector<1x96xf32> to vector<16x96xf32>
    %408 = arith.addf %406, %407 : vector<16x96xf32>
    %409 = vector.extract_strided_slice %408 {offsets = [0, 0], sizes = [16, 32], strides = [1, 1]} : vector<16x96xf32> to vector<16x32xf32>
    %410 = vector.extract_strided_slice %408 {offsets = [0, 32], sizes = [16, 32], strides = [1, 1]} : vector<16x96xf32> to vector<16x32xf32>
    %411 = vector.extract_strided_slice %408 {offsets = [0, 64], sizes = [16, 32], strides = [1, 1]} : vector<16x96xf32> to vector<16x32xf32>
    %412 = vector.shape_cast %409 : vector<16x32xf32> to vector<2x8x32xf32>
    %413 = arith.truncf %412 : vector<2x8x32xf32> to vector<2x8x32xbf16>
    %414 = vector.shape_cast %410 : vector<16x32xf32> to vector<2x8x32xf32>
    %415 = arith.truncf %414 : vector<2x8x32xf32> to vector<2x8x32xbf16>
    %416 = vector.shape_cast %411 : vector<16x32xf32> to vector<2x8x32xf32>
    %417 = arith.truncf %416 : vector<2x8x32xf32> to vector<2x8x32xbf16>
    %cst_161 = arith.constant 0.000000e+00 : f32
    %418 = vector.broadcast %cst_161 : f32 to vector<16x32xf32>
    %419 = vector.extract_strided_slice %413 {offsets = [0, 0, 0], sizes = [2, 8, 8], strides = [1, 1, 1]} : vector<2x8x32xbf16> to vector<2x8x8xbf16>
    %420 = vector.extract_strided_slice %415 {offsets = [0, 0, 0], sizes = [2, 8, 8], strides = [1, 1, 1]} : vector<2x8x32xbf16> to vector<2x8x8xbf16>
    "tpu.trace_start"() <{level = 10 : i32, message = "bqd,bkd->bqk"}> : () -> ()
    %cst_162 = arith.constant dense<0.000000e+00> : vector<2x8x8xf32>
    %421 = tpu.matmul %419, %420, %cst_162 {dimension_numbers = #tpu.dot_dimension_numbers<[2], [2], [1], [1], [0, 0, 0, 1, 1, 1], [0], [0]>} : vector<2x8x8xbf16>, vector<2x8x8xbf16>, vector<2x8x8xf32> -> vector<2x8x8xf32>
    "tpu.trace_stop"() : () -> ()
    %422 = arith.addf %421, %5 : vector<2x8x8xf32>
    %cst_163 = arith.constant dense<0xFF800000> : vector<2x8xf32>
    %423 = vector.multi_reduction <maximumf>, %422, %cst_163 [2] : vector<2x8x8xf32> to vector<2x8xf32>
    %424 = vector.shape_cast %423 : vector<2x8xf32> to vector<2x8x1xf32>
    %425 = vector.broadcast %424 : vector<2x8x1xf32> to vector<2x8x8xf32>
    %426 = arith.subf %422, %425 : vector<2x8x8xf32>
    %427 = math.exp %426 : vector<2x8x8xf32>
    %cst_164 = arith.constant dense<0.000000e+00> : vector<2x8xf32>
    %428 = vector.multi_reduction <add>, %427, %cst_164 [2] : vector<2x8x8xf32> to vector<2x8xf32>
    %429 = vector.shape_cast %428 : vector<2x8xf32> to vector<2x8x1xf32>
    %430 = tpu.reciprocal %429 {approx = true} : vector<2x8x1xf32> -> vector<2x8x1xf32>
    %431 = vector.broadcast %430 : vector<2x8x1xf32> to vector<2x8x8xf32>
    %432 = arith.mulf %427, %431 : vector<2x8x8xf32>
    %433 = arith.truncf %432 : vector<2x8x8xf32> to vector<2x8x8xbf16>
    %434 = vector.extract_strided_slice %417 {offsets = [0, 0, 0], sizes = [2, 8, 8], strides = [1, 1, 1]} : vector<2x8x32xbf16> to vector<2x8x8xbf16>
    "tpu.trace_start"() <{level = 10 : i32, message = "bqk,bkd->bqd"}> : () -> ()
    %cst_165 = arith.constant dense<0.000000e+00> : vector<2x8x8xf32>
    %435 = tpu.matmul %433, %434, %cst_165 {dimension_numbers = #tpu.dot_dimension_numbers<[2], [1], [1], [2], [0, 0, 0, 1, 1, 2], [0], [0]>} : vector<2x8x8xbf16>, vector<2x8x8xbf16>, vector<2x8x8xf32> -> vector<2x8x8xf32>
    "tpu.trace_stop"() : () -> ()
    %436 = vector.shape_cast %435 : vector<2x8x8xf32> to vector<16x8xf32>
    %437 = arith.truncf %436 : vector<16x8xf32> to vector<16x8xbf16>
    %c0_166 = arith.constant 0 : index
    %c0_167 = arith.constant 0 : index
    %c0_168 = arith.constant 0 : index
    %438 = vector.load %arg11[%c0_166, %c0_167, %c0_168] : memref<8x8x32xbf16, #tpu.memory_space<vmem>>, vector<1x8x32xbf16>
    %439 = vector.shape_cast %438 : vector<1x8x32xbf16> to vector<8x32xbf16>
    %cst_169 = arith.constant dense<0.000000e+00> : vector<16x32xf32>
    %440 = tpu.matmul %437, %439, %cst_169 {dimension_numbers = #tpu.dot_dimension_numbers<[1], [0], [0], [1], [0, 0, 1, 1], [], []>} : vector<16x8xbf16>, vector<8x32xbf16>, vector<16x32xf32> -> vector<16x32xf32>
    %441 = arith.addf %418, %440 : vector<16x32xf32>
    %442 = vector.extract_strided_slice %413 {offsets = [0, 0, 8], sizes = [2, 8, 8], strides = [1, 1, 1]} : vector<2x8x32xbf16> to vector<2x8x8xbf16>
    %443 = vector.extract_strided_slice %415 {offsets = [0, 0, 8], sizes = [2, 8, 8], strides = [1, 1, 1]} : vector<2x8x32xbf16> to vector<2x8x8xbf16>
    "tpu.trace_start"() <{level = 10 : i32, message = "bqd,bkd->bqk"}> : () -> ()
    %cst_170 = arith.constant dense<0.000000e+00> : vector<2x8x8xf32>
    %444 = tpu.matmul %442, %443, %cst_170 {dimension_numbers = #tpu.dot_dimension_numbers<[2], [2], [1], [1], [0, 0, 0, 1, 1, 1], [0], [0]>} : vector<2x8x8xbf16>, vector<2x8x8xbf16>, vector<2x8x8xf32> -> vector<2x8x8xf32>
    "tpu.trace_stop"() : () -> ()
    %445 = arith.addf %444, %5 : vector<2x8x8xf32>
    %cst_171 = arith.constant dense<0xFF800000> : vector<2x8xf32>
    %446 = vector.multi_reduction <maximumf>, %445, %cst_171 [2] : vector<2x8x8xf32> to vector<2x8xf32>
    %447 = vector.shape_cast %446 : vector<2x8xf32> to vector<2x8x1xf32>
    %448 = vector.broadcast %447 : vector<2x8x1xf32> to vector<2x8x8xf32>
    %449 = arith.subf %445, %448 : vector<2x8x8xf32>
    %450 = math.exp %449 : vector<2x8x8xf32>
    %cst_172 = arith.constant dense<0.000000e+00> : vector<2x8xf32>
    %451 = vector.multi_reduction <add>, %450, %cst_172 [2] : vector<2x8x8xf32> to vector<2x8xf32>
    %452 = vector.shape_cast %451 : vector<2x8xf32> to vector<2x8x1xf32>
    %453 = tpu.reciprocal %452 {approx = true} : vector<2x8x1xf32> -> vector<2x8x1xf32>
    %454 = vector.broadcast %453 : vector<2x8x1xf32> to vector<2x8x8xf32>
    %455 = arith.mulf %450, %454 : vector<2x8x8xf32>
    %456 = arith.truncf %455 : vector<2x8x8xf32> to vector<2x8x8xbf16>
    %457 = vector.extract_strided_slice %417 {offsets = [0, 0, 8], sizes = [2, 8, 8], strides = [1, 1, 1]} : vector<2x8x32xbf16> to vector<2x8x8xbf16>
    "tpu.trace_start"() <{level = 10 : i32, message = "bqk,bkd->bqd"}> : () -> ()
    %cst_173 = arith.constant dense<0.000000e+00> : vector<2x8x8xf32>
    %458 = tpu.matmul %456, %457, %cst_173 {dimension_numbers = #tpu.dot_dimension_numbers<[2], [1], [1], [2], [0, 0, 0, 1, 1, 2], [0], [0]>} : vector<2x8x8xbf16>, vector<2x8x8xbf16>, vector<2x8x8xf32> -> vector<2x8x8xf32>
    "tpu.trace_stop"() : () -> ()
    %459 = vector.shape_cast %458 : vector<2x8x8xf32> to vector<16x8xf32>
    %460 = arith.truncf %459 : vector<16x8xf32> to vector<16x8xbf16>
    %c1_174 = arith.constant 1 : index
    %c0_175 = arith.constant 0 : index
    %c0_176 = arith.constant 0 : index
    %461 = vector.load %arg11[%c1_174, %c0_175, %c0_176] : memref<8x8x32xbf16, #tpu.memory_space<vmem>>, vector<1x8x32xbf16>
    %462 = vector.shape_cast %461 : vector<1x8x32xbf16> to vector<8x32xbf16>
    %cst_177 = arith.constant dense<0.000000e+00> : vector<16x32xf32>
    %463 = tpu.matmul %460, %462, %cst_177 {dimension_numbers = #tpu.dot_dimension_numbers<[1], [0], [0], [1], [0, 0, 1, 1], [], []>} : vector<16x8xbf16>, vector<8x32xbf16>, vector<16x32xf32> -> vector<16x32xf32>
    %464 = arith.addf %441, %463 : vector<16x32xf32>
    %465 = vector.extract_strided_slice %413 {offsets = [0, 0, 16], sizes = [2, 8, 8], strides = [1, 1, 1]} : vector<2x8x32xbf16> to vector<2x8x8xbf16>
    %466 = vector.extract_strided_slice %415 {offsets = [0, 0, 16], sizes = [2, 8, 8], strides = [1, 1, 1]} : vector<2x8x32xbf16> to vector<2x8x8xbf16>
    "tpu.trace_start"() <{level = 10 : i32, message = "bqd,bkd->bqk"}> : () -> ()
    %cst_178 = arith.constant dense<0.000000e+00> : vector<2x8x8xf32>
    %467 = tpu.matmul %465, %466, %cst_178 {dimension_numbers = #tpu.dot_dimension_numbers<[2], [2], [1], [1], [0, 0, 0, 1, 1, 1], [0], [0]>} : vector<2x8x8xbf16>, vector<2x8x8xbf16>, vector<2x8x8xf32> -> vector<2x8x8xf32>
    "tpu.trace_stop"() : () -> ()
    %468 = arith.addf %467, %5 : vector<2x8x8xf32>
    %cst_179 = arith.constant dense<0xFF800000> : vector<2x8xf32>
    %469 = vector.multi_reduction <maximumf>, %468, %cst_179 [2] : vector<2x8x8xf32> to vector<2x8xf32>
    %470 = vector.shape_cast %469 : vector<2x8xf32> to vector<2x8x1xf32>
    %471 = vector.broadcast %470 : vector<2x8x1xf32> to vector<2x8x8xf32>
    %472 = arith.subf %468, %471 : vector<2x8x8xf32>
    %473 = math.exp %472 : vector<2x8x8xf32>
    %cst_180 = arith.constant dense<0.000000e+00> : vector<2x8xf32>
    %474 = vector.multi_reduction <add>, %473, %cst_180 [2] : vector<2x8x8xf32> to vector<2x8xf32>
    %475 = vector.shape_cast %474 : vector<2x8xf32> to vector<2x8x1xf32>
    %476 = tpu.reciprocal %475 {approx = true} : vector<2x8x1xf32> -> vector<2x8x1xf32>
    %477 = vector.broadcast %476 : vector<2x8x1xf32> to vector<2x8x8xf32>
    %478 = arith.mulf %473, %477 : vector<2x8x8xf32>
    %479 = arith.truncf %478 : vector<2x8x8xf32> to vector<2x8x8xbf16>
    %480 = vector.extract_strided_slice %417 {offsets = [0, 0, 16], sizes = [2, 8, 8], strides = [1, 1, 1]} : vector<2x8x32xbf16> to vector<2x8x8xbf16>
    "tpu.trace_start"() <{level = 10 : i32, message = "bqk,bkd->bqd"}> : () -> ()
    %cst_181 = arith.constant dense<0.000000e+00> : vector<2x8x8xf32>
    %481 = tpu.matmul %479, %480, %cst_181 {dimension_numbers = #tpu.dot_dimension_numbers<[2], [1], [1], [2], [0, 0, 0, 1, 1, 2], [0], [0]>} : vector<2x8x8xbf16>, vector<2x8x8xbf16>, vector<2x8x8xf32> -> vector<2x8x8xf32>
    "tpu.trace_stop"() : () -> ()
    %482 = vector.shape_cast %481 : vector<2x8x8xf32> to vector<16x8xf32>
    %483 = arith.truncf %482 : vector<16x8xf32> to vector<16x8xbf16>
    %c2_182 = arith.constant 2 : index
    %c0_183 = arith.constant 0 : index
    %c0_184 = arith.constant 0 : index
    %484 = vector.load %arg11[%c2_182, %c0_183, %c0_184] : memref<8x8x32xbf16, #tpu.memory_space<vmem>>, vector<1x8x32xbf16>
    %485 = vector.shape_cast %484 : vector<1x8x32xbf16> to vector<8x32xbf16>
    %cst_185 = arith.constant dense<0.000000e+00> : vector<16x32xf32>
    %486 = tpu.matmul %483, %485, %cst_185 {dimension_numbers = #tpu.dot_dimension_numbers<[1], [0], [0], [1], [0, 0, 1, 1], [], []>} : vector<16x8xbf16>, vector<8x32xbf16>, vector<16x32xf32> -> vector<16x32xf32>
    %487 = arith.addf %464, %486 : vector<16x32xf32>
    %488 = vector.extract_strided_slice %413 {offsets = [0, 0, 24], sizes = [2, 8, 8], strides = [1, 1, 1]} : vector<2x8x32xbf16> to vector<2x8x8xbf16>
    %489 = vector.extract_strided_slice %415 {offsets = [0, 0, 24], sizes = [2, 8, 8], strides = [1, 1, 1]} : vector<2x8x32xbf16> to vector<2x8x8xbf16>
    "tpu.trace_start"() <{level = 10 : i32, message = "bqd,bkd->bqk"}> : () -> ()
    %cst_186 = arith.constant dense<0.000000e+00> : vector<2x8x8xf32>
    %490 = tpu.matmul %488, %489, %cst_186 {dimension_numbers = #tpu.dot_dimension_numbers<[2], [2], [1], [1], [0, 0, 0, 1, 1, 1], [0], [0]>} : vector<2x8x8xbf16>, vector<2x8x8xbf16>, vector<2x8x8xf32> -> vector<2x8x8xf32>
    "tpu.trace_stop"() : () -> ()
    %491 = arith.addf %490, %5 : vector<2x8x8xf32>
    %cst_187 = arith.constant dense<0xFF800000> : vector<2x8xf32>
    %492 = vector.multi_reduction <maximumf>, %491, %cst_187 [2] : vector<2x8x8xf32> to vector<2x8xf32>
    %493 = vector.shape_cast %492 : vector<2x8xf32> to vector<2x8x1xf32>
    %494 = vector.broadcast %493 : vector<2x8x1xf32> to vector<2x8x8xf32>
    %495 = arith.subf %491, %494 : vector<2x8x8xf32>
    %496 = math.exp %495 : vector<2x8x8xf32>
    %cst_188 = arith.constant dense<0.000000e+00> : vector<2x8xf32>
    %497 = vector.multi_reduction <add>, %496, %cst_188 [2] : vector<2x8x8xf32> to vector<2x8xf32>
    %498 = vector.shape_cast %497 : vector<2x8xf32> to vector<2x8x1xf32>
    %499 = tpu.reciprocal %498 {approx = true} : vector<2x8x1xf32> -> vector<2x8x1xf32>
    %500 = vector.broadcast %499 : vector<2x8x1xf32> to vector<2x8x8xf32>
    %501 = arith.mulf %496, %500 : vector<2x8x8xf32>
    %502 = arith.truncf %501 : vector<2x8x8xf32> to vector<2x8x8xbf16>
    %503 = vector.extract_strided_slice %417 {offsets = [0, 0, 24], sizes = [2, 8, 8], strides = [1, 1, 1]} : vector<2x8x32xbf16> to vector<2x8x8xbf16>
    "tpu.trace_start"() <{level = 10 : i32, message = "bqk,bkd->bqd"}> : () -> ()
    %cst_189 = arith.constant dense<0.000000e+00> : vector<2x8x8xf32>
    %504 = tpu.matmul %502, %503, %cst_189 {dimension_numbers = #tpu.dot_dimension_numbers<[2], [1], [1], [2], [0, 0, 0, 1, 1, 2], [0], [0]>} : vector<2x8x8xbf16>, vector<2x8x8xbf16>, vector<2x8x8xf32> -> vector<2x8x8xf32>
    "tpu.trace_stop"() : () -> ()
    %505 = vector.shape_cast %504 : vector<2x8x8xf32> to vector<16x8xf32>
    %506 = arith.truncf %505 : vector<16x8xf32> to vector<16x8xbf16>
    %c3_190 = arith.constant 3 : index
    %c0_191 = arith.constant 0 : index
    %c0_192 = arith.constant 0 : index
    %507 = vector.load %arg11[%c3_190, %c0_191, %c0_192] : memref<8x8x32xbf16, #tpu.memory_space<vmem>>, vector<1x8x32xbf16>
    %508 = vector.shape_cast %507 : vector<1x8x32xbf16> to vector<8x32xbf16>
    %cst_193 = arith.constant dense<0.000000e+00> : vector<16x32xf32>
    %509 = tpu.matmul %506, %508, %cst_193 {dimension_numbers = #tpu.dot_dimension_numbers<[1], [0], [0], [1], [0, 0, 1, 1], [], []>} : vector<16x8xbf16>, vector<8x32xbf16>, vector<16x32xf32> -> vector<16x32xf32>
    %510 = arith.addf %487, %509 : vector<16x32xf32>
    %511 = vector.broadcast %404 : vector<1x32xf32> to vector<16x32xf32>
    %512 = arith.addf %510, %511 : vector<16x32xf32>
    %513 = arith.addf %378, %512 : vector<16x32xf32>
    %c4_194 = arith.constant 4 : index
    %c0_195 = arith.constant 0 : index
    %514 = vector.load %arg9[%c4_194, %c0_195] : memref<28x96xf32, #tpu.memory_space<vmem>>, vector<1x32xf32>
    %c5_196 = arith.constant 5 : index
    %c0_197 = arith.constant 0 : index
    %515 = vector.load %arg9[%c5_196, %c0_197] : memref<28x96xf32, #tpu.memory_space<vmem>>, vector<1x32xf32>
    %cst_198 = arith.constant dense<0.000000e+00> : vector<16xf32>
    %516 = vector.multi_reduction <add>, %513, %cst_198 [1] : vector<16x32xf32> to vector<16xf32>
    %517 = vector.shape_cast %516 : vector<16xf32> to vector<16x1xf32>
    %cst_199 = arith.constant 3.200000e+01 : f32
    %518 = vector.broadcast %cst_199 : f32 to vector<16x1xf32>
    %519 = arith.divf %517, %518 : vector<16x1xf32>
    %520 = vector.broadcast %519 : vector<16x1xf32> to vector<16x32xf32>
    %521 = arith.subf %513, %520 : vector<16x32xf32>
    %522 = arith.mulf %521, %521 : vector<16x32xf32>
    %cst_200 = arith.constant dense<0.000000e+00> : vector<16xf32>
    %523 = vector.multi_reduction <add>, %522, %cst_200 [1] : vector<16x32xf32> to vector<16xf32>
    %524 = vector.shape_cast %523 : vector<16xf32> to vector<16x1xf32>
    %cst_201 = arith.constant 0.0322580636 : f32
    %525 = vector.broadcast %cst_201 : f32 to vector<16x1xf32>
    %526 = arith.mulf %524, %525 : vector<16x1xf32>
    %527 = vector.broadcast %514 : vector<1x32xf32> to vector<16x32xf32>
    %528 = arith.mulf %527, %521 : vector<16x32xf32>
    %529 = math.sqrt %526 : vector<16x1xf32>
    %cst_202 = arith.constant 9.99999997E-7 : f32
    %530 = vector.broadcast %cst_202 : f32 to vector<16x1xf32>
    %531 = arith.addf %529, %530 : vector<16x1xf32>
    %532 = vector.broadcast %531 : vector<16x1xf32> to vector<16x32xf32>
    %533 = arith.divf %528, %532 : vector<16x32xf32>
    %534 = vector.broadcast %515 : vector<1x32xf32> to vector<16x32xf32>
    %535 = arith.addf %533, %534 : vector<16x32xf32>
    %c0_203 = arith.constant 0 : index
    %c0_204 = arith.constant 0 : index
    %c0_205 = arith.constant 0 : index
    %536 = vector.load %arg12[%c0_203, %c0_204, %c0_205] : memref<2x32x32xbf16, #tpu.memory_space<vmem>>, vector<1x32x32xbf16>
    %537 = vector.shape_cast %536 : vector<1x32x32xbf16> to vector<32x32xbf16>
    %c6_206 = arith.constant 6 : index
    %c0_207 = arith.constant 0 : index
    %538 = vector.load %arg9[%c6_206, %c0_207] : memref<28x96xf32, #tpu.memory_space<vmem>>, vector<1x32xf32>
    %c0_208 = arith.constant 0 : index
    %c0_209 = arith.constant 0 : index
    %c0_210 = arith.constant 0 : index
    %539 = vector.load %arg13[%c0_208, %c0_209, %c0_210] : memref<2x32x64xbf16, #tpu.memory_space<vmem>>, vector<1x32x64xbf16>
    %540 = vector.shape_cast %539 : vector<1x32x64xbf16> to vector<32x64xbf16>
    %c7_211 = arith.constant 7 : index
    %c0_212 = arith.constant 0 : index
    %541 = vector.load %arg9[%c7_211, %c0_212] : memref<28x96xf32, #tpu.memory_space<vmem>>, vector<1x64xf32>
    %c8_213 = arith.constant 8 : index
    %c0_214 = arith.constant 0 : index
    %542 = vector.load %arg9[%c8_213, %c0_214] : memref<28x96xf32, #tpu.memory_space<vmem>>, vector<1x32xf32>
    %543 = arith.truncf %535 : vector<16x32xf32> to vector<16x32xbf16>
    %cst_215 = arith.constant dense<0.000000e+00> : vector<16x32xf32>
    %544 = tpu.matmul %543, %537, %cst_215 {dimension_numbers = #tpu.dot_dimension_numbers<[1], [0], [0], [1], [0, 0, 1, 1], [], []>} : vector<16x32xbf16>, vector<32x32xbf16>, vector<16x32xf32> -> vector<16x32xf32>
    %545 = vector.broadcast %538 : vector<1x32xf32> to vector<16x32xf32>
    %546 = arith.addf %544, %545 : vector<16x32xf32>
    %cst_216 = arith.constant dense<0.000000e+00> : vector<16x64xf32>
    %547 = tpu.matmul %377, %540, %cst_216 {dimension_numbers = #tpu.dot_dimension_numbers<[1], [0], [0], [1], [0, 0, 1, 1], [], []>} : vector<16x32xbf16>, vector<32x64xbf16>, vector<16x64xf32> -> vector<16x64xf32>
    %548 = vector.broadcast %541 : vector<1x64xf32> to vector<16x64xf32>
    %549 = arith.addf %547, %548 : vector<16x64xf32>
    %550 = vector.extract_strided_slice %549 {offsets = [0, 0], sizes = [16, 32], strides = [1, 1]} : vector<16x64xf32> to vector<16x32xf32>
    %551 = vector.extract_strided_slice %549 {offsets = [0, 32], sizes = [16, 32], strides = [1, 1]} : vector<16x64xf32> to vector<16x32xf32>
    %552 = vector.shape_cast %546 : vector<16x32xf32> to vector<2x8x32xf32>
    %553 = arith.truncf %552 : vector<2x8x32xf32> to vector<2x8x32xbf16>
    %554 = vector.shape_cast %550 : vector<16x32xf32> to vector<2x8x32xf32>
    %555 = arith.truncf %554 : vector<2x8x32xf32> to vector<2x8x32xbf16>
    %556 = vector.shape_cast %551 : vector<16x32xf32> to vector<2x8x32xf32>
    %557 = arith.truncf %556 : vector<2x8x32xf32> to vector<2x8x32xbf16>
    %cst_217 = arith.constant 0.000000e+00 : f32
    %558 = vector.broadcast %cst_217 : f32 to vector<16x32xf32>
    %559 = vector.extract_strided_slice %553 {offsets = [0, 0, 0], sizes = [2, 8, 8], strides = [1, 1, 1]} : vector<2x8x32xbf16> to vector<2x8x8xbf16>
    %560 = vector.extract_strided_slice %555 {offsets = [0, 0, 0], sizes = [2, 8, 8], strides = [1, 1, 1]} : vector<2x8x32xbf16> to vector<2x8x8xbf16>
    "tpu.trace_start"() <{level = 10 : i32, message = "bqd,bkd->bqk"}> : () -> ()
    %cst_218 = arith.constant dense<0.000000e+00> : vector<2x8x8xf32>
    %561 = tpu.matmul %559, %560, %cst_218 {dimension_numbers = #tpu.dot_dimension_numbers<[2], [2], [1], [1], [0, 0, 0, 1, 1, 1], [0], [0]>} : vector<2x8x8xbf16>, vector<2x8x8xbf16>, vector<2x8x8xf32> -> vector<2x8x8xf32>
    "tpu.trace_stop"() : () -> ()
    %562 = arith.addf %561, %4 : vector<2x8x8xf32>
    %cst_219 = arith.constant dense<0xFF800000> : vector<2x8xf32>
    %563 = vector.multi_reduction <maximumf>, %562, %cst_219 [2] : vector<2x8x8xf32> to vector<2x8xf32>
    %564 = vector.shape_cast %563 : vector<2x8xf32> to vector<2x8x1xf32>
    %565 = vector.broadcast %564 : vector<2x8x1xf32> to vector<2x8x8xf32>
    %566 = arith.subf %562, %565 : vector<2x8x8xf32>
    %567 = math.exp %566 : vector<2x8x8xf32>
    %cst_220 = arith.constant dense<0.000000e+00> : vector<2x8xf32>
    %568 = vector.multi_reduction <add>, %567, %cst_220 [2] : vector<2x8x8xf32> to vector<2x8xf32>
    %569 = vector.shape_cast %568 : vector<2x8xf32> to vector<2x8x1xf32>
    %570 = tpu.reciprocal %569 {approx = true} : vector<2x8x1xf32> -> vector<2x8x1xf32>
    %571 = vector.broadcast %570 : vector<2x8x1xf32> to vector<2x8x8xf32>
    %572 = arith.mulf %567, %571 : vector<2x8x8xf32>
    %573 = arith.truncf %572 : vector<2x8x8xf32> to vector<2x8x8xbf16>
    %574 = vector.extract_strided_slice %557 {offsets = [0, 0, 0], sizes = [2, 8, 8], strides = [1, 1, 1]} : vector<2x8x32xbf16> to vector<2x8x8xbf16>
    "tpu.trace_start"() <{level = 10 : i32, message = "bqk,bkd->bqd"}> : () -> ()
    %cst_221 = arith.constant dense<0.000000e+00> : vector<2x8x8xf32>
    %575 = tpu.matmul %573, %574, %cst_221 {dimension_numbers = #tpu.dot_dimension_numbers<[2], [1], [1], [2], [0, 0, 0, 1, 1, 2], [0], [0]>} : vector<2x8x8xbf16>, vector<2x8x8xbf16>, vector<2x8x8xf32> -> vector<2x8x8xf32>
    "tpu.trace_stop"() : () -> ()
    %576 = vector.shape_cast %575 : vector<2x8x8xf32> to vector<16x8xf32>
    %577 = arith.truncf %576 : vector<16x8xf32> to vector<16x8xbf16>
    %c0_222 = arith.constant 0 : index
    %c0_223 = arith.constant 0 : index
    %c0_224 = arith.constant 0 : index
    %578 = vector.load %arg14[%c0_222, %c0_223, %c0_224] : memref<8x8x32xbf16, #tpu.memory_space<vmem>>, vector<1x8x32xbf16>
    %579 = vector.shape_cast %578 : vector<1x8x32xbf16> to vector<8x32xbf16>
    %cst_225 = arith.constant dense<0.000000e+00> : vector<16x32xf32>
    %580 = tpu.matmul %577, %579, %cst_225 {dimension_numbers = #tpu.dot_dimension_numbers<[1], [0], [0], [1], [0, 0, 1, 1], [], []>} : vector<16x8xbf16>, vector<8x32xbf16>, vector<16x32xf32> -> vector<16x32xf32>
    %581 = arith.addf %558, %580 : vector<16x32xf32>
    %582 = vector.extract_strided_slice %553 {offsets = [0, 0, 8], sizes = [2, 8, 8], strides = [1, 1, 1]} : vector<2x8x32xbf16> to vector<2x8x8xbf16>
    %583 = vector.extract_strided_slice %555 {offsets = [0, 0, 8], sizes = [2, 8, 8], strides = [1, 1, 1]} : vector<2x8x32xbf16> to vector<2x8x8xbf16>
    "tpu.trace_start"() <{level = 10 : i32, message = "bqd,bkd->bqk"}> : () -> ()
    %cst_226 = arith.constant dense<0.000000e+00> : vector<2x8x8xf32>
    %584 = tpu.matmul %582, %583, %cst_226 {dimension_numbers = #tpu.dot_dimension_numbers<[2], [2], [1], [1], [0, 0, 0, 1, 1, 1], [0], [0]>} : vector<2x8x8xbf16>, vector<2x8x8xbf16>, vector<2x8x8xf32> -> vector<2x8x8xf32>
    "tpu.trace_stop"() : () -> ()
    %585 = arith.addf %584, %4 : vector<2x8x8xf32>
    %cst_227 = arith.constant dense<0xFF800000> : vector<2x8xf32>
    %586 = vector.multi_reduction <maximumf>, %585, %cst_227 [2] : vector<2x8x8xf32> to vector<2x8xf32>
    %587 = vector.shape_cast %586 : vector<2x8xf32> to vector<2x8x1xf32>
    %588 = vector.broadcast %587 : vector<2x8x1xf32> to vector<2x8x8xf32>
    %589 = arith.subf %585, %588 : vector<2x8x8xf32>
    %590 = math.exp %589 : vector<2x8x8xf32>
    %cst_228 = arith.constant dense<0.000000e+00> : vector<2x8xf32>
    %591 = vector.multi_reduction <add>, %590, %cst_228 [2] : vector<2x8x8xf32> to vector<2x8xf32>
    %592 = vector.shape_cast %591 : vector<2x8xf32> to vector<2x8x1xf32>
    %593 = tpu.reciprocal %592 {approx = true} : vector<2x8x1xf32> -> vector<2x8x1xf32>
    %594 = vector.broadcast %593 : vector<2x8x1xf32> to vector<2x8x8xf32>
    %595 = arith.mulf %590, %594 : vector<2x8x8xf32>
    %596 = arith.truncf %595 : vector<2x8x8xf32> to vector<2x8x8xbf16>
    %597 = vector.extract_strided_slice %557 {offsets = [0, 0, 8], sizes = [2, 8, 8], strides = [1, 1, 1]} : vector<2x8x32xbf16> to vector<2x8x8xbf16>
    "tpu.trace_start"() <{level = 10 : i32, message = "bqk,bkd->bqd"}> : () -> ()
    %cst_229 = arith.constant dense<0.000000e+00> : vector<2x8x8xf32>
    %598 = tpu.matmul %596, %597, %cst_229 {dimension_numbers = #tpu.dot_dimension_numbers<[2], [1], [1], [2], [0, 0, 0, 1, 1, 2], [0], [0]>} : vector<2x8x8xbf16>, vector<2x8x8xbf16>, vector<2x8x8xf32> -> vector<2x8x8xf32>
    "tpu.trace_stop"() : () -> ()
    %599 = vector.shape_cast %598 : vector<2x8x8xf32> to vector<16x8xf32>
    %600 = arith.truncf %599 : vector<16x8xf32> to vector<16x8xbf16>
    %c1_230 = arith.constant 1 : index
    %c0_231 = arith.constant 0 : index
    %c0_232 = arith.constant 0 : index
    %601 = vector.load %arg14[%c1_230, %c0_231, %c0_232] : memref<8x8x32xbf16, #tpu.memory_space<vmem>>, vector<1x8x32xbf16>
    %602 = vector.shape_cast %601 : vector<1x8x32xbf16> to vector<8x32xbf16>
    %cst_233 = arith.constant dense<0.000000e+00> : vector<16x32xf32>
    %603 = tpu.matmul %600, %602, %cst_233 {dimension_numbers = #tpu.dot_dimension_numbers<[1], [0], [0], [1], [0, 0, 1, 1], [], []>} : vector<16x8xbf16>, vector<8x32xbf16>, vector<16x32xf32> -> vector<16x32xf32>
    %604 = arith.addf %581, %603 : vector<16x32xf32>
    %605 = vector.extract_strided_slice %553 {offsets = [0, 0, 16], sizes = [2, 8, 8], strides = [1, 1, 1]} : vector<2x8x32xbf16> to vector<2x8x8xbf16>
    %606 = vector.extract_strided_slice %555 {offsets = [0, 0, 16], sizes = [2, 8, 8], strides = [1, 1, 1]} : vector<2x8x32xbf16> to vector<2x8x8xbf16>
    "tpu.trace_start"() <{level = 10 : i32, message = "bqd,bkd->bqk"}> : () -> ()
    %cst_234 = arith.constant dense<0.000000e+00> : vector<2x8x8xf32>
    %607 = tpu.matmul %605, %606, %cst_234 {dimension_numbers = #tpu.dot_dimension_numbers<[2], [2], [1], [1], [0, 0, 0, 1, 1, 1], [0], [0]>} : vector<2x8x8xbf16>, vector<2x8x8xbf16>, vector<2x8x8xf32> -> vector<2x8x8xf32>
    "tpu.trace_stop"() : () -> ()
    %608 = arith.addf %607, %4 : vector<2x8x8xf32>
    %cst_235 = arith.constant dense<0xFF800000> : vector<2x8xf32>
    %609 = vector.multi_reduction <maximumf>, %608, %cst_235 [2] : vector<2x8x8xf32> to vector<2x8xf32>
    %610 = vector.shape_cast %609 : vector<2x8xf32> to vector<2x8x1xf32>
    %611 = vector.broadcast %610 : vector<2x8x1xf32> to vector<2x8x8xf32>
    %612 = arith.subf %608, %611 : vector<2x8x8xf32>
    %613 = math.exp %612 : vector<2x8x8xf32>
    %cst_236 = arith.constant dense<0.000000e+00> : vector<2x8xf32>
    %614 = vector.multi_reduction <add>, %613, %cst_236 [2] : vector<2x8x8xf32> to vector<2x8xf32>
    %615 = vector.shape_cast %614 : vector<2x8xf32> to vector<2x8x1xf32>
    %616 = tpu.reciprocal %615 {approx = true} : vector<2x8x1xf32> -> vector<2x8x1xf32>
    %617 = vector.broadcast %616 : vector<2x8x1xf32> to vector<2x8x8xf32>
    %618 = arith.mulf %613, %617 : vector<2x8x8xf32>
    %619 = arith.truncf %618 : vector<2x8x8xf32> to vector<2x8x8xbf16>
    %620 = vector.extract_strided_slice %557 {offsets = [0, 0, 16], sizes = [2, 8, 8], strides = [1, 1, 1]} : vector<2x8x32xbf16> to vector<2x8x8xbf16>
    "tpu.trace_start"() <{level = 10 : i32, message = "bqk,bkd->bqd"}> : () -> ()
    %cst_237 = arith.constant dense<0.000000e+00> : vector<2x8x8xf32>
    %621 = tpu.matmul %619, %620, %cst_237 {dimension_numbers = #tpu.dot_dimension_numbers<[2], [1], [1], [2], [0, 0, 0, 1, 1, 2], [0], [0]>} : vector<2x8x8xbf16>, vector<2x8x8xbf16>, vector<2x8x8xf32> -> vector<2x8x8xf32>
    "tpu.trace_stop"() : () -> ()
    %622 = vector.shape_cast %621 : vector<2x8x8xf32> to vector<16x8xf32>
    %623 = arith.truncf %622 : vector<16x8xf32> to vector<16x8xbf16>
    %c2_238 = arith.constant 2 : index
    %c0_239 = arith.constant 0 : index
    %c0_240 = arith.constant 0 : index
    %624 = vector.load %arg14[%c2_238, %c0_239, %c0_240] : memref<8x8x32xbf16, #tpu.memory_space<vmem>>, vector<1x8x32xbf16>
    %625 = vector.shape_cast %624 : vector<1x8x32xbf16> to vector<8x32xbf16>
    %cst_241 = arith.constant dense<0.000000e+00> : vector<16x32xf32>
    %626 = tpu.matmul %623, %625, %cst_241 {dimension_numbers = #tpu.dot_dimension_numbers<[1], [0], [0], [1], [0, 0, 1, 1], [], []>} : vector<16x8xbf16>, vector<8x32xbf16>, vector<16x32xf32> -> vector<16x32xf32>
    %627 = arith.addf %604, %626 : vector<16x32xf32>
    %628 = vector.extract_strided_slice %553 {offsets = [0, 0, 24], sizes = [2, 8, 8], strides = [1, 1, 1]} : vector<2x8x32xbf16> to vector<2x8x8xbf16>
    %629 = vector.extract_strided_slice %555 {offsets = [0, 0, 24], sizes = [2, 8, 8], strides = [1, 1, 1]} : vector<2x8x32xbf16> to vector<2x8x8xbf16>
    "tpu.trace_start"() <{level = 10 : i32, message = "bqd,bkd->bqk"}> : () -> ()
    %cst_242 = arith.constant dense<0.000000e+00> : vector<2x8x8xf32>
    %630 = tpu.matmul %628, %629, %cst_242 {dimension_numbers = #tpu.dot_dimension_numbers<[2], [2], [1], [1], [0, 0, 0, 1, 1, 1], [0], [0]>} : vector<2x8x8xbf16>, vector<2x8x8xbf16>, vector<2x8x8xf32> -> vector<2x8x8xf32>
    "tpu.trace_stop"() : () -> ()
    %631 = arith.addf %630, %4 : vector<2x8x8xf32>
    %cst_243 = arith.constant dense<0xFF800000> : vector<2x8xf32>
    %632 = vector.multi_reduction <maximumf>, %631, %cst_243 [2] : vector<2x8x8xf32> to vector<2x8xf32>
    %633 = vector.shape_cast %632 : vector<2x8xf32> to vector<2x8x1xf32>
    %634 = vector.broadcast %633 : vector<2x8x1xf32> to vector<2x8x8xf32>
    %635 = arith.subf %631, %634 : vector<2x8x8xf32>
    %636 = math.exp %635 : vector<2x8x8xf32>
    %cst_244 = arith.constant dense<0.000000e+00> : vector<2x8xf32>
    %637 = vector.multi_reduction <add>, %636, %cst_244 [2] : vector<2x8x8xf32> to vector<2x8xf32>
    %638 = vector.shape_cast %637 : vector<2x8xf32> to vector<2x8x1xf32>
    %639 = tpu.reciprocal %638 {approx = true} : vector<2x8x1xf32> -> vector<2x8x1xf32>
    %640 = vector.broadcast %639 : vector<2x8x1xf32> to vector<2x8x8xf32>
    %641 = arith.mulf %636, %640 : vector<2x8x8xf32>
    %642 = arith.truncf %641 : vector<2x8x8xf32> to vector<2x8x8xbf16>
    %643 = vector.extract_strided_slice %557 {offsets = [0, 0, 24], sizes = [2, 8, 8], strides = [1, 1, 1]} : vector<2x8x32xbf16> to vector<2x8x8xbf16>
    "tpu.trace_start"() <{level = 10 : i32, message = "bqk,bkd->bqd"}> : () -> ()
    %cst_245 = arith.constant dense<0.000000e+00> : vector<2x8x8xf32>
    %644 = tpu.matmul %642, %643, %cst_245 {dimension_numbers = #tpu.dot_dimension_numbers<[2], [1], [1], [2], [0, 0, 0, 1, 1, 2], [0], [0]>} : vector<2x8x8xbf16>, vector<2x8x8xbf16>, vector<2x8x8xf32> -> vector<2x8x8xf32>
    "tpu.trace_stop"() : () -> ()
    %645 = vector.shape_cast %644 : vector<2x8x8xf32> to vector<16x8xf32>
    %646 = arith.truncf %645 : vector<16x8xf32> to vector<16x8xbf16>
    %c3_246 = arith.constant 3 : index
    %c0_247 = arith.constant 0 : index
    %c0_248 = arith.constant 0 : index
    %647 = vector.load %arg14[%c3_246, %c0_247, %c0_248] : memref<8x8x32xbf16, #tpu.memory_space<vmem>>, vector<1x8x32xbf16>
    %648 = vector.shape_cast %647 : vector<1x8x32xbf16> to vector<8x32xbf16>
    %cst_249 = arith.constant dense<0.000000e+00> : vector<16x32xf32>
    %649 = tpu.matmul %646, %648, %cst_249 {dimension_numbers = #tpu.dot_dimension_numbers<[1], [0], [0], [1], [0, 0, 1, 1], [], []>} : vector<16x8xbf16>, vector<8x32xbf16>, vector<16x32xf32> -> vector<16x32xf32>
    %650 = arith.addf %627, %649 : vector<16x32xf32>
    %651 = vector.broadcast %542 : vector<1x32xf32> to vector<16x32xf32>
    %652 = arith.addf %650, %651 : vector<16x32xf32>
    %653 = arith.addf %513, %652 : vector<16x32xf32>
    %c9_250 = arith.constant 9 : index
    %c0_251 = arith.constant 0 : index
    %654 = vector.load %arg9[%c9_250, %c0_251] : memref<28x96xf32, #tpu.memory_space<vmem>>, vector<1x32xf32>
    %c10_252 = arith.constant 10 : index
    %c0_253 = arith.constant 0 : index
    %655 = vector.load %arg9[%c10_252, %c0_253] : memref<28x96xf32, #tpu.memory_space<vmem>>, vector<1x32xf32>
    %cst_254 = arith.constant dense<0.000000e+00> : vector<16xf32>
    %656 = vector.multi_reduction <add>, %653, %cst_254 [1] : vector<16x32xf32> to vector<16xf32>
    %657 = vector.shape_cast %656 : vector<16xf32> to vector<16x1xf32>
    %cst_255 = arith.constant 3.200000e+01 : f32
    %658 = vector.broadcast %cst_255 : f32 to vector<16x1xf32>
    %659 = arith.divf %657, %658 : vector<16x1xf32>
    %660 = vector.broadcast %659 : vector<16x1xf32> to vector<16x32xf32>
    %661 = arith.subf %653, %660 : vector<16x32xf32>
    %662 = arith.mulf %661, %661 : vector<16x32xf32>
    %cst_256 = arith.constant dense<0.000000e+00> : vector<16xf32>
    %663 = vector.multi_reduction <add>, %662, %cst_256 [1] : vector<16x32xf32> to vector<16xf32>
    %664 = vector.shape_cast %663 : vector<16xf32> to vector<16x1xf32>
    %cst_257 = arith.constant 0.0322580636 : f32
    %665 = vector.broadcast %cst_257 : f32 to vector<16x1xf32>
    %666 = arith.mulf %664, %665 : vector<16x1xf32>
    %667 = vector.broadcast %654 : vector<1x32xf32> to vector<16x32xf32>
    %668 = arith.mulf %667, %661 : vector<16x32xf32>
    %669 = math.sqrt %666 : vector<16x1xf32>
    %cst_258 = arith.constant 9.99999997E-7 : f32
    %670 = vector.broadcast %cst_258 : f32 to vector<16x1xf32>
    %671 = arith.addf %669, %670 : vector<16x1xf32>
    %672 = vector.broadcast %671 : vector<16x1xf32> to vector<16x32xf32>
    %673 = arith.divf %668, %672 : vector<16x32xf32>
    %674 = vector.broadcast %655 : vector<1x32xf32> to vector<16x32xf32>
    %675 = arith.addf %673, %674 : vector<16x32xf32>
    %c0_259 = arith.constant 0 : index
    %c0_260 = arith.constant 0 : index
    %c0_261 = arith.constant 0 : index
    %676 = vector.load %arg15[%c0_259, %c0_260, %c0_261] : memref<2x32x64xbf16, #tpu.memory_space<vmem>>, vector<1x32x64xbf16>
    %677 = vector.shape_cast %676 : vector<1x32x64xbf16> to vector<32x64xbf16>
    %c11_262 = arith.constant 11 : index
    %c0_263 = arith.constant 0 : index
    %678 = vector.load %arg9[%c11_262, %c0_263] : memref<28x96xf32, #tpu.memory_space<vmem>>, vector<1x64xf32>
    %c0_264 = arith.constant 0 : index
    %c0_265 = arith.constant 0 : index
    %c0_266 = arith.constant 0 : index
    %679 = vector.load %arg16[%c0_264, %c0_265, %c0_266] : memref<2x64x32xbf16, #tpu.memory_space<vmem>>, vector<1x64x32xbf16>
    %680 = vector.shape_cast %679 : vector<1x64x32xbf16> to vector<64x32xbf16>
    %c12_267 = arith.constant 12 : index
    %c0_268 = arith.constant 0 : index
    %681 = vector.load %arg9[%c12_267, %c0_268] : memref<28x96xf32, #tpu.memory_space<vmem>>, vector<1x32xf32>
    %682 = arith.truncf %675 : vector<16x32xf32> to vector<16x32xbf16>
    %cst_269 = arith.constant dense<0.000000e+00> : vector<16x64xf32>
    %683 = tpu.matmul %682, %677, %cst_269 {dimension_numbers = #tpu.dot_dimension_numbers<[1], [0], [0], [1], [0, 0, 1, 1], [], []>} : vector<16x32xbf16>, vector<32x64xbf16>, vector<16x64xf32> -> vector<16x64xf32>
    %684 = vector.broadcast %678 : vector<1x64xf32> to vector<16x64xf32>
    %685 = arith.addf %683, %684 : vector<16x64xf32>
    %cst_270 = arith.constant 0.000000e+00 : f32
    %686 = vector.broadcast %cst_270 : f32 to vector<16x64xf32>
    %687 = arith.maximumf %685, %686 : vector<16x64xf32>
    %688 = arith.truncf %687 : vector<16x64xf32> to vector<16x64xbf16>
    %cst_271 = arith.constant dense<0.000000e+00> : vector<16x32xf32>
    %689 = tpu.matmul %688, %680, %cst_271 {dimension_numbers = #tpu.dot_dimension_numbers<[1], [0], [0], [1], [0, 0, 1, 1], [], []>} : vector<16x64xbf16>, vector<64x32xbf16>, vector<16x32xf32> -> vector<16x32xf32>
    %690 = vector.broadcast %681 : vector<1x32xf32> to vector<16x32xf32>
    %691 = arith.addf %689, %690 : vector<16x32xf32>
    %692 = arith.addf %653, %691 : vector<16x32xf32>
    %c13_272 = arith.constant 13 : index
    %c0_273 = arith.constant 0 : index
    %693 = vector.load %arg9[%c13_272, %c0_273] : memref<28x96xf32, #tpu.memory_space<vmem>>, vector<1x32xf32>
    %c14_274 = arith.constant 14 : index
    %c0_275 = arith.constant 0 : index
    %694 = vector.load %arg9[%c14_274, %c0_275] : memref<28x96xf32, #tpu.memory_space<vmem>>, vector<1x32xf32>
    %cst_276 = arith.constant dense<0.000000e+00> : vector<16xf32>
    %695 = vector.multi_reduction <add>, %692, %cst_276 [1] : vector<16x32xf32> to vector<16xf32>
    %696 = vector.shape_cast %695 : vector<16xf32> to vector<16x1xf32>
    %cst_277 = arith.constant 3.200000e+01 : f32
    %697 = vector.broadcast %cst_277 : f32 to vector<16x1xf32>
    %698 = arith.divf %696, %697 : vector<16x1xf32>
    %699 = vector.broadcast %698 : vector<16x1xf32> to vector<16x32xf32>
    %700 = arith.subf %692, %699 : vector<16x32xf32>
    %701 = arith.mulf %700, %700 : vector<16x32xf32>
    %cst_278 = arith.constant dense<0.000000e+00> : vector<16xf32>
    %702 = vector.multi_reduction <add>, %701, %cst_278 [1] : vector<16x32xf32> to vector<16xf32>
    %703 = vector.shape_cast %702 : vector<16xf32> to vector<16x1xf32>
    %cst_279 = arith.constant 0.0322580636 : f32
    %704 = vector.broadcast %cst_279 : f32 to vector<16x1xf32>
    %705 = arith.mulf %703, %704 : vector<16x1xf32>
    %706 = vector.broadcast %693 : vector<1x32xf32> to vector<16x32xf32>
    %707 = arith.mulf %706, %700 : vector<16x32xf32>
    %708 = math.sqrt %705 : vector<16x1xf32>
    %cst_280 = arith.constant 9.99999997E-7 : f32
    %709 = vector.broadcast %cst_280 : f32 to vector<16x1xf32>
    %710 = arith.addf %708, %709 : vector<16x1xf32>
    %711 = vector.broadcast %710 : vector<16x1xf32> to vector<16x32xf32>
    %712 = arith.divf %707, %711 : vector<16x32xf32>
    %713 = vector.broadcast %694 : vector<1x32xf32> to vector<16x32xf32>
    %714 = arith.addf %712, %713 : vector<16x32xf32>
    %c1_281 = arith.constant 1 : index
    %c0_282 = arith.constant 0 : index
    %c0_283 = arith.constant 0 : index
    %715 = vector.load %arg10[%c1_281, %c0_282, %c0_283] : memref<2x32x96xbf16, #tpu.memory_space<vmem>>, vector<1x32x96xbf16>
    %716 = vector.shape_cast %715 : vector<1x32x96xbf16> to vector<32x96xbf16>
    %c15_284 = arith.constant 15 : index
    %c0_285 = arith.constant 0 : index
    %717 = vector.load %arg9[%c15_284, %c0_285] : memref<28x96xf32, #tpu.memory_space<vmem>>, vector<1x96xf32>
    %c16_286 = arith.constant 16 : index
    %c0_287 = arith.constant 0 : index
    %718 = vector.load %arg9[%c16_286, %c0_287] : memref<28x96xf32, #tpu.memory_space<vmem>>, vector<1x32xf32>
    %719 = arith.truncf %714 : vector<16x32xf32> to vector<16x32xbf16>
    %cst_288 = arith.constant dense<0.000000e+00> : vector<16x96xf32>
    %720 = tpu.matmul %719, %716, %cst_288 {dimension_numbers = #tpu.dot_dimension_numbers<[1], [0], [0], [1], [0, 0, 1, 1], [], []>} : vector<16x32xbf16>, vector<32x96xbf16>, vector<16x96xf32> -> vector<16x96xf32>
    %721 = vector.broadcast %717 : vector<1x96xf32> to vector<16x96xf32>
    %722 = arith.addf %720, %721 : vector<16x96xf32>
    %723 = vector.extract_strided_slice %722 {offsets = [0, 0], sizes = [16, 32], strides = [1, 1]} : vector<16x96xf32> to vector<16x32xf32>
    %724 = vector.extract_strided_slice %722 {offsets = [0, 32], sizes = [16, 32], strides = [1, 1]} : vector<16x96xf32> to vector<16x32xf32>
    %725 = vector.extract_strided_slice %722 {offsets = [0, 64], sizes = [16, 32], strides = [1, 1]} : vector<16x96xf32> to vector<16x32xf32>
    %726 = vector.shape_cast %723 : vector<16x32xf32> to vector<2x8x32xf32>
    %727 = arith.truncf %726 : vector<2x8x32xf32> to vector<2x8x32xbf16>
    %728 = vector.shape_cast %724 : vector<16x32xf32> to vector<2x8x32xf32>
    %729 = arith.truncf %728 : vector<2x8x32xf32> to vector<2x8x32xbf16>
    %730 = vector.shape_cast %725 : vector<16x32xf32> to vector<2x8x32xf32>
    %731 = arith.truncf %730 : vector<2x8x32xf32> to vector<2x8x32xbf16>
    %cst_289 = arith.constant 0.000000e+00 : f32
    %732 = vector.broadcast %cst_289 : f32 to vector<16x32xf32>
    %733 = vector.extract_strided_slice %727 {offsets = [0, 0, 0], sizes = [2, 8, 8], strides = [1, 1, 1]} : vector<2x8x32xbf16> to vector<2x8x8xbf16>
    %734 = vector.extract_strided_slice %729 {offsets = [0, 0, 0], sizes = [2, 8, 8], strides = [1, 1, 1]} : vector<2x8x32xbf16> to vector<2x8x8xbf16>
    "tpu.trace_start"() <{level = 10 : i32, message = "bqd,bkd->bqk"}> : () -> ()
    %cst_290 = arith.constant dense<0.000000e+00> : vector<2x8x8xf32>
    %735 = tpu.matmul %733, %734, %cst_290 {dimension_numbers = #tpu.dot_dimension_numbers<[2], [2], [1], [1], [0, 0, 0, 1, 1, 1], [0], [0]>} : vector<2x8x8xbf16>, vector<2x8x8xbf16>, vector<2x8x8xf32> -> vector<2x8x8xf32>
    "tpu.trace_stop"() : () -> ()
    %736 = arith.addf %735, %5 : vector<2x8x8xf32>
    %cst_291 = arith.constant dense<0xFF800000> : vector<2x8xf32>
    %737 = vector.multi_reduction <maximumf>, %736, %cst_291 [2] : vector<2x8x8xf32> to vector<2x8xf32>
    %738 = vector.shape_cast %737 : vector<2x8xf32> to vector<2x8x1xf32>
    %739 = vector.broadcast %738 : vector<2x8x1xf32> to vector<2x8x8xf32>
    %740 = arith.subf %736, %739 : vector<2x8x8xf32>
    %741 = math.exp %740 : vector<2x8x8xf32>
    %cst_292 = arith.constant dense<0.000000e+00> : vector<2x8xf32>
    %742 = vector.multi_reduction <add>, %741, %cst_292 [2] : vector<2x8x8xf32> to vector<2x8xf32>
    %743 = vector.shape_cast %742 : vector<2x8xf32> to vector<2x8x1xf32>
    %744 = tpu.reciprocal %743 {approx = true} : vector<2x8x1xf32> -> vector<2x8x1xf32>
    %745 = vector.broadcast %744 : vector<2x8x1xf32> to vector<2x8x8xf32>
    %746 = arith.mulf %741, %745 : vector<2x8x8xf32>
    %747 = arith.truncf %746 : vector<2x8x8xf32> to vector<2x8x8xbf16>
    %748 = vector.extract_strided_slice %731 {offsets = [0, 0, 0], sizes = [2, 8, 8], strides = [1, 1, 1]} : vector<2x8x32xbf16> to vector<2x8x8xbf16>
    "tpu.trace_start"() <{level = 10 : i32, message = "bqk,bkd->bqd"}> : () -> ()
    %cst_293 = arith.constant dense<0.000000e+00> : vector<2x8x8xf32>
    %749 = tpu.matmul %747, %748, %cst_293 {dimension_numbers = #tpu.dot_dimension_numbers<[2], [1], [1], [2], [0, 0, 0, 1, 1, 2], [0], [0]>} : vector<2x8x8xbf16>, vector<2x8x8xbf16>, vector<2x8x8xf32> -> vector<2x8x8xf32>
    "tpu.trace_stop"() : () -> ()
    %750 = vector.shape_cast %749 : vector<2x8x8xf32> to vector<16x8xf32>
    %751 = arith.truncf %750 : vector<16x8xf32> to vector<16x8xbf16>
    %c4_294 = arith.constant 4 : index
    %c0_295 = arith.constant 0 : index
    %c0_296 = arith.constant 0 : index
    %752 = vector.load %arg11[%c4_294, %c0_295, %c0_296] : memref<8x8x32xbf16, #tpu.memory_space<vmem>>, vector<1x8x32xbf16>
    %753 = vector.shape_cast %752 : vector<1x8x32xbf16> to vector<8x32xbf16>
    %cst_297 = arith.constant dense<0.000000e+00> : vector<16x32xf32>
    %754 = tpu.matmul %751, %753, %cst_297 {dimension_numbers = #tpu.dot_dimension_numbers<[1], [0], [0], [1], [0, 0, 1, 1], [], []>} : vector<16x8xbf16>, vector<8x32xbf16>, vector<16x32xf32> -> vector<16x32xf32>
    %755 = arith.addf %732, %754 : vector<16x32xf32>
    %756 = vector.extract_strided_slice %727 {offsets = [0, 0, 8], sizes = [2, 8, 8], strides = [1, 1, 1]} : vector<2x8x32xbf16> to vector<2x8x8xbf16>
    %757 = vector.extract_strided_slice %729 {offsets = [0, 0, 8], sizes = [2, 8, 8], strides = [1, 1, 1]} : vector<2x8x32xbf16> to vector<2x8x8xbf16>
    "tpu.trace_start"() <{level = 10 : i32, message = "bqd,bkd->bqk"}> : () -> ()
    %cst_298 = arith.constant dense<0.000000e+00> : vector<2x8x8xf32>
    %758 = tpu.matmul %756, %757, %cst_298 {dimension_numbers = #tpu.dot_dimension_numbers<[2], [2], [1], [1], [0, 0, 0, 1, 1, 1], [0], [0]>} : vector<2x8x8xbf16>, vector<2x8x8xbf16>, vector<2x8x8xf32> -> vector<2x8x8xf32>
    "tpu.trace_stop"() : () -> ()
    %759 = arith.addf %758, %5 : vector<2x8x8xf32>
    %cst_299 = arith.constant dense<0xFF800000> : vector<2x8xf32>
    %760 = vector.multi_reduction <maximumf>, %759, %cst_299 [2] : vector<2x8x8xf32> to vector<2x8xf32>
    %761 = vector.shape_cast %760 : vector<2x8xf32> to vector<2x8x1xf32>
    %762 = vector.broadcast %761 : vector<2x8x1xf32> to vector<2x8x8xf32>
    %763 = arith.subf %759, %762 : vector<2x8x8xf32>
    %764 = math.exp %763 : vector<2x8x8xf32>
    %cst_300 = arith.constant dense<0.000000e+00> : vector<2x8xf32>
    %765 = vector.multi_reduction <add>, %764, %cst_300 [2] : vector<2x8x8xf32> to vector<2x8xf32>
    %766 = vector.shape_cast %765 : vector<2x8xf32> to vector<2x8x1xf32>
    %767 = tpu.reciprocal %766 {approx = true} : vector<2x8x1xf32> -> vector<2x8x1xf32>
    %768 = vector.broadcast %767 : vector<2x8x1xf32> to vector<2x8x8xf32>
    %769 = arith.mulf %764, %768 : vector<2x8x8xf32>
    %770 = arith.truncf %769 : vector<2x8x8xf32> to vector<2x8x8xbf16>
    %771 = vector.extract_strided_slice %731 {offsets = [0, 0, 8], sizes = [2, 8, 8], strides = [1, 1, 1]} : vector<2x8x32xbf16> to vector<2x8x8xbf16>
    "tpu.trace_start"() <{level = 10 : i32, message = "bqk,bkd->bqd"}> : () -> ()
    %cst_301 = arith.constant dense<0.000000e+00> : vector<2x8x8xf32>
    %772 = tpu.matmul %770, %771, %cst_301 {dimension_numbers = #tpu.dot_dimension_numbers<[2], [1], [1], [2], [0, 0, 0, 1, 1, 2], [0], [0]>} : vector<2x8x8xbf16>, vector<2x8x8xbf16>, vector<2x8x8xf32> -> vector<2x8x8xf32>
    "tpu.trace_stop"() : () -> ()
    %773 = vector.shape_cast %772 : vector<2x8x8xf32> to vector<16x8xf32>
    %774 = arith.truncf %773 : vector<16x8xf32> to vector<16x8xbf16>
    %c5_302 = arith.constant 5 : index
    %c0_303 = arith.constant 0 : index
    %c0_304 = arith.constant 0 : index
    %775 = vector.load %arg11[%c5_302, %c0_303, %c0_304] : memref<8x8x32xbf16, #tpu.memory_space<vmem>>, vector<1x8x32xbf16>
    %776 = vector.shape_cast %775 : vector<1x8x32xbf16> to vector<8x32xbf16>
    %cst_305 = arith.constant dense<0.000000e+00> : vector<16x32xf32>
    %777 = tpu.matmul %774, %776, %cst_305 {dimension_numbers = #tpu.dot_dimension_numbers<[1], [0], [0], [1], [0, 0, 1, 1], [], []>} : vector<16x8xbf16>, vector<8x32xbf16>, vector<16x32xf32> -> vector<16x32xf32>
    %778 = arith.addf %755, %777 : vector<16x32xf32>
    %779 = vector.extract_strided_slice %727 {offsets = [0, 0, 16], sizes = [2, 8, 8], strides = [1, 1, 1]} : vector<2x8x32xbf16> to vector<2x8x8xbf16>
    %780 = vector.extract_strided_slice %729 {offsets = [0, 0, 16], sizes = [2, 8, 8], strides = [1, 1, 1]} : vector<2x8x32xbf16> to vector<2x8x8xbf16>
    "tpu.trace_start"() <{level = 10 : i32, message = "bqd,bkd->bqk"}> : () -> ()
    %cst_306 = arith.constant dense<0.000000e+00> : vector<2x8x8xf32>
    %781 = tpu.matmul %779, %780, %cst_306 {dimension_numbers = #tpu.dot_dimension_numbers<[2], [2], [1], [1], [0, 0, 0, 1, 1, 1], [0], [0]>} : vector<2x8x8xbf16>, vector<2x8x8xbf16>, vector<2x8x8xf32> -> vector<2x8x8xf32>
    "tpu.trace_stop"() : () -> ()
    %782 = arith.addf %781, %5 : vector<2x8x8xf32>
    %cst_307 = arith.constant dense<0xFF800000> : vector<2x8xf32>
    %783 = vector.multi_reduction <maximumf>, %782, %cst_307 [2] : vector<2x8x8xf32> to vector<2x8xf32>
    %784 = vector.shape_cast %783 : vector<2x8xf32> to vector<2x8x1xf32>
    %785 = vector.broadcast %784 : vector<2x8x1xf32> to vector<2x8x8xf32>
    %786 = arith.subf %782, %785 : vector<2x8x8xf32>
    %787 = math.exp %786 : vector<2x8x8xf32>
    %cst_308 = arith.constant dense<0.000000e+00> : vector<2x8xf32>
    %788 = vector.multi_reduction <add>, %787, %cst_308 [2] : vector<2x8x8xf32> to vector<2x8xf32>
    %789 = vector.shape_cast %788 : vector<2x8xf32> to vector<2x8x1xf32>
    %790 = tpu.reciprocal %789 {approx = true} : vector<2x8x1xf32> -> vector<2x8x1xf32>
    %791 = vector.broadcast %790 : vector<2x8x1xf32> to vector<2x8x8xf32>
    %792 = arith.mulf %787, %791 : vector<2x8x8xf32>
    %793 = arith.truncf %792 : vector<2x8x8xf32> to vector<2x8x8xbf16>
    %794 = vector.extract_strided_slice %731 {offsets = [0, 0, 16], sizes = [2, 8, 8], strides = [1, 1, 1]} : vector<2x8x32xbf16> to vector<2x8x8xbf16>
    "tpu.trace_start"() <{level = 10 : i32, message = "bqk,bkd->bqd"}> : () -> ()
    %cst_309 = arith.constant dense<0.000000e+00> : vector<2x8x8xf32>
    %795 = tpu.matmul %793, %794, %cst_309 {dimension_numbers = #tpu.dot_dimension_numbers<[2], [1], [1], [2], [0, 0, 0, 1, 1, 2], [0], [0]>} : vector<2x8x8xbf16>, vector<2x8x8xbf16>, vector<2x8x8xf32> -> vector<2x8x8xf32>
    "tpu.trace_stop"() : () -> ()
    %796 = vector.shape_cast %795 : vector<2x8x8xf32> to vector<16x8xf32>
    %797 = arith.truncf %796 : vector<16x8xf32> to vector<16x8xbf16>
    %c6_310 = arith.constant 6 : index
    %c0_311 = arith.constant 0 : index
    %c0_312 = arith.constant 0 : index
    %798 = vector.load %arg11[%c6_310, %c0_311, %c0_312] : memref<8x8x32xbf16, #tpu.memory_space<vmem>>, vector<1x8x32xbf16>
    %799 = vector.shape_cast %798 : vector<1x8x32xbf16> to vector<8x32xbf16>
    %cst_313 = arith.constant dense<0.000000e+00> : vector<16x32xf32>
    %800 = tpu.matmul %797, %799, %cst_313 {dimension_numbers = #tpu.dot_dimension_numbers<[1], [0], [0], [1], [0, 0, 1, 1], [], []>} : vector<16x8xbf16>, vector<8x32xbf16>, vector<16x32xf32> -> vector<16x32xf32>
    %801 = arith.addf %778, %800 : vector<16x32xf32>
    %802 = vector.extract_strided_slice %727 {offsets = [0, 0, 24], sizes = [2, 8, 8], strides = [1, 1, 1]} : vector<2x8x32xbf16> to vector<2x8x8xbf16>
    %803 = vector.extract_strided_slice %729 {offsets = [0, 0, 24], sizes = [2, 8, 8], strides = [1, 1, 1]} : vector<2x8x32xbf16> to vector<2x8x8xbf16>
    "tpu.trace_start"() <{level = 10 : i32, message = "bqd,bkd->bqk"}> : () -> ()
    %cst_314 = arith.constant dense<0.000000e+00> : vector<2x8x8xf32>
    %804 = tpu.matmul %802, %803, %cst_314 {dimension_numbers = #tpu.dot_dimension_numbers<[2], [2], [1], [1], [0, 0, 0, 1, 1, 1], [0], [0]>} : vector<2x8x8xbf16>, vector<2x8x8xbf16>, vector<2x8x8xf32> -> vector<2x8x8xf32>
    "tpu.trace_stop"() : () -> ()
    %805 = arith.addf %804, %5 : vector<2x8x8xf32>
    %cst_315 = arith.constant dense<0xFF800000> : vector<2x8xf32>
    %806 = vector.multi_reduction <maximumf>, %805, %cst_315 [2] : vector<2x8x8xf32> to vector<2x8xf32>
    %807 = vector.shape_cast %806 : vector<2x8xf32> to vector<2x8x1xf32>
    %808 = vector.broadcast %807 : vector<2x8x1xf32> to vector<2x8x8xf32>
    %809 = arith.subf %805, %808 : vector<2x8x8xf32>
    %810 = math.exp %809 : vector<2x8x8xf32>
    %cst_316 = arith.constant dense<0.000000e+00> : vector<2x8xf32>
    %811 = vector.multi_reduction <add>, %810, %cst_316 [2] : vector<2x8x8xf32> to vector<2x8xf32>
    %812 = vector.shape_cast %811 : vector<2x8xf32> to vector<2x8x1xf32>
    %813 = tpu.reciprocal %812 {approx = true} : vector<2x8x1xf32> -> vector<2x8x1xf32>
    %814 = vector.broadcast %813 : vector<2x8x1xf32> to vector<2x8x8xf32>
    %815 = arith.mulf %810, %814 : vector<2x8x8xf32>
    %816 = arith.truncf %815 : vector<2x8x8xf32> to vector<2x8x8xbf16>
    %817 = vector.extract_strided_slice %731 {offsets = [0, 0, 24], sizes = [2, 8, 8], strides = [1, 1, 1]} : vector<2x8x32xbf16> to vector<2x8x8xbf16>
    "tpu.trace_start"() <{level = 10 : i32, message = "bqk,bkd->bqd"}> : () -> ()
    %cst_317 = arith.constant dense<0.000000e+00> : vector<2x8x8xf32>
    %818 = tpu.matmul %816, %817, %cst_317 {dimension_numbers = #tpu.dot_dimension_numbers<[2], [1], [1], [2], [0, 0, 0, 1, 1, 2], [0], [0]>} : vector<2x8x8xbf16>, vector<2x8x8xbf16>, vector<2x8x8xf32> -> vector<2x8x8xf32>
    "tpu.trace_stop"() : () -> ()
    %819 = vector.shape_cast %818 : vector<2x8x8xf32> to vector<16x8xf32>
    %820 = arith.truncf %819 : vector<16x8xf32> to vector<16x8xbf16>
    %c7_318 = arith.constant 7 : index
    %c0_319 = arith.constant 0 : index
    %c0_320 = arith.constant 0 : index
    %821 = vector.load %arg11[%c7_318, %c0_319, %c0_320] : memref<8x8x32xbf16, #tpu.memory_space<vmem>>, vector<1x8x32xbf16>
    %822 = vector.shape_cast %821 : vector<1x8x32xbf16> to vector<8x32xbf16>
    %cst_321 = arith.constant dense<0.000000e+00> : vector<16x32xf32>
    %823 = tpu.matmul %820, %822, %cst_321 {dimension_numbers = #tpu.dot_dimension_numbers<[1], [0], [0], [1], [0, 0, 1, 1], [], []>} : vector<16x8xbf16>, vector<8x32xbf16>, vector<16x32xf32> -> vector<16x32xf32>
    %824 = arith.addf %801, %823 : vector<16x32xf32>
    %825 = vector.broadcast %718 : vector<1x32xf32> to vector<16x32xf32>
    %826 = arith.addf %824, %825 : vector<16x32xf32>
    %827 = arith.addf %692, %826 : vector<16x32xf32>
    %c17_322 = arith.constant 17 : index
    %c0_323 = arith.constant 0 : index
    %828 = vector.load %arg9[%c17_322, %c0_323] : memref<28x96xf32, #tpu.memory_space<vmem>>, vector<1x32xf32>
    %c18 = arith.constant 18 : index
    %c0_324 = arith.constant 0 : index
    %829 = vector.load %arg9[%c18, %c0_324] : memref<28x96xf32, #tpu.memory_space<vmem>>, vector<1x32xf32>
    %cst_325 = arith.constant dense<0.000000e+00> : vector<16xf32>
    %830 = vector.multi_reduction <add>, %827, %cst_325 [1] : vector<16x32xf32> to vector<16xf32>
    %831 = vector.shape_cast %830 : vector<16xf32> to vector<16x1xf32>
    %cst_326 = arith.constant 3.200000e+01 : f32
    %832 = vector.broadcast %cst_326 : f32 to vector<16x1xf32>
    %833 = arith.divf %831, %832 : vector<16x1xf32>
    %834 = vector.broadcast %833 : vector<16x1xf32> to vector<16x32xf32>
    %835 = arith.subf %827, %834 : vector<16x32xf32>
    %836 = arith.mulf %835, %835 : vector<16x32xf32>
    %cst_327 = arith.constant dense<0.000000e+00> : vector<16xf32>
    %837 = vector.multi_reduction <add>, %836, %cst_327 [1] : vector<16x32xf32> to vector<16xf32>
    %838 = vector.shape_cast %837 : vector<16xf32> to vector<16x1xf32>
    %cst_328 = arith.constant 0.0322580636 : f32
    %839 = vector.broadcast %cst_328 : f32 to vector<16x1xf32>
    %840 = arith.mulf %838, %839 : vector<16x1xf32>
    %841 = vector.broadcast %828 : vector<1x32xf32> to vector<16x32xf32>
    %842 = arith.mulf %841, %835 : vector<16x32xf32>
    %843 = math.sqrt %840 : vector<16x1xf32>
    %cst_329 = arith.constant 9.99999997E-7 : f32
    %844 = vector.broadcast %cst_329 : f32 to vector<16x1xf32>
    %845 = arith.addf %843, %844 : vector<16x1xf32>
    %846 = vector.broadcast %845 : vector<16x1xf32> to vector<16x32xf32>
    %847 = arith.divf %842, %846 : vector<16x32xf32>
    %848 = vector.broadcast %829 : vector<1x32xf32> to vector<16x32xf32>
    %849 = arith.addf %847, %848 : vector<16x32xf32>
    %c1_330 = arith.constant 1 : index
    %c0_331 = arith.constant 0 : index
    %c0_332 = arith.constant 0 : index
    %850 = vector.load %arg12[%c1_330, %c0_331, %c0_332] : memref<2x32x32xbf16, #tpu.memory_space<vmem>>, vector<1x32x32xbf16>
    %851 = vector.shape_cast %850 : vector<1x32x32xbf16> to vector<32x32xbf16>
    %c19 = arith.constant 19 : index
    %c0_333 = arith.constant 0 : index
    %852 = vector.load %arg9[%c19, %c0_333] : memref<28x96xf32, #tpu.memory_space<vmem>>, vector<1x32xf32>
    %c1_334 = arith.constant 1 : index
    %c0_335 = arith.constant 0 : index
    %c0_336 = arith.constant 0 : index
    %853 = vector.load %arg13[%c1_334, %c0_335, %c0_336] : memref<2x32x64xbf16, #tpu.memory_space<vmem>>, vector<1x32x64xbf16>
    %854 = vector.shape_cast %853 : vector<1x32x64xbf16> to vector<32x64xbf16>
    %c20 = arith.constant 20 : index
    %c0_337 = arith.constant 0 : index
    %855 = vector.load %arg9[%c20, %c0_337] : memref<28x96xf32, #tpu.memory_space<vmem>>, vector<1x64xf32>
    %c21 = arith.constant 21 : index
    %c0_338 = arith.constant 0 : index
    %856 = vector.load %arg9[%c21, %c0_338] : memref<28x96xf32, #tpu.memory_space<vmem>>, vector<1x32xf32>
    %857 = arith.truncf %849 : vector<16x32xf32> to vector<16x32xbf16>
    %cst_339 = arith.constant dense<0.000000e+00> : vector<16x32xf32>
    %858 = tpu.matmul %857, %851, %cst_339 {dimension_numbers = #tpu.dot_dimension_numbers<[1], [0], [0], [1], [0, 0, 1, 1], [], []>} : vector<16x32xbf16>, vector<32x32xbf16>, vector<16x32xf32> -> vector<16x32xf32>
    %859 = vector.broadcast %852 : vector<1x32xf32> to vector<16x32xf32>
    %860 = arith.addf %858, %859 : vector<16x32xf32>
    %cst_340 = arith.constant dense<0.000000e+00> : vector<16x64xf32>
    %861 = tpu.matmul %377, %854, %cst_340 {dimension_numbers = #tpu.dot_dimension_numbers<[1], [0], [0], [1], [0, 0, 1, 1], [], []>} : vector<16x32xbf16>, vector<32x64xbf16>, vector<16x64xf32> -> vector<16x64xf32>
    %862 = vector.broadcast %855 : vector<1x64xf32> to vector<16x64xf32>
    %863 = arith.addf %861, %862 : vector<16x64xf32>
    %864 = vector.extract_strided_slice %863 {offsets = [0, 0], sizes = [16, 32], strides = [1, 1]} : vector<16x64xf32> to vector<16x32xf32>
    %865 = vector.extract_strided_slice %863 {offsets = [0, 32], sizes = [16, 32], strides = [1, 1]} : vector<16x64xf32> to vector<16x32xf32>
    %866 = vector.shape_cast %860 : vector<16x32xf32> to vector<2x8x32xf32>
    %867 = arith.truncf %866 : vector<2x8x32xf32> to vector<2x8x32xbf16>
    %868 = vector.shape_cast %864 : vector<16x32xf32> to vector<2x8x32xf32>
    %869 = arith.truncf %868 : vector<2x8x32xf32> to vector<2x8x32xbf16>
    %870 = vector.shape_cast %865 : vector<16x32xf32> to vector<2x8x32xf32>
    %871 = arith.truncf %870 : vector<2x8x32xf32> to vector<2x8x32xbf16>
    %cst_341 = arith.constant 0.000000e+00 : f32
    %872 = vector.broadcast %cst_341 : f32 to vector<16x32xf32>
    %873 = vector.extract_strided_slice %867 {offsets = [0, 0, 0], sizes = [2, 8, 8], strides = [1, 1, 1]} : vector<2x8x32xbf16> to vector<2x8x8xbf16>
    %874 = vector.extract_strided_slice %869 {offsets = [0, 0, 0], sizes = [2, 8, 8], strides = [1, 1, 1]} : vector<2x8x32xbf16> to vector<2x8x8xbf16>
    "tpu.trace_start"() <{level = 10 : i32, message = "bqd,bkd->bqk"}> : () -> ()
    %cst_342 = arith.constant dense<0.000000e+00> : vector<2x8x8xf32>
    %875 = tpu.matmul %873, %874, %cst_342 {dimension_numbers = #tpu.dot_dimension_numbers<[2], [2], [1], [1], [0, 0, 0, 1, 1, 1], [0], [0]>} : vector<2x8x8xbf16>, vector<2x8x8xbf16>, vector<2x8x8xf32> -> vector<2x8x8xf32>
    "tpu.trace_stop"() : () -> ()
    %876 = arith.addf %875, %4 : vector<2x8x8xf32>
    %cst_343 = arith.constant dense<0xFF800000> : vector<2x8xf32>
    %877 = vector.multi_reduction <maximumf>, %876, %cst_343 [2] : vector<2x8x8xf32> to vector<2x8xf32>
    %878 = vector.shape_cast %877 : vector<2x8xf32> to vector<2x8x1xf32>
    %879 = vector.broadcast %878 : vector<2x8x1xf32> to vector<2x8x8xf32>
    %880 = arith.subf %876, %879 : vector<2x8x8xf32>
    %881 = math.exp %880 : vector<2x8x8xf32>
    %cst_344 = arith.constant dense<0.000000e+00> : vector<2x8xf32>
    %882 = vector.multi_reduction <add>, %881, %cst_344 [2] : vector<2x8x8xf32> to vector<2x8xf32>
    %883 = vector.shape_cast %882 : vector<2x8xf32> to vector<2x8x1xf32>
    %884 = tpu.reciprocal %883 {approx = true} : vector<2x8x1xf32> -> vector<2x8x1xf32>
    %885 = vector.broadcast %884 : vector<2x8x1xf32> to vector<2x8x8xf32>
    %886 = arith.mulf %881, %885 : vector<2x8x8xf32>
    %887 = arith.truncf %886 : vector<2x8x8xf32> to vector<2x8x8xbf16>
    %888 = vector.extract_strided_slice %871 {offsets = [0, 0, 0], sizes = [2, 8, 8], strides = [1, 1, 1]} : vector<2x8x32xbf16> to vector<2x8x8xbf16>
    "tpu.trace_start"() <{level = 10 : i32, message = "bqk,bkd->bqd"}> : () -> ()
    %cst_345 = arith.constant dense<0.000000e+00> : vector<2x8x8xf32>
    %889 = tpu.matmul %887, %888, %cst_345 {dimension_numbers = #tpu.dot_dimension_numbers<[2], [1], [1], [2], [0, 0, 0, 1, 1, 2], [0], [0]>} : vector<2x8x8xbf16>, vector<2x8x8xbf16>, vector<2x8x8xf32> -> vector<2x8x8xf32>
    "tpu.trace_stop"() : () -> ()
    %890 = vector.shape_cast %889 : vector<2x8x8xf32> to vector<16x8xf32>
    %891 = arith.truncf %890 : vector<16x8xf32> to vector<16x8xbf16>
    %c4_346 = arith.constant 4 : index
    %c0_347 = arith.constant 0 : index
    %c0_348 = arith.constant 0 : index
    %892 = vector.load %arg14[%c4_346, %c0_347, %c0_348] : memref<8x8x32xbf16, #tpu.memory_space<vmem>>, vector<1x8x32xbf16>
    %893 = vector.shape_cast %892 : vector<1x8x32xbf16> to vector<8x32xbf16>
    %cst_349 = arith.constant dense<0.000000e+00> : vector<16x32xf32>
    %894 = tpu.matmul %891, %893, %cst_349 {dimension_numbers = #tpu.dot_dimension_numbers<[1], [0], [0], [1], [0, 0, 1, 1], [], []>} : vector<16x8xbf16>, vector<8x32xbf16>, vector<16x32xf32> -> vector<16x32xf32>
    %895 = arith.addf %872, %894 : vector<16x32xf32>
    %896 = vector.extract_strided_slice %867 {offsets = [0, 0, 8], sizes = [2, 8, 8], strides = [1, 1, 1]} : vector<2x8x32xbf16> to vector<2x8x8xbf16>
    %897 = vector.extract_strided_slice %869 {offsets = [0, 0, 8], sizes = [2, 8, 8], strides = [1, 1, 1]} : vector<2x8x32xbf16> to vector<2x8x8xbf16>
    "tpu.trace_start"() <{level = 10 : i32, message = "bqd,bkd->bqk"}> : () -> ()
    %cst_350 = arith.constant dense<0.000000e+00> : vector<2x8x8xf32>
    %898 = tpu.matmul %896, %897, %cst_350 {dimension_numbers = #tpu.dot_dimension_numbers<[2], [2], [1], [1], [0, 0, 0, 1, 1, 1], [0], [0]>} : vector<2x8x8xbf16>, vector<2x8x8xbf16>, vector<2x8x8xf32> -> vector<2x8x8xf32>
    "tpu.trace_stop"() : () -> ()
    %899 = arith.addf %898, %4 : vector<2x8x8xf32>
    %cst_351 = arith.constant dense<0xFF800000> : vector<2x8xf32>
    %900 = vector.multi_reduction <maximumf>, %899, %cst_351 [2] : vector<2x8x8xf32> to vector<2x8xf32>
    %901 = vector.shape_cast %900 : vector<2x8xf32> to vector<2x8x1xf32>
    %902 = vector.broadcast %901 : vector<2x8x1xf32> to vector<2x8x8xf32>
    %903 = arith.subf %899, %902 : vector<2x8x8xf32>
    %904 = math.exp %903 : vector<2x8x8xf32>
    %cst_352 = arith.constant dense<0.000000e+00> : vector<2x8xf32>
    %905 = vector.multi_reduction <add>, %904, %cst_352 [2] : vector<2x8x8xf32> to vector<2x8xf32>
    %906 = vector.shape_cast %905 : vector<2x8xf32> to vector<2x8x1xf32>
    %907 = tpu.reciprocal %906 {approx = true} : vector<2x8x1xf32> -> vector<2x8x1xf32>
    %908 = vector.broadcast %907 : vector<2x8x1xf32> to vector<2x8x8xf32>
    %909 = arith.mulf %904, %908 : vector<2x8x8xf32>
    %910 = arith.truncf %909 : vector<2x8x8xf32> to vector<2x8x8xbf16>
    %911 = vector.extract_strided_slice %871 {offsets = [0, 0, 8], sizes = [2, 8, 8], strides = [1, 1, 1]} : vector<2x8x32xbf16> to vector<2x8x8xbf16>
    "tpu.trace_start"() <{level = 10 : i32, message = "bqk,bkd->bqd"}> : () -> ()
    %cst_353 = arith.constant dense<0.000000e+00> : vector<2x8x8xf32>
    %912 = tpu.matmul %910, %911, %cst_353 {dimension_numbers = #tpu.dot_dimension_numbers<[2], [1], [1], [2], [0, 0, 0, 1, 1, 2], [0], [0]>} : vector<2x8x8xbf16>, vector<2x8x8xbf16>, vector<2x8x8xf32> -> vector<2x8x8xf32>
    "tpu.trace_stop"() : () -> ()
    %913 = vector.shape_cast %912 : vector<2x8x8xf32> to vector<16x8xf32>
    %914 = arith.truncf %913 : vector<16x8xf32> to vector<16x8xbf16>
    %c5_354 = arith.constant 5 : index
    %c0_355 = arith.constant 0 : index
    %c0_356 = arith.constant 0 : index
    %915 = vector.load %arg14[%c5_354, %c0_355, %c0_356] : memref<8x8x32xbf16, #tpu.memory_space<vmem>>, vector<1x8x32xbf16>
    %916 = vector.shape_cast %915 : vector<1x8x32xbf16> to vector<8x32xbf16>
    %cst_357 = arith.constant dense<0.000000e+00> : vector<16x32xf32>
    %917 = tpu.matmul %914, %916, %cst_357 {dimension_numbers = #tpu.dot_dimension_numbers<[1], [0], [0], [1], [0, 0, 1, 1], [], []>} : vector<16x8xbf16>, vector<8x32xbf16>, vector<16x32xf32> -> vector<16x32xf32>
    %918 = arith.addf %895, %917 : vector<16x32xf32>
    %919 = vector.extract_strided_slice %867 {offsets = [0, 0, 16], sizes = [2, 8, 8], strides = [1, 1, 1]} : vector<2x8x32xbf16> to vector<2x8x8xbf16>
    %920 = vector.extract_strided_slice %869 {offsets = [0, 0, 16], sizes = [2, 8, 8], strides = [1, 1, 1]} : vector<2x8x32xbf16> to vector<2x8x8xbf16>
    "tpu.trace_start"() <{level = 10 : i32, message = "bqd,bkd->bqk"}> : () -> ()
    %cst_358 = arith.constant dense<0.000000e+00> : vector<2x8x8xf32>
    %921 = tpu.matmul %919, %920, %cst_358 {dimension_numbers = #tpu.dot_dimension_numbers<[2], [2], [1], [1], [0, 0, 0, 1, 1, 1], [0], [0]>} : vector<2x8x8xbf16>, vector<2x8x8xbf16>, vector<2x8x8xf32> -> vector<2x8x8xf32>
    "tpu.trace_stop"() : () -> ()
    %922 = arith.addf %921, %4 : vector<2x8x8xf32>
    %cst_359 = arith.constant dense<0xFF800000> : vector<2x8xf32>
    %923 = vector.multi_reduction <maximumf>, %922, %cst_359 [2] : vector<2x8x8xf32> to vector<2x8xf32>
    %924 = vector.shape_cast %923 : vector<2x8xf32> to vector<2x8x1xf32>
    %925 = vector.broadcast %924 : vector<2x8x1xf32> to vector<2x8x8xf32>
    %926 = arith.subf %922, %925 : vector<2x8x8xf32>
    %927 = math.exp %926 : vector<2x8x8xf32>
    %cst_360 = arith.constant dense<0.000000e+00> : vector<2x8xf32>
    %928 = vector.multi_reduction <add>, %927, %cst_360 [2] : vector<2x8x8xf32> to vector<2x8xf32>
    %929 = vector.shape_cast %928 : vector<2x8xf32> to vector<2x8x1xf32>
    %930 = tpu.reciprocal %929 {approx = true} : vector<2x8x1xf32> -> vector<2x8x1xf32>
    %931 = vector.broadcast %930 : vector<2x8x1xf32> to vector<2x8x8xf32>
    %932 = arith.mulf %927, %931 : vector<2x8x8xf32>
    %933 = arith.truncf %932 : vector<2x8x8xf32> to vector<2x8x8xbf16>
    %934 = vector.extract_strided_slice %871 {offsets = [0, 0, 16], sizes = [2, 8, 8], strides = [1, 1, 1]} : vector<2x8x32xbf16> to vector<2x8x8xbf16>
    "tpu.trace_start"() <{level = 10 : i32, message = "bqk,bkd->bqd"}> : () -> ()
    %cst_361 = arith.constant dense<0.000000e+00> : vector<2x8x8xf32>
    %935 = tpu.matmul %933, %934, %cst_361 {dimension_numbers = #tpu.dot_dimension_numbers<[2], [1], [1], [2], [0, 0, 0, 1, 1, 2], [0], [0]>} : vector<2x8x8xbf16>, vector<2x8x8xbf16>, vector<2x8x8xf32> -> vector<2x8x8xf32>
    "tpu.trace_stop"() : () -> ()
    %936 = vector.shape_cast %935 : vector<2x8x8xf32> to vector<16x8xf32>
    %937 = arith.truncf %936 : vector<16x8xf32> to vector<16x8xbf16>
    %c6_362 = arith.constant 6 : index
    %c0_363 = arith.constant 0 : index
    %c0_364 = arith.constant 0 : index
    %938 = vector.load %arg14[%c6_362, %c0_363, %c0_364] : memref<8x8x32xbf16, #tpu.memory_space<vmem>>, vector<1x8x32xbf16>
    %939 = vector.shape_cast %938 : vector<1x8x32xbf16> to vector<8x32xbf16>
    %cst_365 = arith.constant dense<0.000000e+00> : vector<16x32xf32>
    %940 = tpu.matmul %937, %939, %cst_365 {dimension_numbers = #tpu.dot_dimension_numbers<[1], [0], [0], [1], [0, 0, 1, 1], [], []>} : vector<16x8xbf16>, vector<8x32xbf16>, vector<16x32xf32> -> vector<16x32xf32>
    %941 = arith.addf %918, %940 : vector<16x32xf32>
    %942 = vector.extract_strided_slice %867 {offsets = [0, 0, 24], sizes = [2, 8, 8], strides = [1, 1, 1]} : vector<2x8x32xbf16> to vector<2x8x8xbf16>
    %943 = vector.extract_strided_slice %869 {offsets = [0, 0, 24], sizes = [2, 8, 8], strides = [1, 1, 1]} : vector<2x8x32xbf16> to vector<2x8x8xbf16>
    "tpu.trace_start"() <{level = 10 : i32, message = "bqd,bkd->bqk"}> : () -> ()
    %cst_366 = arith.constant dense<0.000000e+00> : vector<2x8x8xf32>
    %944 = tpu.matmul %942, %943, %cst_366 {dimension_numbers = #tpu.dot_dimension_numbers<[2], [2], [1], [1], [0, 0, 0, 1, 1, 1], [0], [0]>} : vector<2x8x8xbf16>, vector<2x8x8xbf16>, vector<2x8x8xf32> -> vector<2x8x8xf32>
    "tpu.trace_stop"() : () -> ()
    %945 = arith.addf %944, %4 : vector<2x8x8xf32>
    %cst_367 = arith.constant dense<0xFF800000> : vector<2x8xf32>
    %946 = vector.multi_reduction <maximumf>, %945, %cst_367 [2] : vector<2x8x8xf32> to vector<2x8xf32>
    %947 = vector.shape_cast %946 : vector<2x8xf32> to vector<2x8x1xf32>
    %948 = vector.broadcast %947 : vector<2x8x1xf32> to vector<2x8x8xf32>
    %949 = arith.subf %945, %948 : vector<2x8x8xf32>
    %950 = math.exp %949 : vector<2x8x8xf32>
    %cst_368 = arith.constant dense<0.000000e+00> : vector<2x8xf32>
    %951 = vector.multi_reduction <add>, %950, %cst_368 [2] : vector<2x8x8xf32> to vector<2x8xf32>
    %952 = vector.shape_cast %951 : vector<2x8xf32> to vector<2x8x1xf32>
    %953 = tpu.reciprocal %952 {approx = true} : vector<2x8x1xf32> -> vector<2x8x1xf32>
    %954 = vector.broadcast %953 : vector<2x8x1xf32> to vector<2x8x8xf32>
    %955 = arith.mulf %950, %954 : vector<2x8x8xf32>
    %956 = arith.truncf %955 : vector<2x8x8xf32> to vector<2x8x8xbf16>
    %957 = vector.extract_strided_slice %871 {offsets = [0, 0, 24], sizes = [2, 8, 8], strides = [1, 1, 1]} : vector<2x8x32xbf16> to vector<2x8x8xbf16>
    "tpu.trace_start"() <{level = 10 : i32, message = "bqk,bkd->bqd"}> : () -> ()
    %cst_369 = arith.constant dense<0.000000e+00> : vector<2x8x8xf32>
    %958 = tpu.matmul %956, %957, %cst_369 {dimension_numbers = #tpu.dot_dimension_numbers<[2], [1], [1], [2], [0, 0, 0, 1, 1, 2], [0], [0]>} : vector<2x8x8xbf16>, vector<2x8x8xbf16>, vector<2x8x8xf32> -> vector<2x8x8xf32>
    "tpu.trace_stop"() : () -> ()
    %959 = vector.shape_cast %958 : vector<2x8x8xf32> to vector<16x8xf32>
    %960 = arith.truncf %959 : vector<16x8xf32> to vector<16x8xbf16>
    %c7_370 = arith.constant 7 : index
    %c0_371 = arith.constant 0 : index
    %c0_372 = arith.constant 0 : index
    %961 = vector.load %arg14[%c7_370, %c0_371, %c0_372] : memref<8x8x32xbf16, #tpu.memory_space<vmem>>, vector<1x8x32xbf16>
    %962 = vector.shape_cast %961 : vector<1x8x32xbf16> to vector<8x32xbf16>
    %cst_373 = arith.constant dense<0.000000e+00> : vector<16x32xf32>
    %963 = tpu.matmul %960, %962, %cst_373 {dimension_numbers = #tpu.dot_dimension_numbers<[1], [0], [0], [1], [0, 0, 1, 1], [], []>} : vector<16x8xbf16>, vector<8x32xbf16>, vector<16x32xf32> -> vector<16x32xf32>
    %964 = arith.addf %941, %963 : vector<16x32xf32>
    %965 = vector.broadcast %856 : vector<1x32xf32> to vector<16x32xf32>
    %966 = arith.addf %964, %965 : vector<16x32xf32>
    %967 = arith.addf %827, %966 : vector<16x32xf32>
    %c22 = arith.constant 22 : index
    %c0_374 = arith.constant 0 : index
    %968 = vector.load %arg9[%c22, %c0_374] : memref<28x96xf32, #tpu.memory_space<vmem>>, vector<1x32xf32>
    %c23 = arith.constant 23 : index
    %c0_375 = arith.constant 0 : index
    %969 = vector.load %arg9[%c23, %c0_375] : memref<28x96xf32, #tpu.memory_space<vmem>>, vector<1x32xf32>
    %cst_376 = arith.constant dense<0.000000e+00> : vector<16xf32>
    %970 = vector.multi_reduction <add>, %967, %cst_376 [1] : vector<16x32xf32> to vector<16xf32>
    %971 = vector.shape_cast %970 : vector<16xf32> to vector<16x1xf32>
    %cst_377 = arith.constant 3.200000e+01 : f32
    %972 = vector.broadcast %cst_377 : f32 to vector<16x1xf32>
    %973 = arith.divf %971, %972 : vector<16x1xf32>
    %974 = vector.broadcast %973 : vector<16x1xf32> to vector<16x32xf32>
    %975 = arith.subf %967, %974 : vector<16x32xf32>
    %976 = arith.mulf %975, %975 : vector<16x32xf32>
    %cst_378 = arith.constant dense<0.000000e+00> : vector<16xf32>
    %977 = vector.multi_reduction <add>, %976, %cst_378 [1] : vector<16x32xf32> to vector<16xf32>
    %978 = vector.shape_cast %977 : vector<16xf32> to vector<16x1xf32>
    %cst_379 = arith.constant 0.0322580636 : f32
    %979 = vector.broadcast %cst_379 : f32 to vector<16x1xf32>
    %980 = arith.mulf %978, %979 : vector<16x1xf32>
    %981 = vector.broadcast %968 : vector<1x32xf32> to vector<16x32xf32>
    %982 = arith.mulf %981, %975 : vector<16x32xf32>
    %983 = math.sqrt %980 : vector<16x1xf32>
    %cst_380 = arith.constant 9.99999997E-7 : f32
    %984 = vector.broadcast %cst_380 : f32 to vector<16x1xf32>
    %985 = arith.addf %983, %984 : vector<16x1xf32>
    %986 = vector.broadcast %985 : vector<16x1xf32> to vector<16x32xf32>
    %987 = arith.divf %982, %986 : vector<16x32xf32>
    %988 = vector.broadcast %969 : vector<1x32xf32> to vector<16x32xf32>
    %989 = arith.addf %987, %988 : vector<16x32xf32>
    %c1_381 = arith.constant 1 : index
    %c0_382 = arith.constant 0 : index
    %c0_383 = arith.constant 0 : index
    %990 = vector.load %arg15[%c1_381, %c0_382, %c0_383] : memref<2x32x64xbf16, #tpu.memory_space<vmem>>, vector<1x32x64xbf16>
    %991 = vector.shape_cast %990 : vector<1x32x64xbf16> to vector<32x64xbf16>
    %c24 = arith.constant 24 : index
    %c0_384 = arith.constant 0 : index
    %992 = vector.load %arg9[%c24, %c0_384] : memref<28x96xf32, #tpu.memory_space<vmem>>, vector<1x64xf32>
    %c1_385 = arith.constant 1 : index
    %c0_386 = arith.constant 0 : index
    %c0_387 = arith.constant 0 : index
    %993 = vector.load %arg16[%c1_385, %c0_386, %c0_387] : memref<2x64x32xbf16, #tpu.memory_space<vmem>>, vector<1x64x32xbf16>
    %994 = vector.shape_cast %993 : vector<1x64x32xbf16> to vector<64x32xbf16>
    %c25 = arith.constant 25 : index
    %c0_388 = arith.constant 0 : index
    %995 = vector.load %arg9[%c25, %c0_388] : memref<28x96xf32, #tpu.memory_space<vmem>>, vector<1x32xf32>
    %996 = arith.truncf %989 : vector<16x32xf32> to vector<16x32xbf16>
    %cst_389 = arith.constant dense<0.000000e+00> : vector<16x64xf32>
    %997 = tpu.matmul %996, %991, %cst_389 {dimension_numbers = #tpu.dot_dimension_numbers<[1], [0], [0], [1], [0, 0, 1, 1], [], []>} : vector<16x32xbf16>, vector<32x64xbf16>, vector<16x64xf32> -> vector<16x64xf32>
    %998 = vector.broadcast %992 : vector<1x64xf32> to vector<16x64xf32>
    %999 = arith.addf %997, %998 : vector<16x64xf32>
    %cst_390 = arith.constant 0.000000e+00 : f32
    %1000 = vector.broadcast %cst_390 : f32 to vector<16x64xf32>
    %1001 = arith.maximumf %999, %1000 : vector<16x64xf32>
    %1002 = arith.truncf %1001 : vector<16x64xf32> to vector<16x64xbf16>
    %cst_391 = arith.constant dense<0.000000e+00> : vector<16x32xf32>
    %1003 = tpu.matmul %1002, %994, %cst_391 {dimension_numbers = #tpu.dot_dimension_numbers<[1], [0], [0], [1], [0, 0, 1, 1], [], []>} : vector<16x64xbf16>, vector<64x32xbf16>, vector<16x32xf32> -> vector<16x32xf32>
    %1004 = vector.broadcast %995 : vector<1x32xf32> to vector<16x32xf32>
    %1005 = arith.addf %1003, %1004 : vector<16x32xf32>
    %1006 = arith.addf %967, %1005 : vector<16x32xf32>
    %c26 = arith.constant 26 : index
    %c0_392 = arith.constant 0 : index
    %1007 = vector.load %arg9[%c26, %c0_392] : memref<28x96xf32, #tpu.memory_space<vmem>>, vector<1x32xf32>
    %c27 = arith.constant 27 : index
    %c0_393 = arith.constant 0 : index
    %1008 = vector.load %arg9[%c27, %c0_393] : memref<28x96xf32, #tpu.memory_space<vmem>>, vector<1x32xf32>
    %cst_394 = arith.constant dense<0.000000e+00> : vector<16xf32>
    %1009 = vector.multi_reduction <add>, %1006, %cst_394 [1] : vector<16x32xf32> to vector<16xf32>
    %1010 = vector.shape_cast %1009 : vector<16xf32> to vector<16x1xf32>
    %cst_395 = arith.constant 3.200000e+01 : f32
    %1011 = vector.broadcast %cst_395 : f32 to vector<16x1xf32>
    %1012 = arith.divf %1010, %1011 : vector<16x1xf32>
    %1013 = vector.broadcast %1012 : vector<16x1xf32> to vector<16x32xf32>
    %1014 = arith.subf %1006, %1013 : vector<16x32xf32>
    %1015 = arith.mulf %1014, %1014 : vector<16x32xf32>
    %cst_396 = arith.constant dense<0.000000e+00> : vector<16xf32>
    %1016 = vector.multi_reduction <add>, %1015, %cst_396 [1] : vector<16x32xf32> to vector<16xf32>
    %1017 = vector.shape_cast %1016 : vector<16xf32> to vector<16x1xf32>
    %cst_397 = arith.constant 0.0322580636 : f32
    %1018 = vector.broadcast %cst_397 : f32 to vector<16x1xf32>
    %1019 = arith.mulf %1017, %1018 : vector<16x1xf32>
    %1020 = vector.broadcast %1007 : vector<1x32xf32> to vector<16x32xf32>
    %1021 = arith.mulf %1020, %1014 : vector<16x32xf32>
    %1022 = math.sqrt %1019 : vector<16x1xf32>
    %cst_398 = arith.constant 9.99999997E-7 : f32
    %1023 = vector.broadcast %cst_398 : f32 to vector<16x1xf32>
    %1024 = arith.addf %1022, %1023 : vector<16x1xf32>
    %1025 = vector.broadcast %1024 : vector<16x1xf32> to vector<16x32xf32>
    %1026 = arith.divf %1021, %1025 : vector<16x32xf32>
    %1027 = vector.broadcast %1008 : vector<1x32xf32> to vector<16x32xf32>
    %1028 = arith.addf %1026, %1027 : vector<16x32xf32>
    %c0_399 = arith.constant 0 : index
    %c0_400 = arith.constant 0 : index
    %1029 = vector.load %arg17[%c0_399, %c0_400] : memref<16x32xf32, #tpu.memory_space<vmem>>, vector<16x32xf32>
    tpu.vector_store %arg17[%c0_399, %c0_400], %1028 {strides = array<i32>} : memref<16x32xf32, #tpu.memory_space<vmem>>, vector<16x32xf32>,
    return
  }
}

</mosaic_0001>

<bundles_post_ra>
// kernel: transformer_forward.1
= control target key start
LH: loop header
LB: loop body
LE: loop exit
PB: predicated region body
PF: predicated region fallthrough
CT: control target
= control target key end

     0   :  { %s7442_s0 = inlined_call_operand.vmem [shape: f32[16,32], index: 0, kind: input, shape index: {}]   ;;  %s7443_s1 = inlined_call_operand.vmem [shape: f32[16,32], index: 1, kind: input, shape index: {}]   ;;  %s7444_s2 = inlined_call_operand.vmem [shape: f32[2,1,8], index: 2, kind: input, shape index: {}]   ;;  %s7445_s3 = inlined_call_operand.vmem [shape: f32[2,8,8], index: 3, kind: input, shape index: {}]   ;;  %s7446_s4 = inlined_call_operand.vmem [shape: f32[18,96], index: 4, kind: input, shape index: {}]   ;;  %s7447_s5 = inlined_call_operand.vmem [shape: bf16[2,32,96], index: 5, kind: input, shape index: {}]   ;;  %s7448_s6 = inlined_call_operand.vmem [shape: bf16[8,8,32], index: 6, kind: input, shape index: {}]   ;;  %s7449_s7 = inlined_call_operand.vmem [shape: bf16[2,32,64], index: 7, kind: input, shape index: {}]   ;;  %s7450_s8 = inlined_call_operand.vmem [shape: bf16[2,64,32], index: 8, kind: input, shape index: {}]   ;;  %s7451_s9 = inlined_call_operand.vmem [shape: f32[28,96], index: 9, kind: input, shape index: {}]   ;;  %s7452_s10 = inlined_call_operand.vmem [shape: bf16[2,32,96], index: 10, kind: input, shape index: {}]   ;;  %s7453_s11 = inlined_call_operand.vmem [shape: bf16[8,8,32], index: 11, kind: input, shape index: {}]   ;;  %s7454_s12 = inlined_call_operand.vmem [shape: bf16[2,32,32], index: 12, kind: input, shape index: {}]   ;;  %s7455_s13 = inlined_call_operand.vmem [shape: bf16[2,32,64], index: 13, kind: input, shape index: {}]   ;;  %s7456_s14 = inlined_call_operand.vmem [shape: bf16[8,8,32], index: 14, kind: input, shape index: {}]   ;;  %s7457_s15 = inlined_call_operand.vmem [shape: bf16[2,32,64], index: 15, kind: input, shape index: {}]   ;;  %s7458_s16 = inlined_call_operand.vmem [shape: bf16[2,64,32], index: 16, kind: input, shape index: {}]   ;;  %s7459_s17 = inlined_call_operand.hbm [shape: f32[16,32], index: 17, kind: output, shape index: {}]  }
   0x1   :  { %7478 = sst [smem:[#allocation5_spill]] %s7442_s0 }
   0x2   :  { %7479 = sst [smem:[#allocation6_spill]] %s7443_s1 }
   0x3   :  { %s7480_s26 = sld [smem:[#allocation5_spill]]  ;;  %vm72_vm0 = vcmask 261120  }
   0x9   :  { %v5994_v0 = vld [vmem:[%s7480_s26] sm:$0xff]  ;;  %v5999_v1 = vld [vmem:[%s7480_s26 + $0x8] sm:$0xff] }
   0xa   :  { %v73_v2 = vsel %vm72_vm0, %v5994_v0, 0.0  ;;  %v76_v3 = vsel %vm72_vm0, %v5999_v1, 0.0 }
   0xb   :  { %74 = vadd.xlane.f32.xlu0 %v73_v2 }
  0x13   :  { %77 = vadd.xlane.f32.xlu0 %v76_v3 }
  0x14   :  { %22 = vsyncpa [#allocation3], 0  ;;  %v5886_v4 = vmov 32.0   ;;  %v5458_v21 = vld [vmem:[%s7447_s5 + $0x8] sm:$0xff]  ;;  %v5457_v23 = vld [vmem:[%s7447_s5] sm:$0xff]  ;;  %s7474_s24 = smov 96  }
  0x15   :  { %5560 = vrcp.f32 %v5886_v4  ;;  %191 = vmatpush.bf16.msra.mxu0 %v5458_v21  ;;  %v5512_v58 = vld [vmem:[%s7446_s4] ss:$0 sm:$0xff]  ;;  %s7472_s25 = smov 88   ;;  %s7476_s26 = smov 120   ;;  %vm206_vm14 = vcmask 64512   ;;  %vm279_vm15 = vcmask 1043456  }
  0x16   :  { %s5890_s27 = smov 56   ;;  %s7470_s0 = smov 80  }
  0x17   :  { %s5892_s19 = smov 64   ;;  %s5893_s1 = smov 112  }
  0x18   :  { %s7468_s20 = smov 48   ;;  %s7466_s21 = smov 72  }
  0x19   :  { %192 = vmatpush.bf16.msra.mxu0 %v5457_v23  ;;  %s7464_s28 = smov 104   ;;  %s7462_s18 = smov 40  }
  0x1a   :  { %s7482_s22 = smov 48   ;;  %s7483_s23 = smov 72  }
  0x1b   :  { %v5561_v5 = vpop.eup %5560  ;;  %s7484_s29 = smov 104   ;;  %s7485_s30 = smov 40  }
  0x1c   :  { %v80_v6 = vmul.f32 32.0, %v5561_v5  ;;  %vm84_vm1 = vweird.f32 %v5561_v5 }
  0x1e   :  { %v81_v7 = vsub.f32 1.0, %v80_v6 }
  0x20   :  { %v82_v8 = vmul.f32 %v5561_v5, %v81_v7 }
  0x22   :  { %v83_v9 = vadd.f32 %v5561_v5, %v82_v8 }
  0x24   :  { %v6005_v10 = vsel %vm84_vm1, %v5561_v5, %v83_v9 }
  0x7e   :  { %v75_v11 = vpop.xlane.xlu0 %74 }
  0x7f   :  { %v86_v12 = vmul.f32 %v6005_v10, %v75_v11  ;;  %v5513_v11 = vld [vmem:[%s7446_s4 + $0x1] ss:$0 sm:$0xff] }
  0x81   :  { %v6009_v13 = vsub.f32 %v5994_v0, %v86_v12 }
  0x83   :  { %v90_v14 = vmul.f32 %v6009_v13, %v6009_v13  ;;  %v101_v4 = vmul.f32 %v5512_v58, %v6009_v13  ;;  %v5514_v13 = vld [vmem:[%s7446_s4 + $0x2] ss:$0 sm:$0xff] }
  0x85   :  { %v92_v15 = vsel %vm72_vm0, %v90_v14, 0.0 }
  0x86   :  { %93 = vadd.xlane.f32.xlu1 %v92_v15  ;;  %v78_v16 = vpop.xlane.xlu0 %77 }
  0x87   :  { %v87_v17 = vmul.f32 %v6005_v10, %v78_v16 }
  0x89   :  { %v6016_v18 = vsub.f32 %v5999_v1, %v87_v17 }
  0x8b   :  { %v91_v19 = vmul.f32 %v6016_v18, %v6016_v18  ;;  %v102_v7 = vmul.f32 %v5512_v58, %v6016_v18 }
  0x8d   :  { %v95_v20 = vsel %vm72_vm0, %v91_v19, 0.0 }
  0x8e   :  { %96 = vadd.xlane.f32.xlu1 %v95_v20 }
  0xf9   :  { %v94_v22 = vpop.xlane.xlu1 %93 }
  0xfa   :  { %v98_v24 = vmul.f32 0.032258064, %v94_v22 }
  0xfc   :  { %5562 = vrsqrt.f32 %v98_v24  ;;  %vm110_vm2 = vcmp.eq.f32.partialorder %v98_v24, inf  ;;  %v113_v37 = vand.u32 2147483648, %v98_v24  ;;  %vm112_vm3 = vcmp.eq.f32.partialorder %v98_v24, 0.0 }
 0x101   :  { %v97_v25 = vpop.xlane.xlu1 %96 }
 0x102   :  { %v5563_v26 = vpop.eup %5562  ;;  %v99_v27 = vmul.f32 0.032258064, %v97_v25 }
 0x103   :  { %v104_v28 = vmul.f32 %v5563_v26, %v98_v24 }
 0x104   :  { %5564 = vrsqrt.f32 %v99_v27  ;;  %vm122_vm4 = vcmp.eq.f32.partialorder %v99_v27, inf  ;;  %v125_v45 = vand.u32 2147483648, %v99_v27  ;;  %vm124_vm5 = vcmp.eq.f32.partialorder %v99_v27, 0.0 }
 0x105   :  { %v105_v29 = vmul.f32 %v5563_v26, %v104_v28 }
 0x107   :  { %v106_v30 = vmul.f32 0.5, %v105_v29 }
 0x109   :  { %v107_v31 = vsub.f32 1.5, %v106_v30 }
 0x10a   :  { %v5565_v32 = vpop.eup %5564 }
 0x10b   :  { %v108_v33 = vmul.f32 %v5563_v26, %v107_v31  ;;  %v116_v34 = vmul.f32 %v5565_v32, %v99_v27 }
 0x10d   :  { %v109_v35 = vmul.f32 %v108_v33, %v98_v24  ;;  %v117_v36 = vmul.f32 %v5565_v32, %v116_v34 }
 0x10f   :  { %v111_v38 = vsel %vm110_vm2, %v98_v24, %v109_v35  ;;  %v118_v39 = vmul.f32 0.5, %v117_v36 }
 0x110   :  { %v114_v40 = vsel %vm112_vm3, %v113_v37, %v111_v38 }
 0x111   :  { %v119_v41 = vsub.f32 1.5, %v118_v39  ;;  %v127_v42 = vadd.f32 1e-06, %v114_v40  ;;  %v6069_v40 = vld [vmem:[%s7444_s2] ss:$0 sm:$0xff] }
 0x113   :  { %v120_v43 = vmul.f32 %v5565_v32, %v119_v41  ;;  %5566 = vrcp.f32 %v127_v42  ;;  %v140_v55 = vand.u32 2147483648, %v127_v42  ;;  %vm134_vm7 = vweird.f32 %v127_v42 }
 0x114   :  { %v138_v56 = vand.u32 2147483647, %v127_v42 }
 0x115   :  { %v121_v44 = vmul.f32 %v120_v43, %v99_v27  ;;  %v141_v61 = vor.u32 1.1754944e-38, %v140_v55 }
 0x116   :  { %vm139_vm9 = vcmp.eq.f32.partialorder %v138_v56, 8.507059e+37 }
 0x117   :  { %v123_v46 = vsel %vm122_vm4, %v99_v27, %v121_v44 }
 0x118   :  { %v126_v47 = vsel %vm124_vm5, %v125_v45, %v123_v46 }
 0x119   :  { %v5567_v48 = vpop.eup %5566  ;;  %v128_v49 = vadd.f32 1e-06, %v126_v47 }
 0x11a   :  { %v130_v50 = vmul.f32 %v5567_v48, %v127_v42  ;;  %vm135_vm6 = vweird.f32 %v5567_v48 }
 0x11b   :  { %5568 = vrcp.f32 %v128_v49  ;;  %vm136_vm8 = vmor %vm134_vm7, %vm135_vm6  ;;  %v155_v62 = vand.u32 2147483648, %v128_v49  ;;  %v153_v2 = vand.u32 2147483647, %v128_v49  ;;  %vm149_vm11 = vweird.f32 %v128_v49 }
 0x11c   :  { %v131_v51 = vsub.f32 1.0, %v130_v50 }
 0x11d   :  { %v156_v6 = vor.u32 1.1754944e-38, %v155_v62  ;;  %vm154_vm13 = vcmp.eq.f32.partialorder %v153_v2, 8.507059e+37 }
 0x11e   :  { %v132_v52 = vmul.f32 %v5567_v48, %v131_v51 }
 0x120   :  { %v133_v53 = vadd.f32 %v5567_v48, %v132_v52 }
 0x121   :  { %v5569_v54 = vpop.eup %5568 }
 0x122   :  { %v145_v57 = vmul.f32 %v5569_v54, %v128_v49  ;;  %v137_v59 = vsel %vm136_vm8, %v5567_v48, %v133_v53  ;;  %vm150_vm10 = vweird.f32 %v5569_v54  ;;  %v6080_v49 = vld [vmem:[%s7444_s2 + $0x1] ss:$0 sm:$0xff] }
 0x123   :  { %v142_v3 = vsel %vm139_vm9, %v141_v61, %v137_v59  ;;  %vm151_vm12 = vmor %vm149_vm11, %vm150_vm10 }
 0x124   :  { %v146_v60 = vsub.f32 1.0, %v145_v57  ;;  %v143_v8 = vmul.f32 %v142_v3, %v101_v4 }
 0x126   :  { %v147_v63 = vmul.f32 %v5569_v54, %v146_v60  ;;  %v160_v15 = vadd.f32 %v5513_v11, %v143_v8 }
 0x128   :  { %v148_v5 = vadd.f32 %v5569_v54, %v147_v63 }
 0x12a   :  { %v152_v9 = vsel %vm151_vm12, %v5569_v54, %v148_v5 }
 0x12b   :  { %v157_v12 = vsel %vm154_vm13, %v156_v6, %v152_v9  ;;  %vm910_vm13 = vcmask 523264  }
 0x12c   :  { %v158_v14 = vmul.f32 %v157_v12, %v102_v7 }
 0x12e   :  { %v161_v16 = vadd.f32 %v5513_v11, %v158_v14 }
 0x130   :  { %v168_v17 = vpack.c.bf16 %v161_v16, %v160_v15 }
 0x132   :  { %5108 = vmatmul.msk.bf16.vlgmr.msra.gmra.mxu0 %vm72_vm0, %v168_v17 }
 0x1af   :  { %v194_v19 = vpop.f32.mrf.mxu0 }
 0x1b0   :  { %v195_v18 = vadd.f32 %v5514_v13, %v194_v19 }
 0x1b2   :  { %v199_v20 = vpack.c.bf16 %v195_v18, %v195_v18 }
 0x1b4   :  { %v202_v21 = vunpack.c.l.b16 %v199_v20 }
 0x1b6   :  { %v6039_v22 = vpack.c.b16 %v202_v21, %v202_v21 }
 0x1b7   :  { %v196_v23 = vpop.f32.mrf.mxu0 }
 0x1b8   :  { %v197_v24 = vadd.f32 %v5514_v13, %v196_v23  ;;  %204 = vrot.lane.b32.xlu0 %v6039_v22, %s7474_s24  ;;  %321 = vrot.lane.b32.xlu2 %v6039_v22, %s7472_s25 }
 0x1ba   :  { %v200_v25 = vpack.c.bf16 %v197_v24, %v197_v24 }
 0x1bc   :  { %v227_v26 = vunpack.c.l.b16 %v200_v25 }
 0x1be   :  { %v6045_v27 = vpack.c.b16 %v227_v26, %v227_v26 }
 0x1c0   :  { %229 = vrot.lane.b32.xlu1 %v6045_v27, %s7474_s24  ;;  %319 = vrot.lane.b32.xlu2 %v6039_v22, %s7476_s26 }
 0x1c8   :  { %389 = vrot.lane.b32.xlu1 %v6039_v22, %s5890_s27  ;;  %344 = vrot.lane.b32.xlu2 %v6045_v27, %s7472_s25 }
 0x1d0   :  { %342 = vrot.lane.b32.xlu2 %v6045_v27, %s7476_s26 }
 0x212   :  { %v322_v28 = vpop.permute.xlu2 %321 }
 0x213   :  { %v327_v29 = vsel %vm206_vm14, %v322_v28, 0 }
 0x214   :  { %336 = vmatpush.bf16.xpose.msrb.mxu0 %v327_v29 }
 0x21a   :  { %v320_v30 = vpop.permute.xlu2 %319 }
 0x21b   :  { %5113 = vmatmul.msk.bf16.vlgmr.msrb.gmra.mxu0 %vm206_vm14, %v320_v30  ;;  %v5117_v30 = vld [vmem:[%s7448_s6 + $0x4] sm:$0xf] }
 0x222   :  { %v345_v31 = vpop.permute.xlu2 %344 }
 0x223   :  { %v350_v34 = vsel %vm206_vm14, %v345_v31, 0  ;;  %v438_v31 = vsel %vm279_vm15, %v5117_v30, 0 }
 0x224   :  { %447 = vmatpush.bf16.msra.mxu0 %v438_v31 }
 0x22a   :  { %v205_v32 = vpop.permute.xlu0 %204  ;;  %v343_v39 = vpop.permute.xlu2 %342 }
 0x22b   :  { %v211_v33 = vsel %vm206_vm14, %v205_v32, 0 }
 0x22c   :  { %220 = vmatpush.bf16.xpose.msra.mxu1 %v211_v33 }
 0x232   :  { %v230_v35 = vpop.permute.xlu1 %229 }
 0x233   :  { %5109 = vmatmul.msk.bf16.vlgmr.msra.gmra.mxu1 %vm206_vm14, %v199_v20  ;;  %v235_v36 = vsel %vm206_vm14, %v230_v35, 0 }
 0x234   :  { %359 = vmatpush.bf16.xpose.msrb.mxu1 %v350_v34  ;;  %244 = vmatpush.bf16.xpose.msra.mxu2 %v235_v36 }
 0x23a   :  { %v390_v37 = vpop.permute.xlu1 %389 }
 0x23b   :  { %5110 = vmatmul.msk.bf16.vlgmr.msra.gmra.mxu2 %vm206_vm14, %v200_v25  ;;  %v395_v38 = vsel %vm279_vm15, %v390_v37, 0 }
 0x23c   :  { %404 = vmatpush.bf16.msrb.mxu2 %v395_v38 }
 0x243   :  { %5114 = vmatmul.msk.bf16.vlgmr.msrb.gmra.mxu1 %vm206_vm14, %v343_v39 }
 0x298   :  { %v338_v41 = vpop.f32.mrf.mxu0 }
 0x299   :  { %v339_v42 = vadd.f32 %v6069_v40, %v338_v41 }
 0x29b   :  { %v365_v43 = vsel %vm206_vm14, %v339_v42, -inf }
 0x29c   :  { %366 = vmax.xlane.f32.xlu2 %v365_v43 }
 0x2a0   :  { %v340_v44 = vpop.f32.mrf.mxu0 }
 0x2b0   :  { %v222_v45 = vpop.f32.mrf.mxu1 }
 0x2b1   :  { %v223_v46 = vadd.f32 %v6069_v40, %v222_v45 }
 0x2b3   :  { %v250_v47 = vsel %vm206_vm14, %v223_v46, -inf }
 0x2b4   :  { %476 = vrot.lane.b32.xlu2 %v6039_v22, %s7470_s0  ;;  %251 = vmax.xlane.f32.xlu1 %v250_v47 }
 0x2b8   :  { %v224_v48 = vpop.f32.mrf.mxu1 }
 0x2be   :  { %v246_v50 = vpop.f32.mrf.mxu2 }
 0x2bf   :  { %v247_v51 = vadd.f32 %v6080_v49, %v246_v50 }
 0x2c0   :  { %v361_v52 = vpop.f32.mrf.mxu1 }
 0x2c1   :  { %v253_v53 = vsel %vm206_vm14, %v247_v51, -inf  ;;  %v362_v56 = vadd.f32 %v6080_v49, %v361_v52 }
 0x2c2   :  { %254 = vmax.xlane.f32.xlu1 %v253_v53 }
 0x2c3   :  { %v368_v57 = vsel %vm206_vm14, %v362_v56, -inf }
 0x2c6   :  { %v248_v54 = vpop.f32.mrf.mxu2 }
 0x2c8   :  { %v363_v55 = vpop.f32.mrf.mxu1 }
 0x2db   :  { %274 = vrot.lane.b32.xlu1 %v6039_v22, %s5892_s19 }
 0x2dd   :  { %369 = vmax.xlane.f32.xlu2 %v368_v57 }
 0x2f5   :  { %296 = vrot.lane.b32.xlu2 %v6045_v27, %s5892_s19 }
 0x2fd   :  { %499 = vrot.lane.b32.xlu2 %v6045_v27, %s7470_s0 }
 0x30f   :  { %v367_v58 = vpop.xlane.xlu2 %366 }
 0x310   :  { %v371_v59 = vsub.f32 %v339_v42, %v367_v58 }
 0x312   :  { %v373_v60 = vmul.f32 1.442695, %v371_v59 }
 0x314   :  { %5570 = vpow2.f32 %v373_v60 }
 0x317   :  { %v477_v61 = vpop.permute.xlu2 %476 }
 0x318   :  { %v482_v62 = vsel %vm206_vm14, %v477_v61, 0  ;;  %v318_v61 = vld [vmem:[%s7448_s6] sm:$0xf] }
 0x319   :  { %491 = vmatpush.bf16.xpose.msra.mxu2 %v482_v62  ;;  %v458_v62 = vsel %vm279_vm15, %v318_v61, 0  ;;  %v5124_v61 = vld [vmem:[%s7448_s6 + $0x8] sm:$0xf] }
 0x31a   :  { %v5571_v63 = vpop.eup %5570  ;;  %467 = vmatpush.bf16.msra.mxu1 %v458_v62  ;;  %v593_v62 = vsel %vm279_vm15, %v5124_v61, 0 }
 0x31b   :  { %v377_v2 = vsel %vm206_vm14, %v5571_v63, 0.0 }
 0x31c   :  { %378 = vadd.xlane.f32.xlu0 %v377_v2 }
 0x327   :  { %v252_v3 = vpop.xlane.xlu1 %251 }
 0x328   :  { %v256_v9 = vsub.f32 %v223_v46, %v252_v3 }
 0x32a   :  { %v258_v11 = vmul.f32 1.442695, %v256_v9 }
 0x330   :  { %474 = vrot.lane.b32.xlu0 %v6039_v22, %s5893_s1 }
 0x335   :  { %v255_v4 = vpop.xlane.xlu1 %254 }
 0x336   :  { %v257_v5 = vsub.f32 %v247_v51, %v255_v4 }
 0x338   :  { %v260_v6 = vmul.f32 1.442695, %v257_v5 }
 0x33a   :  { %5572 = vpow2.f32 %v260_v6 }
 0x33b   :  { %5574 = vpow2.f32 %v258_v11 }
 0x340   :  { %v5573_v7 = vpop.eup %5572 }
 0x341   :  { %v265_v8 = vsel %vm206_vm14, %v5573_v7, 0.0  ;;  %v5575_v13 = vpop.eup %5574 }
 0x342   :  { %266 = vadd.xlane.f32.xlu1 %v265_v8  ;;  %v262_v18 = vsel %vm206_vm14, %v5575_v13, 0.0 }
 0x34d   :  { %v275_v12 = vpop.permute.xlu1 %274 }
 0x34e   :  { %v281_v14 = vsel %vm279_vm15, %v275_v12, 0 }
 0x34f   :  { %290 = vmatpush.bf16.msra.mxu3 %v281_v14 }
 0x350   :  { %v370_v15 = vpop.xlane.xlu2 %369 }
 0x351   :  { %v372_v16 = vsub.f32 %v362_v56, %v370_v15 }
 0x353   :  { %v375_v17 = vmul.f32 1.442695, %v372_v16 }
 0x355   :  { %5576 = vpow2.f32 %v375_v17 }
 0x358   :  { %v297_v19 = vpop.permute.xlu2 %296 }
 0x359   :  { %v302_v20 = vsel %vm279_vm15, %v297_v19, 0 }
 0x35a   :  { %263 = vadd.xlane.f32.xlu0 %v262_v18  ;;  %311 = vmatpush.bf16.msrb.mxu3 %v302_v20 }
 0x35b   :  { %497 = vrot.lane.b32.xlu1 %v6045_v27, %s5893_s1  ;;  %v5577_v21 = vpop.eup %5576 }
 0x35c   :  { %v380_v23 = vsel %vm206_vm14, %v5577_v21, 0.0 }
 0x360   :  { %v500_v44 = vpop.permute.xlu2 %499 }
 0x361   :  { %v505_v48 = vsel %vm206_vm14, %v500_v44, 0 }
 0x362   :  { %381 = vadd.xlane.f32.xlu0 %v380_v23 }
 0x363   :  { %544 = vrot.lane.b32.xlu1 %v6039_v22, %s7468_s20 }
 0x36b   :  { %613 = vrot.lane.b32.xlu1 %v6039_v22, %s7466_s21 }
 0x373   :  { %636 = vrot.lane.b32.xlu1 %v6045_v27, %s7466_s21 }
 0x376   :  { %410 = vrot.lane.b32.xlu0 %v6045_v27, %s5890_s27 }
 0x38f   :  { %v379_v24 = vpop.xlane.xlu0 %378 }
 0x390   :  { %5578 = vrcp.f32 %v379_v24 }
 0x396   :  { %v5579_v25 = vpop.eup %5578 }
 0x397   :  { %v385_v26 = vmul.f32 %v5579_v25, %v5571_v63 }
 0x399   :  { %v387_v28 = vpack.c.bf16 %v385_v26, %v385_v26 }
 0x39b   :  { %5115 = vmatmul.msk.bf16.vlgmr.msrb.gmra.mxu2 %vm206_vm14, %v387_v28 }
 0x39c   :  { %602 = vmatpush.bf16.msrb.mxu2 %v593_v62 }
 0x3a2   :  { %v475_v29 = vpop.permute.xlu0 %474 }
 0x3ab   :  { %5120 = vmatmul.msk.bf16.vlgmr.msra.gmra.mxu2 %vm206_vm14, %v475_v29 }
 0x3b5   :  { %v267_v32 = vpop.xlane.xlu1 %266 }
 0x3cd   :  { %v264_v33 = vpop.xlane.xlu0 %263  ;;  %v498_v34 = vpop.permute.xlu1 %497 }
 0x3ce   :  { %5580 = vrcp.f32 %v264_v33 }
 0x3cf   :  { %5582 = vrcp.f32 %v267_v32 }
 0x3d4   :  { %v5581_v35 = vpop.eup %5580 }
 0x3d5   :  { %v545_v36 = vpop.permute.xlu1 %544  ;;  %v270_v37 = vmul.f32 %v5581_v35, %v5575_v13  ;;  %v5583_v41 = vpop.eup %5582 }
 0x3d6   :  { %v550_v38 = vsel %vm279_vm15, %v545_v36, 0  ;;  %v382_v42 = vpop.xlane.xlu0 %381  ;;  %v271_v43 = vmul.f32 %v5583_v41, %v5573_v7 }
 0x3d7   :  { %559 = vmatpush.bf16.msrb.mxu0 %v550_v38  ;;  %v272_v39 = vpack.c.bf16 %v270_v37, %v270_v37  ;;  %5584 = vrcp.f32 %v382_v42 }
 0x3d8   :  { %v273_v45 = vpack.c.bf16 %v271_v43, %v271_v43 }
 0x3d9   :  { %5111 = vmatmul.msk.bf16.vlgmr.msra.gmra.mxu3 %vm206_vm14, %v272_v39 }
 0x3dd   :  { %v5585_v50 = vpop.eup %5584  ;;  %v614_v52 = vpop.permute.xlu1 %613 }
 0x3de   :  { %v386_v51 = vmul.f32 %v5585_v50, %v5577_v21  ;;  %v619_v54 = vsel %vm206_vm14, %v614_v52, 0 }
 0x3e0   :  { %v388_v53 = vpack.c.bf16 %v386_v51, %v386_v51 }
 0x3e5   :  { %v637_v6 = vpop.permute.xlu1 %636 }
 0x3e6   :  { %v642_v9 = vsel %vm206_vm14, %v637_v6, 0 }
 0x3e8   :  { %v411_v46 = vpop.permute.xlu0 %410 }
 0x3e9   :  { %v416_v47 = vsel %vm279_vm15, %v411_v46, 0  ;;  %5112 = vmatmul.msk.bf16.vlgmr.msrb.gmra.mxu3 %vm206_vm14, %v273_v45 }
 0x3ea   :  { %425 = vmatpush.bf16.msra.mxu3 %v416_v47 }
 0x3ee   :  { %514 = vmatpush.bf16.xpose.msrb.mxu3 %v505_v48 }
 0x3f9   :  { %5116 = vmatmul.msk.bf16.vlgmr.msra.gmra.mxu3 %vm206_vm14, %v388_v53 }
 0x3fa   :  { %628 = vmatpush.bf16.xpose.msra.mxu3 %v619_v54 }
 0x409   :  { %5121 = vmatmul.msk.bf16.vlgmr.msrb.gmra.mxu3 %vm206_vm14, %v498_v34 }
 0x41e   :  { %v406_v55 = vpop.f32.mrf.mxu2 }
 0x426   :  { %v408_v56 = vpop.f32.mrf.mxu2 }
 0x42e   :  { %v493_v57 = vpop.f32.mrf.mxu2 }
 0x42f   :  { %v494_v58 = vadd.f32 %v6069_v40, %v493_v57 }
 0x431   :  { %v520_v59 = vsel %vm206_vm14, %v494_v58, -inf }
 0x432   :  { %521 = vmax.xlane.f32.xlu0 %v520_v59 }
 0x436   :  { %v495_v60 = vpop.f32.mrf.mxu2 }
 0x446   :  { %611 = vrot.lane.b32.xlu0 %v6039_v22, %s7464_s28 }
 0x45c   :  { %v292_v63 = vpop.f32.mrf.mxu3 }
 0x464   :  { %v294_v2 = vpop.f32.mrf.mxu3 }
 0x46c   :  { %v313_v3 = vpop.f32.mrf.mxu3 }
 0x46d   :  { %v317_v4 = vpack.c.bf16 %v313_v3, %v292_v63 }
 0x46f   :  { %5119 = vmatmul.msk.bf16.vlgmr.msra.gmra.mxu1 %vm206_vm14, %v317_v4 }
 0x474   :  { %v315_v5 = vpop.f32.mrf.mxu3 }
 0x47c   :  { %v427_v7 = vpop.f32.mrf.mxu3 }
 0x47d   :  { %v431_v8 = vpack.c.bf16 %v427_v7, %v406_v55 }
 0x47f   :  { %5118 = vmatmul.msk.bf16.vlgmr.msra.gmra.mxu0 %vm206_vm14, %v431_v8 }
 0x480   :  { %651 = vmatpush.bf16.xpose.msra.mxu0 %v642_v9 }
 0x484   :  { %v429_v11 = vpop.f32.mrf.mxu3 }
 0x48c   :  { %v516_v12 = vpop.f32.mrf.mxu3 }
 0x48d   :  { %v517_v14 = vadd.f32 %v6080_v49, %v516_v12 }
 0x48f   :  { %v523_v15 = vsel %vm206_vm14, %v517_v14, -inf }
 0x490   :  { %524 = vmax.xlane.f32.xlu1 %v523_v15 }
 0x494   :  { %v518_v16 = vpop.f32.mrf.mxu3 }
 0x4a5   :  { %v522_v17 = vpop.xlane.xlu0 %521 }
 0x4a6   :  { %v526_v13 = vsub.f32 %v494_v58, %v522_v17 }
 0x4a8   :  { %v528_v19 = vmul.f32 1.442695, %v526_v13 }
 0x4aa   :  { %5586 = vpow2.f32 %v528_v19 }
 0x4b0   :  { %v5587_v18 = vpop.eup %5586 }
 0x4b1   :  { %v532_v20 = vsel %vm206_vm14, %v5587_v18, 0.0 }
 0x4b2   :  { %533 = vadd.xlane.f32.xlu2 %v532_v20 }
 0x4b8   :  { %v612_v21 = vpop.permute.xlu0 %611 }
 0x4b9   :  { %5126 = vmatmul.msk.bf16.vlgmr.msra.gmra.mxu3 %vm206_vm14, %v612_v21 }
 0x4ca   :  { %634 = vrot.lane.b32.xlu2 %v6045_v27, %s7464_s28  ;;  %s7486_s28 = sld [smem:[#allocation6_spill]] }
 0x4d2   :  { %565 = vrot.lane.b32.xlu2 %v6045_v27, %s7468_s20 }
 0x4ec   :  { %v469_v23 = vpop.f32.mrf.mxu1 }
 0x4f4   :  { %v471_v63 = vpop.f32.mrf.mxu1 }
 0x4fc   :  { %v449_v24 = vpop.f32.mrf.mxu0 }
 0x4fd   :  { %v6144_v25 = vadd.f32 %v469_v23, %v449_v24 }
 0x503   :  { %v525_v26 = vpop.xlane.xlu1 %524 }
 0x504   :  { %v527_v28 = vsub.f32 %v517_v14, %v525_v26  ;;  %v6153_v48 = vpop.f32.mrf.mxu0 }
 0x506   :  { %v530_v29 = vmul.f32 1.442695, %v527_v28 }
 0x508   :  { %5588 = vpow2.f32 %v530_v29 }
 0x50e   :  { %v5589_v30 = vpop.eup %5588 }
 0x50f   :  { %v535_v31 = vsel %vm206_vm14, %v5589_v30, 0.0 }
 0x510   :  { %536 = vadd.xlane.f32.xlu0 %v535_v31 }
 0x525   :  { %v534_v32 = vpop.xlane.xlu2 %533 }
 0x526   :  { %5590 = vrcp.f32 %v534_v32  ;;  %v5517_v32 = vld [vmem:[%s7446_s4 + $0x3] ss:$0 sm:$0xff] }
 0x52c   :  { %v5591_v33 = vpop.eup %5590 }
 0x52d   :  { %v540_v34 = vmul.f32 %v5591_v33, %v5587_v18  ;;  %v635_v35 = vpop.permute.xlu2 %634 }
 0x52f   :  { %v542_v36 = vpack.c.bf16 %v540_v34, %v540_v34 }
 0x531   :  { %5122 = vmatmul.msk.bf16.vlgmr.msrb.gmra.mxu0 %vm206_vm14, %v542_v36  ;;  %v472_v36 = vadd.f32 %v471_v63, %v6153_v48 }
 0x535   :  { %v566_v37 = vpop.permute.xlu2 %565 }
 0x536   :  { %v571_v38 = vsel %vm279_vm15, %v566_v37, 0 }
 0x537   :  { %580 = vmatpush.bf16.msrb.mxu1 %v571_v38 }
 0x53c   :  { %v630_v39 = vpop.f32.mrf.mxu3 }
 0x53d   :  { %v631_v41 = vadd.f32 %v6069_v40, %v630_v39 }
 0x53f   :  { %v657_v42 = vsel %vm206_vm14, %v631_v41, -inf }
 0x540   :  { %658 = vmax.xlane.f32.xlu1 %v657_v42 }
 0x541   :  { %5127 = vmatmul.msk.bf16.vlgmr.msra.gmra.mxu0 %vm206_vm14, %v635_v35 }
 0x544   :  { %v632_v43 = vpop.f32.mrf.mxu3 }
 0x583   :  { %v537_v44 = vpop.xlane.xlu0 %536 }
 0x584   :  { %5592 = vrcp.f32 %v537_v44 }
 0x58a   :  { %v5593_v45 = vpop.eup %5592 }
 0x58b   :  { %v541_v46 = vmul.f32 %v5593_v45, %v5589_v30 }
 0x58d   :  { %v543_v47 = vpack.c.bf16 %v541_v46, %v541_v46 }
 0x58f   :  { %5123 = vmatmul.msk.bf16.vlgmr.msrb.gmra.mxu1 %vm206_vm14, %v543_v47 }
 0x5ae   :  { %v561_v50 = vpop.f32.mrf.mxu0 }
 0x5b3   :  { %v659_v51 = vpop.xlane.xlu1 %658 }
 0x5b4   :  { %v663_v52 = vsub.f32 %v631_v41, %v659_v51 }
 0x5b6   :  { %v665_v53 = vmul.f32 1.442695, %v663_v52  ;;  %v563_v54 = vpop.f32.mrf.mxu0 }
 0x5b8   :  { %5594 = vpow2.f32 %v665_v53 }
 0x5be   :  { %v5595_v55 = vpop.eup %5594  ;;  %v653_v56 = vpop.f32.mrf.mxu0 }
 0x5bf   :  { %v654_v57 = vadd.f32 %v6080_v49, %v653_v56  ;;  %v669_v58 = vsel %vm206_vm14, %v5595_v55, 0.0 }
 0x5c0   :  { %670 = vadd.xlane.f32.xlu0 %v669_v58  ;;  %v5459_v58 = vld [vmem:[%s7449_s7] sm:$0xff] }
 0x5c1   :  { %v660_v59 = vsel %vm206_vm14, %v654_v57, -inf }
 0x5c2   :  { %661 = vmax.xlane.f32.xlu2 %v660_v59 }
 0x5c6   :  { %v655_v60 = vpop.f32.mrf.mxu0 }
 0x5d4   :  { %681 = vrot.lane.b32.xlu0 %v6039_v22, %s7462_s18 }
 0x60c   :  { %v582_v49 = vpop.f32.mrf.mxu1 }
 0x60d   :  { %v586_v2 = vpack.c.bf16 %v582_v49, %v561_v50 }
 0x60f   :  { %5125 = vmatmul.msk.bf16.vlgmr.msrb.gmra.mxu2 %vm206_vm14, %v586_v2 }
 0x614   :  { %v584_v3 = vpop.f32.mrf.mxu1 }
 0x633   :  { %v671_v7 = vpop.xlane.xlu0 %670 }
 0x635   :  { %v662_v4 = vpop.xlane.xlu2 %661 }
 0x636   :  { %v664_v5 = vsub.f32 %v654_v57, %v662_v4  ;;  %v5460_v57 = vld [vmem:[%s7449_s7 + $0x8] sm:$0xff] }
 0x637   :  { %874 = vmatpush.bf16.msrb.mxu0 %v5460_v57  ;;  %v5520_v57 = vld [vmem:[%s7446_s4 + $0x6] ss:$0 sm:$0xff] }
 0x638   :  { %v667_v6 = vmul.f32 1.442695, %v664_v5 }
 0x63a   :  { %5596 = vpow2.f32 %v667_v6 }
 0x63b   :  { %5598 = vrcp.f32 %v671_v7  ;;  %875 = vmatpush.bf16.msrb.mxu0 %v5459_v58 }
 0x640   :  { %v5597_v22 = vpop.eup %5596 }
 0x641   :  { %v672_v8 = vsel %vm206_vm14, %v5597_v22, 0.0  ;;  %v5599_v9 = vpop.eup %5598 }
 0x642   :  { %673 = vadd.xlane.f32.xlu1 %v672_v8  ;;  %v677_v11 = vmul.f32 %v5599_v9, %v5595_v55 }
 0x644   :  { %v679_v15 = vpack.c.bf16 %v677_v11, %v677_v11 }
 0x646   :  { %v682_v12 = vpop.permute.xlu0 %681 }
 0x647   :  { %v687_v14 = vsel %vm279_vm15, %v682_v12, 0 }
 0x648   :  { %696 = vmatpush.bf16.msra.mxu1 %v687_v14 }
 0x64b   :  { %5128 = vmatmul.msk.bf16.vlgmr.msra.gmra.mxu1 %vm206_vm14, %v679_v15 }
 0x65b   :  { %702 = vrot.lane.b32.xlu1 %v6045_v27, %s7462_s18  ;;  %v5130_v27 = vld [vmem:[%s7448_s6 + $0xc] sm:$0xf]  ;;  %s7481_s18 = smov 80  }
 0x65c   :  { %v730_v28 = vsel %vm279_vm15, %v5130_v27, 0 }
 0x65d   :  { %739 = vmatpush.bf16.msrb.mxu3 %v730_v28 }
 0x692   :  { %v604_v16 = vpop.f32.mrf.mxu2 }
 0x693   :  { %v609_v17 = vadd.f32 %v604_v16, %v6144_v25 }
 0x69a   :  { %v606_v25 = vpop.f32.mrf.mxu2 }
 0x69b   :  { %v610_v38 = vadd.f32 %v606_v25, %v472_v36 }
 0x6b5   :  { %v674_v13 = vpop.xlane.xlu1 %673 }
 0x6b6   :  { %5600 = vrcp.f32 %v674_v13 }
 0x6bc   :  { %v5601_v18 = vpop.eup %5600 }
 0x6bd   :  { %v678_v20 = vmul.f32 %v5601_v18, %v5597_v22 }
 0x6bf   :  { %v680_v24 = vpack.c.bf16 %v678_v20, %v678_v20 }
 0x6c8   :  { %v698_v19 = vpop.f32.mrf.mxu1 }
 0x6cd   :  { %v703_v21 = vpop.permute.xlu1 %702 }
 0x6ce   :  { %v708_v23 = vsel %vm279_vm15, %v703_v21, 0 }
 0x6cf   :  { %717 = vmatpush.bf16.msra.mxu2 %v708_v23 }
 0x6d0   :  { %v700_v26 = vpop.f32.mrf.mxu1 }
 0x6d2   :  { %5129 = vmatmul.msk.bf16.vlgmr.msra.gmra.mxu2 %vm206_vm14, %v680_v24 }
 0x755   :  { %v719_v29 = vpop.f32.mrf.mxu2 }
 0x756   :  { %v723_v30 = vpack.c.bf16 %v719_v29, %v698_v19 }
 0x758   :  { %5131 = vmatmul.msk.bf16.vlgmr.msrb.gmra.mxu3 %vm206_vm14, %v723_v30  ;;  %v5518_v30 = vld [vmem:[%s7446_s4 + $0x4] ss:$0 sm:$0xff] }
 0x75d   :  { %v721_v31 = vpop.f32.mrf.mxu2 }
 0x7db   :  { %v741_v33 = vpop.f32.mrf.mxu3 }
 0x7dc   :  { %v746_v34 = vadd.f32 %v741_v33, %v609_v17 }
 0x7de   :  { %v749_v35 = vadd.f32 %v5517_v32, %v746_v34 }
 0x7e0   :  { %v6183_v37 = vadd.f32 %v749_v35, %v5994_v0 }
 0x7e2   :  { %v755_v39 = vsel %vm72_vm0, %v6183_v37, 0.0 }
 0x7e3   :  { %756 = vadd.xlane.f32.xlu2 %v755_v39  ;;  %v743_v41 = vpop.f32.mrf.mxu3 }
 0x7e4   :  { %v747_v42 = vadd.f32 %v743_v41, %v610_v38 }
 0x7e6   :  { %v750_v43 = vadd.f32 %v5517_v32, %v747_v42 }
 0x7e8   :  { %v6188_v44 = vadd.f32 %v750_v43, %v5999_v1 }
 0x7ea   :  { %v758_v45 = vsel %vm72_vm0, %v6188_v44, 0.0 }
 0x7eb   :  { %759 = vadd.xlane.f32.xlu2 %v758_v45 }
 0x856   :  { %v757_v46 = vpop.xlane.xlu2 %756 }
 0x857   :  { %v761_v47 = vmul.f32 %v757_v46, %v6005_v10 }
 0x859   :  { %v6194_v0 = vsub.f32 %v6183_v37, %v761_v47  ;;  %v5519_v47 = vld [vmem:[%s7446_s4 + $0x5] ss:$0 sm:$0xff] }
 0x85b   :  { %v765_v48 = vmul.f32 %v6194_v0, %v6194_v0  ;;  %v776_v39 = vmul.f32 %v5518_v30, %v6194_v0  ;;  %v5464_v0 = vld [vmem:[%s7450_s8 + $0x18] sm:$0xff] }
 0x85c   :  { %918 = vmatpush.bf16.msrb.mxu1 %v5464_v0 }
 0x85d   :  { %v767_v50 = vsel %vm72_vm0, %v765_v48, 0.0 }
 0x85e   :  { %768 = vadd.xlane.f32.xlu1 %v767_v50  ;;  %v760_v51 = vpop.xlane.xlu2 %759 }
 0x85f   :  { %v762_v1 = vmul.f32 %v760_v51, %v6005_v10 }
 0x861   :  { %v6201_v52 = vsub.f32 %v6188_v44, %v762_v1 }
 0x863   :  { %v766_v53 = vmul.f32 %v6201_v52, %v6201_v52  ;;  %v777_v43 = vmul.f32 %v5518_v30, %v6201_v52  ;;  %v5463_v52 = vld [vmem:[%s7450_s8 + $0x10] sm:$0xff] }
 0x864   :  { %919 = vmatpush.bf16.msrb.mxu1 %v5463_v52 }
 0x865   :  { %v770_v54 = vsel %vm72_vm0, %v766_v53, 0.0 }
 0x866   :  { %771 = vadd.xlane.f32.xlu0 %v770_v54  ;;  %v5462_v54 = vld [vmem:[%s7450_s8 + $0x8] sm:$0xff] }
 0x868   :  { %920 = vmatpush.bf16.msrb.mxu1 %v5462_v54 }
 0x8d1   :  { %v769_v55 = vpop.xlane.xlu1 %768 }
 0x8d2   :  { %v773_v56 = vmul.f32 0.032258064, %v769_v55  ;;  %v5461_v55 = vld [vmem:[%s7450_s8] sm:$0xff] }
 0x8d3   :  { %921 = vmatpush.bf16.msrb.mxu1 %v5461_v55 }
 0x8d4   :  { %5602 = vrsqrt.f32 %v773_v56  ;;  %vm785_vm1 = vcmp.eq.f32.partialorder %v773_v56, inf  ;;  %v788_v22 = vand.u32 2147483648, %v773_v56  ;;  %vm787_vm2 = vcmp.eq.f32.partialorder %v773_v56, 0.0 }
 0x8d9   :  { %v772_v59 = vpop.xlane.xlu0 %771 }
 0x8da   :  { %v5603_v60 = vpop.eup %5602  ;;  %v774_v61 = vmul.f32 0.032258064, %v772_v59 }
 0x8db   :  { %v779_v62 = vmul.f32 %v5603_v60, %v773_v56 }
 0x8dc   :  { %5604 = vrsqrt.f32 %v774_v61  ;;  %vm797_vm3 = vcmp.eq.f32.partialorder %v774_v61, inf  ;;  %v800_v17 = vand.u32 2147483648, %v774_v61  ;;  %vm799_vm4 = vcmp.eq.f32.partialorder %v774_v61, 0.0 }
 0x8dd   :  { %v780_v63 = vmul.f32 %v5603_v60, %v779_v62 }
 0x8df   :  { %v781_v49 = vmul.f32 0.5, %v780_v63 }
 0x8e1   :  { %v782_v2 = vsub.f32 1.5, %v781_v49  ;;  %v5521_v49 = vld [vmem:[%s7446_s4 + $0x7] ss:$0 sm:$0xff] }
 0x8e2   :  { %v5605_v3 = vpop.eup %5604 }
 0x8e3   :  { %v783_v4 = vmul.f32 %v5603_v60, %v782_v2  ;;  %v791_v5 = vmul.f32 %v5605_v3, %v774_v61 }
 0x8e5   :  { %v784_v6 = vmul.f32 %v783_v4, %v773_v56  ;;  %v792_v7 = vmul.f32 %v5605_v3, %v791_v5 }
 0x8e7   :  { %v786_v8 = vsel %vm785_vm1, %v773_v56, %v784_v6  ;;  %v793_v9 = vmul.f32 0.5, %v792_v7 }
 0x8e8   :  { %v789_v11 = vsel %vm787_vm2, %v788_v22, %v786_v8 }
 0x8e9   :  { %v802_v12 = vadd.f32 1e-06, %v789_v11  ;;  %v794_v14 = vsub.f32 1.5, %v793_v9 }
 0x8eb   :  { %5606 = vrcp.f32 %v802_v12  ;;  %v795_v15 = vmul.f32 %v5605_v3, %v794_v14  ;;  %v815_v28 = vand.u32 2147483648, %v802_v12  ;;  %vm809_vm6 = vweird.f32 %v802_v12 }
 0x8ec   :  { %v813_v25 = vand.u32 2147483647, %v802_v12 }
 0x8ed   :  { %v796_v16 = vmul.f32 %v795_v15, %v774_v61  ;;  %v816_v33 = vor.u32 1.1754944e-38, %v815_v28 }
 0x8ee   :  { %vm814_vm8 = vcmp.eq.f32.partialorder %v813_v25, 8.507059e+37 }
 0x8ef   :  { %v798_v13 = vsel %vm797_vm3, %v774_v61, %v796_v16 }
 0x8f0   :  { %v801_v19 = vsel %vm799_vm4, %v800_v17, %v798_v13 }
 0x8f1   :  { %v5607_v18 = vpop.eup %5606  ;;  %v803_v20 = vadd.f32 1e-06, %v801_v19 }
 0x8f2   :  { %v805_v21 = vmul.f32 %v5607_v18, %v802_v12  ;;  %vm810_vm5 = vweird.f32 %v5607_v18 }
 0x8f3   :  { %5608 = vrcp.f32 %v803_v20  ;;  %vm811_vm7 = vmor %vm809_vm6, %vm810_vm5  ;;  %v830_v34 = vand.u32 2147483648, %v803_v20  ;;  %v828_v36 = vand.u32 2147483647, %v803_v20  ;;  %vm824_vm10 = vweird.f32 %v803_v20 }
 0x8f4   :  { %v806_v23 = vsub.f32 1.0, %v805_v21  ;;  %v5465_v21 = vld [vmem:[%s7447_s5 + $0x10] sm:$0xff] }
 0x8f5   :  { %v831_v42 = vor.u32 1.1754944e-38, %v830_v34  ;;  %vm829_vm12 = vcmp.eq.f32.partialorder %v828_v36, 8.507059e+37 }
 0x8f6   :  { %v807_v24 = vmul.f32 %v5607_v18, %v806_v23 }
 0x8f8   :  { %v808_v26 = vadd.f32 %v5607_v18, %v807_v24 }
 0x8f9   :  { %v5609_v27 = vpop.eup %5608 }
 0x8fa   :  { %v820_v29 = vmul.f32 %v5609_v27, %v803_v20  ;;  %v812_v31 = vsel %vm811_vm7, %v5607_v18, %v808_v26  ;;  %vm825_vm9 = vweird.f32 %v5609_v27  ;;  %v5466_v20 = vld [vmem:[%s7447_s5 + $0x18] sm:$0xff] }
 0x8fb   :  { %v817_v38 = vsel %vm814_vm8, %v816_v33, %v812_v31  ;;  %vm826_vm11 = vmor %vm824_vm10, %vm825_vm9  ;;  %1044 = vmatpush.bf16.msrb.mxu2 %v5466_v20 }
 0x8fc   :  { %v821_v32 = vsub.f32 1.0, %v820_v29  ;;  %v818_v45 = vmul.f32 %v817_v38, %v776_v39 }
 0x8fe   :  { %v822_v35 = vmul.f32 %v5609_v27, %v821_v32  ;;  %v835_v51 = vadd.f32 %v5519_v47, %v818_v45 }
 0x8ff   :  { %1045 = vmatpush.bf16.msrb.mxu2 %v5465_v21 }
 0x900   :  { %v823_v41 = vadd.f32 %v5609_v27, %v822_v35 }
 0x902   :  { %v827_v46 = vsel %vm826_vm11, %v5609_v27, %v823_v41 }
 0x903   :  { %v832_v48 = vsel %vm829_vm12, %v831_v42, %v827_v46 }
 0x904   :  { %v833_v50 = vmul.f32 %v832_v48, %v777_v43 }
 0x906   :  { %v836_v1 = vadd.f32 %v5519_v47, %v833_v50 }
 0x908   :  { %v851_v53 = vpack.c.bf16 %v836_v1, %v835_v51 }
 0x90a   :  { %5140 = vmatmul.msk.bf16.vlgmr.msrb.gmra.mxu0 %vm72_vm0, %v851_v53 }
 0x987   :  { %v877_v56 = vpop.f32.mrf.mxu0 }
 0x988   :  { %v878_v58 = vadd.f32 %v5520_v57, %v877_v56 }
 0x98a   :  { %v882_v61 = vmax.f32 %v878_v58, 0.0  ;;  %v5522_v58 = vld [vmem:[%s7446_s4 + $0x8] ss:$0 sm:$0xff] }
 0x98f   :  { %v879_v59 = vpop.f32.mrf.mxu0 }
 0x990   :  { %v880_v60 = vadd.f32 %v5520_v57, %v879_v59 }
 0x992   :  { %v883_v62 = vmax.f32 %v880_v60, 0.0 }
 0x994   :  { %v884_v63 = vpack.c.bf16 %v883_v62, %v882_v61 }
 0x996   :  { %5157 = vmatmul.msk.bf16.vlgmr.msrb.gmra.mxu1 %vm910_vm13, %v884_v63 }
 0xa13   :  { %v923_v2 = vpop.f32.mrf.mxu1 }
 0xa14   :  { %v924_v3 = vadd.f32 %v5521_v49, %v923_v2 }
 0xa16   :  { %v6241_v4 = vadd.f32 %v924_v3, %v6183_v37 }
 0xa18   :  { %v932_v5 = vsel %vm72_vm0, %v6241_v4, 0.0 }
 0xa19   :  { %933 = vadd.xlane.f32.xlu2 %v932_v5 }
 0xa1b   :  { %v925_v6 = vpop.f32.mrf.mxu1 }
 0xa1c   :  { %v926_v7 = vadd.f32 %v5521_v49, %v925_v6 }
 0xa1e   :  { %v6246_v22 = vadd.f32 %v926_v7, %v6188_v44 }
 0xa20   :  { %v935_v8 = vsel %vm72_vm0, %v6246_v22, 0.0 }
 0xa21   :  { %936 = vadd.xlane.f32.xlu2 %v935_v8 }
 0xa8c   :  { %v934_v9 = vpop.xlane.xlu2 %933 }
 0xa8d   :  { %v938_v11 = vmul.f32 %v934_v9, %v6005_v10 }
 0xa8f   :  { %v6252_v12 = vsub.f32 %v6241_v4, %v938_v11  ;;  %v5523_v11 = vld [vmem:[%s7446_s4 + $0x9] ss:$0 sm:$0xff] }
 0xa91   :  { %v942_v37 = vmul.f32 %v6252_v12, %v6252_v12  ;;  %v953_v3 = vmul.f32 %v5522_v58, %v6252_v12  ;;  %v5524_v12 = vld [vmem:[%s7446_s4 + $0xa] ss:$0 sm:$0xff] }
 0xa93   :  { %v944_v14 = vsel %vm72_vm0, %v942_v37, 0.0 }
 0xa94   :  { %945 = vadd.xlane.f32.xlu2 %v944_v14  ;;  %v937_v15 = vpop.xlane.xlu2 %936 }
 0xa95   :  { %v939_v44 = vmul.f32 %v937_v15, %v6005_v10 }
 0xa97   :  { %v6259_v16 = vsub.f32 %v6246_v22, %v939_v44 }
 0xa99   :  { %v943_v17 = vmul.f32 %v6259_v16, %v6259_v16  ;;  %v954_v7 = vmul.f32 %v5522_v58, %v6259_v16 }
 0xa9b   :  { %v947_v13 = vsel %vm72_vm0, %v943_v17, 0.0 }
 0xa9c   :  { %948 = vadd.xlane.f32.xlu2 %v947_v13 }
 0xb07   :  { %v946_v19 = vpop.xlane.xlu2 %945 }
 0xb08   :  { %v950_v18 = vmul.f32 0.032258064, %v946_v19 }
 0xb0a   :  { %5610 = vrsqrt.f32 %v950_v18  ;;  %vm962_vm1 = vcmp.eq.f32.partialorder %v950_v18, inf  ;;  %v965_v35 = vand.u32 2147483648, %v950_v18  ;;  %vm964_vm2 = vcmp.eq.f32.partialorder %v950_v18, 0.0 }
 0xb0f   :  { %v949_v23 = vpop.xlane.xlu2 %948 }
 0xb10   :  { %v5611_v24 = vpop.eup %5610  ;;  %v951_v26 = vmul.f32 0.032258064, %v949_v23 }
 0xb11   :  { %v956_v27 = vmul.f32 %v5611_v24, %v950_v18 }
 0xb12   :  { %5612 = vrsqrt.f32 %v951_v26  ;;  %vm974_vm3 = vcmp.eq.f32.partialorder %v951_v26, inf  ;;  %v977_v46 = vand.u32 2147483648, %v951_v26  ;;  %vm976_vm4 = vcmp.eq.f32.partialorder %v951_v26, 0.0 }
 0xb13   :  { %v957_v28 = vmul.f32 %v5611_v24, %v956_v27 }
 0xb15   :  { %v958_v25 = vmul.f32 0.5, %v957_v28 }
 0xb17   :  { %v959_v29 = vsub.f32 1.5, %v958_v25 }
 0xb18   :  { %v5613_v30 = vpop.eup %5612 }
 0xb19   :  { %v960_v31 = vmul.f32 %v5611_v24, %v959_v29  ;;  %v968_v32 = vmul.f32 %v5613_v30, %v951_v26 }
 0xb1b   :  { %v961_v33 = vmul.f32 %v960_v31, %v950_v18  ;;  %v969_v34 = vmul.f32 %v5613_v30, %v968_v32 }
 0xb1d   :  { %v963_v36 = vsel %vm962_vm1, %v950_v18, %v961_v33  ;;  %v970_v38 = vmul.f32 0.5, %v969_v34 }
 0xb1e   :  { %v966_v39 = vsel %vm964_vm2, %v965_v35, %v963_v36 }
 0xb1f   :  { %v979_v41 = vadd.f32 1e-06, %v966_v39  ;;  %v971_v42 = vsub.f32 1.5, %v970_v38 }
 0xb21   :  { %5614 = vrcp.f32 %v979_v41  ;;  %v972_v43 = vmul.f32 %v5613_v30, %v971_v42  ;;  %v992_v55 = vand.u32 2147483648, %v979_v41  ;;  %vm986_vm6 = vweird.f32 %v979_v41 }
 0xb22   :  { %v990_v56 = vand.u32 2147483647, %v979_v41 }
 0xb23   :  { %v973_v45 = vmul.f32 %v972_v43, %v951_v26  ;;  %v993_v61 = vor.u32 1.1754944e-38, %v992_v55 }
 0xb24   :  { %vm991_vm8 = vcmp.eq.f32.partialorder %v990_v56, 8.507059e+37 }
 0xb25   :  { %v975_v47 = vsel %vm974_vm3, %v951_v26, %v973_v45 }
 0xb26   :  { %v978_v48 = vsel %vm976_vm4, %v977_v46, %v975_v47  ;;  %v6311_v47 = vld [vmem:[%s7444_s2] ss:$0 sm:$0xff] }
 0xb27   :  { %v5615_v50 = vpop.eup %5614  ;;  %v980_v51 = vadd.f32 1e-06, %v978_v48 }
 0xb28   :  { %v982_v1 = vmul.f32 %v5615_v50, %v979_v41  ;;  %vm987_vm5 = vweird.f32 %v5615_v50 }
 0xb29   :  { %5616 = vrcp.f32 %v980_v51  ;;  %vm988_vm7 = vmor %vm986_vm6, %vm987_vm5  ;;  %v1007_v62 = vand.u32 2147483648, %v980_v51  ;;  %v1005_v49 = vand.u32 2147483647, %v980_v51  ;;  %vm1001_vm10 = vweird.f32 %v980_v51 }
 0xb2a   :  { %v983_v53 = vsub.f32 1.0, %v982_v1 }
 0xb2b   :  { %v1008_v6 = vor.u32 1.1754944e-38, %v1007_v62  ;;  %vm1006_vm12 = vcmp.eq.f32.partialorder %v1005_v49, 8.507059e+37 }
 0xb2c   :  { %v984_v0 = vmul.f32 %v5615_v50, %v983_v53 }
 0xb2e   :  { %v985_v52 = vadd.f32 %v5615_v50, %v984_v0 }
 0xb2f   :  { %v5617_v54 = vpop.eup %5616 }
 0xb30   :  { %v997_v57 = vmul.f32 %v5617_v54, %v980_v51  ;;  %v989_v59 = vsel %vm988_vm7, %v5615_v50, %v985_v52  ;;  %vm1002_vm9 = vweird.f32 %v5617_v54 }
 0xb31   :  { %v994_v2 = vsel %vm991_vm8, %v993_v61, %v989_v59  ;;  %vm1003_vm11 = vmor %vm1001_vm10, %vm1002_vm9 }
 0xb32   :  { %v998_v60 = vsub.f32 1.0, %v997_v57  ;;  %v995_v8 = vmul.f32 %v994_v2, %v953_v3 }
 0xb34   :  { %v999_v63 = vmul.f32 %v5617_v54, %v998_v60  ;;  %v1012_v15 = vadd.f32 %v5523_v11, %v995_v8 }
 0xb36   :  { %v1000_v5 = vadd.f32 %v5617_v54, %v999_v63  ;;  %v6329_v63 = vld [vmem:[%s7444_s2 + $0x1] ss:$0 sm:$0xff] }
 0xb38   :  { %v1004_v9 = vsel %vm1003_vm11, %v5617_v54, %v1000_v5 }
 0xb39   :  { %v1009_v37 = vsel %vm1006_vm12, %v1008_v6, %v1004_v9 }
 0xb3a   :  { %v1010_v14 = vmul.f32 %v1009_v37, %v954_v7 }
 0xb3c   :  { %v1013_v44 = vadd.f32 %v5523_v11, %v1010_v14 }
 0xb3e   :  { %v1021_v17 = vpack.c.bf16 %v1013_v44, %v1012_v15 }
 0xb40   :  { %5170 = vmatmul.msk.bf16.vlgmr.msrb.gmra.mxu2 %vm72_vm0, %v1021_v17 }
 0xbc3   :  { %v1047_v13 = vpop.f32.mrf.mxu2 }
 0xbc4   :  { %v1048_v16 = vadd.f32 %v5524_v12, %v1047_v13 }
 0xbc6   :  { %v1052_v19 = vpack.c.bf16 %v1048_v16, %v1048_v16 }
 0xbc8   :  { %v1055_v18 = vunpack.c.l.b16 %v1052_v19 }
 0xbca   :  { %v6282_v20 = vpack.c.b16 %v1055_v18, %v1055_v18 }
 0xbcb   :  { %v1049_v21 = vpop.f32.mrf.mxu2 }
 0xbcc   :  { %v1050_v23 = vadd.f32 %v5524_v12, %v1049_v21  ;;  %1171 = vrot.lane.b32.xlu0 %v6282_v20, %s7476_s26  ;;  %1173 = vrot.lane.b32.xlu1 %v6282_v20, %s7472_s25 }
 0xbcd   :  { %1057 = vrot.lane.b32.xlu2 %v6282_v20, %s7474_s24 }
 0xbce   :  { %v1053_v24 = vpack.c.bf16 %v1050_v23, %v1050_v23 }
 0xbd0   :  { %v1079_v26 = vunpack.c.l.b16 %v1053_v24 }
 0xbd2   :  { %v6290_v27 = vpack.c.b16 %v1079_v26, %v1079_v26 }
 0xbd4   :  { %1196 = vrot.lane.b32.xlu0 %v6290_v27, %s7472_s25 }
 0xbd5   :  { %1081 = vrot.lane.b32.xlu2 %v6290_v27, %s7474_s24 }
 0xbdd   :  { %1194 = vrot.lane.b32.xlu2 %v6290_v27, %s7476_s26 }
 0xc27   :  { %v1058_v28 = vpop.permute.xlu2 %1057 }
 0xc28   :  { %v1063_v25 = vsel %vm206_vm14, %v1058_v28, 0 }
 0xc29   :  { %1072 = vmatpush.bf16.xpose.msra.mxu3 %v1063_v25 }
 0xc2f   :  { %v1082_v29 = vpop.permute.xlu2 %1081 }
 0xc30   :  { %v1087_v30 = vsel %vm206_vm14, %v1082_v29, 0  ;;  %5171 = vmatmul.msk.bf16.vlgmr.msra.gmra.mxu3 %vm206_vm14, %v1052_v19  ;;  %v5180_v19 = vld [vmem:[%s7448_s6 + $0x14] sm:$0xf] }
 0xc31   :  { %1096 = vmatpush.bf16.xpose.msra.mxu0 %v1087_v30  ;;  %v1290_v18 = vsel %vm279_vm15, %v5180_v19, 0 }
 0xc37   :  { %v1195_v36 = vpop.permute.xlu2 %1194 }
 0xc38   :  { %5172 = vmatmul.msk.bf16.vlgmr.msra.gmra.mxu0 %vm206_vm14, %v1053_v24 }
 0xc3e   :  { %v1172_v31 = vpop.permute.xlu0 %1171  ;;  %v1174_v32 = vpop.permute.xlu1 %1173 }
 0xc3f   :  { %v1179_v33 = vsel %vm206_vm14, %v1174_v32, 0 }
 0xc40   :  { %1188 = vmatpush.bf16.xpose.msrb.mxu3 %v1179_v33 }
 0xc46   :  { %v1197_v34 = vpop.permute.xlu0 %1196 }
 0xc47   :  { %v1202_v35 = vsel %vm206_vm14, %v1197_v34, 0  ;;  %5176 = vmatmul.msk.bf16.vlgmr.msrb.gmra.mxu3 %vm206_vm14, %v1172_v31 }
 0xc48   :  { %1211 = vmatpush.bf16.xpose.msrb.mxu0 %v1202_v35  ;;  %1299 = vmatpush.bf16.msra.mxu3 %v1290_v18 }
 0xc4f   :  { %5177 = vmatmul.msk.bf16.vlgmr.msrb.gmra.mxu0 %vm206_vm14, %v1195_v36 }
 0xcb3   :  { %v1074_v38 = vpop.f32.mrf.mxu3 }
 0xcb4   :  { %v1075_v39 = vadd.f32 %v6069_v40, %v1074_v38 }
 0xcb5   :  { %v1098_v41 = vpop.f32.mrf.mxu0 }
 0xcb6   :  { %v1102_v42 = vsel %vm206_vm14, %v1075_v39, -inf  ;;  %v1099_v49 = vadd.f32 %v6329_v63, %v1098_v41 }
 0xcb7   :  { %1103 = vmax.xlane.f32.xlu1 %v1102_v42 }
 0xcb8   :  { %v1105_v2 = vsel %vm206_vm14, %v1099_v49, -inf }
 0xcbb   :  { %v1076_v43 = vpop.f32.mrf.mxu3 }
 0xcbd   :  { %v1100_v45 = vpop.f32.mrf.mxu0 }
 0xcca   :  { %v1190_v46 = vpop.f32.mrf.mxu3 }
 0xccb   :  { %v1191_v48 = vadd.f32 %v6311_v47, %v1190_v46 }
 0xccc   :  { %v1213_v50 = vpop.f32.mrf.mxu0 }
 0xccd   :  { %v1217_v51 = vsel %vm206_vm14, %v1191_v48, -inf  ;;  %v1214_v3 = vadd.f32 %v6329_v63, %v1213_v50 }
 0xcce   :  { %1218 = vmax.xlane.f32.xlu0 %v1217_v51 }
 0xccf   :  { %v1220_v5 = vsel %vm206_vm14, %v1214_v3, -inf }
 0xcd0   :  { %1126 = vrot.lane.b32.xlu1 %v6282_v20, %s5892_s19 }
 0xcd2   :  { %v1192_v40 = vpop.f32.mrf.mxu3 }
 0xcd4   :  { %v1215_v1 = vpop.f32.mrf.mxu0 }
 0xcd8   :  { %1326 = vrot.lane.b32.xlu1 %v6282_v20, %s5893_s1 }
 0xd2a   :  { %v1104_v53 = vpop.xlane.xlu1 %1103 }
 0xd2b   :  { %v1108_v0 = vsub.f32 %v1075_v39, %v1104_v53 }
 0xd2d   :  { %v1110_v52 = vmul.f32 1.442695, %v1108_v0 }
 0xd2f   :  { %5618 = vpow2.f32 %v1110_v52 }
 0xd35   :  { %v5619_v54 = vpop.eup %5618 }
 0xd36   :  { %v1114_v55 = vsel %vm206_vm14, %v5619_v54, 0.0 }
 0xd37   :  { %1115 = vadd.xlane.f32.xlu2 %v1114_v55 }
 0xd41   :  { %v1219_v56 = vpop.xlane.xlu0 %1218 }
 0xd42   :  { %v1223_v57 = vsub.f32 %v1191_v48, %v1219_v56  ;;  %v1127_v58 = vpop.permute.xlu1 %1126 }
 0xd43   :  { %v1132_v59 = vsel %vm279_vm15, %v1127_v58, 0 }
 0xd44   :  { %v1225_v60 = vmul.f32 1.442695, %v1223_v57  ;;  %1141 = vmatpush.bf16.msra.mxu1 %v1132_v59 }
 0xd46   :  { %5620 = vpow2.f32 %v1225_v60 }
 0xd4a   :  { %v1327_v16 = vpop.permute.xlu1 %1326 }
 0xd4c   :  { %v5621_v61 = vpop.eup %5620 }
 0xd4d   :  { %v1229_v62 = vsel %vm206_vm14, %v5621_v61, 0.0 }
 0xd4e   :  { %1230 = vadd.xlane.f32.xlu0 %v1229_v62 }
 0xd4f   :  { %1241 = vrot.lane.b32.xlu2 %v6282_v20, %s5890_s27 }
 0xd62   :  { %1328 = vrot.lane.b32.xlu0 %v6282_v20, %s7481_s18 }
 0xd78   :  { %1106 = vmax.xlane.f32.xlu2 %v1105_v2 }
 0xd8c   :  { %1221 = vmax.xlane.f32.xlu0 %v1220_v5 }
 0xd90   :  { %1147 = vrot.lane.b32.xlu2 %v6290_v27, %s5892_s19 }
 0xd98   :  { %1349 = vrot.lane.b32.xlu2 %v6290_v27, %s5893_s1 }
 0xda0   :  { %1396 = vrot.lane.b32.xlu2 %v6282_v20, %s7482_s22 }
 0xda8   :  { %1465 = vrot.lane.b32.xlu2 %v6282_v20, %s7483_s23 }
 0xdaa   :  { %v1116_v6 = vpop.xlane.xlu2 %1115 }
 0xdab   :  { %5622 = vrcp.f32 %v1116_v6  ;;  %v5175_v6 = vld [vmem:[%s7448_s6 + $0x10] sm:$0xf] }
 0xdb0   :  { %1488 = vrot.lane.b32.xlu2 %v6290_v27, %s7483_s23 }
 0xdb1   :  { %v5623_v7 = vpop.eup %5622 }
 0xdb2   :  { %v1122_v8 = vmul.f32 %v5623_v7, %v5619_v54  ;;  %v1242_v9 = vpop.permute.xlu2 %1241  ;;  %v1310_v7 = vsel %vm279_vm15, %v5175_v6, 0 }
 0xdb3   :  { %v1247_v11 = vsel %vm279_vm15, %v1242_v9, 0  ;;  %1319 = vmatpush.bf16.msra.mxu0 %v1310_v7 }
 0xdb4   :  { %v1124_v37 = vpack.c.bf16 %v1122_v8, %v1122_v8  ;;  %1256 = vmatpush.bf16.msrb.mxu1 %v1247_v11 }
 0xdb6   :  { %5173 = vmatmul.msk.bf16.vlgmr.msra.gmra.mxu1 %vm206_vm14, %v1124_v37 }
 0xdb8   :  { %1463 = vrot.lane.b32.xlu2 %v6282_v20, %s7484_s29 }
 0xdc0   :  { %1486 = vrot.lane.b32.xlu2 %v6290_v27, %s7484_s29 }
 0xdc1   :  { %v1231_v14 = vpop.xlane.xlu0 %1230 }
 0xdc2   :  { %5624 = vrcp.f32 %v1231_v14 }
 0xdc8   :  { %v5625_v15 = vpop.eup %5624 }
 0xdc9   :  { %v1237_v44 = vmul.f32 %v5625_v15, %v5621_v61 }
 0xdcb   :  { %v1239_v17 = vpack.c.bf16 %v1237_v44, %v1237_v44 }
 0xdcd   :  { %5178 = vmatmul.msk.bf16.vlgmr.msrb.gmra.mxu1 %vm206_vm14, %v1239_v17 }
 0xdd4   :  { %v1329_v12 = vpop.permute.xlu0 %1328 }
 0xdd5   :  { %v1334_v13 = vsel %vm206_vm14, %v1329_v12, 0 }
 0xdd6   :  { %1343 = vmatpush.bf16.xpose.msra.mxu1 %v1334_v13 }
 0xddd   :  { %5183 = vmatmul.msk.bf16.vlgmr.msra.gmra.mxu1 %vm206_vm14, %v1327_v16 }
 0xdeb   :  { %v1107_v21 = vpop.xlane.xlu2 %1106 }
 0xdec   :  { %v1109_v23 = vsub.f32 %v1099_v49, %v1107_v21 }
 0xdee   :  { %v1112_v24 = vmul.f32 1.442695, %v1109_v23 }
 0xdf0   :  { %5626 = vpow2.f32 %v1112_v24 }
 0xdf3   :  { %v1148_v26 = vpop.permute.xlu2 %1147 }
 0xdf4   :  { %v1153_v28 = vsel %vm279_vm15, %v1148_v26, 0 }
 0xdf5   :  { %1162 = vmatpush.bf16.msra.mxu2 %v1153_v28 }
 0xdf6   :  { %v5627_v25 = vpop.eup %5626 }
 0xdf7   :  { %v1117_v29 = vsel %vm206_vm14, %v5627_v25, 0.0 }
 0xdf8   :  { %1118 = vadd.xlane.f32.xlu1 %v1117_v29 }
 0xdfb   :  { %v1350_v30 = vpop.permute.xlu2 %1349 }
 0xdff   :  { %v1222_v31 = vpop.xlane.xlu0 %1221 }
 0xe00   :  { %v1224_v32 = vsub.f32 %v1214_v3, %v1222_v31 }
 0xe02   :  { %v1227_v33 = vmul.f32 1.442695, %v1224_v32 }
 0xe03   :  { %v1397_v34 = vpop.permute.xlu2 %1396 }
 0xe04   :  { %5628 = vpow2.f32 %v1227_v33  ;;  %v1402_v35 = vsel %vm279_vm15, %v1397_v34, 0 }
 0xe05   :  { %1411 = vmatpush.bf16.msrb.mxu3 %v1402_v35 }
 0xe0a   :  { %v5629_v36 = vpop.eup %5628 }
 0xe0b   :  { %v1232_v38 = vsel %vm206_vm14, %v5629_v36, 0.0  ;;  %v1466_v58 = vpop.permute.xlu2 %1465 }
 0xe0c   :  { %1233 = vadd.xlane.f32.xlu0 %v1232_v38  ;;  %v1471_v61 = vsel %vm206_vm14, %v1466_v58, 0 }
 0xe11   :  { %1262 = vrot.lane.b32.xlu1 %v6290_v27, %s5890_s27 }
 0xe13   :  { %v1489_v62 = vpop.permute.xlu2 %1488 }
 0xe14   :  { %v1494_v17 = vsel %vm206_vm14, %v1489_v62, 0 }
 0xe1b   :  { %v1464_v49 = vpop.permute.xlu2 %1463 }
 0xe20   :  { %1351 = vrot.lane.b32.xlu0 %v6290_v27, %s7481_s18 }
 0xe23   :  { %v1487_v33 = vpop.permute.xlu2 %1486 }
 0xe33   :  { %v1143_v39 = vpop.f32.mrf.mxu1 }
 0xe3b   :  { %v1145_v41 = vpop.f32.mrf.mxu1 }
 0xe4a   :  { %v1258_v42 = vpop.f32.mrf.mxu1 }
 0xe52   :  { %v1260_v43 = vpop.f32.mrf.mxu1 }
 0xe5a   :  { %v1345_v45 = vpop.f32.mrf.mxu1 }
 0xe5b   :  { %v1346_v46 = vadd.f32 %v6311_v47, %v1345_v45 }
 0xe5d   :  { %v1372_v48 = vsel %vm206_vm14, %v1346_v46, -inf }
 0xe5e   :  { %1373 = vmax.xlane.f32.xlu1 %v1372_v48 }
 0xe62   :  { %v1347_v50 = vpop.f32.mrf.mxu1 }
 0xe6b   :  { %v1119_v51 = vpop.xlane.xlu1 %1118 }
 0xe6c   :  { %5630 = vrcp.f32 %v1119_v51 }
 0xe72   :  { %v5631_v40 = vpop.eup %5630 }
 0xe73   :  { %v1123_v1 = vmul.f32 %v5631_v40, %v5627_v25 }
 0xe75   :  { %v1125_v53 = vpack.c.bf16 %v1123_v1, %v1123_v1 }
 0xe77   :  { %5174 = vmatmul.msk.bf16.vlgmr.msra.gmra.mxu2 %vm206_vm14, %v1125_v53 }
 0xe7f   :  { %v1234_v0 = vpop.xlane.xlu0 %1233 }
 0xe80   :  { %5632 = vrcp.f32 %v1234_v0 }
 0xe83   :  { %v1263_v52 = vpop.permute.xlu1 %1262 }
 0xe84   :  { %v1268_v54 = vsel %vm279_vm15, %v1263_v52, 0 }
 0xe85   :  { %1277 = vmatpush.bf16.msrb.mxu2 %v1268_v54  ;;  %v1869_v54 = vld [vmem:[%s7486_s28 + $0x8] sm:$0xff] }
 0xe86   :  { %v5633_v55 = vpop.eup %5632 }
 0xe87   :  { %v1238_v56 = vmul.f32 %v5633_v55, %v5629_v36 }
 0xe89   :  { %v1240_v57 = vpack.c.bf16 %v1238_v56, %v1238_v56  ;;  %v1875_v56 = vsel %vm72_vm0, %v1869_v54, 0.0 }
 0xe8b   :  { %5179 = vmatmul.msk.bf16.vlgmr.msrb.gmra.mxu2 %vm206_vm14, %v1240_v57 }
 0xe92   :  { %v1352_v59 = vpop.permute.xlu0 %1351 }
 0xe93   :  { %v1357_v60 = vsel %vm206_vm14, %v1352_v59, 0 }
 0xe94   :  { %1366 = vmatpush.bf16.xpose.msra.mxu2 %v1357_v60 }
 0xe9b   :  { %5184 = vmatmul.msk.bf16.vlgmr.msra.gmra.mxu2 %vm206_vm14, %v1350_v30 }
 0xe9c   :  { %1480 = vmatpush.bf16.xpose.msrb.mxu2 %v1471_v61 }
 0xeab   :  { %5189 = vmatmul.msk.bf16.vlgmr.msrb.gmra.mxu2 %vm206_vm14, %v1464_v49 }
 0xed1   :  { %v1374_v2 = vpop.xlane.xlu1 %1373 }
 0xed2   :  { %v1378_v3 = vsub.f32 %v1346_v46, %v1374_v2 }
 0xed4   :  { %v1380_v5 = vmul.f32 1.442695, %v1378_v3 }
 0xed6   :  { %5634 = vpow2.f32 %v1380_v5 }
 0xedc   :  { %v5635_v8 = vpop.eup %5634 }
 0xedd   :  { %v1384_v9 = vsel %vm206_vm14, %v5635_v8, 0.0 }
 0xede   :  { %1385 = vadd.xlane.f32.xlu0 %v1384_v9 }
 0xef2   :  { %1417 = vrot.lane.b32.xlu0 %v6290_v27, %s7482_s22 }
 0xefa   :  { %v1164_v11 = vpop.f32.mrf.mxu2 }
 0xefb   :  { %v1168_v37 = vpack.c.bf16 %v1164_v11, %v1143_v39 }
 0xefd   :  { %5182 = vmatmul.msk.bf16.vlgmr.msra.gmra.mxu0 %vm206_vm14, %v1168_v37 }
 0xf02   :  { %v1166_v14 = vpop.f32.mrf.mxu2 }
 0xf0e   :  { %v1279_v15 = vpop.f32.mrf.mxu2 }
 0xf0f   :  { %v1283_v44 = vpack.c.bf16 %v1279_v15, %v1258_v42 }
 0xf11   :  { %5181 = vmatmul.msk.bf16.vlgmr.msra.gmra.mxu3 %vm206_vm14, %v1283_v44 }
 0xf12   :  { %1503 = vmatpush.bf16.xpose.msra.mxu3 %v1494_v17 }
 0xf16   :  { %v1281_v12 = vpop.f32.mrf.mxu2 }
 0xf1e   :  { %v1368_v13 = vpop.f32.mrf.mxu2 }
 0xf1f   :  { %v1369_v16 = vadd.f32 %v6329_v63, %v1368_v13  ;;  %v1868_v13 = vld [vmem:[%s7486_s28] sm:$0xff] }
 0xf21   :  { %v1375_v19 = vsel %vm206_vm14, %v1369_v16, -inf }
 0xf22   :  { %1376 = vmax.xlane.f32.xlu1 %v1375_v19 }
 0xf26   :  { %v1370_v18 = vpop.f32.mrf.mxu2 }
 0xf2e   :  { %v1482_v21 = vpop.f32.mrf.mxu2 }
 0xf2f   :  { %v1483_v23 = vadd.f32 %v6311_v47, %v1482_v21 }
 0xf31   :  { %v1509_v24 = vsel %vm206_vm14, %v1483_v23, -inf }
 0xf32   :  { %1510 = vmax.xlane.f32.xlu1 %v1509_v24 }
 0xf36   :  { %v1484_v26 = vpop.f32.mrf.mxu2 }
 0xf51   :  { %v1386_v28 = vpop.xlane.xlu0 %1385 }
 0xf52   :  { %5636 = vrcp.f32 %v1386_v28 }
 0xf58   :  { %v5637_v25 = vpop.eup %5636 }
 0xf59   :  { %v1392_v29 = vmul.f32 %v5637_v25, %v5635_v8 }
 0xf5b   :  { %v1394_v30 = vpack.c.bf16 %v1392_v29, %v1392_v29 }
 0xf5d   :  { %5185 = vmatmul.msk.bf16.vlgmr.msrb.gmra.mxu3 %vm206_vm14, %v1394_v30 }
 0xf64   :  { %v1418_v31 = vpop.permute.xlu0 %1417 }
 0xf65   :  { %v1423_v32 = vsel %vm279_vm15, %v1418_v31, 0 }
 0xf66   :  { %1432 = vmatpush.bf16.msrb.mxu0 %v1423_v32 }
 0xf6d   :  { %5190 = vmatmul.msk.bf16.vlgmr.msra.gmra.mxu3 %vm206_vm14, %v1487_v33 }
 0xf7a   :  { %v1321_v34 = vpop.f32.mrf.mxu0 }
 0xf82   :  { %v6421_v15 = vpop.f32.mrf.mxu0 }
 0xf94   :  { %v1301_v47 = vpop.f32.mrf.mxu3 }
 0xf95   :  { %v6392_v35 = vadd.f32 %v1321_v34, %v1301_v47  ;;  %v1377_v36 = vpop.xlane.xlu1 %1376 }
 0xf96   :  { %v1379_v38 = vsub.f32 %v1369_v16, %v1377_v36  ;;  %v1872_v16 = vsel %vm72_vm0, %v1868_v13, 0.0  ;;  %v5193_v36 = vld [vmem:[%s7448_s6 + $0x1c] sm:$0xf] }
 0xf98   :  { %v1382_v39 = vmul.f32 1.442695, %v1379_v38  ;;  %v1582_v38 = vsel %vm279_vm15, %v5193_v36, 0 }
 0xf99   :  { %1591 = vmatpush.bf16.msra.mxu2 %v1582_v38 }
 0xf9a   :  { %5638 = vpow2.f32 %v1382_v39 }
 0xf9c   :  { %v6398_v51 = vpop.f32.mrf.mxu3 }
 0xfa0   :  { %v5639_v41 = vpop.eup %5638 }
 0xfa1   :  { %v1387_v42 = vsel %vm206_vm14, %v5639_v41, 0.0 }
 0xfa2   :  { %1388 = vadd.xlane.f32.xlu2 %v1387_v42 }
 0xfa5   :  { %v1511_v43 = vpop.xlane.xlu1 %1510 }
 0xfa6   :  { %v1515_v45 = vsub.f32 %v1483_v23, %v1511_v43 }
 0xfa8   :  { %v1517_v46 = vmul.f32 1.442695, %v1515_v45 }
 0xfaa   :  { %5640 = vpow2.f32 %v1517_v46 }
 0xfb0   :  { %v5641_v48 = vpop.eup %5640 }
 0xfb1   :  { %v1521_v50 = vsel %vm206_vm14, %v5641_v48, 0.0 }
 0xfb2   :  { %1522 = vadd.xlane.f32.xlu0 %v1521_v50 }
 0xfba   :  { %1554 = vrot.lane.b32.xlu2 %v6290_v27, %s7485_s30  ;;  %1876 = vadd.xlane.f32.xlu0 %v1875_v56  ;;  %v5187_v27 = vld [vmem:[%s7448_s6 + $0x18] sm:$0xf]  ;;  %v5473_v56 = vld [vmem:[%s7452_s10] sm:$0xff] }
 0xfbb   :  { %v1445_v57 = vsel %vm279_vm15, %v5187_v27, 0 }
 0xfbc   :  { %1454 = vmatpush.bf16.msrb.mxu1 %v1445_v57 }
 0xfe0   :  { %v1413_v40 = vpop.f32.mrf.mxu3 }
 0xfe8   :  { %v1415_v1 = vpop.f32.mrf.mxu3 }
 0xff0   :  { %v1505_v53 = vpop.f32.mrf.mxu3 }
 0xff1   :  { %v1506_v0 = vadd.f32 %v6329_v63, %v1505_v53 }
 0xff3   :  { %v1512_v52 = vsel %vm206_vm14, %v1506_v0, -inf }
 0xff4   :  { %1513 = vmax.xlane.f32.xlu1 %v1512_v52 }
 0xff8   :  { %v1507_v55 = vpop.f32.mrf.mxu3 }
0x1015   :  { %v1389_v58 = vpop.xlane.xlu2 %1388 }
0x1016   :  { %5642 = vrcp.f32 %v1389_v58 }
0x101c   :  { %v5643_v63 = vpop.eup %5642 }
0x101d   :  { %v1393_v59 = vmul.f32 %v5643_v63, %v5639_v41  ;;  %v1555_v60 = vpop.permute.xlu2 %1554 }
0x101e   :  { %v1560_v61 = vsel %vm279_vm15, %v1555_v60, 0 }
0x101f   :  { %v1395_v62 = vpack.c.bf16 %v1393_v59, %v1393_v59  ;;  %1569 = vmatpush.bf16.msra.mxu1 %v1560_v61 }
0x1021   :  { %5186 = vmatmul.msk.bf16.vlgmr.msrb.gmra.mxu0 %vm206_vm14, %v1395_v62 }
0x1025   :  { %v1523_v49 = vpop.xlane.xlu0 %1522 }
0x102d   :  { %v1877_v6 = vpop.xlane.xlu0 %1876 }
0x102e   :  { %v1879_v7 = vmul.f32 %v1877_v6, %v6005_v10 }
0x1030   :  { %v6413_v8 = vsub.f32 %v1869_v54, %v1879_v7  ;;  %v5474_v54 = vld [vmem:[%s7452_s10 + $0x8] sm:$0xff] }
0x1032   :  { %v1883_v9 = vmul.f32 %v6413_v8, %v6413_v8 }
0x1034   :  { %v1887_v14 = vsel %vm72_vm0, %v1883_v9, 0.0 }
0x1035   :  { %1888 = vadd.xlane.f32.xlu0 %v1887_v14 }
0x1067   :  { %v1514_v2 = vpop.xlane.xlu1 %1513 }
0x1068   :  { %v1516_v3 = vsub.f32 %v1506_v0, %v1514_v2 }
0x106a   :  { %v1519_v5 = vmul.f32 1.442695, %v1516_v3 }
0x106c   :  { %5644 = vpow2.f32 %v1519_v5 }
0x1072   :  { %v5645_v11 = vpop.eup %5644 }
0x1073   :  { %v1524_v37 = vsel %vm206_vm14, %v5645_v11, 0.0 }
0x1074   :  { %1525 = vadd.xlane.f32.xlu1 %v1524_v37 }
0x108d   :  { %1533 = vrot.lane.b32.xlu1 %v6282_v20, %s7485_s30 }
0x109e   :  { %v1434_v44 = vpop.f32.mrf.mxu0 }
0x109f   :  { %v1438_v17 = vpack.c.bf16 %v1434_v44, %v1413_v40 }
0x10a1   :  { %5188 = vmatmul.msk.bf16.vlgmr.msrb.gmra.mxu1 %vm206_vm14, %v1438_v17 }
0x10a2   :  { %1983 = vmatpush.bf16.msrb.mxu1 %v5474_v54 }
0x10a6   :  { %v1436_v12 = vpop.f32.mrf.mxu0  ;;  %1984 = vmatpush.bf16.msrb.mxu1 %v5473_v56 }
0x10a8   :  { %v1889_v42 = vpop.xlane.xlu0 %1888 }
0x10a9   :  { %v1891_v43 = vmul.f32 0.032258064, %v1889_v42 }
0x10ab   :  { %vm1914_vm1 = vcmp.eq.f32.partialorder %v1891_v43, inf  ;;  %v1917_v27 = vand.u32 2147483648, %v1891_v43  ;;  %vm1916_vm2 = vcmp.eq.f32.partialorder %v1891_v43, 0.0 }
0x10b7   :  { %1873 = vadd.xlane.f32.xlu1 %v1872_v16 }
0x10e7   :  { %v1526_v19 = vpop.xlane.xlu1 %1525 }
0x10e8   :  { %5646 = vrcp.f32 %v1526_v19 }
0x10e9   :  { %5648 = vrcp.f32 %v1523_v49 }
0x10ea   :  { %5650 = vrsqrt.f32 %v1891_v43 }
0x10ee   :  { %v5647_v18 = vpop.eup %5646 }
0x10ef   :  { %v1530_v21 = vmul.f32 %v5647_v18, %v5645_v11  ;;  %v5649_v20 = vpop.eup %5648 }
0x10f0   :  { %v1529_v24 = vmul.f32 %v5649_v20, %v5641_v48  ;;  %v5651_v50 = vpop.eup %5650 }
0x10f1   :  { %v1532_v23 = vpack.c.bf16 %v1530_v21, %v1530_v21  ;;  %v1908_v40 = vmul.f32 %v5651_v50, %v1891_v43  ;;  %v5525_v21 = vld [vmem:[%s7451_s9] ss:$0 sm:$0xff] }
0x10f2   :  { %v1531_v25 = vpack.c.bf16 %v1529_v24, %v1529_v24 }
0x10f3   :  { %5192 = vmatmul.msk.bf16.vlgmr.msra.gmra.mxu1 %vm206_vm14, %v1532_v23  ;;  %v1909_v1 = vmul.f32 %v5651_v50, %v1908_v40 }
0x10f5   :  { %v1910_v53 = vmul.f32 0.5, %v1909_v1  ;;  %v1324_v1 = vadd.f32 %v6421_v15, %v6398_v51 }
0x10f7   :  { %v1911_v0 = vsub.f32 1.5, %v1910_v53 }
0x10f9   :  { %v1912_v52 = vmul.f32 %v5651_v50, %v1911_v0 }
0x10fb   :  { %v1913_v55 = vmul.f32 %v1912_v52, %v1891_v43 }
0x10fd   :  { %v1915_v57 = vsel %vm1914_vm1, %v1891_v43, %v1913_v55 }
0x10fe   :  { %v1918_v59 = vsel %vm1916_vm2, %v1917_v27, %v1915_v57 }
0x10ff   :  { %v1534_v26 = vpop.permute.xlu1 %1533  ;;  %v1920_v60 = vadd.f32 1e-06, %v1918_v59 }
0x1100   :  { %v1539_v28 = vsel %vm279_vm15, %v1534_v26, 0 }
0x1101   :  { %1548 = vmatpush.bf16.msra.mxu0 %v1539_v28  ;;  %vm1941_vm5 = vweird.f32 %v1920_v60  ;;  %v1945_v19 = vand.u32 2147483647, %v1920_v60 }
0x1103   :  { %vm1946_vm8 = vcmp.eq.f32.partialorder %v1945_v19, 8.507059e+37 }
0x1104   :  { %5191 = vmatmul.msk.bf16.vlgmr.msra.gmra.mxu0 %vm206_vm14, %v1531_v25  ;;  %v1894_v25 = vmul.f32 %v5525_v21, %v6413_v8 }
0x111e   :  { %v1456_v29 = vpop.f32.mrf.mxu1 }
0x111f   :  { %v6432_v30 = vadd.f32 %v1456_v29, %v6392_v35 }
0x1126   :  { %v6444_v35 = vpop.f32.mrf.mxu1 }
0x1127   :  { %v1462_v0 = vadd.f32 %v6444_v35, %v1324_v1 }
0x112a   :  { %v1874_v31 = vpop.xlane.xlu1 %1873 }
0x112b   :  { %v1878_v32 = vmul.f32 %v1874_v31, %v6005_v10 }
0x112d   :  { %v6435_v33 = vsub.f32 %v1868_v13, %v1878_v32  ;;  %v1947_v13 = vand.u32 2147483648, %v1920_v60 }
0x112f   :  { %v1882_v34 = vmul.f32 %v6435_v33, %v6435_v33  ;;  %v1948_v20 = vor.u32 1.1754944e-38, %v1947_v13  ;;  %v1893_v36 = vmul.f32 %v5525_v21, %v6435_v33 }
0x1131   :  { %v1884_v47 = vsel %vm72_vm0, %v1882_v34, 0.0 }
0x1132   :  { %1885 = vadd.xlane.f32.xlu2 %v1884_v47 }
0x1170   :  { %v1571_v39 = vpop.f32.mrf.mxu1 }
0x1178   :  { %v1573_v41 = vpop.f32.mrf.mxu1 }
0x1179   :  { %v5526_v41 = vld [vmem:[%s7451_s9 + $0x1] ss:$0 sm:$0xff] }
0x1181   :  { %v1550_v45 = vpop.f32.mrf.mxu0 }
0x1182   :  { %v1575_v46 = vpack.c.bf16 %v1571_v39, %v1550_v45 }
0x1184   :  { %5194 = vmatmul.msk.bf16.vlgmr.msra.gmra.mxu2 %vm206_vm14, %v1575_v46 }
0x1189   :  { %v1552_v48 = vpop.f32.mrf.mxu0 }
0x118a   :  { %v5527_v48 = vld [vmem:[%s7446_s4 + $0xb] ss:$0 sm:$0xff] }
0x11a5   :  { %v1886_v58 = vpop.xlane.xlu2 %1885 }
0x11a6   :  { %v1890_v63 = vmul.f32 0.032258064, %v1886_v58 }
0x11a8   :  { %5652 = vrsqrt.f32 %v1890_v63  ;;  %vm1902_vm3 = vcmp.eq.f32.partialorder %v1890_v63, inf  ;;  %v1905_v11 = vand.u32 2147483648, %v1890_v63  ;;  %vm1904_vm4 = vcmp.eq.f32.partialorder %v1890_v63, 0.0 }
0x11a9   :  { %5654 = vrcp.f32 %v1920_v60 }
0x11ae   :  { %v5653_v61 = vpop.eup %5652 }
0x11af   :  { %v1896_v62 = vmul.f32 %v5653_v61, %v1890_v63  ;;  %v5655_v3 = vpop.eup %5654 }
0x11b0   :  { %v1937_v7 = vmul.f32 %v5655_v3, %v1920_v60  ;;  %vm1942_vm6 = vweird.f32 %v5655_v3 }
0x11b1   :  { %v1897_v49 = vmul.f32 %v5653_v61, %v1896_v62  ;;  %vm1943_vm7 = vmor %vm1941_vm5, %vm1942_vm6 }
0x11b2   :  { %v1938_v44 = vsub.f32 1.0, %v1937_v7 }
0x11b3   :  { %v1898_v2 = vmul.f32 0.5, %v1897_v49 }
0x11b4   :  { %v1939_v12 = vmul.f32 %v5655_v3, %v1938_v44  ;;  %v5467_v44 = vld [vmem:[%s7449_s7 + $0x10] sm:$0xff] }
0x11b5   :  { %v1899_v5 = vsub.f32 1.5, %v1898_v2 }
0x11b6   :  { %v1940_v16 = vadd.f32 %v5655_v3, %v1939_v12 }
0x11b7   :  { %v1900_v6 = vmul.f32 %v5653_v61, %v1899_v5 }
0x11b8   :  { %v1944_v26 = vsel %vm1943_vm7, %v5655_v3, %v1940_v16 }
0x11b9   :  { %v1901_v9 = vmul.f32 %v1900_v6, %v1890_v63  ;;  %v1949_v32 = vsel %vm1946_vm8, %v1948_v20, %v1944_v26 }
0x11ba   :  { %v1950_v39 = vmul.f32 %v1949_v32, %v1894_v25 }
0x11bb   :  { %v1903_v37 = vsel %vm1902_vm3, %v1890_v63, %v1901_v9 }
0x11bc   :  { %v1906_v14 = vsel %vm1904_vm4, %v1905_v11, %v1903_v37  ;;  %v1953_v45 = vadd.f32 %v5526_v41, %v1950_v39 }
0x11bd   :  { %v1919_v17 = vadd.f32 1e-06, %v1906_v14  ;;  %v5468_v14 = vld [vmem:[%s7449_s7 + $0x18] sm:$0xff]  ;;  %s7489_s7 = smov 88  }
0x11be   :  { %1728 = vmatpush.bf16.msrb.mxu3 %v5468_v14 }
0x11bf   :  { %5656 = vrcp.f32 %v1919_v17  ;;  %v1932_v28 = vand.u32 2147483648, %v1919_v17  ;;  %v1930_v31 = vand.u32 2147483647, %v1919_v17  ;;  %vm1926_vm10 = vweird.f32 %v1919_v17 }
0x11c1   :  { %v1933_v47 = vor.u32 1.1754944e-38, %v1932_v28  ;;  %vm1931_vm12 = vcmp.eq.f32.partialorder %v1930_v31, 8.507059e+37 }
0x11c2   :  { %1729 = vmatpush.bf16.msrb.mxu3 %v5467_v44 }
0x11c5   :  { %v5657_v18 = vpop.eup %5656 }
0x11c6   :  { %v1922_v23 = vmul.f32 %v5657_v18, %v1919_v17  ;;  %vm1927_vm9 = vweird.f32 %v5657_v18 }
0x11c7   :  { %vm1928_vm11 = vmor %vm1926_vm10, %vm1927_vm9 }
0x11c8   :  { %v1923_v24 = vsub.f32 1.0, %v1922_v23 }
0x11ca   :  { %v1924_v29 = vmul.f32 %v5657_v18, %v1923_v24 }
0x11cc   :  { %v1925_v34 = vadd.f32 %v5657_v18, %v1924_v29 }
0x11ce   :  { %v1929_v38 = vsel %vm1928_vm11, %v5657_v18, %v1925_v34 }
0x11cf   :  { %v1934_v42 = vsel %vm1931_vm12, %v1933_v47, %v1929_v38 }
0x11d0   :  { %v1935_v43 = vmul.f32 %v1934_v42, %v1893_v36 }
0x11d2   :  { %v1952_v8 = vadd.f32 %v5526_v41, %v1935_v43 }
0x11d4   :  { %v1960_v46 = vpack.c.bf16 %v1953_v45, %v1952_v8 }
0x11d6   :  { %5241 = vmatmul.msk.bf16.vlgmr.msrb.gmra.mxu1 %vm72_vm0, %v1960_v46 }
0x1207   :  { %v1593_v50 = vpop.f32.mrf.mxu2 }
0x1208   :  { %v1598_v33 = vadd.f32 %v1593_v50, %v6432_v30 }
0x120a   :  { %v1601_v40 = vadd.f32 %v5527_v48, %v1598_v33 }
0x120c   :  { %v6469_v53 = vadd.f32 %v1601_v40, %v6241_v4  ;;  %v5528_v4 = vld [vmem:[%s7451_s9 + $0x2] ss:$0 sm:$0xff] }
0x120e   :  { %v1607_v52 = vsel %vm72_vm0, %v6469_v53, 0.0 }
0x120f   :  { %1608 = vadd.xlane.f32.xlu0 %v1607_v52  ;;  %v1595_v54 = vpop.f32.mrf.mxu2 }
0x1210   :  { %v1599_v55 = vadd.f32 %v1595_v54, %v1462_v0 }
0x1212   :  { %v1602_v56 = vadd.f32 %v5527_v48, %v1599_v55 }
0x1214   :  { %v6475_v27 = vadd.f32 %v1602_v56, %v6246_v22 }
0x1216   :  { %v1610_v30 = vsel %vm72_vm0, %v6475_v27, 0.0 }
0x1217   :  { %1611 = vadd.xlane.f32.xlu0 %v1610_v30 }
0x1253   :  { %v1986_v51 = vpop.f32.mrf.mxu1 }
0x1254   :  { %v1987_v15 = vadd.f32 %v5528_v4, %v1986_v51 }
0x1256   :  { %v1991_v35 = vpack.c.bf16 %v1987_v15, %v1987_v15 }
0x1258   :  { %v1994_v57 = vunpack.c.l.b16 %v1991_v35 }
0x125a   :  { %v6482_v58 = vpack.c.b16 %v1994_v57, %v1994_v57  ;;  %v5529_v57 = vld [vmem:[%s7446_s4 + $0xc] ss:$0 sm:$0xff] }
0x125b   :  { %v1988_v63 = vpop.f32.mrf.mxu1 }
0x125c   :  { %v1989_v59 = vadd.f32 %v5528_v4, %v1988_v63  ;;  %2109 = vrot.lane.b32.xlu2 %v6482_v58, %s7476_s26  ;;  %2111 = vrot.lane.b32.xlu1 %v6482_v58, %s7472_s25 }
0x125d   :  { %1996 = vrot.lane.b32.xlu0 %v6482_v58, %s7474_s24 }
0x125e   :  { %v6490_v22 = vpack.c.bf16 %v1989_v59, %v1989_v59 }
0x1260   :  { %v2018_v60 = vunpack.c.l.b16 %v6490_v22 }
0x1262   :  { %v6493_v61 = vpack.c.b16 %v2018_v60, %v2018_v60 }
0x1264   :  { %2020 = vrot.lane.b32.xlu2 %v6493_v61, %s7474_s24  ;;  %s7487_s24 = smov 120  }
0x126c   :  { %2134 = vrot.lane.b32.xlu2 %v6493_v61, %s7472_s25  ;;  %s5088_s25 = sshll.u32 %s7459_s17, 4  ;;  %s5089_s25 = int_to_ptr.hbm [resolvable:$true] %s5088_s25 }
0x1274   :  { %2132 = vrot.lane.b32.xlu2 %v6493_v61, %s7476_s26  ;;  %s5899_s26 = smov 128  }
0x1282   :  { %v1609_v62 = vpop.xlane.xlu0 %1608 }
0x1283   :  { %v1613_v49 = vmul.f32 %v1609_v62, %v6005_v10 }
0x1285   :  { %v6503_v2 = vsub.f32 %v6469_v53, %v1613_v49 }
0x1287   :  { %v1617_v3 = vmul.f32 %v6503_v2, %v6503_v2 }
0x1289   :  { %v1619_v5 = vsel %vm72_vm0, %v1617_v3, 0.0 }
0x128a   :  { %v1612_v6 = vpop.xlane.xlu0 %1611  ;;  %1620 = vadd.xlane.f32.xlu0 %v1619_v5 }
0x128b   :  { %v1614_v7 = vmul.f32 %v1612_v6, %v6005_v10  ;;  %v1628_v6 = vmul.f32 %v5529_v57, %v6503_v2 }
0x128d   :  { %v6510_v9 = vsub.f32 %v6475_v27, %v1614_v7 }
0x128f   :  { %v1618_v11 = vmul.f32 %v6510_v9, %v6510_v9 }
0x1291   :  { %v1622_v37 = vsel %vm72_vm0, %v1618_v11, 0.0 }
0x1292   :  { %1623 = vadd.xlane.f32.xlu1 %v1622_v37  ;;  %v1629_v37 = vmul.f32 %v5529_v57, %v6510_v9 }
0x12b6   :  { %v2110_v17 = vpop.permute.xlu2 %2109 }
0x12be   :  { %v2021_v12 = vpop.permute.xlu2 %2020 }
0x12bf   :  { %v2026_v13 = vsel %vm206_vm14, %v2021_v12, 0 }
0x12c0   :  { %2035 = vmatpush.bf16.xpose.msra.mxu3 %v2026_v13 }
0x12ce   :  { %v2112_v16 = vpop.permute.xlu1 %2111 }
0x12cf   :  { %v2117_v19 = vsel %vm206_vm14, %v2112_v16, 0  ;;  %v1997_v18 = vpop.permute.xlu0 %1996 }
0x12d0   :  { %v2002_v21 = vsel %vm206_vm14, %v1997_v18, 0  ;;  %v2135_v18 = vpop.permute.xlu2 %2134 }
0x12d1   :  { %2011 = vmatpush.bf16.xpose.msrb.mxu2 %v2002_v21  ;;  %v2140_v2 = vsel %vm206_vm14, %v2135_v18, 0 }
0x12d8   :  { %5242 = vmatmul.msk.bf16.vlgmr.msrb.gmra.mxu2 %vm206_vm14, %v1991_v35  ;;  %v2133_v9 = vpop.permute.xlu2 %2132 }
0x12d9   :  { %2126 = vmatpush.bf16.xpose.msra.mxu2 %v2117_v19 }
0x12e8   :  { %5246 = vmatmul.msk.bf16.vlgmr.msra.gmra.mxu2 %vm206_vm14, %v2110_v17  ;;  %v5530_v17 = vld [vmem:[%s7446_s4 + $0xd] ss:$0 sm:$0xff] }
0x12fd   :  { %v1621_v23 = vpop.xlane.xlu0 %1620 }
0x12fe   :  { %v1625_v20 = vmul.f32 0.032258064, %v1621_v23  ;;  %v6542_v23 = vld [vmem:[%s7445_s3] sm:$0xff] }
0x1300   :  { %5658 = vrsqrt.f32 %v1625_v20  ;;  %vm1637_vm1 = vcmp.eq.f32.partialorder %v1625_v20, inf  ;;  %v1640_v41 = vand.u32 2147483648, %v1625_v20  ;;  %vm1639_vm2 = vcmp.eq.f32.partialorder %v1625_v20, 0.0 }
0x1305   :  { %v1624_v24 = vpop.xlane.xlu1 %1623 }
0x1306   :  { %v5659_v26 = vpop.eup %5658  ;;  %v1626_v28 = vmul.f32 0.032258064, %v1624_v24 }
0x1307   :  { %v1631_v25 = vmul.f32 %v5659_v26, %v1625_v20 }
0x1308   :  { %5660 = vrsqrt.f32 %v1626_v28  ;;  %vm1649_vm3 = vcmp.eq.f32.partialorder %v1626_v28, inf  ;;  %v1652_v33 = vand.u32 2147483648, %v1626_v28  ;;  %vm1651_vm4 = vcmp.eq.f32.partialorder %v1626_v28, 0.0 }
0x1309   :  { %v1632_v29 = vmul.f32 %v5659_v26, %v1631_v25 }
0x130b   :  { %v1633_v31 = vmul.f32 0.5, %v1632_v29 }
0x130d   :  { %v1634_v32 = vsub.f32 1.5, %v1633_v31 }
0x130e   :  { %v5661_v34 = vpop.eup %5660 }
0x130f   :  { %v1635_v47 = vmul.f32 %v5659_v26, %v1634_v32  ;;  %v1643_v36 = vmul.f32 %v5661_v34, %v1626_v28  ;;  %v5472_v32 = vld [vmem:[%s7450_s8 + $0x38] sm:$0xff] }
0x1310   :  { %1771 = vmatpush.bf16.msrb.mxu0 %v5472_v32 }
0x1311   :  { %v1636_v38 = vmul.f32 %v1635_v47, %v1625_v20  ;;  %v1644_v39 = vmul.f32 %v5661_v34, %v1643_v36  ;;  %v5470_v47 = vld [vmem:[%s7450_s8 + $0x28] sm:$0xff]  ;;  %v5469_v36 = vld [vmem:[%s7450_s8 + $0x20] sm:$0xff] }
0x1313   :  { %v1638_v42 = vsel %vm1637_vm1, %v1625_v20, %v1636_v38  ;;  %v1645_v43 = vmul.f32 0.5, %v1644_v39  ;;  %v5531_v39 = vld [vmem:[%s7446_s4 + $0xe] ss:$0 sm:$0xff] }
0x1314   :  { %v1641_v8 = vsel %vm1639_vm2, %v1640_v41, %v1638_v42 }
0x1315   :  { %v1654_v45 = vadd.f32 1e-06, %v1641_v8  ;;  %v1646_v46 = vsub.f32 1.5, %v1645_v43 }
0x1317   :  { %5662 = vrcp.f32 %v1654_v45  ;;  %v1647_v48 = vmul.f32 %v5661_v34, %v1646_v46  ;;  %v1667_v51 = vand.u32 2147483648, %v1654_v45  ;;  %vm1661_vm6 = vweird.f32 %v1654_v45  ;;  %v5471_v34 = vld [vmem:[%s7450_s8 + $0x30] sm:$0xff]  ;;  %s5898_s8 = smov [#allocation2]  }
0x1318   :  { %v1665_v15 = vand.u32 2147483647, %v1654_v45  ;;  %1772 = vmatpush.bf16.msrb.mxu0 %v5471_v34 }
0x1319   :  { %v1648_v50 = vmul.f32 %v1647_v48, %v1626_v28  ;;  %v1668_v60 = vor.u32 1.1754944e-38, %v1667_v51  ;;  %v6572_v48 = vld [vmem:[%s7445_s3 + $0x8] sm:$0xff] }
0x131a   :  { %vm1666_vm8 = vcmp.eq.f32.partialorder %v1665_v15, 8.507059e+37 }
0x131b   :  { %v1650_v40 = vsel %vm1649_vm3, %v1626_v28, %v1648_v50 }
0x131c   :  { %v1653_v1 = vsel %vm1651_vm4, %v1652_v33, %v1650_v40  ;;  %1773 = vmatpush.bf16.msrb.mxu0 %v5470_v47 }
0x131d   :  { %v5663_v0 = vpop.eup %5662  ;;  %v1655_v52 = vadd.f32 1e-06, %v1653_v1 }
0x131e   :  { %v1657_v54 = vmul.f32 %v5663_v0, %v1654_v45  ;;  %vm1662_vm5 = vweird.f32 %v5663_v0 }
0x131f   :  { %5664 = vrcp.f32 %v1655_v52  ;;  %vm1663_vm7 = vmor %vm1661_vm6, %vm1662_vm5  ;;  %v1682_v62 = vand.u32 2147483648, %v1655_v52  ;;  %v1680_v3 = vand.u32 2147483647, %v1655_v52  ;;  %vm1676_vm10 = vweird.f32 %v1655_v52 }
0x1320   :  { %v1658_v55 = vsub.f32 1.0, %v1657_v54  ;;  %1774 = vmatpush.bf16.msrb.mxu0 %v5469_v36 }
0x1321   :  { %v1683_v11 = vor.u32 1.1754944e-38, %v1682_v62  ;;  %vm1681_vm12 = vcmp.eq.f32.partialorder %v1680_v3, 8.507059e+37 }
0x1322   :  { %v1659_v56 = vmul.f32 %v5663_v0, %v1658_v55 }
0x1324   :  { %v1660_v30 = vadd.f32 %v5663_v0, %v1659_v56 }
0x1325   :  { %v5665_v4 = vpop.eup %5664 }
0x1326   :  { %v1672_v35 = vmul.f32 %v5665_v4, %v1655_v52  ;;  %v1664_v63 = vsel %vm1663_vm7, %v5663_v0, %v1660_v30  ;;  %vm1677_vm9 = vweird.f32 %v5665_v4 }
0x1327   :  { %v1669_v5 = vsel %vm1666_vm8, %v1668_v60, %v1664_v63  ;;  %vm1678_vm11 = vmor %vm1676_vm10, %vm1677_vm9 }
0x1328   :  { %v1673_v59 = vsub.f32 1.0, %v1672_v35  ;;  %v1670_v14 = vmul.f32 %v1669_v5, %v1628_v6 }
0x132a   :  { %v1674_v49 = vmul.f32 %v5665_v4, %v1673_v59  ;;  %v1687_v16 = vadd.f32 %v5530_v17, %v1670_v14 }
0x132c   :  { %v1675_v7 = vadd.f32 %v5665_v4, %v1674_v49 }
0x132e   :  { %v1679_v44 = vsel %vm1678_vm11, %v5665_v4, %v1675_v7  ;;  %v6601_v7 = vld [vmem:[%s7446_s4 + $0xf] ss:$0 sm:$0xff] }
0x132f   :  { %v1684_v12 = vsel %vm1681_vm12, %v1683_v11, %v1679_v44 }
0x1330   :  { %v1685_v13 = vmul.f32 %v1684_v12, %v1629_v37  ;;  %v5250_v37 = vld [vmem:[%s7453_s11 + $0x4] sm:$0xf] }
0x1331   :  { %v2228_v14 = vsel %vm279_vm15, %v5250_v37, 0 }
0x1332   :  { %v1688_v19 = vadd.f32 %v5530_v17, %v1685_v13  ;;  %2237 = vmatpush.bf16.msrb.mxu2 %v2228_v14 }
0x1334   :  { %v1705_v21 = vpack.c.bf16 %v1688_v19, %v1687_v16 }
0x1336   :  { %5215 = vmatmul.msk.bf16.vlgmr.msrb.gmra.mxu3 %vm72_vm0, %v1705_v21 }
0x1337   :  { %2149 = vmatpush.bf16.xpose.msrb.mxu3 %v2140_v2 }
0x1346   :  { %5243 = vmatmul.msk.bf16.vlgmr.msra.gmra.mxu3 %vm206_vm14, %v6490_v22 }
0x1356   :  { %5247 = vmatmul.msk.bf16.vlgmr.msrb.gmra.mxu3 %vm206_vm14, %v2133_v9 }
0x135b   :  { %v2013_v20 = vpop.f32.mrf.mxu2 }
0x135c   :  { %v2014_v24 = vadd.f32 %v2013_v20, %v6542_v23 }
0x135e   :  { %v2041_v26 = vsel %vm206_vm14, %v2014_v24, -inf }
0x135f   :  { %2042 = vmax.xlane.f32.xlu2 %v2041_v26 }
0x1363   :  { %v2015_v28 = vpop.f32.mrf.mxu2 }
0x136b   :  { %v2128_v25 = vpop.f32.mrf.mxu2 }
0x136c   :  { %v2129_v29 = vadd.f32 %v2128_v25, %v6542_v23 }
0x136e   :  { %v2155_v22 = vsel %vm206_vm14, %v2129_v29, -inf }
0x136f   :  { %2156 = vmax.xlane.f32.xlu0 %v2155_v22 }
0x1373   :  { %v2130_v31 = vpop.f32.mrf.mxu2 }
0x1383   :  { %2065 = vrot.lane.b32.xlu0 %v6482_v58, %s5892_s19 }
0x138b   :  { %2266 = vrot.lane.b32.xlu0 %v6482_v58, %s7481_s18 }
0x1393   :  { %2264 = vrot.lane.b32.xlu0 %v6482_v58, %s5893_s1 }
0x13b9   :  { %v1731_v38 = vpop.f32.mrf.mxu3 }
0x13ba   :  { %v1732_v41 = vadd.f32 %v5531_v39, %v1731_v38 }
0x13bc   :  { %v1736_v8 = vmax.f32 %v1732_v41, 0.0 }
0x13c1   :  { %v1733_v42 = vpop.f32.mrf.mxu3 }
0x13c2   :  { %v1734_v43 = vadd.f32 %v5531_v39, %v1733_v42 }
0x13c4   :  { %v1737_v45 = vmax.f32 %v1734_v43, 0.0 }
0x13c6   :  { %v1738_v46 = vpack.c.bf16 %v1737_v45, %v1736_v8 }
0x13c8   :  { %5232 = vmatmul.msk.bf16.vlgmr.msrb.gmra.mxu0 %vm910_vm13, %v1738_v46 }
0x13c9   :  { %v2037_v50 = vpop.f32.mrf.mxu3 }
0x13ca   :  { %v2038_v33 = vadd.f32 %v2037_v50, %v6572_v48 }
0x13cc   :  { %v2044_v40 = vsel %vm206_vm14, %v2038_v33, -inf }
0x13cd   :  { %2045 = vmax.xlane.f32.xlu2 %v2044_v40 }
0x13d1   :  { %v2039_v1 = vpop.f32.mrf.mxu3 }
0x13d2   :  { %v2043_v0 = vpop.xlane.xlu2 %2042 }
0x13d3   :  { %v2047_v52 = vsub.f32 %v2014_v24, %v2043_v0 }
0x13d5   :  { %v2049_v54 = vmul.f32 1.442695, %v2047_v52 }
0x13d7   :  { %5666 = vpow2.f32 %v2049_v54 }
0x13d9   :  { %v2151_v55 = vpop.f32.mrf.mxu3 }
0x13da   :  { %v2152_v56 = vadd.f32 %v2151_v55, %v6572_v48 }
0x13dc   :  { %v2158_v30 = vsel %vm206_vm14, %v2152_v56, -inf }
0x13dd   :  { %v5667_v4 = vpop.eup %5666  ;;  %2159 = vmax.xlane.f32.xlu0 %v2158_v30 }
0x13de   :  { %v2053_v51 = vsel %vm206_vm14, %v5667_v4, 0.0 }
0x13df   :  { %2054 = vadd.xlane.f32.xlu1 %v2053_v51 }
0x13e1   :  { %v2153_v15 = vpop.f32.mrf.mxu3 }
0x13e2   :  { %v2157_v35 = vpop.xlane.xlu0 %2156 }
0x13e3   :  { %v2161_v57 = vsub.f32 %v2129_v29, %v2157_v35 }
0x13e5   :  { %v2163_v63 = vmul.f32 1.442695, %v2161_v57 }
0x13e7   :  { %5668 = vpow2.f32 %v2163_v63 }
0x13ed   :  { %v5669_v59 = vpop.eup %5668 }
0x13ee   :  { %v2167_v60 = vsel %vm206_vm14, %v5669_v59, 0.0 }
0x13ef   :  { %2168 = vadd.xlane.f32.xlu1 %v2167_v60 }
0x13f1   :  { %2334 = vrot.lane.b32.xlu0 %v6482_v58, %s7482_s22 }
0x13f5   :  { %v2066_v62 = vpop.permute.xlu0 %2065 }
0x13f6   :  { %v2071_v49 = vsel %vm279_vm15, %v2066_v62, 0 }
0x13f7   :  { %2080 = vmatpush.bf16.msra.mxu0 %v2071_v49  ;;  %v2108_v49 = vld [vmem:[%s7453_s11] sm:$0xf] }
0x13f9   :  { %2403 = vrot.lane.b32.xlu0 %v6482_v58, %s7483_s23 }
0x13fd   :  { %v2267_v3 = vpop.permute.xlu0 %2266 }
0x13fe   :  { %v2272_v36 = vsel %vm206_vm14, %v2267_v3, 0  ;;  %v2248_v3 = vsel %vm279_vm15, %v2108_v49, 0 }
0x13ff   :  { %2257 = vmatpush.bf16.msra.mxu3 %v2248_v3 }
0x1401   :  { %2426 = vrot.lane.b32.xlu0 %v6493_v61, %s7483_s23 }
0x1405   :  { %v2265_v12 = vpop.permute.xlu0 %2264 }
0x1408   :  { %2179 = vrot.lane.b32.xlu1 %v6482_v58, %s5890_s27 }
0x1409   :  { %2424 = vrot.lane.b32.xlu0 %v6493_v61, %s7484_s29 }
0x1410   :  { %2086 = vrot.lane.b32.xlu1 %v6493_v61, %s5892_s19 }
0x1418   :  { %2200 = vrot.lane.b32.xlu1 %v6493_v61, %s5890_s27 }
0x1420   :  { %2287 = vrot.lane.b32.xlu1 %v6493_v61, %s5893_s1 }
0x1440   :  { %v2046_v5 = vpop.xlane.xlu2 %2045 }
0x1441   :  { %v2048_v6 = vsub.f32 %v2038_v33, %v2046_v5 }
0x1443   :  { %v2051_v11 = vmul.f32 1.442695, %v2048_v6 }
0x1445   :  { %5670 = vpow2.f32 %v2051_v11  ;;  %v1776_v44 = vpop.f32.mrf.mxu0 }
0x1446   :  { %v6608_v17 = vadd.f32 %v6601_v7, %v1776_v44 }
0x1448   :  { %v1781_v49 = vadd.f32 %v6608_v17, %v6469_v53 }
0x144b   :  { %v5671_v13 = vpop.eup %5670 }
0x144c   :  { %v2056_v16 = vsel %vm206_vm14, %v5671_v13, 0.0 }
0x144d   :  { %2057 = vadd.xlane.f32.xlu2 %v2056_v16  ;;  %v6623_v40 = vpop.f32.mrf.mxu0 }
0x1450   :  { %v2160_v19 = vpop.xlane.xlu0 %2159 }
0x1451   :  { %v2162_v18 = vsub.f32 %v2152_v56, %v2160_v19 }
0x1452   :  { %v2055_v21 = vpop.xlane.xlu1 %2054 }
0x1453   :  { %v2165_v2 = vmul.f32 1.442695, %v2162_v18  ;;  %5672 = vrcp.f32 %v2055_v21 }
0x1455   :  { %5674 = vpow2.f32 %v2165_v2 }
0x1459   :  { %v5673_v9 = vpop.eup %5672 }
0x145a   :  { %v2061_v20 = vmul.f32 %v5673_v9, %v5667_v4 }
0x145b   :  { %v5675_v24 = vpop.eup %5674 }
0x145c   :  { %v2063_v26 = vpack.c.bf16 %v2061_v20, %v2061_v20  ;;  %v2170_v28 = vsel %vm206_vm14, %v5675_v24, 0.0 }
0x145d   :  { %2171 = vadd.xlane.f32.xlu2 %v2170_v28 }
0x145e   :  { %5244 = vmatmul.msk.bf16.vlgmr.msra.gmra.mxu0 %vm206_vm14, %v2063_v26 }
0x1462   :  { %v2169_v22 = vpop.xlane.xlu1 %2168 }
0x1463   :  { %v2335_v25 = vpop.permute.xlu0 %2334  ;;  %5676 = vrcp.f32 %v2169_v22 }
0x1464   :  { %v2340_v29 = vsel %vm279_vm15, %v2335_v25, 0 }
0x1465   :  { %2349 = vmatpush.bf16.msra.mxu2 %v2340_v29 }
0x1469   :  { %v5677_v31 = vpop.eup %5676 }
0x146a   :  { %v2175_v32 = vmul.f32 %v5677_v31, %v5669_v59 }
0x146b   :  { %v2404_v54 = vpop.permute.xlu0 %2403 }
0x146c   :  { %v2177_v38 = vpack.c.bf16 %v2175_v32, %v2175_v32  ;;  %v2409_v4 = vsel %vm206_vm14, %v2404_v54, 0 }
0x1473   :  { %v2427_v37 = vpop.permute.xlu0 %2426 }
0x1475   :  { %2289 = vrot.lane.b32.xlu2 %v6493_v61, %s7481_s18 }
0x147a   :  { %v2180_v34 = vpop.permute.xlu1 %2179 }
0x147b   :  { %v2185_v47 = vsel %vm279_vm15, %v2180_v34, 0 }
0x147c   :  { %2194 = vmatpush.bf16.msrb.mxu0 %v2185_v47 }
0x147f   :  { %5248 = vmatmul.msk.bf16.vlgmr.msrb.gmra.mxu0 %vm206_vm14, %v2177_v38 }
0x1480   :  { %2281 = vmatpush.bf16.xpose.msra.mxu0 %v2272_v36 }
0x1482   :  { %v2087_v39 = vpop.permute.xlu1 %2086 }
0x1483   :  { %v2092_v41 = vsel %vm279_vm15, %v2087_v39, 0 }
0x1484   :  { %2101 = vmatpush.bf16.msra.mxu1 %v2092_v41 }
0x148a   :  { %v2201_v42 = vpop.permute.xlu1 %2200 }
0x148b   :  { %v2206_v43 = vsel %vm279_vm15, %v2201_v42, 0 }
0x148c   :  { %2215 = vmatpush.bf16.msrb.mxu1 %v2206_v43 }
0x148f   :  { %5253 = vmatmul.msk.bf16.vlgmr.msra.gmra.mxu0 %vm206_vm14, %v2265_v12  ;;  %v2432_v12 = vsel %vm206_vm14, %v2427_v37, 0 }
0x1492   :  { %v2288_v15 = vpop.permute.xlu1 %2287 }
0x14c0   :  { %v2058_v8 = vpop.xlane.xlu2 %2057 }
0x14c1   :  { %5678 = vrcp.f32 %v2058_v8 }
0x14c7   :  { %v5679_v45 = vpop.eup %5678 }
0x14c8   :  { %v2062_v46 = vmul.f32 %v5679_v45, %v5671_v13 }
0x14ca   :  { %v2064_v50 = vpack.c.bf16 %v2062_v46, %v2062_v46 }
0x14cc   :  { %5245 = vmatmul.msk.bf16.vlgmr.msra.gmra.mxu1 %vm206_vm14, %v2064_v50 }
0x14d0   :  { %v2172_v33 = vpop.xlane.xlu2 %2171 }
0x14d1   :  { %5680 = vrcp.f32 %v2172_v33  ;;  %v2425_v33 = vpop.permute.xlu0 %2424 }
0x14d7   :  { %v5681_v1 = vpop.eup %5680 }
0x14d8   :  { %v2176_v0 = vmul.f32 %v5681_v1, %v5675_v24  ;;  %v2290_v52 = vpop.permute.xlu2 %2289 }
0x14d9   :  { %v2295_v55 = vsel %vm206_vm14, %v2290_v52, 0 }
0x14da   :  { %v2178_v56 = vpack.c.bf16 %v2176_v0, %v2176_v0  ;;  %2304 = vmatpush.bf16.xpose.msra.mxu1 %v2295_v55  ;;  %v1779_v0 = vadd.f32 %v6601_v7, %v6623_v40 }
0x14db   :  { %v2082_v30 = vpop.f32.mrf.mxu0 }
0x14dc   :  { %5249 = vmatmul.msk.bf16.vlgmr.msrb.gmra.mxu1 %vm206_vm14, %v2178_v56  ;;  %v6659_v52 = vadd.f32 %v1779_v0, %v6475_v27 }
0x14de   :  { %v1788_v54 = vsel %vm72_vm0, %v6659_v52, 0.0 }
0x14e2   :  { %2418 = vmatpush.bf16.xpose.msrb.mxu1 %v2409_v4 }
0x14e3   :  { %v2084_v51 = vpop.f32.mrf.mxu0 }
0x14ec   :  { %5254 = vmatmul.msk.bf16.vlgmr.msra.gmra.mxu1 %vm206_vm14, %v2288_v15 }
0x14fc   :  { %v2196_v35 = vpop.f32.mrf.mxu0 }
0x1504   :  { %v2198_v57 = vpop.f32.mrf.mxu0 }
0x150c   :  { %v2283_v63 = vpop.f32.mrf.mxu0 }
0x150d   :  { %v2284_v59 = vadd.f32 %v2283_v63, %v6542_v23 }
0x150f   :  { %v2310_v60 = vsel %vm206_vm14, %v2284_v59, -inf }
0x1510   :  { %2311 = vmax.xlane.f32.xlu1 %v2310_v60 }
0x1514   :  { %v2285_v62 = vpop.f32.mrf.mxu0 }
0x1529   :  { %2401 = vrot.lane.b32.xlu1 %v6482_v58, %s7484_s29 }
0x1549   :  { %v2103_v5 = vpop.f32.mrf.mxu1 }
0x154a   :  { %v2107_v6 = vpack.c.bf16 %v2103_v5, %v2082_v30  ;;  %v1785_v5 = vsel %vm72_vm0, %v1781_v49, 0.0 }
0x154c   :  { %5252 = vmatmul.msk.bf16.vlgmr.msra.gmra.mxu3 %vm206_vm14, %v2107_v6  ;;  %v5257_v6 = vld [vmem:[%s7453_s11 + $0x8] sm:$0xf] }
0x1551   :  { %v2105_v11 = vpop.f32.mrf.mxu1 }
0x1559   :  { %v2217_v14 = vpop.f32.mrf.mxu1 }
0x155a   :  { %v2221_v44 = vpack.c.bf16 %v2217_v14, %v2196_v35 }
0x155c   :  { %5251 = vmatmul.msk.bf16.vlgmr.msrb.gmra.mxu2 %vm206_vm14, %v2221_v44 }
0x155d   :  { %2441 = vmatpush.bf16.xpose.msrb.mxu2 %v2432_v12 }
0x1561   :  { %v2219_v13 = vpop.f32.mrf.mxu1 }
0x1569   :  { %v2306_v16 = vpop.f32.mrf.mxu1 }
0x156a   :  { %v2307_v24 = vadd.f32 %v2306_v16, %v6572_v48 }
0x156c   :  { %v2313_v26 = vsel %vm206_vm14, %v2307_v24, -inf }
0x1571   :  { %v2308_v19 = vpop.f32.mrf.mxu1 }
0x1583   :  { %v2312_v18 = vpop.xlane.xlu1 %2311 }
0x1584   :  { %v2316_v21 = vsub.f32 %v2284_v59, %v2312_v18 }
0x1586   :  { %v2318_v2 = vmul.f32 1.442695, %v2316_v21 }
0x1588   :  { %5682 = vpow2.f32 %v2318_v2 }
0x158e   :  { %v5683_v9 = vpop.eup %5682 }
0x158f   :  { %v2322_v20 = vsel %vm206_vm14, %v5683_v9, 0.0 }
0x1590   :  { %2323 = vadd.xlane.f32.xlu2 %v2322_v20 }
0x1598   :  { %2314 = vmax.xlane.f32.xlu2 %v2313_v26 }
0x159b   :  { %v2402_v28 = vpop.permute.xlu1 %2401 }
0x159c   :  { %5259 = vmatmul.msk.bf16.vlgmr.msrb.gmra.mxu1 %vm206_vm14, %v2402_v28 }
0x15b0   :  { %2355 = vrot.lane.b32.xlu2 %v6493_v61, %s7482_s22 }
0x15cf   :  { %v2259_v25 = vpop.f32.mrf.mxu3 }
0x15d7   :  { %v2261_v37 = vpop.f32.mrf.mxu3 }
0x15df   :  { %v2239_v29 = vpop.f32.mrf.mxu2 }
0x15e0   :  { %v6646_v22 = vadd.f32 %v2259_v25, %v2239_v29 }
0x1603   :  { %v2324_v31 = vpop.xlane.xlu2 %2323 }
0x1604   :  { %5684 = vrcp.f32 %v2324_v31 }
0x160a   :  { %v5685_v32 = vpop.eup %5684 }
0x160b   :  { %v2330_v34 = vmul.f32 %v5685_v32, %v5683_v9  ;;  %v2315_v47 = vpop.xlane.xlu2 %2314 }
0x160c   :  { %v2317_v36 = vsub.f32 %v2307_v24, %v2315_v47 }
0x160d   :  { %v2332_v38 = vpack.c.bf16 %v2330_v34, %v2330_v34 }
0x160e   :  { %v2320_v39 = vmul.f32 1.442695, %v2317_v36 }
0x160f   :  { %5255 = vmatmul.msk.bf16.vlgmr.msra.gmra.mxu2 %vm206_vm14, %v2332_v38 }
0x1610   :  { %5686 = vpow2.f32 %v2320_v39 }
0x1613   :  { %v2356_v41 = vpop.permute.xlu2 %2355 }
0x1614   :  { %v2361_v42 = vsel %vm279_vm15, %v2356_v41, 0  ;;  %v5534_v41 = vld [vmem:[%s7451_s9 + $0x3] ss:$0 sm:$0xff] }
0x1615   :  { %2370 = vmatpush.bf16.msrb.mxu3 %v2361_v42 }
0x1616   :  { %v5687_v43 = vpop.eup %5686 }
0x1617   :  { %v2325_v8 = vsel %vm206_vm14, %v5687_v43, 0.0 }
0x1618   :  { %2326 = vadd.xlane.f32.xlu0 %v2325_v8 }
0x1619   :  { %v2420_v45 = vpop.f32.mrf.mxu1 }
0x161a   :  { %v2421_v46 = vadd.f32 %v2420_v45, %v6542_v23  ;;  %v6663_v23 = vpop.f32.mrf.mxu2 }
0x161c   :  { %v2447_v50 = vsel %vm206_vm14, %v2421_v46, -inf }
0x161d   :  { %2448 = vmax.xlane.f32.xlu1 %v2447_v50  ;;  %v2262_v50 = vadd.f32 %v2261_v37, %v6663_v23 }
0x161f   :  { %5260 = vmatmul.msk.bf16.vlgmr.msrb.gmra.mxu2 %vm206_vm14, %v2425_v33  ;;  %v5852_v33 = vld [vmem:[%s7486_s28] sm:$0xff] }
0x1621   :  { %v2422_v1 = vpop.f32.mrf.mxu1 }
0x1636   :  { %2471 = vrot.lane.b32.xlu1 %v6482_v58, %s7485_s30 }
0x1660   :  { %1789 = vadd.xlane.f32.xlu1 %v1788_v54 }
0x168b   :  { %v2327_v55 = vpop.xlane.xlu0 %2326 }
0x168c   :  { %5688 = vrcp.f32 %v2327_v55 }
0x1690   :  { %v2449_v56 = vpop.xlane.xlu1 %2448 }
0x1691   :  { %v2453_v30 = vsub.f32 %v2421_v46, %v2449_v56 }
0x1692   :  { %v5689_v4 = vpop.eup %5688  ;;  %v2351_v51 = vpop.f32.mrf.mxu2 }
0x1693   :  { %v2331_v15 = vmul.f32 %v5689_v4, %v5687_v43  ;;  %v2455_v58 = vmul.f32 1.442695, %v2453_v30 }
0x1695   :  { %v2333_v35 = vpack.c.bf16 %v2331_v15, %v2331_v15  ;;  %5690 = vpow2.f32 %v2455_v58  ;;  %v5853_v58 = vld [vmem:[%s7486_s28 + $0x8] sm:$0xff]  ;;  %s7488_s28 = smov 96  }
0x1697   :  { %5256 = vmatmul.msk.bf16.vlgmr.msrb.gmra.mxu3 %vm206_vm14, %v2333_v35 }
0x169a   :  { %v2353_v27 = vpop.f32.mrf.mxu2 }
0x169b   :  { %v5691_v7 = vpop.eup %5690 }
0x169c   :  { %v2459_v40 = vsel %vm206_vm14, %v5691_v7, 0.0 }
0x169d   :  { %2460 = vadd.xlane.f32.xlu0 %v2459_v40 }
0x16a2   :  { %v2443_v57 = vpop.f32.mrf.mxu2 }
0x16a3   :  { %v2444_v63 = vadd.f32 %v2443_v57, %v6572_v48  ;;  %v2383_v48 = vsel %vm279_vm15, %v5257_v6, 0 }
0x16a4   :  { %2392 = vmatpush.bf16.msrb.mxu0 %v2383_v48 }
0x16a5   :  { %v2450_v59 = vsel %vm206_vm14, %v2444_v63, -inf }
0x16a6   :  { %2451 = vmax.xlane.f32.xlu2 %v2450_v59 }
0x16a8   :  { %v2472_v60 = vpop.permute.xlu1 %2471 }
0x16a9   :  { %v2477_v62 = vsel %vm279_vm15, %v2472_v60, 0 }
0x16aa   :  { %v2445_v3 = vpop.f32.mrf.mxu2  ;;  %2486 = vmatpush.bf16.msra.mxu3 %v2477_v62 }
0x16ae   :  { %1786 = vadd.xlane.f32.xlu2 %v1785_v5 }
0x16d3   :  { %v1790_v56 = vpop.xlane.xlu1 %1789 }
0x1710   :  { %v2461_v11 = vpop.xlane.xlu0 %2460 }
0x1711   :  { %5692 = vrcp.f32 %v2461_v11  ;;  %v5478_v11 = vld [vmem:[%s7455_s13 + $0x8] sm:$0xff] }
0x1712   :  { %2691 = vmatpush.bf16.msrb.mxu3 %v5478_v11 }
0x1717   :  { %v5693_v14 = vpop.eup %5692 }
0x1718   :  { %v2467_v44 = vmul.f32 %v5693_v14, %v5691_v7  ;;  %v5477_v14 = vld [vmem:[%s7455_s13] sm:$0xff] }
0x1719   :  { %v2452_v12 = vpop.xlane.xlu2 %2451  ;;  %2692 = vmatpush.bf16.msrb.mxu3 %v5477_v14  ;;  %v5475_v14 = vld [vmem:[%s7454_s12] sm:$0xff] }
0x171a   :  { %v2469_v13 = vpack.c.bf16 %v2467_v44, %v2467_v44  ;;  %v2454_v53 = vsub.f32 %v2444_v63, %v2452_v12  ;;  %v2372_v17 = vpop.f32.mrf.mxu3 }
0x171b   :  { %v2376_v16 = vpack.c.bf16 %v2372_v17, %v2351_v51  ;;  %v1792_v51 = vmul.f32 %v1790_v56, %v6005_v10 }
0x171c   :  { %v2457_v19 = vmul.f32 1.442695, %v2454_v53  ;;  %5261 = vmatmul.msk.bf16.vlgmr.msra.gmra.mxu3 %vm206_vm14, %v2469_v13 }
0x171d   :  { %5258 = vmatmul.msk.bf16.vlgmr.msrb.gmra.mxu0 %vm206_vm14, %v2376_v16  ;;  %v6713_v27 = vsub.f32 %v6659_v52, %v1792_v51  ;;  %v5533_v51 = vld [vmem:[%s7446_s4 + $0x10] ss:$0 sm:$0xff] }
0x171e   :  { %5694 = vpow2.f32 %v2457_v19 }
0x171f   :  { %v1796_v57 = vmul.f32 %v6713_v27, %v6713_v27 }
0x1721   :  { %v1787_v42 = vpop.xlane.xlu2 %1786  ;;  %v1800_v63 = vsel %vm72_vm0, %v1796_v57, 0.0 }
0x1722   :  { %v2374_v18 = vpop.f32.mrf.mxu3  ;;  %v1791_v45 = vmul.f32 %v1787_v42, %v6005_v10 }
0x1724   :  { %v5695_v21 = vpop.eup %5694  ;;  %v6700_v0 = vsub.f32 %v1781_v49, %v1791_v45 }
0x1725   :  { %v2462_v2 = vsel %vm206_vm14, %v5695_v21, 0.0 }
0x1726   :  { %2463 = vadd.xlane.f32.xlu0 %v2462_v2  ;;  %v1795_v23 = vmul.f32 %v6700_v0, %v6700_v0 }
0x1728   :  { %v1797_v7 = vsel %vm72_vm0, %v1795_v23, 0.0 }
0x173a   :  { %2492 = vrot.lane.b32.xlu0 %v6493_v61, %s7485_s30  ;;  %v5263_v61 = vld [vmem:[%s7453_s11 + $0xc] sm:$0xf] }
0x173b   :  { %v2520_v47 = vsel %vm279_vm15, %v5263_v61, 0 }
0x173c   :  { %2529 = vmatpush.bf16.msra.mxu1 %v2520_v47 }
0x1799   :  { %v2464_v24 = vpop.xlane.xlu0 %2463 }
0x179a   :  { %v2394_v9 = vpop.f32.mrf.mxu0  ;;  %5696 = vrcp.f32 %v2464_v24 }
0x179b   :  { %v2399_v20 = vadd.f32 %v2394_v9, %v6646_v22 }
0x179f   :  { %v2488_v26 = vpop.f32.mrf.mxu3 }
0x17a0   :  { %v5697_v25 = vpop.eup %5696 }
0x17a1   :  { %v2468_v29 = vmul.f32 %v5697_v25, %v5695_v21 }
0x17a2   :  { %v2396_v22 = vpop.f32.mrf.mxu0 }
0x17a3   :  { %v2470_v34 = vpack.c.bf16 %v2468_v29, %v2468_v29  ;;  %v2400_v54 = vadd.f32 %v2396_v22, %v2262_v50 }
0x17a7   :  { %v2490_v28 = vpop.f32.mrf.mxu3 }
0x17ac   :  { %v2493_v31 = vpop.permute.xlu0 %2492 }
0x17ad   :  { %v2498_v32 = vsel %vm279_vm15, %v2493_v31, 0 }
0x17ae   :  { %2507 = vmatpush.bf16.msra.mxu0 %v2498_v32 }
0x17b1   :  { %5262 = vmatmul.msk.bf16.vlgmr.msra.gmra.mxu0 %vm206_vm14, %v2470_v34 }
0x182e   :  { %v2509_v36 = vpop.f32.mrf.mxu0 }
0x182f   :  { %v2513_v38 = vpack.c.bf16 %v2509_v36, %v2488_v26 }
0x1831   :  { %5264 = vmatmul.msk.bf16.vlgmr.msra.gmra.mxu1 %vm206_vm14, %v2513_v38 }
0x1836   :  { %v2511_v39 = vpop.f32.mrf.mxu0 }
0x18ae   :  { %v2531_v43 = vpop.f32.mrf.mxu1 }
0x18af   :  { %v2536_v8 = vadd.f32 %v2531_v43, %v2399_v20 }
0x18b1   :  { %v2539_v46 = vadd.f32 %v5534_v41, %v2536_v8 }
0x18b3   :  { %v6698_v1 = vadd.f32 %v5852_v33, %v2539_v46 }
0x18b5   :  { %v2545_v55 = vsel %vm72_vm0, %v6698_v1, 0.0 }
0x18b6   :  { %2546 = vadd.xlane.f32.xlu2 %v2545_v55  ;;  %v2533_v30 = vpop.f32.mrf.mxu1 }
0x18b7   :  { %v2537_v4 = vadd.f32 %v2533_v30, %v2400_v54 }
0x18b9   :  { %v2540_v15 = vadd.f32 %v5534_v41, %v2537_v4 }
0x18bb   :  { %v6710_v35 = vadd.f32 %v5853_v58, %v2540_v15 }
0x18bd   :  { %v2548_v40 = vsel %vm72_vm0, %v6710_v35, 0.0 }
0x18be   :  { %1798 = vadd.xlane.f32.xlu2 %v1797_v7  ;;  %2549 = vadd.xlane.f32.xlu0 %v2548_v40  ;;  %v1806_v7 = vmul.f32 %v5533_v51, %v6700_v0 }
0x18c6   :  { %1801 = vadd.xlane.f32.xlu2 %v1800_v63  ;;  %v1807_v63 = vmul.f32 %v5533_v51, %v6713_v27  ;;  %v5476_v27 = vld [vmem:[%s7454_s12 + $0x8] sm:$0xff] }
0x18c7   :  { %2661 = vmatpush.bf16.msra.mxu2 %v5476_v27 }
0x18cb   :  { %2662 = vmatpush.bf16.msra.mxu2 %v5475_v14 }
0x1929   :  { %v2547_v59 = vpop.xlane.xlu2 %2546 }
0x192a   :  { %v2551_v60 = vmul.f32 %v2547_v59, %v6005_v10 }
0x192c   :  { %v6723_v62 = vsub.f32 %v6698_v1, %v2551_v60 }
0x192e   :  { %v2555_v52 = vmul.f32 %v6723_v62, %v6723_v62 }
0x1930   :  { %v2557_v49 = vsel %vm72_vm0, %v2555_v52, 0.0  ;;  %v5536_v52 = vld [vmem:[%s7446_s4 + $0x11] ss:$0 sm:$0xff] }
0x1931   :  { %2558 = vadd.xlane.f32.xlu2 %v2557_v49  ;;  %v1799_v3 = vpop.xlane.xlu2 %1798  ;;  %v2550_v5 = vpop.xlane.xlu0 %2549 }
0x1932   :  { %v1803_v6 = vmul.f32 0.032258064, %v1799_v3  ;;  %v2552_v48 = vmul.f32 %v2550_v5, %v6005_v10 }
0x1934   :  { %5698 = vrsqrt.f32 %v1803_v6  ;;  %v6733_v37 = vsub.f32 %v6710_v35, %v2552_v48  ;;  %vm1815_vm1 = vcmp.eq.f32.partialorder %v1803_v6, inf  ;;  %v1818_v28 = vand.u32 2147483648, %v1803_v6 }
0x1935   :  { %vm1817_vm2 = vcmp.eq.f32.partialorder %v1803_v6, 0.0 }
0x1936   :  { %v2556_v44 = vmul.f32 %v6733_v37, %v6733_v37 }
0x1938   :  { %v2560_v13 = vsel %vm72_vm0, %v2556_v44, 0.0 }
0x1939   :  { %v1802_v12 = vpop.xlane.xlu2 %1801  ;;  %2561 = vadd.xlane.f32.xlu2 %v2560_v13 }
0x193a   :  { %v5699_v53 = vpop.eup %5698  ;;  %v1804_v17 = vmul.f32 0.032258064, %v1802_v12 }
0x193b   :  { %v1809_v16 = vmul.f32 %v5699_v53, %v1803_v6 }
0x193c   :  { %5700 = vrsqrt.f32 %v1804_v17  ;;  %vm1827_vm3 = vcmp.eq.f32.partialorder %v1804_v17, inf  ;;  %v1830_v22 = vand.u32 2147483648, %v1804_v17  ;;  %vm1829_vm4 = vcmp.eq.f32.partialorder %v1804_v17, 0.0 }
0x193d   :  { %v1810_v19 = vmul.f32 %v5699_v53, %v1809_v16 }
0x193f   :  { %v1811_v18 = vmul.f32 0.5, %v1810_v19 }
0x1941   :  { %v1812_v21 = vsub.f32 1.5, %v1811_v18 }
0x1942   :  { %v5701_v2 = vpop.eup %5700 }
0x1943   :  { %v1813_v9 = vmul.f32 %v5699_v53, %v1812_v21  ;;  %v1821_v20 = vmul.f32 %v5701_v2, %v1804_v17 }
0x1945   :  { %v1814_v24 = vmul.f32 %v1813_v9, %v1803_v6  ;;  %v1822_v26 = vmul.f32 %v5701_v2, %v1821_v20 }
0x1947   :  { %v1816_v25 = vsel %vm1815_vm1, %v1803_v6, %v1814_v24  ;;  %v1823_v29 = vmul.f32 0.5, %v1822_v26 }
0x1948   :  { %v1819_v31 = vsel %vm1817_vm2, %v1818_v28, %v1816_v25 }
0x1949   :  { %v1832_v32 = vadd.f32 1e-06, %v1819_v31  ;;  %v1824_v34 = vsub.f32 1.5, %v1823_v29 }
0x194b   :  { %5702 = vrcp.f32 %v1832_v32  ;;  %v1825_v61 = vmul.f32 %v5701_v2, %v1824_v34  ;;  %v1845_v50 = vand.u32 2147483648, %v1832_v32  ;;  %vm1839_vm6 = vweird.f32 %v1832_v32 }
0x194c   :  { %v1843_v33 = vand.u32 2147483647, %v1832_v32 }
0x194d   :  { %v1826_v47 = vmul.f32 %v1825_v61, %v1804_v17  ;;  %v1846_v30 = vor.u32 1.1754944e-38, %v1845_v50 }
0x194e   :  { %vm1844_vm8 = vcmp.eq.f32.partialorder %v1843_v33, 8.507059e+37  ;;  %v5535_v33 = vld [vmem:[%s7451_s9 + $0x4] ss:$0 sm:$0xff] }
0x194f   :  { %v1828_v36 = vsel %vm1827_vm3, %v1804_v17, %v1826_v47 }
0x1950   :  { %v1831_v38 = vsel %vm1829_vm4, %v1830_v22, %v1828_v36 }
0x1951   :  { %v5703_v39 = vpop.eup %5702  ;;  %v1833_v41 = vadd.f32 1e-06, %v1831_v38 }
0x1952   :  { %v1835_v42 = vmul.f32 %v5703_v39, %v1832_v32  ;;  %vm1840_vm5 = vweird.f32 %v5703_v39 }
0x1953   :  { %5704 = vrcp.f32 %v1833_v41  ;;  %vm1841_vm7 = vmor %vm1839_vm6, %vm1840_vm5  ;;  %v1860_v4 = vand.u32 2147483648, %v1833_v41  ;;  %v1858_v23 = vand.u32 2147483647, %v1833_v41  ;;  %vm1854_vm10 = vweird.f32 %v1833_v41 }
0x1954   :  { %v1836_v43 = vsub.f32 1.0, %v1835_v42 }
0x1955   :  { %v1861_v57 = vor.u32 1.1754944e-38, %v1860_v4  ;;  %vm1859_vm12 = vcmp.eq.f32.partialorder %v1858_v23, 8.507059e+37  ;;  %v2566_v23 = vmul.f32 %v5535_v33, %v6723_v62  ;;  %v5538_v62 = vld [vmem:[%s7451_s9 + $0x7] ss:$0 sm:$0xff] }
0x1956   :  { %v1837_v8 = vmul.f32 %v5703_v39, %v1836_v43 }
0x1958   :  { %v1838_v45 = vadd.f32 %v5703_v39, %v1837_v8 }
0x1959   :  { %v5705_v46 = vpop.eup %5704 }
0x195a   :  { %v1850_v54 = vmul.f32 %v5705_v46, %v1833_v41  ;;  %v1842_v55 = vsel %vm1841_vm7, %v5703_v39, %v1838_v45  ;;  %vm1855_vm9 = vweird.f32 %v5705_v46 }
0x195b   :  { %v1847_v58 = vsel %vm1844_vm8, %v1846_v30, %v1842_v55  ;;  %vm1856_vm11 = vmor %vm1854_vm10, %vm1855_vm9 }
0x195c   :  { %v1851_v56 = vsub.f32 1.0, %v1850_v54  ;;  %v1848_v59 = vmul.f32 %v1847_v58, %v1806_v7 }
0x195e   :  { %v1852_v15 = vmul.f32 %v5705_v46, %v1851_v56  ;;  %v1865_v5 = vadd.f32 %v5536_v52, %v1848_v59  ;;  %v5537_v59 = vld [vmem:[%s7451_s9 + $0x5] ss:$0 sm:$0xff] }
0x1960   :  { %v1853_v40 = vadd.f32 %v5705_v46, %v1852_v15 }
0x1962   :  { %v1857_v60 = vsel %vm1856_vm11, %v5705_v46, %v1853_v40  ;;  %v2567_v40 = vmul.f32 %v5535_v33, %v6733_v37 }
0x1963   :  { %v1862_v49 = vsel %vm1859_vm12, %v1861_v57, %v1857_v60 }
0x1964   :  { %v1863_v3 = vmul.f32 %v1862_v49, %v1807_v63 }
0x1966   :  { %v1866_v6 = vadd.f32 %v5536_v52, %v1863_v3 }
0x1968   :  { %v6749_v48 = vpack.c.bf16 %v1866_v6, %v1865_v5 }
0x196a   :  { %5282 = vmatmul.msk.bf16.vlgmr.msrb.gmra.mxu3 %vm72_vm0, %v6749_v48 }
0x19a4   :  { %v2559_v0 = vpop.xlane.xlu2 %2558 }
0x19a5   :  { %v2563_v11 = vmul.f32 0.032258064, %v2559_v0 }
0x19a7   :  { %5706 = vrsqrt.f32 %v2563_v11  ;;  %vm2575_vm1 = vcmp.eq.f32.partialorder %v2563_v11, inf  ;;  %v2578_v20 = vand.u32 2147483648, %v2563_v11  ;;  %vm2577_vm2 = vcmp.eq.f32.partialorder %v2563_v11, 0.0 }
0x19ac   :  { %v2562_v12 = vpop.xlane.xlu2 %2561 }
0x19ad   :  { %v5707_v44 = vpop.eup %5706  ;;  %v2564_v53 = vmul.f32 0.032258064, %v2562_v12 }
0x19ae   :  { %v2569_v13 = vmul.f32 %v5707_v44, %v2563_v11 }
0x19af   :  { %5708 = vrsqrt.f32 %v2564_v53  ;;  %vm2587_vm3 = vcmp.eq.f32.partialorder %v2564_v53, inf  ;;  %v2590_v61 = vand.u32 2147483648, %v2564_v53  ;;  %vm2589_vm4 = vcmp.eq.f32.partialorder %v2564_v53, 0.0 }
0x19b0   :  { %v2570_v17 = vmul.f32 %v5707_v44, %v2569_v13 }
0x19b2   :  { %v2571_v16 = vmul.f32 0.5, %v2570_v17 }
0x19b4   :  { %v2572_v19 = vsub.f32 1.5, %v2571_v16 }
0x19b5   :  { %v5709_v18 = vpop.eup %5708 }
0x19b6   :  { %v2573_v21 = vmul.f32 %v5707_v44, %v2572_v19  ;;  %v2581_v2 = vmul.f32 %v5709_v18, %v2564_v53 }
0x19b8   :  { %v2574_v9 = vmul.f32 %v2573_v21, %v2563_v11  ;;  %v2582_v24 = vmul.f32 %v5709_v18, %v2581_v2  ;;  %v5539_v21 = vld [vmem:[%s7451_s9 + $0x6] ss:$0 sm:$0xff] }
0x19ba   :  { %v2576_v26 = vsel %vm2575_vm1, %v2563_v11, %v2574_v9  ;;  %v2583_v25 = vmul.f32 0.5, %v2582_v24 }
0x19bb   :  { %v2579_v28 = vsel %vm2577_vm2, %v2578_v20, %v2576_v26 }
0x19bc   :  { %v2592_v29 = vadd.f32 1e-06, %v2579_v28  ;;  %v2584_v31 = vsub.f32 1.5, %v2583_v25 }
0x19be   :  { %5710 = vrcp.f32 %v2592_v29  ;;  %v2585_v32 = vmul.f32 %v5709_v18, %v2584_v31  ;;  %v2605_v45 = vand.u32 2147483648, %v2592_v29  ;;  %vm2599_vm6 = vweird.f32 %v2592_v29 }
0x19bf   :  { %v2603_v46 = vand.u32 2147483647, %v2592_v29 }
0x19c0   :  { %v2586_v34 = vmul.f32 %v2585_v32, %v2564_v53  ;;  %v2606_v56 = vor.u32 1.1754944e-38, %v2605_v45 }
0x19c1   :  { %vm2604_vm8 = vcmp.eq.f32.partialorder %v2603_v46, 8.507059e+37 }
0x19c2   :  { %v2588_v47 = vsel %vm2587_vm3, %v2564_v53, %v2586_v34 }
0x19c3   :  { %v2591_v36 = vsel %vm2589_vm4, %v2590_v61, %v2588_v47 }
0x19c4   :  { %v5711_v22 = vpop.eup %5710  ;;  %v2593_v38 = vadd.f32 1e-06, %v2591_v36  ;;  %v6800_v36 = vld [vmem:[%s7444_s2] ss:$0 sm:$0xff] }
0x19c5   :  { %v2595_v39 = vmul.f32 %v5711_v22, %v2592_v29  ;;  %vm2600_vm5 = vweird.f32 %v5711_v22 }
0x19c6   :  { %5712 = vrcp.f32 %v2593_v38  ;;  %vm2601_vm7 = vmor %vm2599_vm6, %vm2600_vm5  ;;  %v2620_v30 = vand.u32 2147483648, %v2593_v38  ;;  %v2618_v51 = vand.u32 2147483647, %v2593_v38  ;;  %vm2614_vm10 = vweird.f32 %v2593_v38 }
0x19c7   :  { %v2596_v41 = vsub.f32 1.0, %v2595_v39 }
0x19c8   :  { %v2621_v7 = vor.u32 1.1754944e-38, %v2620_v30  ;;  %vm2619_vm12 = vcmp.eq.f32.partialorder %v2618_v51, 8.507059e+37 }
0x19c9   :  { %v2597_v42 = vmul.f32 %v5711_v22, %v2596_v41 }
0x19cb   :  { %v2598_v43 = vadd.f32 %v5711_v22, %v2597_v42 }
0x19cc   :  { %v5713_v8 = vpop.eup %5712 }
0x19cd   :  { %v2610_v50 = vmul.f32 %v5713_v8, %v2593_v38  ;;  %v2602_v54 = vsel %vm2601_vm7, %v5711_v22, %v2598_v43  ;;  %vm2615_vm9 = vweird.f32 %v5713_v8 }
0x19ce   :  { %v2607_v15 = vsel %vm2604_vm8, %v2606_v56, %v2602_v54  ;;  %vm2616_vm11 = vmor %vm2614_vm10, %vm2615_vm9 }
0x19cf   :  { %v2611_v55 = vsub.f32 1.0, %v2610_v50  ;;  %v2608_v57 = vmul.f32 %v2607_v15, %v2566_v23 }
0x19d1   :  { %v2612_v4 = vmul.f32 %v5713_v8, %v2611_v55  ;;  %v2625_v49 = vadd.f32 %v5537_v59, %v2608_v57 }
0x19d3   :  { %v2613_v58 = vadd.f32 %v5713_v8, %v2612_v4  ;;  %v6814_v4 = vld [vmem:[%s7444_s2 + $0x1] ss:$0 sm:$0xff] }
0x19d5   :  { %v2617_v63 = vsel %vm2616_vm11, %v5713_v8, %v2613_v58 }
0x19d6   :  { %v2622_v60 = vsel %vm2619_vm12, %v2621_v7, %v2617_v63 }
0x19d7   :  { %v2623_v52 = vmul.f32 %v2622_v60, %v2567_v40 }
0x19d9   :  { %v2626_v3 = vadd.f32 %v5537_v59, %v2623_v52 }
0x19db   :  { %v2638_v5 = vpack.c.bf16 %v2626_v3, %v2625_v49 }
0x19dd   :  { %5273 = vmatmul.msk.bf16.vlgmr.msra.gmra.mxu2 %vm72_vm0, %v2638_v5 }
0x19ed   :  { %v2694_v6 = vpop.f32.mrf.mxu3 }
0x19ee   :  { %v2695_v37 = vadd.f32 %v5538_v62, %v2694_v6 }
0x19f0   :  { %v2701_v0 = vpack.c.bf16 %v2695_v37, %v2695_v37 }
0x19f2   :  { %v2707_v11 = vsel %vm206_vm14, %v2701_v0, 0  ;;  %v2766_v27 = vunpack.c.l.b16 %v2701_v0 }
0x19f3   :  { %2716 = vmatpush.bf16.xpose.msrb.mxu0 %v2707_v11 }
0x19f4   :  { %v6772_v14 = vpack.c.b16 %v2766_v27, %v2766_v27 }
0x19f5   :  { %v2696_v44 = vpop.f32.mrf.mxu3 }
0x19f6   :  { %v2697_v12 = vadd.f32 %v5538_v62, %v2696_v44  ;;  %2820 = vrot.lane.b32.xlu2 %v6772_v14, %s7487_s24 }
0x19f8   :  { %v2702_v13 = vpack.c.bf16 %v2697_v12, %v2697_v12 }
0x19fa   :  { %v2790_v53 = vunpack.c.l.b16 %v2702_v13  ;;  %v2726_v17 = vsel %vm206_vm14, %v2702_v13, 0 }
0x19fb   :  { %2735 = vmatpush.bf16.xpose.msrb.mxu1 %v2726_v17 }
0x19fc   :  { %v6777_v16 = vpack.c.b16 %v2790_v53, %v2790_v53 }
0x19fe   :  { %2846 = vrot.lane.b32.xlu0 %v6777_v16, %s7487_s24 }
0x1a50   :  { %v2821_v19 = vpop.permute.xlu2 %2820 }
0x1a51   :  { %v2826_v18 = vsel %vm206_vm14, %v2821_v19, 0 }
0x1a52   :  { %2835 = vmatpush.bf16.xpose.msra.mxu0 %v2826_v18 }
0x1a60   :  { %v2664_v2 = vpop.f32.mrf.mxu2 }
0x1a61   :  { %v2665_v9 = vadd.f32 %v5539_v21, %v2664_v2 }
0x1a63   :  { %v2699_v20 = vpack.c.bf16 %v2665_v9, %v2665_v9 }
0x1a65   :  { %v2816_v24 = vunpack.c.l.b16 %v2699_v20  ;;  %5283 = vmatmul.msk.bf16.vlgmr.msrb.gmra.mxu0 %vm206_vm14, %v2699_v20 }
0x1a67   :  { %v6786_v26 = vpack.c.b16 %v2816_v24, %v2816_v24 }
0x1a68   :  { %v2666_v28 = vpop.f32.mrf.mxu2 }
0x1a69   :  { %v2667_v25 = vadd.f32 %v5539_v21, %v2666_v28  ;;  %2818 = vrot.lane.b32.xlu1 %v6786_v26, %s7487_s24 }
0x1a6b   :  { %v2700_v29 = vpack.c.bf16 %v2667_v25, %v2667_v25 }
0x1a6d   :  { %v2842_v31 = vunpack.c.l.b16 %v2700_v29  ;;  %5284 = vmatmul.msk.bf16.vlgmr.msrb.gmra.mxu1 %vm206_vm14, %v2700_v29 }
0x1a6f   :  { %v6791_v34 = vpack.c.b16 %v2842_v31, %v2842_v31 }
0x1a70   :  { %v2847_v32 = vpop.permute.xlu0 %2846 }
0x1a71   :  { %v2852_v61 = vsel %vm206_vm14, %v2847_v32, 0  ;;  %2844 = vrot.lane.b32.xlu0 %v6791_v34, %s7487_s24 }
0x1a72   :  { %2861 = vmatpush.bf16.xpose.msra.mxu1 %v2852_v61 }
0x1adb   :  { %v2819_v47 = vpop.permute.xlu1 %2818 }
0x1adc   :  { %5287 = vmatmul.msk.bf16.vlgmr.msra.gmra.mxu0 %vm206_vm14, %v2819_v47 }
0x1ae2   :  { %v2718_v22 = vpop.f32.mrf.mxu0 }
0x1ae3   :  { %v2719_v38 = vadd.f32 %v6800_v36, %v2718_v22  ;;  %v2845_v39 = vpop.permute.xlu0 %2844 }
0x1ae4   :  { %5288 = vmatmul.msk.bf16.vlgmr.msra.gmra.mxu1 %vm206_vm14, %v2845_v39 }
0x1ae5   :  { %v2741_v41 = vsel %vm206_vm14, %v2719_v38, -inf }
0x1ae6   :  { %2742 = vmax.xlane.f32.xlu2 %v2741_v41 }
0x1aea   :  { %v2720_v42 = vpop.f32.mrf.mxu0  ;;  %v2737_v43 = vpop.f32.mrf.mxu1 }
0x1aeb   :  { %v2738_v63 = vadd.f32 %v6814_v4, %v2737_v43 }
0x1aed   :  { %v2744_v59 = vsel %vm206_vm14, %v2738_v63, -inf }
0x1af2   :  { %v2739_v8 = vpop.f32.mrf.mxu1 }
0x1af3   :  { %v2814_v8 = vld [vmem:[%s7456_s14] sm:$0xf] }
0x1afe   :  { %2768 = vrot.lane.b32.xlu2 %v6772_v14, %s7488_s28 }
0x1b06   :  { %2976 = vrot.lane.b32.xlu2 %v6786_v26, %s5893_s1 }
0x1b59   :  { %v2837_v45 = vpop.f32.mrf.mxu0  ;;  %v2743_v46 = vpop.xlane.xlu2 %2742 }
0x1b5a   :  { %v2838_v50 = vadd.f32 %v6800_v36, %v2837_v45  ;;  %v2747_v33 = vsub.f32 %v2719_v38, %v2743_v46  ;;  %v2960_v46 = vsel %vm279_vm15, %v2814_v8, 0 }
0x1b5b   :  { %2969 = vmatpush.bf16.msrb.mxu1 %v2960_v46 }
0x1b5c   :  { %v2749_v54 = vmul.f32 1.442695, %v2747_v33  ;;  %v2867_v55 = vsel %vm206_vm14, %v2838_v50, -inf }
0x1b5d   :  { %2868 = vmax.xlane.f32.xlu1 %v2867_v55 }
0x1b5e   :  { %5714 = vpow2.f32 %v2749_v54 }
0x1b61   :  { %v2839_v56 = vpop.f32.mrf.mxu0  ;;  %v2863_v30 = vpop.f32.mrf.mxu1 }
0x1b62   :  { %v2864_v51 = vadd.f32 %v6814_v4, %v2863_v30  ;;  %v2769_v15 = vpop.permute.xlu2 %2768 }
0x1b63   :  { %v2774_v23 = vsel %vm279_vm15, %v2769_v15, 0 }
0x1b64   :  { %v5715_v58 = vpop.eup %5714  ;;  %2783 = vmatpush.bf16.msrb.mxu2 %v2774_v23  ;;  %v2870_v7 = vsel %vm206_vm14, %v2864_v51, -inf }
0x1b65   :  { %2871 = vmax.xlane.f32.xlu2 %v2870_v7  ;;  %v2753_v40 = vsel %vm206_vm14, %v5715_v58, 0.0 }
0x1b66   :  { %2754 = vadd.xlane.f32.xlu0 %v2753_v40 }
0x1b69   :  { %v2865_v57 = vpop.f32.mrf.mxu1 }
0x1b6a   :  { %v6828_v60 = vpop.permute.xlu2 %2976 }
0x1b7a   :  { %2891 = vrot.lane.b32.xlu0 %v6772_v14, %s7489_s7 }
0x1ba4   :  { %2745 = vmax.xlane.f32.xlu0 %v2744_v59 }
0x1bb8   :  { %2792 = vrot.lane.b32.xlu0 %v6777_v16, %s7488_s28 }
0x1bc0   :  { %2999 = vrot.lane.b32.xlu0 %v6791_v34, %s5893_s1 }
0x1bd0   :  { %v2869_v52 = vpop.xlane.xlu1 %2868 }
0x1bd1   :  { %v2873_v49 = vsub.f32 %v2838_v50, %v2869_v52 }
0x1bd3   :  { %v2875_v3 = vmul.f32 1.442695, %v2873_v49 }
0x1bd5   :  { %5716 = vpow2.f32 %v2875_v3 }
0x1bd8   :  { %v2872_v5 = vpop.xlane.xlu2 %2871 }
0x1bd9   :  { %v2874_v62 = vsub.f32 %v2864_v51, %v2872_v5  ;;  %v2755_v6 = vpop.xlane.xlu0 %2754 }
0x1bda   :  { %5718 = vrcp.f32 %v2755_v6 }
0x1bdb   :  { %v5717_v37 = vpop.eup %5716  ;;  %v2877_v0 = vmul.f32 1.442695, %v2874_v62 }
0x1bdc   :  { %v2879_v11 = vsel %vm206_vm14, %v5717_v37, 0.0 }
0x1bdd   :  { %5720 = vpow2.f32 %v2877_v0  ;;  %2880 = vadd.xlane.f32.xlu1 %v2879_v11 }
0x1be0   :  { %v5719_v27 = vpop.eup %5718 }
0x1be1   :  { %v2761_v44 = vmul.f32 %v5719_v27, %v5715_v58 }
0x1be3   :  { %v6831_v12 = vpop.eup %5720  ;;  %v2763_v13 = vpack.c.bf16 %v2761_v44, %v2761_v44 }
0x1be4   :  { %v2882_v53 = vsel %vm206_vm14, %v6831_v12, 0.0 }
0x1be5   :  { %5285 = vmatmul.msk.bf16.vlgmr.msrb.gmra.mxu2 %vm206_vm14, %v2763_v13  ;;  %2883 = vadd.xlane.f32.xlu2 %v2882_v53 }
0x1bec   :  { %v2892_v17 = vpop.permute.xlu0 %2891 }
0x1bed   :  { %v2897_v19 = vsel %vm279_vm15, %v2892_v17, 0 }
0x1bee   :  { %2906 = vmatpush.bf16.msra.mxu2 %v2897_v19 }
0x1bf6   :  { %2978 = vrot.lane.b32.xlu1 %v6772_v14, %s5893_s1 }
0x1bfd   :  { %3001 = vrot.lane.b32.xlu2 %v6777_v16, %s5893_s1 }
0x1c05   :  { %3046 = vrot.lane.b32.xlu2 %v6772_v14, %s7481_s18 }
0x1c0d   :  { %3115 = vrot.lane.b32.xlu2 %v6772_v14, %s7484_s29 }
0x1c15   :  { %3138 = vrot.lane.b32.xlu2 %v6777_v16, %s7484_s29 }
0x1c17   :  { %v2746_v18 = vpop.xlane.xlu0 %2745 }
0x1c18   :  { %v2748_v21 = vsub.f32 %v2738_v63, %v2746_v18 }
0x1c1a   :  { %v2751_v2 = vmul.f32 1.442695, %v2748_v21 }
0x1c1c   :  { %5722 = vpow2.f32 %v2751_v2 }
0x1c1d   :  { %3113 = vrot.lane.b32.xlu2 %v6786_v26, %s7484_s29  ;;  %v5291_v26 = vld [vmem:[%s7456_s14 + $0x4] sm:$0xf] }
0x1c1e   :  { %v2940_v25 = vsel %vm279_vm15, %v5291_v26, 0 }
0x1c1f   :  { %2949 = vmatpush.bf16.msrb.mxu0 %v2940_v25 }
0x1c22   :  { %v5723_v9 = vpop.eup %5722 }
0x1c23   :  { %v2756_v20 = vsel %vm206_vm14, %v5723_v9, 0.0 }
0x1c24   :  { %2757 = vadd.xlane.f32.xlu1 %v2756_v20 }
0x1c25   :  { %3136 = vrot.lane.b32.xlu2 %v6791_v34, %s7484_s29 }
0x1c2a   :  { %v2793_v24 = vpop.permute.xlu0 %2792 }
0x1c2b   :  { %v2798_v28 = vsel %vm279_vm15, %v2793_v24, 0 }
0x1c2c   :  { %2807 = vmatpush.bf16.msra.mxu3 %v2798_v28 }
0x1c2d   :  { %3067 = vrot.lane.b32.xlu2 %v6777_v16, %s7481_s18 }
0x1c32   :  { %v3000_v52 = vpop.permute.xlu0 %2999 }
0x1c3d   :  { %2912 = vrot.lane.b32.xlu1 %v6777_v16, %s7489_s7 }
0x1c50   :  { %v2881_v29 = vpop.xlane.xlu1 %2880 }
0x1c51   :  { %5724 = vrcp.f32 %v2881_v29 }
0x1c57   :  { %v5725_v31 = vpop.eup %5724 }
0x1c58   :  { %v2887_v32 = vmul.f32 %v5725_v31, %v5717_v37  ;;  %v2884_v34 = vpop.xlane.xlu2 %2883 }
0x1c5a   :  { %v2889_v61 = vpack.c.bf16 %v2887_v32, %v2887_v32 }
0x1c5c   :  { %5289 = vmatmul.msk.bf16.vlgmr.msra.gmra.mxu2 %vm206_vm14, %v2889_v61 }
0x1c60   :  { %v3002_v47 = vpop.permute.xlu2 %3001 }
0x1c61   :  { %v3007_v63 = vsel %vm206_vm14, %v3002_v47, 0 }
0x1c68   :  { %v2979_v22 = vpop.permute.xlu1 %2978  ;;  %v2785_v38 = vpop.f32.mrf.mxu2 }
0x1c69   :  { %v2984_v39 = vsel %vm206_vm14, %v2979_v22, 0  ;;  %v3047_v41 = vpop.permute.xlu2 %3046 }
0x1c6a   :  { %v3052_v42 = vsel %vm279_vm15, %v3047_v41, 0  ;;  %2993 = vmatpush.bf16.xpose.msrb.mxu2 %v2984_v39 }
0x1c6b   :  { %3061 = vmatpush.bf16.msra.mxu0 %v3052_v42 }
0x1c70   :  { %v2787_v43 = vpop.f32.mrf.mxu2 }
0x1c71   :  { %v3116_v45 = vpop.permute.xlu2 %3115  ;;  %5294 = vmatmul.msk.bf16.vlgmr.msrb.gmra.mxu2 %vm206_vm14, %v6828_v60 }
0x1c72   :  { %v3121_v60 = vsel %vm206_vm14, %v3116_v45, 0 }
0x1c79   :  { %v3139_v50 = vpop.permute.xlu2 %3138 }
0x1c7a   :  { %v3144_v13 = vsel %vm206_vm14, %v3139_v50, 0 }
0x1c81   :  { %v3114_v33 = vpop.permute.xlu2 %3113 }
0x1c89   :  { %v6870_v54 = vpop.permute.xlu2 %3136 }
0x1c91   :  { %v3068_v55 = vpop.permute.xlu2 %3067 }
0x1c92   :  { %v3073_v56 = vsel %vm279_vm15, %v3068_v55, 0 }
0x1c93   :  { %3082 = vmatpush.bf16.msra.mxu1 %v3073_v56 }
0x1c97   :  { %v2758_v30 = vpop.xlane.xlu1 %2757 }
0x1c98   :  { %5726 = vrcp.f32 %v2758_v30 }
0x1c99   :  { %5728 = vrcp.f32 %v2884_v34 }
0x1c9e   :  { %v5727_v51 = vpop.eup %5726 }
0x1c9f   :  { %v2762_v15 = vmul.f32 %v5727_v51, %v5723_v9  ;;  %v5729_v58 = vpop.eup %5728 }
0x1ca0   :  { %v2888_v7 = vmul.f32 %v5729_v58, %v6831_v12 }
0x1ca1   :  { %v2764_v23 = vpack.c.bf16 %v2762_v15, %v2762_v15 }
0x1ca2   :  { %v2890_v59 = vpack.c.bf16 %v2888_v7, %v2888_v7 }
0x1ca3   :  { %5286 = vmatmul.msk.bf16.vlgmr.msra.gmra.mxu3 %vm206_vm14, %v2764_v23 }
0x1caf   :  { %v2913_v40 = vpop.permute.xlu1 %2912 }
0x1cb0   :  { %v2918_v57 = vsel %vm279_vm15, %v2913_v40, 0 }
0x1cb1   :  { %2927 = vmatpush.bf16.msrb.mxu3 %v2918_v57 }
0x1cb4   :  { %5290 = vmatmul.msk.bf16.vlgmr.msrb.gmra.mxu3 %vm206_vm14, %v2890_v59 }
0x1cb5   :  { %3016 = vmatpush.bf16.xpose.msra.mxu3 %v3007_v63 }
0x1cbd   :  { %3130 = vmatpush.bf16.xpose.msrb.mxu3 %v3121_v60 }
0x1cc4   :  { %5295 = vmatmul.msk.bf16.vlgmr.msra.gmra.mxu3 %vm206_vm14, %v3000_v52 }
0x1cd4   :  { %5300 = vmatmul.msk.bf16.vlgmr.msrb.gmra.mxu3 %vm206_vm14, %v3114_v33 }
0x1cdf   :  { %v2908_v49 = vpop.f32.mrf.mxu2 }
0x1ce7   :  { %v2910_v3 = vpop.f32.mrf.mxu2 }
0x1cf4   :  { %v2995_v5 = vpop.f32.mrf.mxu2 }
0x1cf5   :  { %v2996_v62 = vadd.f32 %v6800_v36, %v2995_v5 }
0x1cf7   :  { %v3022_v6 = vsel %vm206_vm14, %v2996_v62, -inf }
0x1cf8   :  { %3023 = vmax.xlane.f32.xlu0 %v3022_v6 }
0x1cfc   :  { %v2997_v37 = vpop.f32.mrf.mxu2 }
0x1d26   :  { %v2809_v0 = vpop.f32.mrf.mxu3 }
0x1d27   :  { %v2813_v11 = vpack.c.bf16 %v2809_v0, %v2785_v38 }
0x1d29   :  { %5293 = vmatmul.msk.bf16.vlgmr.msrb.gmra.mxu1 %vm206_vm14, %v2813_v11 }
0x1d2e   :  { %v2811_v27 = vpop.f32.mrf.mxu3 }
0x1d37   :  { %v2929_v44 = vpop.f32.mrf.mxu3 }
0x1d38   :  { %v2933_v12 = vpack.c.bf16 %v2929_v44, %v2908_v49 }
0x1d3a   :  { %5292 = vmatmul.msk.bf16.vlgmr.msrb.gmra.mxu0 %vm206_vm14, %v2933_v12 }
0x1d3b   :  { %3153 = vmatpush.bf16.xpose.msrb.mxu0 %v3144_v13 }
0x1d3f   :  { %v2931_v53 = vpop.f32.mrf.mxu3 }
0x1d47   :  { %v3018_v17 = vpop.f32.mrf.mxu3 }
0x1d48   :  { %v3019_v19 = vadd.f32 %v6814_v4, %v3018_v17 }
0x1d4a   :  { %v3025_v18 = vsel %vm206_vm14, %v3019_v19, -inf }
0x1d4b   :  { %3026 = vmax.xlane.f32.xlu0 %v3025_v18 }
0x1d4f   :  { %v3020_v21 = vpop.f32.mrf.mxu3 }
0x1d57   :  { %v3132_v2 = vpop.f32.mrf.mxu3 }
0x1d58   :  { %v3133_v39 = vadd.f32 %v6800_v36, %v3132_v2  ;;  %v5298_v36 = vld [vmem:[%s7456_s14 + $0x8] sm:$0xf] }
0x1d59   :  { %v3095_v50 = vsel %vm279_vm15, %v5298_v36, 0 }
0x1d5a   :  { %v3159_v41 = vsel %vm206_vm14, %v3133_v39, -inf  ;;  %3104 = vmatpush.bf16.msra.mxu2 %v3095_v50 }
0x1d5f   :  { %v3134_v9 = vpop.f32.mrf.mxu3 }
0x1d6b   :  { %v3024_v20 = vpop.xlane.xlu0 %3023 }
0x1d6c   :  { %v3028_v24 = vsub.f32 %v2996_v62, %v3024_v20 }
0x1d6e   :  { %v3030_v28 = vmul.f32 1.442695, %v3028_v24 }
0x1d70   :  { %5730 = vpow2.f32 %v3030_v28  ;;  %v5304_v28 = vld [vmem:[%s7456_s14 + $0xc] sm:$0xf] }
0x1d76   :  { %v5731_v26 = vpop.eup %5730 }
0x1d77   :  { %v3034_v25 = vsel %vm206_vm14, %v5731_v26, 0.0 }
0x1d78   :  { %3035 = vadd.xlane.f32.xlu1 %v3034_v25 }
0x1da6   :  { %v2971_v29 = vpop.f32.mrf.mxu1 }
0x1dae   :  { %v2973_v49 = vpop.f32.mrf.mxu1 }
0x1db7   :  { %v2951_v31 = vpop.f32.mrf.mxu0 }
0x1db8   :  { %v6889_v32 = vadd.f32 %v2971_v29, %v2951_v31 }
0x1dbe   :  { %v3027_v34 = vpop.xlane.xlu0 %3026 }
0x1dbf   :  { %v3029_v61 = vsub.f32 %v3019_v19, %v3027_v34  ;;  %v5540_v34 = vld [vmem:[%s7451_s9 + $0x8] ss:$0 sm:$0xff] }
0x1dc1   :  { %v3032_v47 = vmul.f32 1.442695, %v3029_v61 }
0x1dc3   :  { %5732 = vpow2.f32 %v3032_v47 }
0x1dc9   :  { %v5733_v22 = vpop.eup %5732 }
0x1dca   :  { %v3037_v38 = vsel %vm206_vm14, %v5733_v22, 0.0 }
0x1dcb   :  { %3038 = vadd.xlane.f32.xlu1 %v3037_v38 }
0x1dd3   :  { %3160 = vmax.xlane.f32.xlu1 %v3159_v41 }
0x1deb   :  { %v3036_v42 = vpop.xlane.xlu1 %3035 }
0x1dec   :  { %5734 = vrcp.f32 %v3036_v42  ;;  %3204 = vrot.lane.b32.xlu1 %v6777_v16, %s7483_s23 }
0x1df2   :  { %v5735_v43 = vpop.eup %5734 }
0x1df3   :  { %v3042_v8 = vmul.f32 %v5735_v43, %v5731_v26  ;;  %v3232_v26 = vsel %vm279_vm15, %v5304_v28, 0 }
0x1df4   :  { %3241 = vmatpush.bf16.msra.mxu3 %v3232_v26 }
0x1df5   :  { %v3044_v45 = vpack.c.bf16 %v3042_v8, %v3042_v8 }
0x1df7   :  { %5296 = vmatmul.msk.bf16.vlgmr.msra.gmra.mxu0 %vm206_vm14, %v3044_v45 }
0x1e07   :  { %5301 = vmatmul.msk.bf16.vlgmr.msrb.gmra.mxu0 %vm206_vm14, %v6870_v54  ;;  %v2953_v54 = vpop.f32.mrf.mxu0 }
0x1e08   :  { %v2974_v38 = vadd.f32 %v2973_v49, %v2953_v54 }
0x1e3e   :  { %v3039_v46 = vpop.xlane.xlu1 %3038 }
0x1e3f   :  { %5736 = vrcp.f32 %v3039_v46 }
0x1e45   :  { %v5737_v33 = vpop.eup %5736 }
0x1e46   :  { %v3043_v55 = vmul.f32 %v5737_v33, %v5733_v22  ;;  %v3161_v56 = vpop.xlane.xlu1 %3160 }
0x1e47   :  { %v3165_v58 = vsub.f32 %v3133_v39, %v3161_v56 }
0x1e48   :  { %v3045_v16 = vpack.c.bf16 %v3043_v55, %v3043_v55 }
0x1e49   :  { %v3167_v7 = vmul.f32 1.442695, %v3165_v58  ;;  %v5480_v58 = vld [vmem:[%s7457_s15 + $0x8] sm:$0xff] }
0x1e4a   :  { %5297 = vmatmul.msk.bf16.vlgmr.msra.gmra.mxu1 %vm206_vm14, %v3045_v16  ;;  %3376 = vmatpush.bf16.msra.mxu0 %v5480_v58  ;;  %v5543_v58 = vld [vmem:[%s7451_s9 + $0xb] ss:$0 sm:$0xff] }
0x1e4b   :  { %5738 = vpow2.f32 %v3167_v7  ;;  %v5479_v7 = vld [vmem:[%s7457_s15] sm:$0xff] }
0x1e4e   :  { %3377 = vmatpush.bf16.msra.mxu0 %v5479_v7 }
0x1e51   :  { %v5739_v59 = vpop.eup %5738 }
0x1e52   :  { %v3171_v52 = vsel %vm206_vm14, %v5739_v59, 0.0 }
0x1e5e   :  { %v3205_v30 = vpop.permute.xlu1 %3204 }
0x1e5f   :  { %v3210_v51 = vsel %vm279_vm15, %v3205_v30, 0 }
0x1e60   :  { %3219 = vmatpush.bf16.msrb.mxu2 %v3210_v51 }
0x1e74   :  { %v3063_v15 = vpop.f32.mrf.mxu0 }
0x1e7c   :  { %v3065_v23 = vpop.f32.mrf.mxu0 }
0x1e84   :  { %v3155_v40 = vpop.f32.mrf.mxu0 }
0x1e85   :  { %v3156_v57 = vadd.f32 %v6814_v4, %v3155_v40 }
0x1e87   :  { %v3162_v63 = vsel %vm206_vm14, %v3156_v57, -inf }
0x1e88   :  { %3163 = vmax.xlane.f32.xlu0 %v3162_v63 }
0x1e8c   :  { %v3157_v60 = vpop.f32.mrf.mxu0 }
0x1e90   :  { %3172 = vadd.xlane.f32.xlu0 %v3171_v52 }
0x1ea4   :  { %3183 = vrot.lane.b32.xlu0 %v6772_v14, %s7483_s23 }
0x1ec7   :  { %v3084_v3 = vpop.f32.mrf.mxu1 }
0x1ec8   :  { %v3088_v5 = vpack.c.bf16 %v3084_v3, %v3063_v15 }
0x1eca   :  { %5299 = vmatmul.msk.bf16.vlgmr.msra.gmra.mxu2 %vm206_vm14, %v3088_v5 }
0x1ecf   :  { %v3086_v62 = vpop.f32.mrf.mxu1 }
0x1efb   :  { %v3164_v6 = vpop.xlane.xlu0 %3163 }
0x1efc   :  { %v3166_v4 = vsub.f32 %v3156_v57, %v3164_v6 }
0x1efe   :  { %v3169_v37 = vmul.f32 1.442695, %v3166_v4 }
0x1f00   :  { %5740 = vpow2.f32 %v3169_v37 }
0x1f03   :  { %v3173_v27 = vpop.xlane.xlu0 %3172 }
0x1f04   :  { %5742 = vrcp.f32 %v3173_v27 }
0x1f06   :  { %v5741_v0 = vpop.eup %5740 }
0x1f07   :  { %v3174_v11 = vsel %vm206_vm14, %v5741_v0, 0.0 }
0x1f08   :  { %3175 = vadd.xlane.f32.xlu2 %v3174_v11 }
0x1f0a   :  { %v5743_v44 = vpop.eup %5742 }
0x1f0b   :  { %v3179_v12 = vmul.f32 %v5743_v44, %v5739_v59 }
0x1f0d   :  { %v3181_v53 = vpack.c.bf16 %v3179_v12, %v3179_v12 }
0x1f16   :  { %v3184_v13 = vpop.permute.xlu0 %3183 }
0x1f17   :  { %v3189_v14 = vsel %vm279_vm15, %v3184_v13, 0 }
0x1f18   :  { %3198 = vmatpush.bf16.msrb.mxu1 %v3189_v14 }
0x1f1b   :  { %5302 = vmatmul.msk.bf16.vlgmr.msrb.gmra.mxu1 %vm206_vm14, %v3181_v53 }
0x1f4d   :  { %v3106_v17 = vpop.f32.mrf.mxu2 }
0x1f4e   :  { %v3111_v19 = vadd.f32 %v3106_v17, %v6889_v32 }
0x1f55   :  { %v3108_v25 = vpop.f32.mrf.mxu2 }
0x1f56   :  { %v3112_v41 = vadd.f32 %v3108_v25, %v2974_v38 }
0x1f7b   :  { %v3176_v18 = vpop.xlane.xlu2 %3175 }
0x1f7c   :  { %5744 = vrcp.f32 %v3176_v18 }
0x1f82   :  { %v5745_v21 = vpop.eup %5744 }
0x1f83   :  { %v3180_v2 = vmul.f32 %v5745_v21, %v5741_v0 }
0x1f85   :  { %v3182_v9 = vpack.c.bf16 %v3180_v2, %v3180_v2 }
0x1f87   :  { %5303 = vmatmul.msk.bf16.vlgmr.msrb.gmra.mxu2 %vm206_vm14, %v3182_v9 }
0x1f98   :  { %v3200_v20 = vpop.f32.mrf.mxu1 }
0x1fa0   :  { %v3202_v24 = vpop.f32.mrf.mxu1 }
0x200a   :  { %v3221_v29 = vpop.f32.mrf.mxu2 }
0x200b   :  { %v3225_v31 = vpack.c.bf16 %v3221_v29, %v3200_v20 }
0x200d   :  { %5305 = vmatmul.msk.bf16.vlgmr.msra.gmra.mxu3 %vm206_vm14, %v3225_v31  ;;  %v5541_v31 = vld [vmem:[%s7451_s9 + $0x9] ss:$0 sm:$0xff] }
0x2012   :  { %v3223_v32 = vpop.f32.mrf.mxu2 }
0x2090   :  { %v3243_v61 = vpop.f32.mrf.mxu3 }
0x2091   :  { %v3248_v47 = vadd.f32 %v3243_v61, %v3111_v19 }
0x2093   :  { %v3251_v22 = vadd.f32 %v5540_v34, %v3248_v47 }
0x2095   :  { %v6925_v39 = vadd.f32 %v3251_v22, %v6698_v1 }
0x2097   :  { %v3257_v42 = vsel %vm72_vm0, %v6925_v39, 0.0 }
0x2098   :  { %3258 = vadd.xlane.f32.xlu0 %v3257_v42  ;;  %v3245_v43 = vpop.f32.mrf.mxu3 }
0x2099   :  { %v3249_v8 = vadd.f32 %v3245_v43, %v3112_v41 }
0x209b   :  { %v3252_v45 = vadd.f32 %v5540_v34, %v3249_v8 }
0x209d   :  { %v6930_v46 = vadd.f32 %v3252_v45, %v6710_v35 }
0x209f   :  { %v3260_v36 = vsel %vm72_vm0, %v6930_v46, 0.0 }
0x20a0   :  { %3261 = vadd.xlane.f32.xlu1 %v3260_v36 }
0x210b   :  { %v3259_v50 = vpop.xlane.xlu0 %3258 }
0x210c   :  { %v3263_v33 = vmul.f32 %v3259_v50, %v6005_v10 }
0x210e   :  { %v6936_v1 = vsub.f32 %v6925_v39, %v3263_v33  ;;  %v5542_v33 = vld [vmem:[%s7451_s9 + $0xa] ss:$0 sm:$0xff] }
0x2110   :  { %v3267_v55 = vmul.f32 %v6936_v1, %v6936_v1  ;;  %v3278_v42 = vmul.f32 %v5541_v31, %v6936_v1  ;;  %v5484_v1 = vld [vmem:[%s7458_s16 + $0x18] sm:$0xff] }
0x2111   :  { %3419 = vmatpush.bf16.msra.mxu1 %v5484_v1 }
0x2112   :  { %v3269_v16 = vsel %vm72_vm0, %v3267_v55, 0.0 }
0x2113   :  { %3270 = vadd.xlane.f32.xlu2 %v3269_v16  ;;  %v3262_v56 = vpop.xlane.xlu1 %3261 }
0x2114   :  { %v3264_v35 = vmul.f32 %v3262_v56, %v6005_v10 }
0x2116   :  { %v6943_v30 = vsub.f32 %v6930_v46, %v3264_v35 }
0x2118   :  { %v3268_v51 = vmul.f32 %v6943_v30, %v6943_v30  ;;  %v3279_v45 = vmul.f32 %v5541_v31, %v6943_v30  ;;  %v5483_v30 = vld [vmem:[%s7458_s16 + $0x10] sm:$0xff] }
0x2119   :  { %3420 = vmatpush.bf16.msra.mxu1 %v5483_v30 }
0x211a   :  { %v3272_v54 = vsel %vm72_vm0, %v3268_v51, 0.0 }
0x211b   :  { %3273 = vadd.xlane.f32.xlu2 %v3272_v54  ;;  %v5482_v54 = vld [vmem:[%s7458_s16 + $0x8] sm:$0xff] }
0x211d   :  { %3421 = vmatpush.bf16.msra.mxu1 %v5482_v54 }
0x2186   :  { %v3271_v15 = vpop.xlane.xlu2 %3270 }
0x2187   :  { %v3275_v23 = vmul.f32 0.032258064, %v3271_v15  ;;  %v5481_v15 = vld [vmem:[%s7458_s16] sm:$0xff] }
0x2188   :  { %3422 = vmatpush.bf16.msra.mxu1 %v5481_v15 }
0x2189   :  { %5746 = vrsqrt.f32 %v3275_v23  ;;  %vm3287_vm1 = vcmp.eq.f32.partialorder %v3275_v23, inf  ;;  %v3290_v37 = vand.u32 2147483648, %v3275_v23  ;;  %vm3289_vm2 = vcmp.eq.f32.partialorder %v3275_v23, 0.0 }
0x218e   :  { %v3274_v40 = vpop.xlane.xlu2 %3273 }
0x218f   :  { %v5747_v57 = vpop.eup %5746  ;;  %v3276_v63 = vmul.f32 0.032258064, %v3274_v40 }
0x2190   :  { %v3281_v59 = vmul.f32 %v5747_v57, %v3275_v23 }
0x2191   :  { %5748 = vrsqrt.f32 %v3276_v63  ;;  %vm3299_vm3 = vcmp.eq.f32.partialorder %v3276_v63, inf  ;;  %v3302_v53 = vand.u32 2147483648, %v3276_v63  ;;  %vm3301_vm4 = vcmp.eq.f32.partialorder %v3276_v63, 0.0 }
0x2192   :  { %v3282_v60 = vmul.f32 %v5747_v57, %v3281_v59 }
0x2194   :  { %v3283_v52 = vmul.f32 0.5, %v3282_v60 }
0x2196   :  { %v3284_v49 = vsub.f32 1.5, %v3283_v52  ;;  %v5544_v52 = vld [vmem:[%s7451_s9 + $0xc] ss:$0 sm:$0xff] }
0x2197   :  { %v5749_v3 = vpop.eup %5748 }
0x2198   :  { %v3285_v5 = vmul.f32 %v5747_v57, %v3284_v49  ;;  %v3293_v62 = vmul.f32 %v5749_v3, %v3276_v63 }
0x219a   :  { %v3286_v6 = vmul.f32 %v3285_v5, %v3275_v23  ;;  %v3294_v4 = vmul.f32 %v5749_v3, %v3293_v62 }
0x219c   :  { %v3288_v0 = vsel %vm3287_vm1, %v3275_v23, %v3286_v6  ;;  %v3295_v11 = vmul.f32 0.5, %v3294_v4 }
0x219d   :  { %v3291_v27 = vsel %vm3289_vm2, %v3290_v37, %v3288_v0 }
0x219e   :  { %v3304_v44 = vadd.f32 1e-06, %v3291_v27  ;;  %v3296_v12 = vsub.f32 1.5, %v3295_v11 }
0x21a0   :  { %5750 = vrcp.f32 %v3304_v44  ;;  %v3297_v13 = vmul.f32 %v5749_v3, %v3296_v12  ;;  %v3317_v26 = vand.u32 2147483648, %v3304_v44  ;;  %vm3311_vm6 = vweird.f32 %v3304_v44 }
0x21a1   :  { %v3315_v25 = vand.u32 2147483647, %v3304_v44 }
0x21a2   :  { %v3298_v14 = vmul.f32 %v3297_v13, %v3276_v63  ;;  %v3318_v61 = vor.u32 1.1754944e-38, %v3317_v26 }
0x21a3   :  { %vm3316_vm8 = vcmp.eq.f32.partialorder %v3315_v25, 8.507059e+37 }
0x21a4   :  { %v3300_v17 = vsel %vm3299_vm3, %v3276_v63, %v3298_v14 }
0x21a5   :  { %v3303_v19 = vsel %vm3301_vm4, %v3302_v53, %v3300_v17 }
0x21a6   :  { %v5751_v18 = vpop.eup %5750  ;;  %v3305_v21 = vadd.f32 1e-06, %v3303_v19 }
0x21a7   :  { %v3307_v2 = vmul.f32 %v5751_v18, %v3304_v44  ;;  %vm3312_vm5 = vweird.f32 %v5751_v18 }
0x21a8   :  { %5752 = vrcp.f32 %v3305_v21  ;;  %vm3313_vm7 = vmor %vm3311_vm6, %vm3312_vm5  ;;  %v3332_v47 = vand.u32 2147483648, %v3305_v21  ;;  %v3330_v38 = vand.u32 2147483647, %v3305_v21  ;;  %vm3326_vm10 = vweird.f32 %v3305_v21 }
0x21a9   :  { %v3308_v9 = vsub.f32 1.0, %v3307_v2  ;;  %v5485_v2 = vld [vmem:[%s7452_s10 + $0x10] sm:$0xff] }
0x21aa   :  { %v3333_v8 = vor.u32 1.1754944e-38, %v3332_v47  ;;  %vm3331_vm12 = vcmp.eq.f32.partialorder %v3330_v38, 8.507059e+37 }
0x21ab   :  { %v3309_v20 = vmul.f32 %v5751_v18, %v3308_v9 }
0x21ad   :  { %v3310_v24 = vadd.f32 %v5751_v18, %v3309_v20 }
0x21ae   :  { %v5753_v28 = vpop.eup %5752 }
0x21af   :  { %v3322_v29 = vmul.f32 %v5753_v28, %v3305_v21  ;;  %v3314_v32 = vsel %vm3313_vm7, %v5751_v18, %v3310_v24  ;;  %vm3327_vm9 = vweird.f32 %v5753_v28  ;;  %v5486_v21 = vld [vmem:[%s7452_s10 + $0x18] sm:$0xff] }
0x21b0   :  { %v3319_v41 = vsel %vm3316_vm8, %v3318_v61, %v3314_v32  ;;  %vm3328_vm11 = vmor %vm3326_vm10, %vm3327_vm9  ;;  %3545 = vmatpush.bf16.msra.mxu2 %v5486_v21 }
0x21b1   :  { %v3323_v34 = vsub.f32 1.0, %v3322_v29  ;;  %v3320_v36 = vmul.f32 %v3319_v41, %v3278_v42 }
0x21b3   :  { %v3324_v22 = vmul.f32 %v5753_v28, %v3323_v34  ;;  %v3337_v56 = vadd.f32 %v5542_v33, %v3320_v36 }
0x21b4   :  { %3546 = vmatpush.bf16.msra.mxu2 %v5485_v2 }
0x21b5   :  { %v3325_v43 = vadd.f32 %v5753_v28, %v3324_v22 }
0x21b7   :  { %v3329_v50 = vsel %vm3328_vm11, %v5753_v28, %v3325_v43 }
0x21b8   :  { %v3334_v55 = vsel %vm3331_vm12, %v3333_v8, %v3329_v50 }
0x21b9   :  { %v3335_v16 = vmul.f32 %v3334_v55, %v3279_v45 }
0x21bb   :  { %v3338_v35 = vadd.f32 %v5542_v33, %v3335_v16 }
0x21bd   :  { %v3353_v51 = vpack.c.bf16 %v3338_v35, %v3337_v56 }
0x21bf   :  { %5314 = vmatmul.msk.bf16.vlgmr.msra.gmra.mxu0 %vm72_vm0, %v3353_v51 }
0x223c   :  { %v3379_v23 = vpop.f32.mrf.mxu0 }
0x223d   :  { %v3380_v7 = vadd.f32 %v5543_v58, %v3379_v23 }
0x223f   :  { %v3384_v63 = vmax.f32 %v3380_v7, 0.0  ;;  %v5545_v7 = vld [vmem:[%s7451_s9 + $0xd] ss:$0 sm:$0xff] }
0x2244   :  { %v3381_v40 = vpop.f32.mrf.mxu0 }
0x2245   :  { %v3382_v57 = vadd.f32 %v5543_v58, %v3381_v40 }
0x2247   :  { %v3385_v59 = vmax.f32 %v3382_v57, 0.0 }
0x2249   :  { %v3386_v60 = vpack.c.bf16 %v3385_v59, %v3384_v63 }
0x224b   :  { %5331 = vmatmul.msk.bf16.vlgmr.msra.gmra.mxu1 %vm910_vm13, %v3386_v60 }
0x22c8   :  { %v3424_v49 = vpop.f32.mrf.mxu1 }
0x22c9   :  { %v3425_v3 = vadd.f32 %v5544_v52, %v3424_v49 }
0x22cb   :  { %v6983_v5 = vadd.f32 %v3425_v3, %v6925_v39 }
0x22cd   :  { %v3433_v62 = vsel %vm72_vm0, %v6983_v5, 0.0 }
0x22ce   :  { %3434 = vadd.xlane.f32.xlu2 %v3433_v62 }
0x22d0   :  { %v3426_v6 = vpop.f32.mrf.mxu1 }
0x22d1   :  { %v3427_v4 = vadd.f32 %v5544_v52, %v3426_v6 }
0x22d3   :  { %v6988_v37 = vadd.f32 %v3427_v4, %v6930_v46 }
0x22d5   :  { %v3436_v0 = vsel %vm72_vm0, %v6988_v37, 0.0 }
0x22d6   :  { %3437 = vadd.xlane.f32.xlu2 %v3436_v0 }
0x2341   :  { %v3435_v11 = vpop.xlane.xlu2 %3434 }
0x2342   :  { %v3439_v27 = vmul.f32 %v3435_v11, %v6005_v10 }
0x2344   :  { %v6994_v44 = vsub.f32 %v6983_v5, %v3439_v27  ;;  %v5546_v27 = vld [vmem:[%s7451_s9 + $0xe] ss:$0 sm:$0xff] }
0x2346   :  { %v3443_v39 = vmul.f32 %v6994_v44, %v6994_v44  ;;  %v3454_v3 = vmul.f32 %v5545_v7, %v6994_v44  ;;  %v5547_v44 = vld [vmem:[%s7451_s9 + $0xf] ss:$0 sm:$0xff] }
0x2348   :  { %v3445_v12 = vsel %vm72_vm0, %v3443_v39, 0.0 }
0x2349   :  { %3446 = vadd.xlane.f32.xlu0 %v3445_v12  ;;  %v3438_v13 = vpop.xlane.xlu2 %3437 }
0x234a   :  { %v3440_v46 = vmul.f32 %v3438_v13, %v6005_v10 }
0x234c   :  { %v7001_v14 = vsub.f32 %v6988_v37, %v3440_v46 }
0x234e   :  { %v3444_v53 = vmul.f32 %v7001_v14, %v7001_v14  ;;  %v3455_v4 = vmul.f32 %v5545_v7, %v7001_v14 }
0x2350   :  { %v3448_v17 = vsel %vm72_vm0, %v3444_v53, 0.0 }
0x2351   :  { %3449 = vadd.xlane.f32.xlu2 %v3448_v17 }
0x23bc   :  { %v3447_v19 = vpop.xlane.xlu0 %3446 }
0x23bd   :  { %v3451_v18 = vmul.f32 0.032258064, %v3447_v19 }
0x23bf   :  { %5754 = vrsqrt.f32 %v3451_v18  ;;  %vm3463_vm1 = vcmp.eq.f32.partialorder %v3451_v18, inf  ;;  %v3466_v22 = vand.u32 2147483648, %v3451_v18  ;;  %vm3465_vm2 = vcmp.eq.f32.partialorder %v3451_v18, 0.0 }
0x23c4   :  { %v3450_v9 = vpop.xlane.xlu2 %3449 }
0x23c5   :  { %v5755_v20 = vpop.eup %5754  ;;  %v3452_v24 = vmul.f32 0.032258064, %v3450_v9 }
0x23c6   :  { %v3457_v28 = vmul.f32 %v5755_v20, %v3451_v18 }
0x23c7   :  { %5756 = vrsqrt.f32 %v3452_v24  ;;  %vm3475_vm3 = vcmp.eq.f32.partialorder %v3452_v24, inf  ;;  %v3478_v50 = vand.u32 2147483648, %v3452_v24  ;;  %vm3477_vm4 = vcmp.eq.f32.partialorder %v3452_v24, 0.0 }
0x23c8   :  { %v3458_v26 = vmul.f32 %v5755_v20, %v3457_v28 }
0x23ca   :  { %v3459_v25 = vmul.f32 0.5, %v3458_v26 }
0x23cc   :  { %v3460_v29 = vsub.f32 1.5, %v3459_v25 }
0x23cd   :  { %v5757_v31 = vpop.eup %5756 }
0x23ce   :  { %v3461_v32 = vmul.f32 %v5755_v20, %v3460_v29  ;;  %v3469_v34 = vmul.f32 %v5757_v31, %v3452_v24 }
0x23d0   :  { %v3462_v61 = vmul.f32 %v3461_v32, %v3451_v18  ;;  %v3470_v47 = vmul.f32 %v5757_v31, %v3469_v34 }
0x23d2   :  { %v3464_v38 = vsel %vm3463_vm1, %v3451_v18, %v3462_v61  ;;  %v3471_v41 = vmul.f32 0.5, %v3470_v47 }
0x23d3   :  { %v3467_v42 = vsel %vm3465_vm2, %v3466_v22, %v3464_v38 }
0x23d4   :  { %v3480_v43 = vadd.f32 1e-06, %v3467_v42  ;;  %v3472_v8 = vsub.f32 1.5, %v3471_v41  ;;  %v7051_v42 = vld [vmem:[%s7445_s3] sm:$0xff] }
0x23d6   :  { %5758 = vrcp.f32 %v3480_v43  ;;  %v3473_v45 = vmul.f32 %v5757_v31, %v3472_v8  ;;  %v3493_v15 = vand.u32 2147483648, %v3480_v43  ;;  %vm3487_vm6 = vweird.f32 %v3480_v43 }
0x23d7   :  { %v3491_v23 = vand.u32 2147483647, %v3480_v43 }
0x23d8   :  { %v3474_v36 = vmul.f32 %v3473_v45, %v3452_v24  ;;  %v3494_v63 = vor.u32 1.1754944e-38, %v3493_v15 }
0x23d9   :  { %vm3492_vm8 = vcmp.eq.f32.partialorder %v3491_v23, 8.507059e+37 }
0x23da   :  { %v3476_v33 = vsel %vm3475_vm3, %v3452_v24, %v3474_v36 }
0x23db   :  { %v3479_v55 = vsel %vm3477_vm4, %v3478_v50, %v3476_v33 }
0x23dc   :  { %v5759_v16 = vpop.eup %5758  ;;  %v3481_v56 = vadd.f32 1e-06, %v3479_v55 }
0x23dd   :  { %v3483_v35 = vmul.f32 %v5759_v16, %v3480_v43  ;;  %vm3488_vm5 = vweird.f32 %v5759_v16 }
0x23de   :  { %5760 = vrcp.f32 %v3481_v56  ;;  %vm3489_vm7 = vmor %vm3487_vm6, %vm3488_vm5  ;;  %v3508_v59 = vand.u32 2147483648, %v3481_v56  ;;  %v3506_v52 = vand.u32 2147483647, %v3481_v56  ;;  %vm3502_vm10 = vweird.f32 %v3481_v56 }
0x23df   :  { %v3484_v51 = vsub.f32 1.0, %v3483_v35 }
0x23e0   :  { %v3509_v6 = vor.u32 1.1754944e-38, %v3508_v59  ;;  %vm3507_vm12 = vcmp.eq.f32.partialorder %v3506_v52, 8.507059e+37  ;;  %v7071_v52 = vld [vmem:[%s7445_s3 + $0x8] sm:$0xff] }
0x23e1   :  { %v3485_v1 = vmul.f32 %v5759_v16, %v3484_v51 }
0x23e3   :  { %v3486_v30 = vadd.f32 %v5759_v16, %v3485_v1 }
0x23e4   :  { %v5761_v54 = vpop.eup %5760 }
0x23e5   :  { %v3498_v58 = vmul.f32 %v5761_v54, %v3481_v56  ;;  %v3490_v40 = vsel %vm3489_vm7, %v5759_v16, %v3486_v30  ;;  %vm3503_vm9 = vweird.f32 %v5761_v54 }
0x23e6   :  { %v3495_v49 = vsel %vm3492_vm8, %v3494_v63, %v3490_v40  ;;  %vm3504_vm11 = vmor %vm3502_vm10, %vm3503_vm9 }
0x23e7   :  { %v3499_v57 = vsub.f32 1.0, %v3498_v58  ;;  %v3496_v0 = vmul.f32 %v3495_v49, %v3454_v3 }
0x23e9   :  { %v3500_v60 = vmul.f32 %v5761_v54, %v3499_v57  ;;  %v3513_v13 = vadd.f32 %v5546_v27, %v3496_v0 }
0x23eb   :  { %v3501_v62 = vadd.f32 %v5761_v54, %v3500_v60 }
0x23ed   :  { %v3505_v11 = vsel %vm3504_vm11, %v5761_v54, %v3501_v62 }
0x23ee   :  { %v3510_v39 = vsel %vm3507_vm12, %v3509_v6, %v3505_v11 }
0x23ef   :  { %v3511_v12 = vmul.f32 %v3510_v39, %v3455_v4 }
0x23f1   :  { %v3514_v46 = vadd.f32 %v5546_v27, %v3511_v12 }
0x23f3   :  { %v3522_v53 = vpack.c.bf16 %v3514_v46, %v3513_v13 }
0x23f5   :  { %5344 = vmatmul.msk.bf16.vlgmr.msra.gmra.mxu2 %vm72_vm0, %v3522_v53 }
0x2478   :  { %v3548_v17 = vpop.f32.mrf.mxu2 }
0x2479   :  { %v3549_v14 = vadd.f32 %v5547_v44, %v3548_v17 }
0x247b   :  { %v3553_v19 = vpack.c.bf16 %v3549_v14, %v3549_v14 }
0x247d   :  { %v3556_v18 = vunpack.c.l.b16 %v3553_v19 }
0x247f   :  { %v7024_v21 = vpack.c.b16 %v3556_v18, %v3556_v18  ;;  %v5354_v18 = vld [vmem:[%s7453_s11 + $0x14] sm:$0xf] }
0x2480   :  { %v3550_v2 = vpop.f32.mrf.mxu2 }
0x2481   :  { %v3551_v9 = vadd.f32 %v5547_v44, %v3550_v2  ;;  %3672 = vrot.lane.b32.xlu2 %v7024_v21, %s7487_s24  ;;  %3674 = vrot.lane.b32.xlu0 %v7024_v21, %s7489_s7  ;;  %v3791_v2 = vsel %vm279_vm15, %v5354_v18, 0 }
0x2482   :  { %3558 = vrot.lane.b32.xlu1 %v7024_v21, %s7488_s28 }
0x2483   :  { %v3554_v20 = vpack.c.bf16 %v3551_v9, %v3551_v9 }
0x2485   :  { %v3580_v24 = vunpack.c.l.b16 %v3554_v20 }
0x2487   :  { %v7032_v28 = vpack.c.b16 %v3580_v24, %v3580_v24 }
0x2489   :  { %3695 = vrot.lane.b32.xlu2 %v7032_v28, %s7487_s24  ;;  %3697 = vrot.lane.b32.xlu0 %v7032_v28, %s7489_s7 }
0x248a   :  { %3582 = vrot.lane.b32.xlu1 %v7032_v28, %s7488_s28 }
0x24db   :  { %v3673_v22 = vpop.permute.xlu2 %3672 }
0x24e3   :  { %v3696_v38 = vpop.permute.xlu2 %3695 }
0x24f3   :  { %v3675_v26 = vpop.permute.xlu0 %3674 }
0x24f4   :  { %v3680_v25 = vsel %vm206_vm14, %v3675_v26, 0  ;;  %v3559_v29 = vpop.permute.xlu1 %3558 }
0x24f5   :  { %v3564_v31 = vsel %vm206_vm14, %v3559_v29, 0 }
0x24f6   :  { %3573 = vmatpush.bf16.xpose.msrb.mxu3 %v3564_v31 }
0x24fb   :  { %v3698_v32 = vpop.permute.xlu0 %3697 }
0x24fc   :  { %v3703_v34 = vsel %vm206_vm14, %v3698_v32, 0  ;;  %v3583_v61 = vpop.permute.xlu1 %3582 }
0x24fd   :  { %v3588_v47 = vsel %vm206_vm14, %v3583_v61, 0  ;;  %5345 = vmatmul.msk.bf16.vlgmr.msrb.gmra.mxu3 %vm206_vm14, %v3553_v19 }
0x24fe   :  { %3689 = vmatpush.bf16.xpose.msra.mxu3 %v3680_v25  ;;  %3597 = vmatpush.bf16.xpose.msrb.mxu0 %v3588_v47 }
0x2505   :  { %5346 = vmatmul.msk.bf16.vlgmr.msrb.gmra.mxu0 %vm206_vm14, %v3554_v20 }
0x2506   :  { %3712 = vmatpush.bf16.xpose.msra.mxu0 %v3703_v34  ;;  %3800 = vmatpush.bf16.msrb.mxu3 %v3791_v2 }
0x250d   :  { %5350 = vmatmul.msk.bf16.vlgmr.msra.gmra.mxu3 %vm206_vm14, %v3673_v22 }
0x2515   :  { %5351 = vmatmul.msk.bf16.vlgmr.msra.gmra.mxu0 %vm206_vm14, %v3696_v38 }
0x2580   :  { %v3575_v41 = vpop.f32.mrf.mxu3 }
0x2581   :  { %v3576_v43 = vadd.f32 %v7051_v42, %v3575_v41 }
0x2582   :  { %v3599_v8 = vpop.f32.mrf.mxu0 }
0x2583   :  { %v3603_v45 = vsel %vm206_vm14, %v3576_v43, -inf  ;;  %v3600_v49 = vadd.f32 %v7071_v52, %v3599_v8 }
0x2584   :  { %3604 = vmax.xlane.f32.xlu1 %v3603_v45 }
0x2585   :  { %v3606_v3 = vsel %vm206_vm14, %v3600_v49, -inf }
0x2588   :  { %v3577_v36 = vpop.f32.mrf.mxu3 }
0x258a   :  { %v3601_v50 = vpop.f32.mrf.mxu0 }
0x2590   :  { %v3691_v33 = vpop.f32.mrf.mxu3 }
0x2591   :  { %v3692_v55 = vadd.f32 %v7051_v42, %v3691_v33 }
0x2592   :  { %v3714_v16 = vpop.f32.mrf.mxu0 }
0x2593   :  { %v3718_v56 = vsel %vm206_vm14, %v3692_v55, -inf  ;;  %v3715_v62 = vadd.f32 %v7071_v52, %v3714_v16 }
0x2594   :  { %3719 = vmax.xlane.f32.xlu0 %v3718_v56 }
0x2595   :  { %v3721_v6 = vsel %vm206_vm14, %v3715_v62, -inf }
0x2598   :  { %v3693_v35 = vpop.f32.mrf.mxu3 }
0x259a   :  { %v3716_v51 = vpop.f32.mrf.mxu0 }
0x259d   :  { %3627 = vrot.lane.b32.xlu1 %v7024_v21, %s5892_s19 }
0x25a5   :  { %3827 = vrot.lane.b32.xlu1 %v7024_v21, %s5893_s1 }
0x25f7   :  { %v3605_v1 = vpop.xlane.xlu1 %3604 }
0x25f8   :  { %v3609_v30 = vsub.f32 %v3576_v43, %v3605_v1 }
0x25fa   :  { %v3611_v54 = vmul.f32 1.442695, %v3609_v30 }
0x25fc   :  { %5762 = vpow2.f32 %v3611_v54 }
0x2602   :  { %v5763_v15 = vpop.eup %5762 }
0x2603   :  { %v3615_v23 = vsel %vm206_vm14, %v5763_v15, 0.0 }
0x2604   :  { %3616 = vadd.xlane.f32.xlu2 %v3615_v23 }
0x2607   :  { %v3720_v58 = vpop.xlane.xlu0 %3719 }
0x2608   :  { %v3724_v7 = vsub.f32 %v3692_v55, %v3720_v58 }
0x260a   :  { %v3726_v40 = vmul.f32 1.442695, %v3724_v7 }
0x260c   :  { %5764 = vpow2.f32 %v3726_v40 }
0x260f   :  { %v3628_v57 = vpop.permute.xlu1 %3627 }
0x2610   :  { %v3633_v63 = vsel %vm279_vm15, %v3628_v57, 0 }
0x2611   :  { %3642 = vmatpush.bf16.msrb.mxu1 %v3633_v63 }
0x2612   :  { %v5765_v59 = vpop.eup %5764 }
0x2613   :  { %v3730_v60 = vsel %vm206_vm14, %v5765_v59, 0.0 }
0x2614   :  { %3731 = vadd.xlane.f32.xlu0 %v3730_v60 }
0x2617   :  { %v3828_v19 = vpop.permute.xlu1 %3827 }
0x261c   :  { %3742 = vrot.lane.b32.xlu2 %v7024_v21, %s5890_s27 }
0x2628   :  { %3829 = vrot.lane.b32.xlu0 %v7024_v21, %s7481_s18 }
0x2645   :  { %3607 = vmax.xlane.f32.xlu2 %v3606_v3 }
0x2652   :  { %3722 = vmax.xlane.f32.xlu0 %v3721_v6 }
0x265d   :  { %3648 = vrot.lane.b32.xlu2 %v7032_v28, %s5892_s19 }
0x2665   :  { %3850 = vrot.lane.b32.xlu2 %v7032_v28, %s5893_s1 }
0x266d   :  { %3897 = vrot.lane.b32.xlu2 %v7024_v21, %s7482_s22 }
0x2675   :  { %3966 = vrot.lane.b32.xlu2 %v7024_v21, %s7483_s23 }
0x2677   :  { %v3617_v4 = vpop.xlane.xlu2 %3616 }
0x2678   :  { %5766 = vrcp.f32 %v3617_v4 }
0x267d   :  { %3989 = vrot.lane.b32.xlu2 %v7032_v28, %s7483_s23 }
0x267e   :  { %v5767_v0 = vpop.eup %5766 }
0x267f   :  { %v3623_v11 = vmul.f32 %v5767_v0, %v5763_v15  ;;  %v3743_v27 = vpop.permute.xlu2 %3742 }
0x2680   :  { %v3748_v39 = vsel %vm279_vm15, %v3743_v27, 0  ;;  %v5349_v27 = vld [vmem:[%s7453_s11 + $0x10] sm:$0xf] }
0x2681   :  { %v3625_v12 = vpack.c.bf16 %v3623_v11, %v3623_v11  ;;  %3757 = vmatpush.bf16.msra.mxu1 %v3748_v39  ;;  %v3811_v39 = vsel %vm279_vm15, %v5349_v27, 0  ;;  %v5490_v27 = vld [vmem:[%s7455_s13 + $0x18] sm:$0xff] }
0x2682   :  { %3820 = vmatpush.bf16.msrb.mxu0 %v3811_v39 }
0x2683   :  { %5347 = vmatmul.msk.bf16.vlgmr.msrb.gmra.mxu1 %vm206_vm14, %v3625_v12 }
0x2685   :  { %3964 = vrot.lane.b32.xlu2 %v7024_v21, %s7484_s29 }
0x2687   :  { %v3732_v13 = vpop.xlane.xlu0 %3731 }
0x2688   :  { %5768 = vrcp.f32 %v3732_v13 }
0x268d   :  { %3987 = vrot.lane.b32.xlu2 %v7032_v28, %s7484_s29 }
0x268e   :  { %v5769_v46 = vpop.eup %5768 }
0x268f   :  { %v3738_v53 = vmul.f32 %v5769_v46, %v5765_v59 }
0x2691   :  { %v3740_v44 = vpack.c.bf16 %v3738_v53, %v3738_v53 }
0x2693   :  { %5352 = vmatmul.msk.bf16.vlgmr.msra.gmra.mxu1 %vm206_vm14, %v3740_v44 }
0x269a   :  { %v3830_v17 = vpop.permute.xlu0 %3829 }
0x269b   :  { %v3835_v14 = vsel %vm206_vm14, %v3830_v17, 0 }
0x269c   :  { %3844 = vmatpush.bf16.xpose.msrb.mxu1 %v3835_v14 }
0x26a3   :  { %5357 = vmatmul.msk.bf16.vlgmr.msrb.gmra.mxu1 %vm206_vm14, %v3828_v19 }
0x26b8   :  { %v3608_v9 = vpop.xlane.xlu2 %3607 }
0x26b9   :  { %v3610_v20 = vsub.f32 %v3600_v49, %v3608_v9 }
0x26bb   :  { %v3613_v24 = vmul.f32 1.442695, %v3610_v20 }
0x26bd   :  { %5770 = vpow2.f32 %v3613_v24 }
0x26c0   :  { %v3649_v26 = vpop.permute.xlu2 %3648 }
0x26c1   :  { %v3654_v25 = vsel %vm279_vm15, %v3649_v26, 0 }
0x26c2   :  { %3663 = vmatpush.bf16.msrb.mxu2 %v3654_v25 }
0x26c3   :  { %v5771_v29 = vpop.eup %5770 }
0x26c4   :  { %v3618_v31 = vsel %vm206_vm14, %v5771_v29, 0.0 }
0x26c5   :  { %v3723_v32 = vpop.xlane.xlu0 %3722  ;;  %3619 = vadd.xlane.f32.xlu1 %v3618_v31 }
0x26c6   :  { %v3725_v34 = vsub.f32 %v3715_v62, %v3723_v32 }
0x26c8   :  { %v3728_v61 = vmul.f32 1.442695, %v3725_v34  ;;  %v3851_v47 = vpop.permute.xlu2 %3850 }
0x26ca   :  { %5772 = vpow2.f32 %v3728_v61 }
0x26d0   :  { %v5773_v22 = vpop.eup %5772  ;;  %v3898_v38 = vpop.permute.xlu2 %3897 }
0x26d1   :  { %v3903_v41 = vsel %vm279_vm15, %v3898_v38, 0  ;;  %v3733_v43 = vsel %vm206_vm14, %v5773_v22, 0.0 }
0x26d2   :  { %3734 = vadd.xlane.f32.xlu0 %v3733_v43  ;;  %3912 = vmatpush.bf16.msra.mxu3 %v3903_v41 }
0x26d8   :  { %v3967_v57 = vpop.permute.xlu2 %3966 }
0x26d9   :  { %v3972_v60 = vsel %vm206_vm14, %v3967_v57, 0 }
0x26de   :  { %3763 = vrot.lane.b32.xlu1 %v7032_v28, %s5890_s27 }
0x26e0   :  { %v3990_v49 = vpop.permute.xlu2 %3989 }
0x26e1   :  { %v3995_v17 = vsel %vm206_vm14, %v3990_v49, 0 }
0x26e6   :  { %3852 = vrot.lane.b32.xlu0 %v7032_v28, %s7481_s18 }
0x26e8   :  { %v3965_v3 = vpop.permute.xlu2 %3964 }
0x2700   :  { %v3644_v8 = vpop.f32.mrf.mxu1 }
0x2708   :  { %v3646_v45 = vpop.f32.mrf.mxu1 }
0x2710   :  { %v3759_v36 = vpop.f32.mrf.mxu1 }
0x2718   :  { %v3761_v50 = vpop.f32.mrf.mxu1 }
0x2720   :  { %v3846_v33 = vpop.f32.mrf.mxu1 }
0x2721   :  { %v3847_v55 = vadd.f32 %v7051_v42, %v3846_v33 }
0x2723   :  { %v3873_v16 = vsel %vm206_vm14, %v3847_v55, -inf }
0x2724   :  { %3874 = vmax.xlane.f32.xlu0 %v3873_v16 }
0x2728   :  { %v3848_v56 = vpop.f32.mrf.mxu1 }
0x2738   :  { %v3620_v35 = vpop.xlane.xlu1 %3619 }
0x2739   :  { %5774 = vrcp.f32 %v3620_v35 }
0x273f   :  { %v5775_v51 = vpop.eup %5774 }
0x2740   :  { %v3624_v1 = vmul.f32 %v5775_v51, %v5771_v29 }
0x2742   :  { %v3626_v30 = vpack.c.bf16 %v3624_v1, %v3624_v1 }
0x2744   :  { %5348 = vmatmul.msk.bf16.vlgmr.msrb.gmra.mxu2 %vm206_vm14, %v3626_v30 }
0x2745   :  { %v3735_v54 = vpop.xlane.xlu0 %3734 }
0x2746   :  { %5776 = vrcp.f32 %v3735_v54 }
0x274c   :  { %v5777_v15 = vpop.eup %5776 }
0x274d   :  { %v3739_v23 = vmul.f32 %v5777_v15, %v5773_v22  ;;  %v3988_v22 = vpop.permute.xlu2 %3987 }
0x274f   :  { %v3741_v40 = vpack.c.bf16 %v3739_v23, %v3739_v23 }
0x2750   :  { %v3764_v58 = vpop.permute.xlu1 %3763 }
0x2751   :  { %v3769_v7 = vsel %vm279_vm15, %v3764_v58, 0 }
0x2752   :  { %3778 = vmatpush.bf16.msra.mxu2 %v3769_v7 }
0x2755   :  { %5353 = vmatmul.msk.bf16.vlgmr.msra.gmra.mxu2 %vm206_vm14, %v3741_v40 }
0x2758   :  { %v3853_v63 = vpop.permute.xlu0 %3852 }
0x2759   :  { %v3858_v59 = vsel %vm206_vm14, %v3853_v63, 0 }
0x275a   :  { %3867 = vmatpush.bf16.xpose.msrb.mxu2 %v3858_v59 }
0x2762   :  { %3981 = vmatpush.bf16.xpose.msra.mxu2 %v3972_v60 }
0x2765   :  { %5358 = vmatmul.msk.bf16.vlgmr.msrb.gmra.mxu2 %vm206_vm14, %v3851_v47 }
0x2775   :  { %5363 = vmatmul.msk.bf16.vlgmr.msra.gmra.mxu2 %vm206_vm14, %v3965_v3 }
0x2797   :  { %v3875_v62 = vpop.xlane.xlu0 %3874 }
0x2798   :  { %v3879_v6 = vsub.f32 %v3847_v55, %v3875_v62 }
0x279a   :  { %v3881_v4 = vmul.f32 1.442695, %v3879_v6 }
0x279c   :  { %5778 = vpow2.f32 %v3881_v4 }
0x27a2   :  { %v5779_v0 = vpop.eup %5778 }
0x27a3   :  { %v3885_v11 = vsel %vm206_vm14, %v5779_v0, 0.0 }
0x27a4   :  { %3886 = vadd.xlane.f32.xlu1 %v3885_v11 }
0x27bd   :  { %3918 = vrot.lane.b32.xlu1 %v7032_v28, %s7482_s22 }
0x27c7   :  { %v3665_v12 = vpop.f32.mrf.mxu2 }
0x27c8   :  { %v3669_v13 = vpack.c.bf16 %v3665_v12, %v3644_v8 }
0x27ca   :  { %5356 = vmatmul.msk.bf16.vlgmr.msrb.gmra.mxu0 %vm206_vm14, %v3669_v13 }
0x27cf   :  { %v3667_v46 = vpop.f32.mrf.mxu2 }
0x27d0   :  { %v5489_v46 = vld [vmem:[%s7455_s13 + $0x10] sm:$0xff] }
0x27d8   :  { %v3780_v53 = vpop.f32.mrf.mxu2 }
0x27d9   :  { %v3784_v44 = vpack.c.bf16 %v3780_v53, %v3759_v36 }
0x27db   :  { %5355 = vmatmul.msk.bf16.vlgmr.msrb.gmra.mxu3 %vm206_vm14, %v3784_v44 }
0x27dc   :  { %4004 = vmatpush.bf16.xpose.msrb.mxu3 %v3995_v17 }
0x27e0   :  { %v3782_v14 = vpop.f32.mrf.mxu2 }
0x27e8   :  { %v3869_v19 = vpop.f32.mrf.mxu2 }
0x27e9   :  { %v3870_v18 = vadd.f32 %v7071_v52, %v3869_v19 }
0x27eb   :  { %v3876_v2 = vsel %vm206_vm14, %v3870_v18, -inf }
0x27ec   :  { %3877 = vmax.xlane.f32.xlu0 %v3876_v2 }
0x27f0   :  { %v3871_v9 = vpop.f32.mrf.mxu2 }
0x27f8   :  { %v3983_v20 = vpop.f32.mrf.mxu2 }
0x27f9   :  { %v3984_v24 = vadd.f32 %v7051_v42, %v3983_v20  ;;  %v5367_v20 = vld [vmem:[%s7453_s11 + $0x1c] sm:$0xf] }
0x27fb   :  { %v4010_v26 = vsel %vm206_vm14, %v3984_v24, -inf }
0x27fc   :  { %4011 = vmax.xlane.f32.xlu0 %v4010_v26 }
0x2800   :  { %v3985_v25 = vpop.f32.mrf.mxu2 }
0x2801   :  { %v5548_v25 = vld [vmem:[%s7451_s9 + $0x14] ss:$0 sm:$0xff] }
0x2817   :  { %v3887_v29 = vpop.xlane.xlu1 %3886 }
0x2818   :  { %5780 = vrcp.f32 %v3887_v29 }
0x281e   :  { %v5781_v31 = vpop.eup %5780 }
0x281f   :  { %v3893_v32 = vmul.f32 %v5781_v31, %v5779_v0 }
0x2821   :  { %v3895_v34 = vpack.c.bf16 %v3893_v32, %v3893_v32 }
0x2823   :  { %5359 = vmatmul.msk.bf16.vlgmr.msra.gmra.mxu3 %vm206_vm14, %v3895_v34 }
0x282f   :  { %v3919_v61 = vpop.permute.xlu1 %3918 }
0x2830   :  { %v3924_v47 = vsel %vm279_vm15, %v3919_v61, 0 }
0x2831   :  { %3933 = vmatpush.bf16.msra.mxu0 %v3924_v47 }
0x2833   :  { %5364 = vmatmul.msk.bf16.vlgmr.msrb.gmra.mxu3 %vm206_vm14, %v3988_v22 }
0x2847   :  { %v3822_v38 = vpop.f32.mrf.mxu0 }
0x284f   :  { %v3824_v53 = vpop.f32.mrf.mxu0 }
0x285e   :  { %v3802_v42 = vpop.f32.mrf.mxu3 }
0x285f   :  { %v7134_v41 = vadd.f32 %v3822_v38, %v3802_v42  ;;  %v3878_v43 = vpop.xlane.xlu0 %3877 }
0x2860   :  { %v3880_v8 = vsub.f32 %v3870_v18, %v3878_v43 }
0x2862   :  { %v3883_v45 = vmul.f32 1.442695, %v3880_v8 }
0x2864   :  { %5782 = vpow2.f32 %v3883_v45 }
0x2866   :  { %v7139_v33 = vpop.f32.mrf.mxu3 }
0x286a   :  { %v5783_v36 = vpop.eup %5782 }
0x286b   :  { %v3888_v50 = vsel %vm206_vm14, %v5783_v36, 0.0 }
0x286c   :  { %3889 = vadd.xlane.f32.xlu2 %v3888_v50 }
0x286f   :  { %v4012_v16 = vpop.xlane.xlu0 %4011 }
0x2870   :  { %v4016_v35 = vsub.f32 %v3984_v24, %v4012_v16  ;;  %v4083_v24 = vsel %vm279_vm15, %v5367_v20, 0 }
0x2871   :  { %4092 = vmatpush.bf16.msrb.mxu2 %v4083_v24 }
0x2872   :  { %v4018_v51 = vmul.f32 1.442695, %v4016_v35 }
0x2874   :  { %5784 = vpow2.f32 %v4018_v51  ;;  %v3825_v51 = vadd.f32 %v3824_v53, %v7139_v33 }
0x287a   :  { %v5785_v15 = vpop.eup %5784 }
0x287b   :  { %v4022_v58 = vsel %vm206_vm14, %v5785_v15, 0.0 }
0x2884   :  { %4055 = vrot.lane.b32.xlu2 %v7032_v28, %s7485_s30  ;;  %v5361_v28 = vld [vmem:[%s7453_s11 + $0x18] sm:$0xf] }
0x2885   :  { %v3946_v7 = vsel %vm279_vm15, %v5361_v28, 0 }
0x2886   :  { %3955 = vmatpush.bf16.msra.mxu1 %v3946_v7 }
0x28a6   :  { %v3914_v55 = vpop.f32.mrf.mxu3 }
0x28ae   :  { %v3916_v56 = vpop.f32.mrf.mxu3 }
0x28b6   :  { %v4006_v1 = vpop.f32.mrf.mxu3 }
0x28b7   :  { %v4007_v30 = vadd.f32 %v7071_v52, %v4006_v1 }
0x28b9   :  { %v4013_v54 = vsel %vm206_vm14, %v4007_v30, -inf }
0x28ba   :  { %4014 = vmax.xlane.f32.xlu0 %v4013_v54 }
0x28be   :  { %v4008_v23 = vpop.f32.mrf.mxu3 }
0x28c2   :  { %4023 = vadd.xlane.f32.xlu0 %v4022_v58 }
0x28d6   :  { %4034 = vrot.lane.b32.xlu0 %v7024_v21, %s7485_s30 }
0x28df   :  { %v3890_v52 = vpop.xlane.xlu2 %3889 }
0x28e0   :  { %5786 = vrcp.f32 %v3890_v52 }
0x28e6   :  { %v5787_v40 = vpop.eup %5786 }
0x28e7   :  { %v3894_v57 = vmul.f32 %v5787_v40, %v5783_v36  ;;  %v4056_v63 = vpop.permute.xlu2 %4055 }
0x28e8   :  { %v4061_v59 = vsel %vm279_vm15, %v4056_v63, 0 }
0x28e9   :  { %v3896_v60 = vpack.c.bf16 %v3894_v57, %v3894_v57  ;;  %4070 = vmatpush.bf16.msrb.mxu1 %v4061_v59 }
0x28eb   :  { %5360 = vmatmul.msk.bf16.vlgmr.msra.gmra.mxu0 %vm206_vm14, %v3896_v60 }
0x292d   :  { %v4015_v49 = vpop.xlane.xlu0 %4014 }
0x292e   :  { %v4017_v3 = vsub.f32 %v4007_v30, %v4015_v49 }
0x2930   :  { %v4020_v62 = vmul.f32 1.442695, %v4017_v3 }
0x2932   :  { %5788 = vpow2.f32 %v4020_v62 }
0x2935   :  { %v4024_v21 = vpop.xlane.xlu0 %4023 }
0x2936   :  { %5790 = vrcp.f32 %v4024_v21 }
0x2938   :  { %v5789_v6 = vpop.eup %5788 }
0x2939   :  { %v4025_v4 = vsel %vm206_vm14, %v5789_v6, 0.0 }
0x293a   :  { %4026 = vadd.xlane.f32.xlu1 %v4025_v4 }
0x293c   :  { %v5791_v0 = vpop.eup %5790 }
0x293d   :  { %v4030_v11 = vmul.f32 %v5791_v0, %v5785_v15 }
0x293f   :  { %v4032_v13 = vpack.c.bf16 %v4030_v11, %v4030_v11 }
0x2948   :  { %v4035_v39 = vpop.permute.xlu0 %4034 }
0x2949   :  { %v4040_v12 = vsel %vm279_vm15, %v4035_v39, 0  ;;  %v5487_v39 = vld [vmem:[%s7454_s12 + $0x10] sm:$0xff] }
0x294a   :  { %4049 = vmatpush.bf16.msrb.mxu0 %v4040_v12 }
0x294d   :  { %5365 = vmatmul.msk.bf16.vlgmr.msrb.gmra.mxu0 %vm206_vm14, %v4032_v13 }
0x294e   :  { %4253 = vmatpush.bf16.msra.mxu0 %v5490_v27  ;;  %v5488_v27 = vld [vmem:[%s7454_s12 + $0x18] sm:$0xff] }
0x294f   :  { %4226 = vmatpush.bf16.msra.mxu3 %v5488_v27 }
0x2952   :  { %4254 = vmatpush.bf16.msra.mxu0 %v5489_v46 }
0x2953   :  { %4227 = vmatpush.bf16.msra.mxu3 %v5487_v39 }
0x295d   :  { %5394 = vmatmul.msk.bf16.vlgmr.msra.gmra.mxu0 %vm72_vm0, %v6749_v48 }
0x2968   :  { %v3935_v44 = vpop.f32.mrf.mxu0 }
0x2969   :  { %v3939_v17 = vpack.c.bf16 %v3935_v44, %v3914_v55  ;;  %v5549_v55 = vld [vmem:[%s7451_s9 + $0x10] ss:$0 sm:$0xff] }
0x296b   :  { %5362 = vmatmul.msk.bf16.vlgmr.msra.gmra.mxu1 %vm206_vm14, %v3939_v17 }
0x2970   :  { %v3937_v14 = vpop.f32.mrf.mxu0 }
0x29ad   :  { %v4027_v19 = vpop.xlane.xlu1 %4026 }
0x29ae   :  { %5792 = vrcp.f32 %v4027_v19 }
0x29b4   :  { %v5793_v18 = vpop.eup %5792 }
0x29b5   :  { %v4031_v2 = vmul.f32 %v5793_v18, %v5789_v6 }
0x29b7   :  { %v4033_v9 = vpack.c.bf16 %v4031_v2, %v4031_v2 }
0x29b9   :  { %5366 = vmatmul.msk.bf16.vlgmr.msrb.gmra.mxu1 %vm206_vm14, %v4033_v9 }
0x29ca   :  { %v4051_v48 = vpop.f32.mrf.mxu0 }
0x29d2   :  { %v4053_v26 = vpop.f32.mrf.mxu0 }
0x29da   :  { %v4256_v29 = vpop.f32.mrf.mxu0 }
0x29db   :  { %v4257_v31 = vadd.f32 %v5548_v25, %v4256_v29 }
0x29dd   :  { %v4263_v32 = vpack.c.bf16 %v4257_v31, %v4257_v31 }
0x29df   :  { %v4269_v34 = vsel %vm206_vm14, %v4263_v32, 0  ;;  %v4328_v4 = vunpack.c.l.b16 %v4263_v32 }
0x29e0   :  { %4278 = vmatpush.bf16.xpose.msra.mxu1 %v4269_v34 }
0x29e1   :  { %v7209_v21 = vpack.c.b16 %v4328_v4, %v4328_v4 }
0x29e2   :  { %v4258_v61 = vpop.f32.mrf.mxu0 }
0x29e3   :  { %v4259_v47 = vadd.f32 %v5548_v25, %v4258_v61 }
0x29e5   :  { %v4264_v22 = vpack.c.bf16 %v4259_v47, %v4259_v47 }
0x29e7   :  { %v4288_v38 = vsel %vm206_vm14, %v4264_v22, 0  ;;  %v4352_v7 = vunpack.c.l.b16 %v4264_v22 }
0x29e8   :  { %v3957_v42 = vpop.f32.mrf.mxu1  ;;  %4297 = vmatpush.bf16.xpose.msra.mxu2 %v4288_v38 }
0x29e9   :  { %v3962_v43 = vadd.f32 %v3957_v42, %v7134_v41  ;;  %v7190_v33 = vpack.c.b16 %v4352_v7, %v4352_v7 }
0x29f0   :  { %v3959_v8 = vpop.f32.mrf.mxu1 }
0x29f1   :  { %v3963_v30 = vadd.f32 %v3959_v8, %v3825_v51 }
0x2a36   :  { %v4072_v45 = vpop.f32.mrf.mxu1 }
0x2a37   :  { %v4076_v36 = vpack.c.bf16 %v4072_v45, %v4051_v48 }
0x2a39   :  { %5368 = vmatmul.msk.bf16.vlgmr.msrb.gmra.mxu2 %vm206_vm14, %v4076_v36 }
0x2a3e   :  { %v4074_v50 = vpop.f32.mrf.mxu1 }
0x2abc   :  { %v4094_v16 = vpop.f32.mrf.mxu2 }
0x2abd   :  { %v4099_v56 = vadd.f32 %v4094_v16, %v3962_v43 }
0x2abf   :  { %v4102_v35 = vadd.f32 %v5549_v55, %v4099_v56 }
0x2ac1   :  { %v7181_v1 = vadd.f32 %v4102_v35, %v6983_v5 }
0x2ac3   :  { %v4108_v41 = vsel %vm72_vm0, %v7181_v1, 0.0 }
0x2ac4   :  { %4109 = vadd.xlane.f32.xlu0 %v4108_v41  ;;  %v4096_v54 = vpop.f32.mrf.mxu2 }
0x2ac5   :  { %v4100_v15 = vadd.f32 %v4096_v54, %v3963_v30  ;;  %v5550_v30 = vld [vmem:[%s7451_s9 + $0x11] ss:$0 sm:$0xff] }
0x2ac7   :  { %v4103_v23 = vadd.f32 %v5549_v55, %v4100_v15 }
0x2ac9   :  { %v7186_v58 = vadd.f32 %v4103_v23, %v6988_v37 }
0x2acb   :  { %v4111_v28 = vsel %vm72_vm0, %v7186_v58, 0.0 }
0x2acc   :  { %4112 = vadd.xlane.f32.xlu2 %v4111_v28 }
0x2ae4   :  { %4409 = vrot.lane.b32.xlu2 %v7190_v33, %s7487_s24 }
0x2b37   :  { %v4110_v5 = vpop.xlane.xlu0 %4109 }
0x2b38   :  { %v4114_v52 = vmul.f32 %v4110_v5, %v6005_v10 }
0x2b3a   :  { %v7196_v40 = vsub.f32 %v7181_v1, %v4114_v52 }
0x2b3c   :  { %v4118_v37 = vmul.f32 %v7196_v40, %v7196_v40  ;;  %v4129_v52 = vmul.f32 %v5550_v30, %v7196_v40  ;;  %v5552_v40 = vld [vmem:[%s7451_s9 + $0x13] ss:$0 sm:$0xff] }
0x2b3e   :  { %v4120_v57 = vsel %vm72_vm0, %v4118_v37, 0.0 }
0x2b3f   :  { %4121 = vadd.xlane.f32.xlu1 %v4120_v57  ;;  %v4113_v63 = vpop.xlane.xlu2 %4112 }
0x2b40   :  { %v4115_v59 = vmul.f32 %v4113_v63, %v6005_v10 }
0x2b42   :  { %v7203_v60 = vsub.f32 %v7186_v58, %v4115_v59 }
0x2b44   :  { %v4119_v49 = vmul.f32 %v7203_v60, %v7203_v60  ;;  %v4130_v63 = vmul.f32 %v5550_v30, %v7203_v60 }
0x2b46   :  { %v4123_v3 = vsel %vm72_vm0, %v4119_v49, 0.0 }
0x2b47   :  { %4124 = vadd.xlane.f32.xlu1 %v4123_v3  ;;  %v4410_v62 = vpop.permute.xlu2 %4409  ;;  %v5551_v3 = vld [vmem:[%s7451_s9 + $0x12] ss:$0 sm:$0xff] }
0x2b48   :  { %v4415_v6 = vsel %vm206_vm14, %v4410_v62, 0 }
0x2b49   :  { %4424 = vmatpush.bf16.xpose.msrb.mxu2 %v4415_v6 }
0x2b60   :  { %4383 = vrot.lane.b32.xlu1 %v7209_v21, %s7487_s24 }
0x2bb2   :  { %v4122_v0 = vpop.xlane.xlu1 %4121 }
0x2bb3   :  { %v4126_v11 = vmul.f32 0.032258064, %v4122_v0 }
0x2bb5   :  { %5794 = vrsqrt.f32 %v4126_v11  ;;  %vm4138_vm1 = vcmp.eq.f32.partialorder %v4126_v11, inf  ;;  %v4141_v24 = vand.u32 2147483648, %v4126_v11  ;;  %vm4140_vm2 = vcmp.eq.f32.partialorder %v4126_v11, 0.0 }
0x2bba   :  { %v4125_v12 = vpop.xlane.xlu1 %4124 }
0x2bbb   :  { %v5795_v13 = vpop.eup %5794  ;;  %v4127_v46 = vmul.f32 0.032258064, %v4125_v12 }
0x2bbc   :  { %v4132_v53 = vmul.f32 %v5795_v13, %v4126_v11 }
0x2bbd   :  { %5796 = vrsqrt.f32 %v4127_v46  ;;  %vm4150_vm3 = vcmp.eq.f32.partialorder %v4127_v46, inf  ;;  %v4153_v61 = vand.u32 2147483648, %v4127_v46  ;;  %vm4152_vm4 = vcmp.eq.f32.partialorder %v4127_v46, 0.0 }
0x2bbe   :  { %v4133_v44 = vmul.f32 %v5795_v13, %v4132_v53 }
0x2bc0   :  { %v4134_v17 = vmul.f32 0.5, %v4133_v44 }
0x2bc2   :  { %v4135_v14 = vsub.f32 1.5, %v4134_v17 }
0x2bc3   :  { %v5797_v19 = vpop.eup %5796 }
0x2bc4   :  { %v4136_v18 = vmul.f32 %v5795_v13, %v4135_v14  ;;  %v4144_v2 = vmul.f32 %v5797_v19, %v4127_v46 }
0x2bc6   :  { %v4137_v9 = vmul.f32 %v4136_v18, %v4126_v11  ;;  %v4145_v20 = vmul.f32 %v5797_v19, %v4144_v2  ;;  %v7246_v2 = vld [vmem:[%s7444_s2] ss:$0 sm:$0xff] }
0x2bc8   :  { %v4139_v48 = vsel %vm4138_vm1, %v4126_v11, %v4137_v9  ;;  %v4146_v26 = vmul.f32 0.5, %v4145_v20 }
0x2bc9   :  { %v4142_v25 = vsel %vm4140_vm2, %v4141_v24, %v4139_v48 }
0x2bca   :  { %v4155_v29 = vadd.f32 1e-06, %v4142_v25  ;;  %v4147_v31 = vsub.f32 1.5, %v4146_v26 }
0x2bcc   :  { %5798 = vrcp.f32 %v4155_v29  ;;  %v4148_v32 = vmul.f32 %v5797_v19, %v4147_v31  ;;  %v4168_v56 = vand.u32 2147483648, %v4155_v29  ;;  %vm4162_vm6 = vweird.f32 %v4155_v29 }
0x2bcd   :  { %v4166_v35 = vand.u32 2147483647, %v4155_v29 }
0x2bce   :  { %v4149_v34 = vmul.f32 %v4148_v32, %v4127_v46  ;;  %v4169_v15 = vor.u32 1.1754944e-38, %v4168_v56 }
0x2bcf   :  { %vm4167_vm8 = vcmp.eq.f32.partialorder %v4166_v35, 8.507059e+37 }
0x2bd0   :  { %v4151_v47 = vsel %vm4150_vm3, %v4127_v46, %v4149_v34 }
0x2bd1   :  { %v4154_v22 = vsel %vm4152_vm4, %v4153_v61, %v4151_v47 }
0x2bd2   :  { %v5799_v38 = vpop.eup %5798  ;;  %v4156_v42 = vadd.f32 1e-06, %v4154_v22  ;;  %v4384_v43 = vpop.permute.xlu1 %4383 }
0x2bd3   :  { %v4389_v8 = vsel %vm206_vm14, %v4384_v43, 0  ;;  %v4158_v45 = vmul.f32 %v5799_v38, %v4155_v29  ;;  %vm4163_vm5 = vweird.f32 %v5799_v38  ;;  %v7258_v29 = vld [vmem:[%s7444_s2 + $0x1] ss:$0 sm:$0xff] }
0x2bd4   :  { %5800 = vrcp.f32 %v4156_v42  ;;  %4398 = vmatpush.bf16.xpose.msrb.mxu1 %v4389_v8  ;;  %vm4164_vm7 = vmor %vm4162_vm6, %vm4163_vm5  ;;  %v4183_v23 = vand.u32 2147483648, %v4156_v42  ;;  %v4181_v7 = vand.u32 2147483647, %v4156_v42  ;;  %vm4177_vm10 = vweird.f32 %v4156_v42 }
0x2bd5   :  { %v4159_v36 = vsub.f32 1.0, %v4158_v45 }
0x2bd6   :  { %v4184_v57 = vor.u32 1.1754944e-38, %v4183_v23  ;;  %vm4182_vm12 = vcmp.eq.f32.partialorder %v4181_v7, 8.507059e+37 }
0x2bd7   :  { %v4160_v50 = vmul.f32 %v5799_v38, %v4159_v36 }
0x2bd9   :  { %v4161_v55 = vadd.f32 %v5799_v38, %v4160_v50 }
0x2bda   :  { %v5801_v16 = vpop.eup %5800 }
0x2bdb   :  { %v4173_v51 = vmul.f32 %v5801_v16, %v4156_v42  ;;  %v4165_v41 = vsel %vm4164_vm7, %v5799_v38, %v4161_v55  ;;  %vm4178_vm9 = vweird.f32 %v5801_v16 }
0x2bdc   :  { %v4170_v5 = vsel %vm4167_vm8, %v4169_v15, %v4165_v41  ;;  %vm4179_vm11 = vmor %vm4177_vm10, %vm4178_vm9 }
0x2bdd   :  { %v4174_v54 = vsub.f32 1.0, %v4173_v51  ;;  %v4171_v59 = vmul.f32 %v4170_v5, %v4129_v52 }
0x2bdf   :  { %v4175_v28 = vmul.f32 %v5801_v16, %v4174_v54  ;;  %v4188_v4 = vadd.f32 %v5551_v3, %v4171_v59 }
0x2be1   :  { %v4176_v37 = vadd.f32 %v5801_v16, %v4175_v28 }
0x2be3   :  { %v4180_v49 = vsel %vm4179_vm11, %v5801_v16, %v4176_v37 }
0x2be4   :  { %v4185_v62 = vsel %vm4182_vm12, %v4184_v57, %v4180_v49 }
0x2be5   :  { %v4186_v6 = vmul.f32 %v4185_v62, %v4130_v63 }
0x2be7   :  { %v4189_v0 = vadd.f32 %v5551_v3, %v4186_v6 }
0x2be9   :  { %v4203_v11 = vpack.c.bf16 %v4189_v0, %v4188_v4 }
0x2beb   :  { %5385 = vmatmul.msk.bf16.vlgmr.msra.gmra.mxu3 %vm72_vm0, %v4203_v11 }
0x2c6e   :  { %v4229_v27 = vpop.f32.mrf.mxu3 }
0x2c6f   :  { %v4230_v60 = vadd.f32 %v5552_v40, %v4229_v27 }
0x2c71   :  { %v4261_v39 = vpack.c.bf16 %v4230_v60, %v4230_v60 }
0x2c73   :  { %v4379_v12 = vunpack.c.l.b16 %v4261_v39  ;;  %5395 = vmatmul.msk.bf16.vlgmr.msra.gmra.mxu1 %vm206_vm14, %v4261_v39 }
0x2c75   :  { %v7233_v13 = vpack.c.b16 %v4379_v12, %v4379_v12 }
0x2c76   :  { %v4231_v46 = vpop.f32.mrf.mxu3 }
0x2c77   :  { %v4232_v53 = vadd.f32 %v5552_v40, %v4231_v46  ;;  %4381 = vrot.lane.b32.xlu0 %v7233_v13, %s7487_s24 }
0x2c79   :  { %v4262_v44 = vpack.c.bf16 %v4232_v53, %v4232_v53 }
0x2c7b   :  { %v4405_v17 = vunpack.c.l.b16 %v4262_v44  ;;  %5396 = vmatmul.msk.bf16.vlgmr.msra.gmra.mxu2 %vm206_vm14, %v4262_v44 }
0x2c7d   :  { %v7238_v14 = vpack.c.b16 %v4405_v17, %v4405_v17 }
0x2c7f   :  { %4407 = vrot.lane.b32.xlu1 %v7238_v14, %s7487_s24 }
0x2ce9   :  { %v4382_v19 = vpop.permute.xlu0 %4381 }
0x2cea   :  { %5400 = vmatmul.msk.bf16.vlgmr.msrb.gmra.mxu1 %vm206_vm14, %v4382_v19 }
0x2cf0   :  { %v4280_v18 = vpop.f32.mrf.mxu1 }
0x2cf1   :  { %v4281_v9 = vadd.f32 %v7246_v2, %v4280_v18  ;;  %v4408_v20 = vpop.permute.xlu1 %4407 }
0x2cf2   :  { %5401 = vmatmul.msk.bf16.vlgmr.msrb.gmra.mxu2 %vm206_vm14, %v4408_v20  ;;  %v5399_v20 = vld [vmem:[%s7456_s14 + $0x10] sm:$0xf] }
0x2cf3   :  { %v4303_v24 = vsel %vm206_vm14, %v4281_v9, -inf }
0x2cf4   :  { %4304 = vmax.xlane.f32.xlu0 %v4303_v24  ;;  %v4523_v24 = vsel %vm279_vm15, %v5399_v20, 0 }
0x2cf5   :  { %4532 = vmatpush.bf16.msra.mxu2 %v4523_v24 }
0x2cf8   :  { %v4282_v48 = vpop.f32.mrf.mxu1 }
0x2cfe   :  { %v4299_v26 = vpop.f32.mrf.mxu2 }
0x2cff   :  { %v4300_v31 = vadd.f32 %v7258_v29, %v4299_v26 }
0x2d01   :  { %v4306_v32 = vsel %vm206_vm14, %v4300_v31, -inf }
0x2d06   :  { %v4301_v25 = vpop.f32.mrf.mxu2 }
0x2d08   :  { %4330 = vrot.lane.b32.xlu0 %v7209_v21, %s7488_s28 }
0x2d10   :  { %4539 = vrot.lane.b32.xlu0 %v7233_v13, %s5893_s1 }
0x2d3a   :  { %4307 = vmax.xlane.f32.xlu0 %v4306_v32 }
0x2d4e   :  { %4354 = vrot.lane.b32.xlu0 %v7190_v33, %s7488_s28 }
0x2d56   :  { %4562 = vrot.lane.b32.xlu0 %v7238_v14, %s5893_s1 }
0x2d67   :  { %v4400_v34 = vpop.f32.mrf.mxu1  ;;  %v4305_v61 = vpop.xlane.xlu0 %4304 }
0x2d68   :  { %v4401_v47 = vadd.f32 %v7246_v2, %v4400_v34  ;;  %v4309_v22 = vsub.f32 %v4281_v9, %v4305_v61 }
0x2d6a   :  { %v4311_v38 = vmul.f32 1.442695, %v4309_v22  ;;  %v4430_v42 = vsel %vm206_vm14, %v4401_v47, -inf }
0x2d6b   :  { %4431 = vmax.xlane.f32.xlu1 %v4430_v42 }
0x2d6c   :  { %5802 = vpow2.f32 %v4311_v38 }
0x2d6f   :  { %v4402_v43 = vpop.f32.mrf.mxu1 }
0x2d72   :  { %v5803_v8 = vpop.eup %5802 }
0x2d73   :  { %v4315_v45 = vsel %vm206_vm14, %v5803_v8, 0.0 }
0x2d74   :  { %4316 = vadd.xlane.f32.xlu2 %v4315_v45 }
0x2d75   :  { %v4426_v36 = vpop.f32.mrf.mxu2 }
0x2d76   :  { %v4427_v62 = vadd.f32 %v7258_v29, %v4426_v36 }
0x2d78   :  { %v4433_v4 = vsel %vm206_vm14, %v4427_v62, -inf }
0x2d7a   :  { %v4331_v50 = vpop.permute.xlu0 %4330 }
0x2d7b   :  { %v4336_v55 = vsel %vm279_vm15, %v4331_v50, 0  ;;  %v5404_v50 = vld [vmem:[%s7456_s14 + $0x14] sm:$0xf] }
0x2d7c   :  { %4345 = vmatpush.bf16.msrb.mxu3 %v4336_v55  ;;  %v4503_v55 = vsel %vm279_vm15, %v5404_v50, 0 }
0x2d7d   :  { %v4428_v16 = vpop.f32.mrf.mxu2  ;;  %4512 = vmatpush.bf16.msra.mxu1 %v4503_v55 }
0x2d82   :  { %v4540_v56 = vpop.permute.xlu0 %4539 }
0x2d8c   :  { %4541 = vrot.lane.b32.xlu2 %v7209_v21, %s5893_s1 }
0x2dad   :  { %v4308_v35 = vpop.xlane.xlu0 %4307 }
0x2dae   :  { %v4310_v51 = vsub.f32 %v4300_v31, %v4308_v35 }
0x2db0   :  { %v4313_v30 = vmul.f32 1.442695, %v4310_v51 }
0x2db2   :  { %5804 = vpow2.f32 %v4313_v30 }
0x2db8   :  { %v5805_v41 = vpop.eup %5804 }
0x2db9   :  { %v4318_v54 = vsel %vm206_vm14, %v5805_v41, 0.0 }
0x2dba   :  { %4319 = vadd.xlane.f32.xlu2 %v4318_v54 }
0x2dc0   :  { %v4355_v15 = vpop.permute.xlu0 %4354 }
0x2dc1   :  { %v4360_v23 = vsel %vm279_vm15, %v4355_v15, 0 }
0x2dc2   :  { %4369 = vmatpush.bf16.msrb.mxu0 %v4360_v23 }
0x2dc8   :  { %v4563_v30 = vpop.permute.xlu0 %4562 }
0x2dd2   :  { %4475 = vrot.lane.b32.xlu2 %v7190_v33, %s7489_s7 }
0x2dde   :  { %v4432_v28 = vpop.xlane.xlu1 %4431 }
0x2ddf   :  { %v4436_v7 = vsub.f32 %v4401_v47, %v4432_v28 }
0x2de1   :  { %v4438_v5 = vmul.f32 1.442695, %v4436_v7 }
0x2de3   :  { %5806 = vpow2.f32 %v4438_v5 }
0x2de7   :  { %v4317_v52 = vpop.xlane.xlu2 %4316 }
0x2de8   :  { %5808 = vrcp.f32 %v4317_v52 }
0x2de9   :  { %v5807_v37 = vpop.eup %5806 }
0x2dea   :  { %v4442_v57 = vsel %vm206_vm14, %v5807_v37, 0.0 }
0x2deb   :  { %4443 = vadd.xlane.f32.xlu1 %v4442_v57 }
0x2dee   :  { %v5809_v63 = vpop.eup %5808 }
0x2def   :  { %v4323_v59 = vmul.f32 %v5809_v63, %v5803_v8  ;;  %v4542_v3 = vpop.permute.xlu2 %4541 }
0x2df0   :  { %v4547_v19 = vsel %vm206_vm14, %v4542_v3, 0 }
0x2df1   :  { %v4325_v49 = vpack.c.bf16 %v4323_v59, %v4323_v59 }
0x2df3   :  { %5397 = vmatmul.msk.bf16.vlgmr.msrb.gmra.mxu3 %vm206_vm14, %v4325_v49 }
0x2e04   :  { %4454 = vrot.lane.b32.xlu1 %v7209_v21, %s7489_s7 }
0x2e2d   :  { %v4320_v6 = vpop.xlane.xlu2 %4319 }
0x2e2e   :  { %5810 = vrcp.f32 %v4320_v6  ;;  %4434 = vmax.xlane.f32.xlu1 %v4433_v4 }
0x2e34   :  { %v5811_v0 = vpop.eup %5810 }
0x2e35   :  { %v4324_v11 = vmul.f32 %v5811_v0, %v5805_v41  ;;  %v4476_v40 = vpop.permute.xlu2 %4475 }
0x2e36   :  { %v4481_v27 = vsel %vm279_vm15, %v4476_v40, 0 }
0x2e37   :  { %v4326_v60 = vpack.c.bf16 %v4324_v11, %v4324_v11  ;;  %4490 = vmatpush.bf16.msra.mxu0 %v4481_v27 }
0x2e39   :  { %5398 = vmatmul.msk.bf16.vlgmr.msrb.gmra.mxu0 %vm206_vm14, %v4326_v60 }
0x2e5e   :  { %v4444_v39 = vpop.xlane.xlu1 %4443 }
0x2e5f   :  { %5812 = vrcp.f32 %v4444_v39 }
0x2e65   :  { %v5813_v12 = vpop.eup %5812 }
0x2e66   :  { %v4450_v46 = vmul.f32 %v5813_v12, %v5807_v37 }
0x2e68   :  { %v4452_v18 = vpack.c.bf16 %v4450_v46, %v4450_v46 }
0x2e76   :  { %v4455_v53 = vpop.permute.xlu1 %4454  ;;  %v4347_v44 = vpop.f32.mrf.mxu3 }
0x2e77   :  { %v4460_v17 = vsel %vm279_vm15, %v4455_v53, 0 }
0x2e78   :  { %4469 = vmatpush.bf16.msra.mxu3 %v4460_v17 }
0x2e7b   :  { %5402 = vmatmul.msk.bf16.vlgmr.msra.gmra.mxu3 %vm206_vm14, %v4452_v18 }
0x2e7c   :  { %4556 = vmatpush.bf16.xpose.msrb.mxu3 %v4547_v19 }
0x2e7e   :  { %v4349_v9 = vpop.f32.mrf.mxu3 }
0x2e7f   :  { %v5411_v9 = vld [vmem:[%s7456_s14 + $0x18] sm:$0xf] }
0x2e80   :  { %v4658_v24 = vsel %vm279_vm15, %v5411_v9, 0 }
0x2e84   :  { %4667 = vmatpush.bf16.msra.mxu3 %v4658_v24 }
0x2e8b   :  { %5407 = vmatmul.msk.bf16.vlgmr.msrb.gmra.mxu3 %vm206_vm14, %v4540_v56 }
0x2ea1   :  { %v4435_v48 = vpop.xlane.xlu1 %4434 }
0x2ea2   :  { %v4437_v26 = vsub.f32 %v4427_v62, %v4435_v48 }
0x2ea4   :  { %v4440_v25 = vmul.f32 1.442695, %v4437_v26 }
0x2ea6   :  { %5814 = vpow2.f32 %v4440_v25 }
0x2eac   :  { %v5815_v31 = vpop.eup %5814 }
0x2ead   :  { %v4445_v32 = vsel %vm206_vm14, %v5815_v31, 0.0 }
0x2eae   :  { %4446 = vadd.xlane.f32.xlu1 %v4445_v32 }
0x2eb6   :  { %v4371_v34 = vpop.f32.mrf.mxu0 }
0x2eb7   :  { %v4375_v61 = vpack.c.bf16 %v4371_v34, %v4347_v44 }
0x2eb9   :  { %5406 = vmatmul.msk.bf16.vlgmr.msra.gmra.mxu2 %vm206_vm14, %v4375_v61 }
0x2ebe   :  { %v4373_v47 = vpop.f32.mrf.mxu0 }
0x2ec7   :  { %4564 = vrot.lane.b32.xlu1 %v7190_v33, %s5893_s1 }
0x2ecf   :  { %4609 = vrot.lane.b32.xlu1 %v7209_v21, %s7481_s18 }
0x2ed7   :  { %4678 = vrot.lane.b32.xlu1 %v7209_v21, %s7484_s29 }
0x2edf   :  { %4701 = vrot.lane.b32.xlu1 %v7190_v33, %s7484_s29 }
0x2ee7   :  { %4676 = vrot.lane.b32.xlu1 %v7233_v13, %s7484_s29 }
0x2efe   :  { %v4471_v22 = vpop.f32.mrf.mxu3 }
0x2f06   :  { %v4473_v38 = vpop.f32.mrf.mxu3 }
0x2f0e   :  { %v4558_v42 = vpop.f32.mrf.mxu3 }
0x2f0f   :  { %v4559_v43 = vadd.f32 %v7246_v2, %v4558_v42 }
0x2f11   :  { %v4585_v8 = vsel %vm206_vm14, %v4559_v43, -inf }
0x2f12   :  { %4586 = vmax.xlane.f32.xlu0 %v4585_v8 }
0x2f16   :  { %v4560_v45 = vpop.f32.mrf.mxu3 }
0x2f21   :  { %v4447_v36 = vpop.xlane.xlu1 %4446 }
0x2f22   :  { %5816 = vrcp.f32 %v4447_v36 }
0x2f26   :  { %4699 = vrot.lane.b32.xlu0 %v7238_v14, %s7484_s29 }
0x2f28   :  { %v5817_v13 = vpop.eup %5816 }
0x2f29   :  { %v4451_v16 = vmul.f32 %v5817_v13, %v5815_v31 }
0x2f2b   :  { %v4453_v56 = vpack.c.bf16 %v4451_v16, %v4451_v16 }
0x2f2d   :  { %5403 = vmatmul.msk.bf16.vlgmr.msra.gmra.mxu0 %vm206_vm14, %v4453_v56 }
0x2f39   :  { %v4565_v35 = vpop.permute.xlu1 %4564 }
0x2f3a   :  { %v4570_v51 = vsel %vm206_vm14, %v4565_v35, 0 }
0x2f3b   :  { %4579 = vmatpush.bf16.xpose.msrb.mxu0 %v4570_v51 }
0x2f41   :  { %v4610_v41 = vpop.permute.xlu1 %4609 }
0x2f42   :  { %v4615_v54 = vsel %vm279_vm15, %v4610_v41, 0  ;;  %5408 = vmatmul.msk.bf16.vlgmr.msrb.gmra.mxu0 %vm206_vm14, %v4563_v30 }
0x2f43   :  { %4624 = vmatpush.bf16.msrb.mxu1 %v4615_v54  ;;  %v4534_v54 = vpop.f32.mrf.mxu2 }
0x2f49   :  { %v4679_v15 = vpop.permute.xlu1 %4678 }
0x2f4a   :  { %v4684_v23 = vsel %vm206_vm14, %v4679_v15, 0 }
0x2f4b   :  { %4693 = vmatpush.bf16.xpose.msra.mxu0 %v4684_v23  ;;  %v4536_v15 = vpop.f32.mrf.mxu2 }
0x2f51   :  { %v4702_v14 = vpop.permute.xlu1 %4701 }
0x2f52   :  { %v4707_v49 = vsel %vm206_vm14, %v4702_v14, 0 }
0x2f59   :  { %v4677_v28 = vpop.permute.xlu1 %4676 }
0x2f5a   :  { %5413 = vmatmul.msk.bf16.vlgmr.msra.gmra.mxu0 %vm206_vm14, %v4677_v28 }
0x2f85   :  { %v4587_v7 = vpop.xlane.xlu0 %4586 }
0x2f86   :  { %v4591_v5 = vsub.f32 %v4559_v43, %v4587_v7 }
0x2f88   :  { %v4593_v52 = vmul.f32 1.442695, %v4591_v5 }
0x2f8a   :  { %5818 = vpow2.f32 %v4593_v52 }
0x2f90   :  { %v5819_v37 = vpop.eup %5818 }
0x2f91   :  { %v4597_v57 = vsel %vm206_vm14, %v5819_v37, 0.0 }
0x2f92   :  { %4598 = vadd.xlane.f32.xlu2 %v4597_v57 }
0x2f98   :  { %v4700_v44 = vpop.permute.xlu0 %4699 }
0x2faa   :  { %v4492_v63 = vpop.f32.mrf.mxu0 }
0x2fab   :  { %v4496_v59 = vpack.c.bf16 %v4492_v63, %v4471_v22 }
0x2fad   :  { %5405 = vmatmul.msk.bf16.vlgmr.msra.gmra.mxu1 %vm206_vm14, %v4496_v59 }
0x2fae   :  { %4716 = vmatpush.bf16.xpose.msra.mxu1 %v4707_v49 }
0x2fb2   :  { %v4494_v3 = vpop.f32.mrf.mxu0 }
0x2fbf   :  { %v4581_v62 = vpop.f32.mrf.mxu0 }
0x2fc0   :  { %v4582_v6 = vadd.f32 %v7258_v29, %v4581_v62 }
0x2fc2   :  { %v4588_v4 = vsel %vm206_vm14, %v4582_v6, -inf }
0x2fc3   :  { %4589 = vmax.xlane.f32.xlu1 %v4588_v4 }
0x2fc7   :  { %v4583_v0 = vpop.f32.mrf.mxu0 }
0x2fc8   :  { %v5417_v0 = vld [vmem:[%s7456_s14 + $0x1c] sm:$0xf]  ;;  %s5900_s14 = smov 8  }
0x2fd7   :  { %v4695_v11 = vpop.f32.mrf.mxu0 }
0x2fd8   :  { %v4696_v40 = vadd.f32 %v7246_v2, %v4695_v11  ;;  %v4795_v11 = vsel %vm279_vm15, %v5417_v0, 0 }
0x2fd9   :  { %4804 = vmatpush.bf16.msrb.mxu0 %v4795_v11 }
0x2fda   :  { %v4722_v27 = vsel %vm206_vm14, %v4696_v40, -inf }
0x2fdb   :  { %4723 = vmax.xlane.f32.xlu0 %v4722_v27 }
0x2fdf   :  { %v4697_v60 = vpop.f32.mrf.mxu0 }
0x2fef   :  { %4767 = vrot.lane.b32.xlu0 %v7190_v33, %s7483_s23 }
0x3005   :  { %v4599_v39 = vpop.xlane.xlu2 %4598 }
0x3006   :  { %5820 = vrcp.f32 %v4599_v39 }
0x300c   :  { %v5821_v12 = vpop.eup %5820 }
0x300d   :  { %v4605_v46 = vmul.f32 %v5821_v12, %v5819_v37 }
0x300f   :  { %v4607_v53 = vpack.c.bf16 %v4605_v46, %v4605_v46 }
0x3011   :  { %5409 = vmatmul.msk.bf16.vlgmr.msrb.gmra.mxu1 %vm206_vm14, %v4607_v53  ;;  %v5553_v53 = vld [vmem:[%s7451_s9 + $0x15] ss:$0 sm:$0xff] }
0x3021   :  { %5414 = vmatmul.msk.bf16.vlgmr.msra.gmra.mxu1 %vm206_vm14, %v4700_v44 }
0x302a   :  { %v4514_v47 = vpop.f32.mrf.mxu1 }
0x302b   :  { %v4535_v62 = vadd.f32 %v4534_v54, %v4514_v47 }
0x3032   :  { %v7338_v22 = vpop.f32.mrf.mxu1 }
0x3036   :  { %v4590_v17 = vpop.xlane.xlu1 %4589 }
0x3037   :  { %v4592_v19 = vsub.f32 %v4582_v6, %v4590_v17 }
0x3039   :  { %v4595_v2 = vmul.f32 1.442695, %v4592_v19 }
0x303b   :  { %5822 = vpow2.f32 %v4595_v2  ;;  %v4537_v2 = vadd.f32 %v4536_v15, %v7338_v22 }
0x3041   :  { %v5823_v18 = vpop.eup %5822 }
0x3042   :  { %v4600_v20 = vsel %vm206_vm14, %v5823_v18, 0.0 }
0x3043   :  { %4601 = vadd.xlane.f32.xlu2 %v4600_v20 }
0x304e   :  { %v4724_v48 = vpop.xlane.xlu0 %4723 }
0x304f   :  { %v4728_v26 = vsub.f32 %v4696_v40, %v4724_v48 }
0x3051   :  { %v4730_v25 = vmul.f32 1.442695, %v4728_v26 }
0x3053   :  { %5824 = vpow2.f32 %v4730_v25 }
0x3059   :  { %v5825_v31 = vpop.eup %5824 }
0x305a   :  { %v4734_v32 = vsel %vm206_vm14, %v5825_v31, 0.0 }
0x305b   :  { %4630 = vrot.lane.b32.xlu2 %v7190_v33, %s7481_s18  ;;  %4735 = vadd.xlane.f32.xlu1 %v4734_v32 }
0x3061   :  { %v4768_v34 = vpop.permute.xlu0 %4767 }
0x3062   :  { %v4773_v61 = vsel %vm279_vm15, %v4768_v34, 0 }
0x3063   :  { %4782 = vmatpush.bf16.msrb.mxu3 %v4773_v61 }
0x308e   :  { %v4626_v38 = vpop.f32.mrf.mxu1 }
0x3096   :  { %v4628_v42 = vpop.f32.mrf.mxu1 }
0x309e   :  { %v4718_v43 = vpop.f32.mrf.mxu1 }
0x309f   :  { %v4719_v8 = vadd.f32 %v7258_v29, %v4718_v43 }
0x30a1   :  { %v4725_v45 = vsel %vm206_vm14, %v4719_v8, -inf }
0x30a2   :  { %4726 = vmax.xlane.f32.xlu2 %v4725_v45 }
0x30a6   :  { %v4720_v36 = vpop.f32.mrf.mxu1 }
0x30a7   :  { %v5492_v36 = vld [vmem:[%s7457_s15 + $0x18] sm:$0xff] }
0x30a8   :  { %4941 = vmatpush.bf16.msrb.mxu1 %v5492_v36 }
0x30b6   :  { %v4602_v50 = vpop.xlane.xlu2 %4601 }
0x30b7   :  { %5826 = vrcp.f32 %v4602_v50  ;;  %v5491_v50 = vld [vmem:[%s7457_s15 + $0x10] sm:$0xff] }
0x30b8   :  { %4942 = vmatpush.bf16.msrb.mxu1 %v5491_v50 }
0x30bd   :  { %v5827_v33 = vpop.eup %5826 }
0x30be   :  { %v4606_v55 = vmul.f32 %v5827_v33, %v5823_v18  ;;  %v4631_v13 = vpop.permute.xlu2 %4630 }
0x30bf   :  { %v4636_v16 = vsel %vm279_vm15, %v4631_v13, 0 }
0x30c0   :  { %v4608_v56 = vpack.c.bf16 %v4606_v55, %v4606_v55  ;;  %4645 = vmatpush.bf16.msrb.mxu2 %v4636_v16 }
0x30c3   :  { %5410 = vmatmul.msk.bf16.vlgmr.msrb.gmra.mxu2 %vm206_vm14, %v4608_v56 }
0x30ce   :  { %v4736_v7 = vpop.xlane.xlu1 %4735 }
0x3115   :  { %v4727_v35 = vpop.xlane.xlu2 %4726 }
0x3116   :  { %v4729_v51 = vsub.f32 %v4719_v8, %v4727_v35 }
0x3118   :  { %v4732_v30 = vmul.f32 1.442695, %v4729_v51 }
0x311a   :  { %5828 = vpow2.f32 %v4732_v30 }
0x3120   :  { %v5829_v29 = vpop.eup %5828 }
0x3121   :  { %v4737_v41 = vsel %vm206_vm14, %v5829_v29, 0.0 }
0x3122   :  { %4738 = vadd.xlane.f32.xlu1 %v4737_v41 }
0x313b   :  { %4746 = vrot.lane.b32.xlu1 %v7209_v21, %s7483_s23 }
0x3146   :  { %v4647_v23 = vpop.f32.mrf.mxu2 }
0x3147   :  { %v4651_v14 = vpack.c.bf16 %v4647_v23, %v4626_v38 }
0x3149   :  { %5412 = vmatmul.msk.bf16.vlgmr.msra.gmra.mxu3 %vm206_vm14, %v4651_v14 }
0x314e   :  { %v4649_v28 = vpop.f32.mrf.mxu2 }
0x3195   :  { %v4739_v5 = vpop.xlane.xlu1 %4738 }
0x3196   :  { %5830 = vrcp.f32 %v4739_v5 }
0x3197   :  { %5832 = vrcp.f32 %v4736_v7 }
0x319c   :  { %v5831_v52 = vpop.eup %5830 }
0x319d   :  { %v4743_v37 = vmul.f32 %v5831_v52, %v5829_v29  ;;  %v5833_v63 = vpop.eup %5832 }
0x319e   :  { %v4742_v59 = vmul.f32 %v5833_v63, %v5825_v31 }
0x319f   :  { %v4745_v57 = vpack.c.bf16 %v4743_v37, %v4743_v37 }
0x31a0   :  { %v4744_v3 = vpack.c.bf16 %v4742_v59, %v4742_v59 }
0x31a1   :  { %5416 = vmatmul.msk.bf16.vlgmr.msrb.gmra.mxu3 %vm206_vm14, %v4745_v57 }
0x31ad   :  { %v4747_v49 = vpop.permute.xlu1 %4746 }
0x31ae   :  { %v4752_v21 = vsel %vm279_vm15, %v4747_v49, 0 }
0x31af   :  { %4761 = vmatpush.bf16.msra.mxu2 %v4752_v21 }
0x31b2   :  { %5415 = vmatmul.msk.bf16.vlgmr.msra.gmra.mxu2 %vm206_vm14, %v4744_v3 }
0x31cc   :  { %v4669_v6 = vpop.f32.mrf.mxu3 }
0x31cd   :  { %v4674_v4 = vadd.f32 %v4669_v6, %v4535_v62 }
0x31d4   :  { %v4671_v40 = vpop.f32.mrf.mxu3 }
0x31d5   :  { %v4675_v9 = vadd.f32 %v4671_v40, %v4537_v2 }
0x3224   :  { %v4784_v27 = vpop.f32.mrf.mxu3 }
0x322c   :  { %v4786_v60 = vpop.f32.mrf.mxu3 }
0x3235   :  { %v4763_v39 = vpop.f32.mrf.mxu2 }
0x3236   :  { %v4788_v12 = vpack.c.bf16 %v4784_v27, %v4763_v39  ;;  %v5554_v39 = vld [vmem:[%s7451_s9 + $0x16] ss:$0 sm:$0xff] }
0x3238   :  { %5418 = vmatmul.msk.bf16.vlgmr.msrb.gmra.mxu0 %vm206_vm14, %v4788_v12 }
0x323d   :  { %v4765_v46 = vpop.f32.mrf.mxu2 }
0x32b5   :  { %v4806_v44 = vpop.f32.mrf.mxu0 }
0x32b6   :  { %v4811_v17 = vadd.f32 %v4806_v44, %v4674_v4 }
0x32b8   :  { %v4814_v19 = vadd.f32 %v5553_v53, %v4811_v17 }
0x32ba   :  { %v7361_v18 = vadd.f32 %v4814_v19, %v7181_v1 }
0x32bc   :  { %v4820_v20 = vsel %vm72_vm0, %v7361_v18, 0.0 }
0x32bd   :  { %4821 = vadd.xlane.f32.xlu2 %v4820_v20  ;;  %v4808_v24 = vpop.f32.mrf.mxu0 }
0x32be   :  { %v4812_v48 = vadd.f32 %v4808_v24, %v4675_v9 }
0x32c0   :  { %v4815_v26 = vadd.f32 %v5553_v53, %v4812_v48 }
0x32c2   :  { %v7366_v25 = vadd.f32 %v4815_v26, %v7186_v58 }
0x32c4   :  { %v4823_v31 = vsel %vm72_vm0, %v7366_v25, 0.0 }
0x32c5   :  { %4824 = vadd.xlane.f32.xlu0 %v4823_v31 }
0x3330   :  { %v4822_v32 = vpop.xlane.xlu2 %4821 }
0x3331   :  { %v4826_v34 = vmul.f32 %v4822_v32, %v6005_v10  ;;  %v5555_v32 = vld [vmem:[%s7451_s9 + $0x17] ss:$0 sm:$0xff] }
0x3333   :  { %v7372_v1 = vsub.f32 %v7361_v18, %v4826_v34 }
0x3335   :  { %v4830_v61 = vmul.f32 %v7372_v1, %v7372_v1  ;;  %v4841_v9 = vmul.f32 %v5554_v39, %v7372_v1  ;;  %v5496_v1 = vld [vmem:[%s7458_s16 + $0x38] sm:$0xff] }
0x3336   :  { %4984 = vmatpush.bf16.msrb.mxu2 %v5496_v1 }
0x3337   :  { %v4832_v47 = vsel %vm72_vm0, %v4830_v61, 0.0 }
0x3338   :  { %4833 = vadd.xlane.f32.xlu1 %v4832_v47  ;;  %v4825_v22 = vpop.xlane.xlu0 %4824 }
0x3339   :  { %v4827_v58 = vmul.f32 %v4825_v22, %v6005_v10 }
0x333b   :  { %v7379_v38 = vsub.f32 %v7366_v25, %v4827_v58 }
0x333d   :  { %v4831_v42 = vmul.f32 %v7379_v38, %v7379_v38  ;;  %v4842_v48 = vmul.f32 %v5554_v39, %v7379_v38  ;;  %v5495_v38 = vld [vmem:[%s7458_s16 + $0x30] sm:$0xff] }
0x333e   :  { %4985 = vmatpush.bf16.msrb.mxu2 %v5495_v38 }
0x333f   :  { %v4835_v43 = vsel %vm72_vm0, %v4831_v42, 0.0  ;;  %v5494_v42 = vld [vmem:[%s7458_s16 + $0x28] sm:$0xff] }
0x3340   :  { %4836 = vadd.xlane.f32.xlu2 %v4835_v43  ;;  %v5493_v43 = vld [vmem:[%s7458_s16 + $0x20] sm:$0xff] }
0x3342   :  { %4986 = vmatpush.bf16.msrb.mxu2 %v5494_v42 }
0x3346   :  { %4987 = vmatpush.bf16.msrb.mxu2 %v5493_v43 }
0x33ab   :  { %v4834_v8 = vpop.xlane.xlu1 %4833 }
0x33ac   :  { %v4838_v45 = vmul.f32 0.032258064, %v4834_v8 }
0x33ae   :  { %5834 = vrsqrt.f32 %v4838_v45  ;;  %vm4850_vm14 = vcmp.eq.f32.partialorder %v4838_v45, inf  ;;  %v4853_v23 = vand.u32 2147483648, %v4838_v45  ;;  %vm4852_vm15 = vcmp.eq.f32.partialorder %v4838_v45, 0.0 }
0x33b3   :  { %v4837_v33 = vpop.xlane.xlu2 %4836 }
0x33b4   :  { %v5835_v55 = vpop.eup %5834  ;;  %v4839_v13 = vmul.f32 0.032258064, %v4837_v33 }
0x33b5   :  { %v4844_v16 = vmul.f32 %v5835_v55, %v4838_v45 }
0x33b6   :  { %5836 = vrsqrt.f32 %v4839_v13  ;;  %vm4862_vm1 = vcmp.eq.f32.partialorder %v4839_v13, inf  ;;  %v4865_v63 = vand.u32 2147483648, %v4839_v13  ;;  %vm4864_vm2 = vcmp.eq.f32.partialorder %v4839_v13, 0.0 }
0x33b7   :  { %v4845_v56 = vmul.f32 %v5835_v55, %v4844_v16 }
0x33b9   :  { %v4846_v35 = vmul.f32 0.5, %v4845_v56  ;;  %v5557_v56 = vld [vmem:[%s7451_s9 + $0x19] ss:$0 sm:$0xff] }
0x33bb   :  { %v4847_v51 = vsub.f32 1.5, %v4846_v35 }
0x33bc   :  { %v5837_v30 = vpop.eup %5836 }
0x33bd   :  { %v4848_v29 = vmul.f32 %v5835_v55, %v4847_v51  ;;  %v4856_v41 = vmul.f32 %v5837_v30, %v4839_v13 }
0x33bf   :  { %v4849_v54 = vmul.f32 %v4848_v29, %v4838_v45  ;;  %v4857_v15 = vmul.f32 %v5837_v30, %v4856_v41 }
0x33c1   :  { %v4851_v14 = vsel %vm4850_vm14, %v4838_v45, %v4849_v54  ;;  %v4858_v28 = vmul.f32 0.5, %v4857_v15  ;;  %v5556_v45 = vld [vmem:[%s7451_s9 + $0x18] ss:$0 sm:$0xff] }
0x33c2   :  { %v4854_v7 = vsel %vm4852_vm15, %v4853_v23, %v4851_v14 }
0x33c3   :  { %v4867_v5 = vadd.f32 1e-06, %v4854_v7  ;;  %v4859_v52 = vsub.f32 1.5, %v4858_v28 }
0x33c5   :  { %5838 = vrcp.f32 %v4867_v5  ;;  %v4860_v37 = vmul.f32 %v5837_v30, %v4859_v52  ;;  %v4880_v40 = vand.u32 2147483648, %v4867_v5  ;;  %vm4874_vm4 = vweird.f32 %v4867_v5 }
0x33c6   :  { %v4878_v27 = vand.u32 2147483647, %v4867_v5 }
0x33c7   :  { %v4861_v57 = vmul.f32 %v4860_v37, %v4839_v13  ;;  %v4881_v53 = vor.u32 1.1754944e-38, %v4880_v40 }
0x33c8   :  { %vm4879_vm6 = vcmp.eq.f32.partialorder %v4878_v27, 8.507059e+37 }
0x33c9   :  { %v4863_v59 = vsel %vm4862_vm1, %v4839_v13, %v4861_v57 }
0x33ca   :  { %v4866_v49 = vsel %vm4864_vm2, %v4865_v63, %v4863_v59 }
0x33cb   :  { %v5839_v21 = vpop.eup %5838  ;;  %v4868_v3 = vadd.f32 1e-06, %v4866_v49 }
0x33cc   :  { %v4870_v62 = vmul.f32 %v5839_v21, %v4867_v5  ;;  %vm4875_vm3 = vweird.f32 %v5839_v21 }
0x33cd   :  { %5840 = vrcp.f32 %v4868_v3  ;;  %vm4876_vm5 = vmor %vm4874_vm4, %vm4875_vm3  ;;  %v4895_v44 = vand.u32 2147483648, %v4868_v3  ;;  %v4893_v19 = vand.u32 2147483647, %v4868_v3  ;;  %vm4889_vm8 = vweird.f32 %v4868_v3 }
0x33ce   :  { %v4871_v6 = vsub.f32 1.0, %v4870_v62 }
0x33cf   :  { %v4896_v24 = vor.u32 1.1754944e-38, %v4895_v44  ;;  %vm4894_vm10 = vcmp.eq.f32.partialorder %v4893_v19, 8.507059e+37 }
0x33d0   :  { %v4872_v4 = vmul.f32 %v5839_v21, %v4871_v6 }
0x33d2   :  { %v4873_v0 = vadd.f32 %v5839_v21, %v4872_v4 }
0x33d3   :  { %v5841_v11 = vpop.eup %5840 }
0x33d4   :  { %v4885_v60 = vmul.f32 %v5841_v11, %v4868_v3  ;;  %v4877_v12 = vsel %vm4876_vm5, %v5839_v21, %v4873_v0  ;;  %vm4890_vm7 = vweird.f32 %v5841_v11 }
0x33d5   :  { %v4882_v2 = vsel %vm4879_vm6, %v4881_v53, %v4877_v12  ;;  %vm4891_vm9 = vmor %vm4889_vm8, %vm4890_vm7 }
0x33d6   :  { %v4886_v46 = vsub.f32 1.0, %v4885_v60  ;;  %v4883_v26 = vmul.f32 %v4882_v2, %v4841_v9 }
0x33d8   :  { %v4887_v17 = vmul.f32 %v5841_v11, %v4886_v46  ;;  %v4900_v47 = vadd.f32 %v5555_v32, %v4883_v26 }
0x33da   :  { %v4888_v20 = vadd.f32 %v5841_v11, %v4887_v17 }
0x33dc   :  { %v4892_v31 = vsel %vm4891_vm9, %v5841_v11, %v4888_v20 }
0x33dd   :  { %v4897_v34 = vsel %vm4894_vm10, %v4896_v24, %v4892_v31 }
0x33de   :  { %v4898_v61 = vmul.f32 %v4897_v34, %v4842_v48 }
0x33e0   :  { %v4901_v22 = vadd.f32 %v5555_v32, %v4898_v61 }
0x33e2   :  { %v4918_v58 = vpack.c.bf16 %v4901_v22, %v4900_v47  ;;  %v5558_v47 = vld [vmem:[%s7451_s9 + $0x1a] ss:$0 sm:$0xff] }
0x33e4   :  { %5439 = vmatmul.msk.bf16.vlgmr.msrb.gmra.mxu1 %vm72_vm0, %v4918_v58 }
0x3461   :  { %v4944_v8 = vpop.f32.mrf.mxu1 }
0x3462   :  { %v4945_v36 = vadd.f32 %v5556_v45, %v4944_v8 }
0x3464   :  { %v4949_v55 = vmax.f32 %v4945_v36, 0.0  ;;  %v5559_v36 = vld [vmem:[%s7451_s9 + $0x1b] ss:$0 sm:$0xff]  ;;  %s5086_s9 = sshll.u32 %s5898_s8, 4  ;;  %s5087_s9 = int_to_ptr.vmem [resolvable:$true] %s5086_s9 }
0x3469   :  { %v4946_v50 = vpop.f32.mrf.mxu1 }
0x346a   :  { %v4947_v33 = vadd.f32 %v5556_v45, %v4946_v50 }
0x346c   :  { %v4950_v13 = vmax.f32 %v4947_v33, 0.0 }
0x346e   :  { %v4951_v16 = vpack.c.bf16 %v4950_v13, %v4949_v55 }
0x3470   :  { %5456 = vmatmul.msk.bf16.vlgmr.msrb.gmra.mxu2 %vm910_vm13, %v4951_v16 }
0x34f3   :  { %v4989_v35 = vpop.f32.mrf.mxu2 }
0x34f4   :  { %v4990_v51 = vadd.f32 %v5557_v56, %v4989_v35 }
0x34f6   :  { %v4994_v30 = vadd.f32 %v4990_v51, %v7361_v18 }
0x34f8   :  { %v4998_v29 = vsel %vm72_vm0, %v4994_v30, 0.0 }
0x34f9   :  { %4999 = vadd.xlane.f32.xlu2 %v4998_v29 }
0x34fb   :  { %v4991_v41 = vpop.f32.mrf.mxu2 }
0x34fc   :  { %v4992_v54 = vadd.f32 %v5557_v56, %v4991_v41 }
0x34fe   :  { %v4995_v15 = vadd.f32 %v4992_v54, %v7366_v25 }
0x3500   :  { %v5001_v23 = vsel %vm72_vm0, %v4995_v15, 0.0 }
0x3501   :  { %5002 = vadd.xlane.f32.xlu2 %v5001_v23 }
0x356c   :  { %v5000_v14 = vpop.xlane.xlu2 %4999 }
0x356d   :  { %v5004_v28 = vmul.f32 %v5000_v14, %v6005_v10 }
0x356f   :  { %v5006_v7 = vsub.f32 %v4994_v30, %v5004_v28 }
0x3571   :  { %v5008_v5 = vmul.f32 %v5006_v7, %v5006_v7  ;;  %v5019_v43 = vmul.f32 %v5558_v47, %v5006_v7 }
0x3573   :  { %v5010_v52 = vsel %vm72_vm0, %v5008_v5, 0.0 }
0x3574   :  { %5011 = vadd.xlane.f32.xlu2 %v5010_v52  ;;  %v5003_v37 = vpop.xlane.xlu2 %5002 }
0x3575   :  { %v5005_v18 = vmul.f32 %v5003_v37, %v6005_v10 }
0x3577   :  { %v7425_v57 = vsub.f32 %v4995_v15, %v5005_v18 }
0x3579   :  { %v5009_v63 = vmul.f32 %v7425_v57, %v7425_v57  ;;  %v5020_v29 = vmul.f32 %v5558_v47, %v7425_v57 }
0x357b   :  { %v5013_v25 = vsel %vm72_vm0, %v5009_v63, 0.0 }
0x357c   :  { %5014 = vadd.xlane.f32.xlu2 %v5013_v25 }
0x35e7   :  { %v5012_v59 = vpop.xlane.xlu2 %5011 }
0x35e8   :  { %v5016_v49 = vmul.f32 0.032258064, %v5012_v59 }
0x35ea   :  { %5842 = vrsqrt.f32 %v5016_v49  ;;  %vm5028_vm13 = vcmp.eq.f32.partialorder %v5016_v49, inf  ;;  %v5031_v12 = vand.u32 2147483648, %v5016_v49  ;;  %vm5030_vm11 = vcmp.eq.f32.partialorder %v5016_v49, 0.0 }
0x35ef   :  { %v5015_v21 = vpop.xlane.xlu2 %5014 }
0x35f0   :  { %v5843_v3 = vpop.eup %5842  ;;  %v5017_v62 = vmul.f32 0.032258064, %v5015_v21 }
0x35f1   :  { %v5022_v6 = vmul.f32 %v5843_v3, %v5016_v49 }
0x35f2   :  { %5844 = vrsqrt.f32 %v5017_v62  ;;  %vm5040_vm12 = vcmp.eq.f32.partialorder %v5017_v62, inf  ;;  %v5043_v20 = vand.u32 2147483648, %v5017_v62  ;;  %vm5042_vm14 = vcmp.eq.f32.partialorder %v5017_v62, 0.0 }
0x35f3   :  { %v5023_v4 = vmul.f32 %v5843_v3, %v5022_v6 }
0x35f5   :  { %v5024_v0 = vmul.f32 0.5, %v5023_v4 }
0x35f7   :  { %v5025_v11 = vsub.f32 1.5, %v5024_v0 }
0x35f8   :  { %v5845_v10 = vpop.eup %5844 }
0x35f9   :  { %v5026_v40 = vmul.f32 %v5843_v3, %v5025_v11  ;;  %v5034_v27 = vmul.f32 %v5845_v10, %v5017_v62 }
0x35fb   :  { %v5027_v60 = vmul.f32 %v5026_v40, %v5016_v49  ;;  %v5035_v39 = vmul.f32 %v5845_v10, %v5034_v27 }
0x35fd   :  { %v5029_v46 = vsel %vm5028_vm13, %v5016_v49, %v5027_v60  ;;  %v5036_v53 = vmul.f32 0.5, %v5035_v39 }
0x35fe   :  { %v5032_v44 = vsel %vm5030_vm11, %v5031_v12, %v5029_v46 }
0x35ff   :  { %v5045_v17 = vadd.f32 1e-06, %v5032_v44  ;;  %v5037_v19 = vsub.f32 1.5, %v5036_v53 }
0x3601   :  { %5846 = vrcp.f32 %v5045_v17  ;;  %v5038_v2 = vmul.f32 %v5845_v10, %v5037_v19  ;;  %v5058_v61 = vand.u32 2147483648, %v5045_v17  ;;  %v5056_v58 = vand.u32 2147483647, %v5045_v17 }
0x3602   :  { %vm5052_vm1 = vweird.f32 %v5045_v17 }
0x3603   :  { %v5039_v9 = vmul.f32 %v5038_v2, %v5017_v62  ;;  %v5059_v42 = vor.u32 1.1754944e-38, %v5058_v61  ;;  %vm5057_vm3 = vcmp.eq.f32.partialorder %v5056_v58, 8.507059e+37 }
0x3605   :  { %v5041_v24 = vsel %vm5040_vm12, %v5017_v62, %v5039_v9 }
0x3606   :  { %v5044_v48 = vsel %vm5042_vm14, %v5043_v20, %v5041_v24 }
0x3607   :  { %v5847_v26 = vpop.eup %5846  ;;  %v5046_v31 = vadd.f32 1e-06, %v5044_v48 }
0x3608   :  { %v5048_v32 = vmul.f32 %v5847_v26, %v5045_v17  ;;  %vm5053_vm15 = vweird.f32 %v5847_v26 }
0x3609   :  { %5848 = vrcp.f32 %v5046_v31  ;;  %vm5054_vm2 = vmor %vm5052_vm1, %vm5053_vm15  ;;  %v5073_v13 = vand.u32 2147483648, %v5046_v31  ;;  %v5071_v56 = vand.u32 2147483647, %v5046_v31  ;;  %vm5067_vm5 = vweird.f32 %v5046_v31 }
0x360a   :  { %v5049_v34 = vsub.f32 1.0, %v5048_v32 }
0x360b   :  { %v5074_v30 = vor.u32 1.1754944e-38, %v5073_v13  ;;  %vm5072_vm7 = vcmp.eq.f32.partialorder %v5071_v56, 8.507059e+37 }
0x360c   :  { %v5050_v22 = vmul.f32 %v5847_v26, %v5049_v34 }
0x360e   :  { %v5051_v1 = vadd.f32 %v5847_v26, %v5050_v22 }
0x360f   :  { %v5849_v38 = vpop.eup %5848 }
0x3610   :  { %v5055_v8 = vsel %vm5054_vm2, %v5847_v26, %v5051_v1  ;;  %v5063_v45 = vmul.f32 %v5849_v38, %v5046_v31  ;;  %vm5068_vm4 = vweird.f32 %v5849_v38 }
0x3611   :  { %v5060_v50 = vsel %vm5057_vm3, %v5059_v42, %v5055_v8  ;;  %vm5069_vm6 = vmor %vm5067_vm5, %vm5068_vm4 }
0x3612   :  { %v5061_v33 = vmul.f32 %v5060_v50, %v5019_v43  ;;  %v5064_v55 = vsub.f32 1.0, %v5063_v45 }
0x3614   :  { %v5065_v16 = vmul.f32 %v5849_v38, %v5064_v55  ;;  %v5078_v35 = vadd.f32 %v5559_v36, %v5061_v33 }
0x3616   :  { %v5066_v51 = vadd.f32 %v5849_v38, %v5065_v16  ;;  %5080 = vst.msk [vmem:[#allocation2] sm:$0xff] %vm72_vm0, %v5078_v35 }
0x3618   :  { %v5070_v41 = vsel %vm5069_vm6, %v5849_v38, %v5066_v51 }
0x3619   :  { %v5075_v54 = vsel %vm5072_vm7, %v5074_v30, %v5070_v41 }
0x361a   :  { %v5076_v15 = vmul.f32 %v5075_v54, %v5020_v29 }
0x361c   :  { %v5079_v23 = vadd.f32 %v5559_v36, %v5076_v15 }
0x361e   :  { %5081 = vst.msk [vmem:[#allocation2 + $0x8] sm:$0xff] %vm72_vm0, %v5079_v23 }
0x361f   :  { %5094 = dma.vmem_to_hbm [thread:$0]  %s5087_s9, 256, %s5089_s25, [#allocation3], %s5899_s26, %s5899_s26, %s5900_s14  }
0x3620   :  { %5884 = dma.done.wait [#allocation3], 256  }
0x3621   :  { %5885 = vsyncadd [#allocation3], 4294967040 }
0x3622   :  { %5099 = vsyncpa [#allocation3], 1 }

</bundles_post_ra>
